<compile_context>
chip_gen: v6e
topology: v6e:2x2x1
jax: 0.10.0
libtpu: 0.0.40
codegen_flags: <defaults>
</compile_context>

<pallas_src>
import numpy as np
import jax
import jax.numpy as jnp
from jax import lax
from jax.experimental import pallas as pl
from jax.experimental.pallas import tpu as pltpu

ALPHA = 0.2          # LeakyReLU slope
GROUP_SIZE = 4       # minibatch-stddev group size
SPATIAL = 4          # DiscriminatorFinalBlock.spatial_resolution
LANE = 128           # TPU lane width


def _round_up(v, m):
    return ((v + m - 1) // m) * m


# ----------------------------- fused Pallas kernel ---------------------------

def _final_block_kernel(xp_ref, w3_ref, b3_ref, w4_ref, b4_ref, wl_ref, bl_ref,
                        o_ref):
    """conv3x3+LReLU -> conv4x4+LReLU -> Linear(Cout->1), one batch tile.

    xp_ref : [6, 6, TB, Cin_p]    bf16  spatially padded NHWC activations,
                                        (i, j) leading so xp_ref[i, j] is a
                                        contiguous [TB, Cin_p] slab
    w3_ref : [9, Cin_p, Cout_p]   bf16  conv3x3 weight, tap-major (t = kh*3+kw)
    b3_ref : [1, Cout_p]          f32
    w4_ref : [16, Cout_p, Cout_p] bf16  conv4x4 weight, position-major (p = h*4+w)
    b4_ref : [1, Cout_p]          f32
    wl_ref : [1, Cout_p]          f32   final linear weight row
    bl_ref : [1, 1]               f32   final linear bias
    o_ref  : [TB, 128]            f32   lane-dense output (value broadcast over lanes)
    """
    tb = o_ref.shape[0]
    cout_p = b3_ref.shape[1]

    # Hoist the 36 padded-position activation slabs (each [TB, Cin_p], bf16).
    xs = [[xp_ref[i, j] for j in range(6)] for i in range(6)]

    b3 = b3_ref[...]
    b4 = b4_ref[...]

    acc4 = jnp.zeros((tb, cout_p), jnp.float32)
    for p in range(16):                      # 16 output positions of the 4x4 map
        h, w = divmod(p, 4)
        # conv3x3 at (h, w): 9 accumulated MXU matmuls of K = Cin_p, f32 acc.
        acc3 = jnp.zeros((tb, cout_p), jnp.float32)
        for kh in range(3):
            for kw in range(3):
                acc3 = acc3 + jnp.dot(xs[h + kh][w + kw],
                                      w3_ref[kh * 3 + kw],
                                      preferred_element_type=jnp.float32)
        h1 = acc3 + b3
        h1 = jnp.where(h1 >= 0, h1, ALPHA * h1)            # LeakyReLU (f32)
        # conv4x4 (valid over the 4x4 map): position p's contribution.
        acc4 = acc4 + jnp.dot(h1.astype(jnp.bfloat16), w4_ref[p],
                              preferred_element_type=jnp.float32)

    h2 = acc4 + b4
    h2 = jnp.where(h2 >= 0, h2, ALPHA * h2)                # LeakyReLU (f32)

    # Linear(Cout -> 1) as a lane (VPU/XLU) reduction instead of a 1-wide matmul.
    red = jnp.sum(h2 * wl_ref[...], axis=-1, keepdims=True) + bl_ref[...]  # [TB,1]
    o_ref[...] = jnp.broadcast_to(red, o_ref.shape)        # lane-dense store


# ------------------------------- wrapper --------------------------------------

def discriminator_final_block(params, x, group_size=GROUP_SIZE, row_tile=None):
    N, C, H, W = x.shape
    assert H == SPATIAL and W == SPATIAL
    Cout = params["w3"].shape[0]
    cin3 = C + 1
    cin_p = _round_up(cin3, LANE)
    cout_p = _round_up(Cout, LANE)

    if row_tile is None:
        row_tile = min(N, 128)
    assert N % row_tile == 0, "batch must be divisible by row_tile"
    grid = (N // row_tile,)

    # --- minibatch stddev statistic (tiny reduction -> plain JAX) ------------
    G = min(group_size, N)
    assert N % G == 0, "batch must be divisible by group size"
    M = N // G
    xg = x.reshape(G, M, C, H, W).astype(jnp.float32)
    var = ((xg - xg.mean(axis=0, keepdims=True)) ** 2).mean(axis=0)
    stat = jnp.sqrt(var + 1e-8).mean(axis=(1, 2, 3))       # [M]
    stat_n = jnp.tile(stat, (G,))                          # sample n -> stat[n % M]

    # --- layout glue: NHWC + stddev channel, channel pad, spatial pad, bf16 --
    x_nhwc = jnp.transpose(x, (0, 2, 3, 1)).astype(jnp.float32)       # [N,4,4,C]
    std_c = jnp.broadcast_to(stat_n[:, None, None, None], (N, H, W, 1))
    xcat = jnp.concatenate([x_nhwc, std_c], axis=-1)                  # [N,4,4,cin3]
    xcat = jnp.pad(xcat, ((0, 0), (0, 0), (0, 0), (0, cin_p - cin3)))
    xpad = jnp.pad(xcat, ((0, 0), (1, 1), (1, 1), (0, 0)))            # [N,6,6,cin_p]
    xpad_t = jnp.transpose(xpad, (1, 2, 0, 3)).astype(jnp.bfloat16)   # [6,6,N,cin_p]

    # --- weights: bf16, zero padded to lane-aligned channel dims -------------
    w3 = jnp.transpose(params["w3"], (2, 3, 1, 0)).reshape(9, cin3, Cout)
    w3 = jnp.pad(w3, ((0, 0), (0, cin_p - cin3), (0, cout_p - Cout))).astype(jnp.bfloat16)
    b3 = jnp.pad(params["b3"], (0, cout_p - Cout)).reshape(1, cout_p).astype(jnp.float32)
    w4 = jnp.transpose(params["w4"], (2, 3, 1, 0)).reshape(16, Cout, Cout)
    w4 = jnp.pad(w4, ((0, 0), (0, cout_p - Cout), (0, cout_p - Cout))).astype(jnp.bfloat16)
    b4 = jnp.pad(params["b4"], (0, cout_p - Cout)).reshape(1, cout_p).astype(jnp.float32)
    wl = jnp.pad(params["wl"].reshape(-1), (0, cout_p - Cout)).reshape(1, cout_p).astype(jnp.float32)
    bl = params["bl"].reshape(1, 1).astype(jnp.float32)

    out2d = pl.pallas_call(
        _final_block_kernel,
        out_shape=jax.ShapeDtypeStruct((N, LANE), jnp.float32),
        grid=grid,
        in_specs=[
            pl.BlockSpec((6, 6, row_tile, cin_p), lambda i: (0, 0, i, 0)),
            pl.BlockSpec((9, cin_p, cout_p), lambda i: (0, 0, 0)),     # resident
            pl.BlockSpec((1, cout_p), lambda i: (0, 0)),
            pl.BlockSpec((16, cout_p, cout_p), lambda i: (0, 0, 0)),   # resident
            pl.BlockSpec((1, cout_p), lambda i: (0, 0)),
            pl.BlockSpec((1, cout_p), lambda i: (0, 0)),
            pl.BlockSpec((1, 1), lambda i: (0, 0)),
        ],
        out_specs=pl.BlockSpec((row_tile, LANE), lambda i: (i, 0)),
        compiler_params=pltpu.CompilerParams(
            dimension_semantics=("parallel",),       # shards rows across TCs (v7x)
            vmem_limit_bytes=32 * 1024 * 1024,
        ),
    )(xpad_t, w3, b3, w4, b4, wl, bl)

    return out2d[:, :1].reshape(-1, 1, 1, 1)         # matches x.view(-1, 1, 1, 1)


# ------------------------------- parameters -----------------------------------

def init_params(key, channel_in, channel_out):
    """Deterministic PGGAN-style parameters. The equalized-LR runtime scale
    sqrt(2 / fan_in) used by PGConv/PGLinear is folded into the weights."""
    cin3 = channel_in + 1
    ks = jax.random.split(key, 6)
    w3 = jax.random.normal(ks[0], (channel_out, cin3, 3, 3), jnp.float32)
    b3 = 0.1 * jax.random.normal(ks[1], (channel_out,), jnp.float32)
    w4 = jax.random.normal(ks[2], (channel_out, channel_out, 4, 4), jnp.float32)
    b4 = 0.1 * jax.random.normal(ks[3], (channel_out,), jnp.float32)
    wl = jax.random.normal(ks[4], (1, channel_out), jnp.float32)
    bl = 0.1 * jax.random.normal(ks[5], (1,), jnp.float32)
    return {
        "w3": w3 * np.sqrt(2.0 / (cin3 * 9)), "b3": b3,
        "w4": w4 * np.sqrt(2.0 / (channel_out * 16)), "b4": b4,
        "wl": wl * np.sqrt(2.0 / channel_out), "bl": bl,
    }


# --------------------------- pure-JAX f32 reference ---------------------------

def _reference(params, x, group_size=GROUP_SIZE, alpha=ALPHA):
    N, C, H, W = x.shape
    G = min(group_size, N)
    M = N // G
    y = x.reshape(G, M, C, H, W)
    y = y - y.mean(axis=0, keepdims=True)
    y = (y ** 2).mean(axis=0)
    y = jnp.sqrt(y + 1e-8)
    y = y.mean(axis=(1, 2, 3))                          # [M]
    y = jnp.broadcast_to(jnp.tile(y, (G,))[:, None, None, None], (N, 1, H, W))
    xc = jnp.concatenate([x, y], axis=1)

    dn = ("NCHW", "OIHW", "NCHW")
    h = lax.conv_general_dilated(xc, params["w3"], (1, 1), [(1, 1), (1, 1)],
                                 dimension_numbers=dn)
    h = h + params["b3"][None, :, None, None]
    h = jnp.where(h >= 0, h, alpha * h)
    h = lax.conv_general_dilated(h, params["w4"], (1, 1), "VALID",
                                 dimension_numbers=dn)
    h = h + params["b4"][None, :, None, None]
    h = jnp.where(h >= 0, h, alpha * h)
    h = h.reshape(-1, params["w4"].shape[0])
    h = h @ params["wl"].T + params["bl"]
    return h.reshape(-1, 1, 1, 1)


if __name__ == "__main__":
    key = jax.random.PRNGKey(0)
    kx, kp = jax.random.split(key)
    channel_in, channel_out, batch = 4, 8, 16
    x = jax.random.normal(kx, (batch, channel_in, SPATIAL, SPATIAL), jnp.float32)
    params = init_params(kp, channel_in, channel_out)

    # row_tile=8 -> grid=(2,) to exercise the batch tiling / resident weights.
    fwd = jax.jit(lambda p, xx: discriminator_final_block(p, xx, row_tile=8))
    out = jax.block_until_ready(fwd(params, x))
    assert out.shape == (batch, 1, 1, 1)

    ref = jax.block_until_ready(_reference(params, x))
    # bf16 matmul operands (f32 accumulation) -> loosened tolerance vs f32 ref.
    np.testing.assert_allclose(np.asarray(out), np.asarray(ref),
                               rtol=5e-2, atol=5e-2)
    print("KERNEL_OK")
</pallas_src>

<mosaic_0001>
module attributes {stable_mosaic.version = 11 : i64} {
  func.func @_final_block_kernel(%arg0: i32, %arg1: memref<6x6x8x128xbf16, #tpu.memory_space<vmem>>, %arg2: memref<9x128x128xbf16, #tpu.memory_space<vmem>>, %arg3: memref<1x128xf32, #tpu.memory_space<vmem>>, %arg4: memref<16x128x128xbf16, #tpu.memory_space<vmem>>, %arg5: memref<1x128xf32, #tpu.memory_space<vmem>>, %arg6: memref<1x128xf32, #tpu.memory_space<vmem>>, %arg7: memref<1x1xf32, #tpu.memory_space<vmem>>, %arg8: memref<8x128xf32, #tpu.memory_space<vmem>>) attributes {dimension_semantics = [#tpu.dimension_semantics<parallel>], iteration_bounds = array<i64: 2>, scalar_prefetch = 0 : i64, scratch_operands = 0 : i64, tpu.core_type = #tpu.core_type<tc>, window_params = [{transform_indices = @transform_0, window_bounds = array<i64: 6, 6, 8, 128>}, {pipeline_mode = #tpu.pipeline_mode<synchronous>, transform_indices = @transform_1, window_bounds = array<i64: 9, 128, 128>}, {pipeline_mode = #tpu.pipeline_mode<synchronous>, transform_indices = @transform_2, window_bounds = array<i64: 1, 128>}, {pipeline_mode = #tpu.pipeline_mode<synchronous>, transform_indices = @transform_3, window_bounds = array<i64: 16, 128, 128>}, {pipeline_mode = #tpu.pipeline_mode<synchronous>, transform_indices = @transform_4, window_bounds = array<i64: 1, 128>}, {pipeline_mode = #tpu.pipeline_mode<synchronous>, transform_indices = @transform_5, window_bounds = array<i64: 1, 128>}, {pipeline_mode = #tpu.pipeline_mode<synchronous>, transform_indices = @transform_6, window_bounds = array<i64: 1, 1>}, {transform_indices = @transform_7, window_bounds = array<i64: 8, 128>}]} {
    %c0 = arith.constant 0 : index
    %c0_0 = arith.constant 0 : index
    %c0_1 = arith.constant 0 : index
    %c0_2 = arith.constant 0 : index
    %0 = vector.load %arg1[%c0, %c0_0, %c0_1, %c0_2] : memref<6x6x8x128xbf16, #tpu.memory_space<vmem>>, vector<1x1x8x128xbf16>
    %1 = vector.shape_cast %0 : vector<1x1x8x128xbf16> to vector<8x128xbf16>
    %c0_3 = arith.constant 0 : index
    %c1 = arith.constant 1 : index
    %c0_4 = arith.constant 0 : index
    %c0_5 = arith.constant 0 : index
    %2 = vector.load %arg1[%c0_3, %c1, %c0_4, %c0_5] : memref<6x6x8x128xbf16, #tpu.memory_space<vmem>>, vector<1x1x8x128xbf16>
    %3 = vector.shape_cast %2 : vector<1x1x8x128xbf16> to vector<8x128xbf16>
    %c0_6 = arith.constant 0 : index
    %c2 = arith.constant 2 : index
    %c0_7 = arith.constant 0 : index
    %c0_8 = arith.constant 0 : index
    %4 = vector.load %arg1[%c0_6, %c2, %c0_7, %c0_8] : memref<6x6x8x128xbf16, #tpu.memory_space<vmem>>, vector<1x1x8x128xbf16>
    %5 = vector.shape_cast %4 : vector<1x1x8x128xbf16> to vector<8x128xbf16>
    %c0_9 = arith.constant 0 : index
    %c3 = arith.constant 3 : index
    %c0_10 = arith.constant 0 : index
    %c0_11 = arith.constant 0 : index
    %6 = vector.load %arg1[%c0_9, %c3, %c0_10, %c0_11] : memref<6x6x8x128xbf16, #tpu.memory_space<vmem>>, vector<1x1x8x128xbf16>
    %7 = vector.shape_cast %6 : vector<1x1x8x128xbf16> to vector<8x128xbf16>
    %c0_12 = arith.constant 0 : index
    %c4 = arith.constant 4 : index
    %c0_13 = arith.constant 0 : index
    %c0_14 = arith.constant 0 : index
    %8 = vector.load %arg1[%c0_12, %c4, %c0_13, %c0_14] : memref<6x6x8x128xbf16, #tpu.memory_space<vmem>>, vector<1x1x8x128xbf16>
    %9 = vector.shape_cast %8 : vector<1x1x8x128xbf16> to vector<8x128xbf16>
    %c0_15 = arith.constant 0 : index
    %c5 = arith.constant 5 : index
    %c0_16 = arith.constant 0 : index
    %c0_17 = arith.constant 0 : index
    %10 = vector.load %arg1[%c0_15, %c5, %c0_16, %c0_17] : memref<6x6x8x128xbf16, #tpu.memory_space<vmem>>, vector<1x1x8x128xbf16>
    %11 = vector.shape_cast %10 : vector<1x1x8x128xbf16> to vector<8x128xbf16>
    %c1_18 = arith.constant 1 : index
    %c0_19 = arith.constant 0 : index
    %c0_20 = arith.constant 0 : index
    %c0_21 = arith.constant 0 : index
    %12 = vector.load %arg1[%c1_18, %c0_19, %c0_20, %c0_21] : memref<6x6x8x128xbf16, #tpu.memory_space<vmem>>, vector<1x1x8x128xbf16>
    %13 = vector.shape_cast %12 : vector<1x1x8x128xbf16> to vector<8x128xbf16>
    %c1_22 = arith.constant 1 : index
    %c1_23 = arith.constant 1 : index
    %c0_24 = arith.constant 0 : index
    %c0_25 = arith.constant 0 : index
    %14 = vector.load %arg1[%c1_22, %c1_23, %c0_24, %c0_25] : memref<6x6x8x128xbf16, #tpu.memory_space<vmem>>, vector<1x1x8x128xbf16>
    %15 = vector.shape_cast %14 : vector<1x1x8x128xbf16> to vector<8x128xbf16>
    %c1_26 = arith.constant 1 : index
    %c2_27 = arith.constant 2 : index
    %c0_28 = arith.constant 0 : index
    %c0_29 = arith.constant 0 : index
    %16 = vector.load %arg1[%c1_26, %c2_27, %c0_28, %c0_29] : memref<6x6x8x128xbf16, #tpu.memory_space<vmem>>, vector<1x1x8x128xbf16>
    %17 = vector.shape_cast %16 : vector<1x1x8x128xbf16> to vector<8x128xbf16>
    %c1_30 = arith.constant 1 : index
    %c3_31 = arith.constant 3 : index
    %c0_32 = arith.constant 0 : index
    %c0_33 = arith.constant 0 : index
    %18 = vector.load %arg1[%c1_30, %c3_31, %c0_32, %c0_33] : memref<6x6x8x128xbf16, #tpu.memory_space<vmem>>, vector<1x1x8x128xbf16>
    %19 = vector.shape_cast %18 : vector<1x1x8x128xbf16> to vector<8x128xbf16>
    %c1_34 = arith.constant 1 : index
    %c4_35 = arith.constant 4 : index
    %c0_36 = arith.constant 0 : index
    %c0_37 = arith.constant 0 : index
    %20 = vector.load %arg1[%c1_34, %c4_35, %c0_36, %c0_37] : memref<6x6x8x128xbf16, #tpu.memory_space<vmem>>, vector<1x1x8x128xbf16>
    %21 = vector.shape_cast %20 : vector<1x1x8x128xbf16> to vector<8x128xbf16>
    %c1_38 = arith.constant 1 : index
    %c5_39 = arith.constant 5 : index
    %c0_40 = arith.constant 0 : index
    %c0_41 = arith.constant 0 : index
    %22 = vector.load %arg1[%c1_38, %c5_39, %c0_40, %c0_41] : memref<6x6x8x128xbf16, #tpu.memory_space<vmem>>, vector<1x1x8x128xbf16>
    %23 = vector.shape_cast %22 : vector<1x1x8x128xbf16> to vector<8x128xbf16>
    %c2_42 = arith.constant 2 : index
    %c0_43 = arith.constant 0 : index
    %c0_44 = arith.constant 0 : index
    %c0_45 = arith.constant 0 : index
    %24 = vector.load %arg1[%c2_42, %c0_43, %c0_44, %c0_45] : memref<6x6x8x128xbf16, #tpu.memory_space<vmem>>, vector<1x1x8x128xbf16>
    %25 = vector.shape_cast %24 : vector<1x1x8x128xbf16> to vector<8x128xbf16>
    %c2_46 = arith.constant 2 : index
    %c1_47 = arith.constant 1 : index
    %c0_48 = arith.constant 0 : index
    %c0_49 = arith.constant 0 : index
    %26 = vector.load %arg1[%c2_46, %c1_47, %c0_48, %c0_49] : memref<6x6x8x128xbf16, #tpu.memory_space<vmem>>, vector<1x1x8x128xbf16>
    %27 = vector.shape_cast %26 : vector<1x1x8x128xbf16> to vector<8x128xbf16>
    %c2_50 = arith.constant 2 : index
    %c2_51 = arith.constant 2 : index
    %c0_52 = arith.constant 0 : index
    %c0_53 = arith.constant 0 : index
    %28 = vector.load %arg1[%c2_50, %c2_51, %c0_52, %c0_53] : memref<6x6x8x128xbf16, #tpu.memory_space<vmem>>, vector<1x1x8x128xbf16>
    %29 = vector.shape_cast %28 : vector<1x1x8x128xbf16> to vector<8x128xbf16>
    %c2_54 = arith.constant 2 : index
    %c3_55 = arith.constant 3 : index
    %c0_56 = arith.constant 0 : index
    %c0_57 = arith.constant 0 : index
    %30 = vector.load %arg1[%c2_54, %c3_55, %c0_56, %c0_57] : memref<6x6x8x128xbf16, #tpu.memory_space<vmem>>, vector<1x1x8x128xbf16>
    %31 = vector.shape_cast %30 : vector<1x1x8x128xbf16> to vector<8x128xbf16>
    %c2_58 = arith.constant 2 : index
    %c4_59 = arith.constant 4 : index
    %c0_60 = arith.constant 0 : index
    %c0_61 = arith.constant 0 : index
    %32 = vector.load %arg1[%c2_58, %c4_59, %c0_60, %c0_61] : memref<6x6x8x128xbf16, #tpu.memory_space<vmem>>, vector<1x1x8x128xbf16>
    %33 = vector.shape_cast %32 : vector<1x1x8x128xbf16> to vector<8x128xbf16>
    %c2_62 = arith.constant 2 : index
    %c5_63 = arith.constant 5 : index
    %c0_64 = arith.constant 0 : index
    %c0_65 = arith.constant 0 : index
    %34 = vector.load %arg1[%c2_62, %c5_63, %c0_64, %c0_65] : memref<6x6x8x128xbf16, #tpu.memory_space<vmem>>, vector<1x1x8x128xbf16>
    %35 = vector.shape_cast %34 : vector<1x1x8x128xbf16> to vector<8x128xbf16>
    %c3_66 = arith.constant 3 : index
    %c0_67 = arith.constant 0 : index
    %c0_68 = arith.constant 0 : index
    %c0_69 = arith.constant 0 : index
    %36 = vector.load %arg1[%c3_66, %c0_67, %c0_68, %c0_69] : memref<6x6x8x128xbf16, #tpu.memory_space<vmem>>, vector<1x1x8x128xbf16>
    %37 = vector.shape_cast %36 : vector<1x1x8x128xbf16> to vector<8x128xbf16>
    %c3_70 = arith.constant 3 : index
    %c1_71 = arith.constant 1 : index
    %c0_72 = arith.constant 0 : index
    %c0_73 = arith.constant 0 : index
    %38 = vector.load %arg1[%c3_70, %c1_71, %c0_72, %c0_73] : memref<6x6x8x128xbf16, #tpu.memory_space<vmem>>, vector<1x1x8x128xbf16>
    %39 = vector.shape_cast %38 : vector<1x1x8x128xbf16> to vector<8x128xbf16>
    %c3_74 = arith.constant 3 : index
    %c2_75 = arith.constant 2 : index
    %c0_76 = arith.constant 0 : index
    %c0_77 = arith.constant 0 : index
    %40 = vector.load %arg1[%c3_74, %c2_75, %c0_76, %c0_77] : memref<6x6x8x128xbf16, #tpu.memory_space<vmem>>, vector<1x1x8x128xbf16>
    %41 = vector.shape_cast %40 : vector<1x1x8x128xbf16> to vector<8x128xbf16>
    %c3_78 = arith.constant 3 : index
    %c3_79 = arith.constant 3 : index
    %c0_80 = arith.constant 0 : index
    %c0_81 = arith.constant 0 : index
    %42 = vector.load %arg1[%c3_78, %c3_79, %c0_80, %c0_81] : memref<6x6x8x128xbf16, #tpu.memory_space<vmem>>, vector<1x1x8x128xbf16>
    %43 = vector.shape_cast %42 : vector<1x1x8x128xbf16> to vector<8x128xbf16>
    %c3_82 = arith.constant 3 : index
    %c4_83 = arith.constant 4 : index
    %c0_84 = arith.constant 0 : index
    %c0_85 = arith.constant 0 : index
    %44 = vector.load %arg1[%c3_82, %c4_83, %c0_84, %c0_85] : memref<6x6x8x128xbf16, #tpu.memory_space<vmem>>, vector<1x1x8x128xbf16>
    %45 = vector.shape_cast %44 : vector<1x1x8x128xbf16> to vector<8x128xbf16>
    %c3_86 = arith.constant 3 : index
    %c5_87 = arith.constant 5 : index
    %c0_88 = arith.constant 0 : index
    %c0_89 = arith.constant 0 : index
    %46 = vector.load %arg1[%c3_86, %c5_87, %c0_88, %c0_89] : memref<6x6x8x128xbf16, #tpu.memory_space<vmem>>, vector<1x1x8x128xbf16>
    %47 = vector.shape_cast %46 : vector<1x1x8x128xbf16> to vector<8x128xbf16>
    %c4_90 = arith.constant 4 : index
    %c0_91 = arith.constant 0 : index
    %c0_92 = arith.constant 0 : index
    %c0_93 = arith.constant 0 : index
    %48 = vector.load %arg1[%c4_90, %c0_91, %c0_92, %c0_93] : memref<6x6x8x128xbf16, #tpu.memory_space<vmem>>, vector<1x1x8x128xbf16>
    %49 = vector.shape_cast %48 : vector<1x1x8x128xbf16> to vector<8x128xbf16>
    %c4_94 = arith.constant 4 : index
    %c1_95 = arith.constant 1 : index
    %c0_96 = arith.constant 0 : index
    %c0_97 = arith.constant 0 : index
    %50 = vector.load %arg1[%c4_94, %c1_95, %c0_96, %c0_97] : memref<6x6x8x128xbf16, #tpu.memory_space<vmem>>, vector<1x1x8x128xbf16>
    %51 = vector.shape_cast %50 : vector<1x1x8x128xbf16> to vector<8x128xbf16>
    %c4_98 = arith.constant 4 : index
    %c2_99 = arith.constant 2 : index
    %c0_100 = arith.constant 0 : index
    %c0_101 = arith.constant 0 : index
    %52 = vector.load %arg1[%c4_98, %c2_99, %c0_100, %c0_101] : memref<6x6x8x128xbf16, #tpu.memory_space<vmem>>, vector<1x1x8x128xbf16>
    %53 = vector.shape_cast %52 : vector<1x1x8x128xbf16> to vector<8x128xbf16>
    %c4_102 = arith.constant 4 : index
    %c3_103 = arith.constant 3 : index
    %c0_104 = arith.constant 0 : index
    %c0_105 = arith.constant 0 : index
    %54 = vector.load %arg1[%c4_102, %c3_103, %c0_104, %c0_105] : memref<6x6x8x128xbf16, #tpu.memory_space<vmem>>, vector<1x1x8x128xbf16>
    %55 = vector.shape_cast %54 : vector<1x1x8x128xbf16> to vector<8x128xbf16>
    %c4_106 = arith.constant 4 : index
    %c4_107 = arith.constant 4 : index
    %c0_108 = arith.constant 0 : index
    %c0_109 = arith.constant 0 : index
    %56 = vector.load %arg1[%c4_106, %c4_107, %c0_108, %c0_109] : memref<6x6x8x128xbf16, #tpu.memory_space<vmem>>, vector<1x1x8x128xbf16>
    %57 = vector.shape_cast %56 : vector<1x1x8x128xbf16> to vector<8x128xbf16>
    %c4_110 = arith.constant 4 : index
    %c5_111 = arith.constant 5 : index
    %c0_112 = arith.constant 0 : index
    %c0_113 = arith.constant 0 : index
    %58 = vector.load %arg1[%c4_110, %c5_111, %c0_112, %c0_113] : memref<6x6x8x128xbf16, #tpu.memory_space<vmem>>, vector<1x1x8x128xbf16>
    %59 = vector.shape_cast %58 : vector<1x1x8x128xbf16> to vector<8x128xbf16>
    %c5_114 = arith.constant 5 : index
    %c0_115 = arith.constant 0 : index
    %c0_116 = arith.constant 0 : index
    %c0_117 = arith.constant 0 : index
    %60 = vector.load %arg1[%c5_114, %c0_115, %c0_116, %c0_117] : memref<6x6x8x128xbf16, #tpu.memory_space<vmem>>, vector<1x1x8x128xbf16>
    %61 = vector.shape_cast %60 : vector<1x1x8x128xbf16> to vector<8x128xbf16>
    %c5_118 = arith.constant 5 : index
    %c1_119 = arith.constant 1 : index
    %c0_120 = arith.constant 0 : index
    %c0_121 = arith.constant 0 : index
    %62 = vector.load %arg1[%c5_118, %c1_119, %c0_120, %c0_121] : memref<6x6x8x128xbf16, #tpu.memory_space<vmem>>, vector<1x1x8x128xbf16>
    %63 = vector.shape_cast %62 : vector<1x1x8x128xbf16> to vector<8x128xbf16>
    %c5_122 = arith.constant 5 : index
    %c2_123 = arith.constant 2 : index
    %c0_124 = arith.constant 0 : index
    %c0_125 = arith.constant 0 : index
    %64 = vector.load %arg1[%c5_122, %c2_123, %c0_124, %c0_125] : memref<6x6x8x128xbf16, #tpu.memory_space<vmem>>, vector<1x1x8x128xbf16>
    %65 = vector.shape_cast %64 : vector<1x1x8x128xbf16> to vector<8x128xbf16>
    %c5_126 = arith.constant 5 : index
    %c3_127 = arith.constant 3 : index
    %c0_128 = arith.constant 0 : index
    %c0_129 = arith.constant 0 : index
    %66 = vector.load %arg1[%c5_126, %c3_127, %c0_128, %c0_129] : memref<6x6x8x128xbf16, #tpu.memory_space<vmem>>, vector<1x1x8x128xbf16>
    %67 = vector.shape_cast %66 : vector<1x1x8x128xbf16> to vector<8x128xbf16>
    %c5_130 = arith.constant 5 : index
    %c4_131 = arith.constant 4 : index
    %c0_132 = arith.constant 0 : index
    %c0_133 = arith.constant 0 : index
    %68 = vector.load %arg1[%c5_130, %c4_131, %c0_132, %c0_133] : memref<6x6x8x128xbf16, #tpu.memory_space<vmem>>, vector<1x1x8x128xbf16>
    %69 = vector.shape_cast %68 : vector<1x1x8x128xbf16> to vector<8x128xbf16>
    %c5_134 = arith.constant 5 : index
    %c5_135 = arith.constant 5 : index
    %c0_136 = arith.constant 0 : index
    %c0_137 = arith.constant 0 : index
    %70 = vector.load %arg1[%c5_134, %c5_135, %c0_136, %c0_137] : memref<6x6x8x128xbf16, #tpu.memory_space<vmem>>, vector<1x1x8x128xbf16>
    %71 = vector.shape_cast %70 : vector<1x1x8x128xbf16> to vector<8x128xbf16>
    %c0_138 = arith.constant 0 : index
    %c0_139 = arith.constant 0 : index
    %72 = vector.load %arg3[%c0_138, %c0_139] : memref<1x128xf32, #tpu.memory_space<vmem>>, vector<1x128xf32>
    %c0_140 = arith.constant 0 : index
    %c0_141 = arith.constant 0 : index
    %73 = vector.load %arg5[%c0_140, %c0_141] : memref<1x128xf32, #tpu.memory_space<vmem>>, vector<1x128xf32>
    %cst = arith.constant 0.000000e+00 : f32
    %74 = vector.broadcast %cst : f32 to vector<8x128xf32>
    %cst_142 = arith.constant 0.000000e+00 : f32
    %75 = vector.broadcast %cst_142 : f32 to vector<8x128xf32>
    %c0_143 = arith.constant 0 : index
    %c0_144 = arith.constant 0 : index
    %c0_145 = arith.constant 0 : index
    %76 = vector.load %arg2[%c0_143, %c0_144, %c0_145] : memref<9x128x128xbf16, #tpu.memory_space<vmem>>, vector<1x128x128xbf16>
    %77 = vector.shape_cast %76 : vector<1x128x128xbf16> to vector<128x128xbf16>
    %cst_146 = arith.constant dense<0.000000e+00> : vector<8x128xf32>
    %78 = tpu.matmul %1, %77, %cst_146 {dimension_numbers = #tpu.dot_dimension_numbers<[1], [0], [0], [1], [0, 0, 1, 1], [], []>} : vector<8x128xbf16>, vector<128x128xbf16>, vector<8x128xf32> -> vector<8x128xf32>
    %79 = arith.addf %75, %78 : vector<8x128xf32>
    %c1_147 = arith.constant 1 : index
    %c0_148 = arith.constant 0 : index
    %c0_149 = arith.constant 0 : index
    %80 = vector.load %arg2[%c1_147, %c0_148, %c0_149] : memref<9x128x128xbf16, #tpu.memory_space<vmem>>, vector<1x128x128xbf16>
    %81 = vector.shape_cast %80 : vector<1x128x128xbf16> to vector<128x128xbf16>
    %cst_150 = arith.constant dense<0.000000e+00> : vector<8x128xf32>
    %82 = tpu.matmul %3, %81, %cst_150 {dimension_numbers = #tpu.dot_dimension_numbers<[1], [0], [0], [1], [0, 0, 1, 1], [], []>} : vector<8x128xbf16>, vector<128x128xbf16>, vector<8x128xf32> -> vector<8x128xf32>
    %83 = arith.addf %79, %82 : vector<8x128xf32>
    %c2_151 = arith.constant 2 : index
    %c0_152 = arith.constant 0 : index
    %c0_153 = arith.constant 0 : index
    %84 = vector.load %arg2[%c2_151, %c0_152, %c0_153] : memref<9x128x128xbf16, #tpu.memory_space<vmem>>, vector<1x128x128xbf16>
    %85 = vector.shape_cast %84 : vector<1x128x128xbf16> to vector<128x128xbf16>
    %cst_154 = arith.constant dense<0.000000e+00> : vector<8x128xf32>
    %86 = tpu.matmul %5, %85, %cst_154 {dimension_numbers = #tpu.dot_dimension_numbers<[1], [0], [0], [1], [0, 0, 1, 1], [], []>} : vector<8x128xbf16>, vector<128x128xbf16>, vector<8x128xf32> -> vector<8x128xf32>
    %87 = arith.addf %83, %86 : vector<8x128xf32>
    %c3_155 = arith.constant 3 : index
    %c0_156 = arith.constant 0 : index
    %c0_157 = arith.constant 0 : index
    %88 = vector.load %arg2[%c3_155, %c0_156, %c0_157] : memref<9x128x128xbf16, #tpu.memory_space<vmem>>, vector<1x128x128xbf16>
    %89 = vector.shape_cast %88 : vector<1x128x128xbf16> to vector<128x128xbf16>
    %cst_158 = arith.constant dense<0.000000e+00> : vector<8x128xf32>
    %90 = tpu.matmul %13, %89, %cst_158 {dimension_numbers = #tpu.dot_dimension_numbers<[1], [0], [0], [1], [0, 0, 1, 1], [], []>} : vector<8x128xbf16>, vector<128x128xbf16>, vector<8x128xf32> -> vector<8x128xf32>
    %91 = arith.addf %87, %90 : vector<8x128xf32>
    %c4_159 = arith.constant 4 : index
    %c0_160 = arith.constant 0 : index
    %c0_161 = arith.constant 0 : index
    %92 = vector.load %arg2[%c4_159, %c0_160, %c0_161] : memref<9x128x128xbf16, #tpu.memory_space<vmem>>, vector<1x128x128xbf16>
    %93 = vector.shape_cast %92 : vector<1x128x128xbf16> to vector<128x128xbf16>
    %cst_162 = arith.constant dense<0.000000e+00> : vector<8x128xf32>
    %94 = tpu.matmul %15, %93, %cst_162 {dimension_numbers = #tpu.dot_dimension_numbers<[1], [0], [0], [1], [0, 0, 1, 1], [], []>} : vector<8x128xbf16>, vector<128x128xbf16>, vector<8x128xf32> -> vector<8x128xf32>
    %95 = arith.addf %91, %94 : vector<8x128xf32>
    %c5_163 = arith.constant 5 : index
    %c0_164 = arith.constant 0 : index
    %c0_165 = arith.constant 0 : index
    %96 = vector.load %arg2[%c5_163, %c0_164, %c0_165] : memref<9x128x128xbf16, #tpu.memory_space<vmem>>, vector<1x128x128xbf16>
    %97 = vector.shape_cast %96 : vector<1x128x128xbf16> to vector<128x128xbf16>
    %cst_166 = arith.constant dense<0.000000e+00> : vector<8x128xf32>
    %98 = tpu.matmul %17, %97, %cst_166 {dimension_numbers = #tpu.dot_dimension_numbers<[1], [0], [0], [1], [0, 0, 1, 1], [], []>} : vector<8x128xbf16>, vector<128x128xbf16>, vector<8x128xf32> -> vector<8x128xf32>
    %99 = arith.addf %95, %98 : vector<8x128xf32>
    %c6 = arith.constant 6 : index
    %c0_167 = arith.constant 0 : index
    %c0_168 = arith.constant 0 : index
    %100 = vector.load %arg2[%c6, %c0_167, %c0_168] : memref<9x128x128xbf16, #tpu.memory_space<vmem>>, vector<1x128x128xbf16>
    %101 = vector.shape_cast %100 : vector<1x128x128xbf16> to vector<128x128xbf16>
    %cst_169 = arith.constant dense<0.000000e+00> : vector<8x128xf32>
    %102 = tpu.matmul %25, %101, %cst_169 {dimension_numbers = #tpu.dot_dimension_numbers<[1], [0], [0], [1], [0, 0, 1, 1], [], []>} : vector<8x128xbf16>, vector<128x128xbf16>, vector<8x128xf32> -> vector<8x128xf32>
    %103 = arith.addf %99, %102 : vector<8x128xf32>
    %c7 = arith.constant 7 : index
    %c0_170 = arith.constant 0 : index
    %c0_171 = arith.constant 0 : index
    %104 = vector.load %arg2[%c7, %c0_170, %c0_171] : memref<9x128x128xbf16, #tpu.memory_space<vmem>>, vector<1x128x128xbf16>
    %105 = vector.shape_cast %104 : vector<1x128x128xbf16> to vector<128x128xbf16>
    %cst_172 = arith.constant dense<0.000000e+00> : vector<8x128xf32>
    %106 = tpu.matmul %27, %105, %cst_172 {dimension_numbers = #tpu.dot_dimension_numbers<[1], [0], [0], [1], [0, 0, 1, 1], [], []>} : vector<8x128xbf16>, vector<128x128xbf16>, vector<8x128xf32> -> vector<8x128xf32>
    %107 = arith.addf %103, %106 : vector<8x128xf32>
    %c8 = arith.constant 8 : index
    %c0_173 = arith.constant 0 : index
    %c0_174 = arith.constant 0 : index
    %108 = vector.load %arg2[%c8, %c0_173, %c0_174] : memref<9x128x128xbf16, #tpu.memory_space<vmem>>, vector<1x128x128xbf16>
    %109 = vector.shape_cast %108 : vector<1x128x128xbf16> to vector<128x128xbf16>
    %cst_175 = arith.constant dense<0.000000e+00> : vector<8x128xf32>
    %110 = tpu.matmul %29, %109, %cst_175 {dimension_numbers = #tpu.dot_dimension_numbers<[1], [0], [0], [1], [0, 0, 1, 1], [], []>} : vector<8x128xbf16>, vector<128x128xbf16>, vector<8x128xf32> -> vector<8x128xf32>
    %111 = arith.addf %107, %110 : vector<8x128xf32>
    %112 = vector.broadcast %72 : vector<1x128xf32> to vector<8x128xf32>
    %113 = arith.addf %111, %112 : vector<8x128xf32>
    %cst_176 = arith.constant 0.000000e+00 : f32
    %114 = vector.broadcast %cst_176 : f32 to vector<8x128xf32>
    %115 = arith.cmpf oge, %113, %114 : vector<8x128xf32>
    %cst_177 = arith.constant 2.000000e-01 : f32
    %116 = vector.broadcast %cst_177 : f32 to vector<8x128xf32>
    %117 = arith.mulf %116, %113 : vector<8x128xf32>
    %118 = arith.select %115, %113, %117 : vector<8x128xi1>, vector<8x128xf32>
    %119 = arith.truncf %118 : vector<8x128xf32> to vector<8x128xbf16>
    %c0_178 = arith.constant 0 : index
    %c0_179 = arith.constant 0 : index
    %c0_180 = arith.constant 0 : index
    %120 = vector.load %arg4[%c0_178, %c0_179, %c0_180] : memref<16x128x128xbf16, #tpu.memory_space<vmem>>, vector<1x128x128xbf16>
    %121 = vector.shape_cast %120 : vector<1x128x128xbf16> to vector<128x128xbf16>
    %cst_181 = arith.constant dense<0.000000e+00> : vector<8x128xf32>
    %122 = tpu.matmul %119, %121, %cst_181 {dimension_numbers = #tpu.dot_dimension_numbers<[1], [0], [0], [1], [0, 0, 1, 1], [], []>} : vector<8x128xbf16>, vector<128x128xbf16>, vector<8x128xf32> -> vector<8x128xf32>
    %123 = arith.addf %74, %122 : vector<8x128xf32>
    %cst_182 = arith.constant 0.000000e+00 : f32
    %124 = vector.broadcast %cst_182 : f32 to vector<8x128xf32>
    %c0_183 = arith.constant 0 : index
    %c0_184 = arith.constant 0 : index
    %c0_185 = arith.constant 0 : index
    %125 = vector.load %arg2[%c0_183, %c0_184, %c0_185] : memref<9x128x128xbf16, #tpu.memory_space<vmem>>, vector<1x128x128xbf16>
    %126 = vector.shape_cast %125 : vector<1x128x128xbf16> to vector<128x128xbf16>
    %cst_186 = arith.constant dense<0.000000e+00> : vector<8x128xf32>
    %127 = tpu.matmul %3, %126, %cst_186 {dimension_numbers = #tpu.dot_dimension_numbers<[1], [0], [0], [1], [0, 0, 1, 1], [], []>} : vector<8x128xbf16>, vector<128x128xbf16>, vector<8x128xf32> -> vector<8x128xf32>
    %128 = arith.addf %124, %127 : vector<8x128xf32>
    %c1_187 = arith.constant 1 : index
    %c0_188 = arith.constant 0 : index
    %c0_189 = arith.constant 0 : index
    %129 = vector.load %arg2[%c1_187, %c0_188, %c0_189] : memref<9x128x128xbf16, #tpu.memory_space<vmem>>, vector<1x128x128xbf16>
    %130 = vector.shape_cast %129 : vector<1x128x128xbf16> to vector<128x128xbf16>
    %cst_190 = arith.constant dense<0.000000e+00> : vector<8x128xf32>
    %131 = tpu.matmul %5, %130, %cst_190 {dimension_numbers = #tpu.dot_dimension_numbers<[1], [0], [0], [1], [0, 0, 1, 1], [], []>} : vector<8x128xbf16>, vector<128x128xbf16>, vector<8x128xf32> -> vector<8x128xf32>
    %132 = arith.addf %128, %131 : vector<8x128xf32>
    %c2_191 = arith.constant 2 : index
    %c0_192 = arith.constant 0 : index
    %c0_193 = arith.constant 0 : index
    %133 = vector.load %arg2[%c2_191, %c0_192, %c0_193] : memref<9x128x128xbf16, #tpu.memory_space<vmem>>, vector<1x128x128xbf16>
    %134 = vector.shape_cast %133 : vector<1x128x128xbf16> to vector<128x128xbf16>
    %cst_194 = arith.constant dense<0.000000e+00> : vector<8x128xf32>
    %135 = tpu.matmul %7, %134, %cst_194 {dimension_numbers = #tpu.dot_dimension_numbers<[1], [0], [0], [1], [0, 0, 1, 1], [], []>} : vector<8x128xbf16>, vector<128x128xbf16>, vector<8x128xf32> -> vector<8x128xf32>
    %136 = arith.addf %132, %135 : vector<8x128xf32>
    %c3_195 = arith.constant 3 : index
    %c0_196 = arith.constant 0 : index
    %c0_197 = arith.constant 0 : index
    %137 = vector.load %arg2[%c3_195, %c0_196, %c0_197] : memref<9x128x128xbf16, #tpu.memory_space<vmem>>, vector<1x128x128xbf16>
    %138 = vector.shape_cast %137 : vector<1x128x128xbf16> to vector<128x128xbf16>
    %cst_198 = arith.constant dense<0.000000e+00> : vector<8x128xf32>
    %139 = tpu.matmul %15, %138, %cst_198 {dimension_numbers = #tpu.dot_dimension_numbers<[1], [0], [0], [1], [0, 0, 1, 1], [], []>} : vector<8x128xbf16>, vector<128x128xbf16>, vector<8x128xf32> -> vector<8x128xf32>
    %140 = arith.addf %136, %139 : vector<8x128xf32>
    %c4_199 = arith.constant 4 : index
    %c0_200 = arith.constant 0 : index
    %c0_201 = arith.constant 0 : index
    %141 = vector.load %arg2[%c4_199, %c0_200, %c0_201] : memref<9x128x128xbf16, #tpu.memory_space<vmem>>, vector<1x128x128xbf16>
    %142 = vector.shape_cast %141 : vector<1x128x128xbf16> to vector<128x128xbf16>
    %cst_202 = arith.constant dense<0.000000e+00> : vector<8x128xf32>
    %143 = tpu.matmul %17, %142, %cst_202 {dimension_numbers = #tpu.dot_dimension_numbers<[1], [0], [0], [1], [0, 0, 1, 1], [], []>} : vector<8x128xbf16>, vector<128x128xbf16>, vector<8x128xf32> -> vector<8x128xf32>
    %144 = arith.addf %140, %143 : vector<8x128xf32>
    %c5_203 = arith.constant 5 : index
    %c0_204 = arith.constant 0 : index
    %c0_205 = arith.constant 0 : index
    %145 = vector.load %arg2[%c5_203, %c0_204, %c0_205] : memref<9x128x128xbf16, #tpu.memory_space<vmem>>, vector<1x128x128xbf16>
    %146 = vector.shape_cast %145 : vector<1x128x128xbf16> to vector<128x128xbf16>
    %cst_206 = arith.constant dense<0.000000e+00> : vector<8x128xf32>
    %147 = tpu.matmul %19, %146, %cst_206 {dimension_numbers = #tpu.dot_dimension_numbers<[1], [0], [0], [1], [0, 0, 1, 1], [], []>} : vector<8x128xbf16>, vector<128x128xbf16>, vector<8x128xf32> -> vector<8x128xf32>
    %148 = arith.addf %144, %147 : vector<8x128xf32>
    %c6_207 = arith.constant 6 : index
    %c0_208 = arith.constant 0 : index
    %c0_209 = arith.constant 0 : index
    %149 = vector.load %arg2[%c6_207, %c0_208, %c0_209] : memref<9x128x128xbf16, #tpu.memory_space<vmem>>, vector<1x128x128xbf16>
    %150 = vector.shape_cast %149 : vector<1x128x128xbf16> to vector<128x128xbf16>
    %cst_210 = arith.constant dense<0.000000e+00> : vector<8x128xf32>
    %151 = tpu.matmul %27, %150, %cst_210 {dimension_numbers = #tpu.dot_dimension_numbers<[1], [0], [0], [1], [0, 0, 1, 1], [], []>} : vector<8x128xbf16>, vector<128x128xbf16>, vector<8x128xf32> -> vector<8x128xf32>
    %152 = arith.addf %148, %151 : vector<8x128xf32>
    %c7_211 = arith.constant 7 : index
    %c0_212 = arith.constant 0 : index
    %c0_213 = arith.constant 0 : index
    %153 = vector.load %arg2[%c7_211, %c0_212, %c0_213] : memref<9x128x128xbf16, #tpu.memory_space<vmem>>, vector<1x128x128xbf16>
    %154 = vector.shape_cast %153 : vector<1x128x128xbf16> to vector<128x128xbf16>
    %cst_214 = arith.constant dense<0.000000e+00> : vector<8x128xf32>
    %155 = tpu.matmul %29, %154, %cst_214 {dimension_numbers = #tpu.dot_dimension_numbers<[1], [0], [0], [1], [0, 0, 1, 1], [], []>} : vector<8x128xbf16>, vector<128x128xbf16>, vector<8x128xf32> -> vector<8x128xf32>
    %156 = arith.addf %152, %155 : vector<8x128xf32>
    %c8_215 = arith.constant 8 : index
    %c0_216 = arith.constant 0 : index
    %c0_217 = arith.constant 0 : index
    %157 = vector.load %arg2[%c8_215, %c0_216, %c0_217] : memref<9x128x128xbf16, #tpu.memory_space<vmem>>, vector<1x128x128xbf16>
    %158 = vector.shape_cast %157 : vector<1x128x128xbf16> to vector<128x128xbf16>
    %cst_218 = arith.constant dense<0.000000e+00> : vector<8x128xf32>
    %159 = tpu.matmul %31, %158, %cst_218 {dimension_numbers = #tpu.dot_dimension_numbers<[1], [0], [0], [1], [0, 0, 1, 1], [], []>} : vector<8x128xbf16>, vector<128x128xbf16>, vector<8x128xf32> -> vector<8x128xf32>
    %160 = arith.addf %156, %159 : vector<8x128xf32>
    %161 = vector.broadcast %72 : vector<1x128xf32> to vector<8x128xf32>
    %162 = arith.addf %160, %161 : vector<8x128xf32>
    %cst_219 = arith.constant 0.000000e+00 : f32
    %163 = vector.broadcast %cst_219 : f32 to vector<8x128xf32>
    %164 = arith.cmpf oge, %162, %163 : vector<8x128xf32>
    %cst_220 = arith.constant 2.000000e-01 : f32
    %165 = vector.broadcast %cst_220 : f32 to vector<8x128xf32>
    %166 = arith.mulf %165, %162 : vector<8x128xf32>
    %167 = arith.select %164, %162, %166 : vector<8x128xi1>, vector<8x128xf32>
    %168 = arith.truncf %167 : vector<8x128xf32> to vector<8x128xbf16>
    %c1_221 = arith.constant 1 : index
    %c0_222 = arith.constant 0 : index
    %c0_223 = arith.constant 0 : index
    %169 = vector.load %arg4[%c1_221, %c0_222, %c0_223] : memref<16x128x128xbf16, #tpu.memory_space<vmem>>, vector<1x128x128xbf16>
    %170 = vector.shape_cast %169 : vector<1x128x128xbf16> to vector<128x128xbf16>
    %cst_224 = arith.constant dense<0.000000e+00> : vector<8x128xf32>
    %171 = tpu.matmul %168, %170, %cst_224 {dimension_numbers = #tpu.dot_dimension_numbers<[1], [0], [0], [1], [0, 0, 1, 1], [], []>} : vector<8x128xbf16>, vector<128x128xbf16>, vector<8x128xf32> -> vector<8x128xf32>
    %172 = arith.addf %123, %171 : vector<8x128xf32>
    %cst_225 = arith.constant 0.000000e+00 : f32
    %173 = vector.broadcast %cst_225 : f32 to vector<8x128xf32>
    %c0_226 = arith.constant 0 : index
    %c0_227 = arith.constant 0 : index
    %c0_228 = arith.constant 0 : index
    %174 = vector.load %arg2[%c0_226, %c0_227, %c0_228] : memref<9x128x128xbf16, #tpu.memory_space<vmem>>, vector<1x128x128xbf16>
    %175 = vector.shape_cast %174 : vector<1x128x128xbf16> to vector<128x128xbf16>
    %cst_229 = arith.constant dense<0.000000e+00> : vector<8x128xf32>
    %176 = tpu.matmul %5, %175, %cst_229 {dimension_numbers = #tpu.dot_dimension_numbers<[1], [0], [0], [1], [0, 0, 1, 1], [], []>} : vector<8x128xbf16>, vector<128x128xbf16>, vector<8x128xf32> -> vector<8x128xf32>
    %177 = arith.addf %173, %176 : vector<8x128xf32>
    %c1_230 = arith.constant 1 : index
    %c0_231 = arith.constant 0 : index
    %c0_232 = arith.constant 0 : index
    %178 = vector.load %arg2[%c1_230, %c0_231, %c0_232] : memref<9x128x128xbf16, #tpu.memory_space<vmem>>, vector<1x128x128xbf16>
    %179 = vector.shape_cast %178 : vector<1x128x128xbf16> to vector<128x128xbf16>
    %cst_233 = arith.constant dense<0.000000e+00> : vector<8x128xf32>
    %180 = tpu.matmul %7, %179, %cst_233 {dimension_numbers = #tpu.dot_dimension_numbers<[1], [0], [0], [1], [0, 0, 1, 1], [], []>} : vector<8x128xbf16>, vector<128x128xbf16>, vector<8x128xf32> -> vector<8x128xf32>
    %181 = arith.addf %177, %180 : vector<8x128xf32>
    %c2_234 = arith.constant 2 : index
    %c0_235 = arith.constant 0 : index
    %c0_236 = arith.constant 0 : index
    %182 = vector.load %arg2[%c2_234, %c0_235, %c0_236] : memref<9x128x128xbf16, #tpu.memory_space<vmem>>, vector<1x128x128xbf16>
    %183 = vector.shape_cast %182 : vector<1x128x128xbf16> to vector<128x128xbf16>
    %cst_237 = arith.constant dense<0.000000e+00> : vector<8x128xf32>
    %184 = tpu.matmul %9, %183, %cst_237 {dimension_numbers = #tpu.dot_dimension_numbers<[1], [0], [0], [1], [0, 0, 1, 1], [], []>} : vector<8x128xbf16>, vector<128x128xbf16>, vector<8x128xf32> -> vector<8x128xf32>
    %185 = arith.addf %181, %184 : vector<8x128xf32>
    %c3_238 = arith.constant 3 : index
    %c0_239 = arith.constant 0 : index
    %c0_240 = arith.constant 0 : index
    %186 = vector.load %arg2[%c3_238, %c0_239, %c0_240] : memref<9x128x128xbf16, #tpu.memory_space<vmem>>, vector<1x128x128xbf16>
    %187 = vector.shape_cast %186 : vector<1x128x128xbf16> to vector<128x128xbf16>
    %cst_241 = arith.constant dense<0.000000e+00> : vector<8x128xf32>
    %188 = tpu.matmul %17, %187, %cst_241 {dimension_numbers = #tpu.dot_dimension_numbers<[1], [0], [0], [1], [0, 0, 1, 1], [], []>} : vector<8x128xbf16>, vector<128x128xbf16>, vector<8x128xf32> -> vector<8x128xf32>
    %189 = arith.addf %185, %188 : vector<8x128xf32>
    %c4_242 = arith.constant 4 : index
    %c0_243 = arith.constant 0 : index
    %c0_244 = arith.constant 0 : index
    %190 = vector.load %arg2[%c4_242, %c0_243, %c0_244] : memref<9x128x128xbf16, #tpu.memory_space<vmem>>, vector<1x128x128xbf16>
    %191 = vector.shape_cast %190 : vector<1x128x128xbf16> to vector<128x128xbf16>
    %cst_245 = arith.constant dense<0.000000e+00> : vector<8x128xf32>
    %192 = tpu.matmul %19, %191, %cst_245 {dimension_numbers = #tpu.dot_dimension_numbers<[1], [0], [0], [1], [0, 0, 1, 1], [], []>} : vector<8x128xbf16>, vector<128x128xbf16>, vector<8x128xf32> -> vector<8x128xf32>
    %193 = arith.addf %189, %192 : vector<8x128xf32>
    %c5_246 = arith.constant 5 : index
    %c0_247 = arith.constant 0 : index
    %c0_248 = arith.constant 0 : index
    %194 = vector.load %arg2[%c5_246, %c0_247, %c0_248] : memref<9x128x128xbf16, #tpu.memory_space<vmem>>, vector<1x128x128xbf16>
    %195 = vector.shape_cast %194 : vector<1x128x128xbf16> to vector<128x128xbf16>
    %cst_249 = arith.constant dense<0.000000e+00> : vector<8x128xf32>
    %196 = tpu.matmul %21, %195, %cst_249 {dimension_numbers = #tpu.dot_dimension_numbers<[1], [0], [0], [1], [0, 0, 1, 1], [], []>} : vector<8x128xbf16>, vector<128x128xbf16>, vector<8x128xf32> -> vector<8x128xf32>
    %197 = arith.addf %193, %196 : vector<8x128xf32>
    %c6_250 = arith.constant 6 : index
    %c0_251 = arith.constant 0 : index
    %c0_252 = arith.constant 0 : index
    %198 = vector.load %arg2[%c6_250, %c0_251, %c0_252] : memref<9x128x128xbf16, #tpu.memory_space<vmem>>, vector<1x128x128xbf16>
    %199 = vector.shape_cast %198 : vector<1x128x128xbf16> to vector<128x128xbf16>
    %cst_253 = arith.constant dense<0.000000e+00> : vector<8x128xf32>
    %200 = tpu.matmul %29, %199, %cst_253 {dimension_numbers = #tpu.dot_dimension_numbers<[1], [0], [0], [1], [0, 0, 1, 1], [], []>} : vector<8x128xbf16>, vector<128x128xbf16>, vector<8x128xf32> -> vector<8x128xf32>
    %201 = arith.addf %197, %200 : vector<8x128xf32>
    %c7_254 = arith.constant 7 : index
    %c0_255 = arith.constant 0 : index
    %c0_256 = arith.constant 0 : index
    %202 = vector.load %arg2[%c7_254, %c0_255, %c0_256] : memref<9x128x128xbf16, #tpu.memory_space<vmem>>, vector<1x128x128xbf16>
    %203 = vector.shape_cast %202 : vector<1x128x128xbf16> to vector<128x128xbf16>
    %cst_257 = arith.constant dense<0.000000e+00> : vector<8x128xf32>
    %204 = tpu.matmul %31, %203, %cst_257 {dimension_numbers = #tpu.dot_dimension_numbers<[1], [0], [0], [1], [0, 0, 1, 1], [], []>} : vector<8x128xbf16>, vector<128x128xbf16>, vector<8x128xf32> -> vector<8x128xf32>
    %205 = arith.addf %201, %204 : vector<8x128xf32>
    %c8_258 = arith.constant 8 : index
    %c0_259 = arith.constant 0 : index
    %c0_260 = arith.constant 0 : index
    %206 = vector.load %arg2[%c8_258, %c0_259, %c0_260] : memref<9x128x128xbf16, #tpu.memory_space<vmem>>, vector<1x128x128xbf16>
    %207 = vector.shape_cast %206 : vector<1x128x128xbf16> to vector<128x128xbf16>
    %cst_261 = arith.constant dense<0.000000e+00> : vector<8x128xf32>
    %208 = tpu.matmul %33, %207, %cst_261 {dimension_numbers = #tpu.dot_dimension_numbers<[1], [0], [0], [1], [0, 0, 1, 1], [], []>} : vector<8x128xbf16>, vector<128x128xbf16>, vector<8x128xf32> -> vector<8x128xf32>
    %209 = arith.addf %205, %208 : vector<8x128xf32>
    %210 = vector.broadcast %72 : vector<1x128xf32> to vector<8x128xf32>
    %211 = arith.addf %209, %210 : vector<8x128xf32>
    %cst_262 = arith.constant 0.000000e+00 : f32
    %212 = vector.broadcast %cst_262 : f32 to vector<8x128xf32>
    %213 = arith.cmpf oge, %211, %212 : vector<8x128xf32>
    %cst_263 = arith.constant 2.000000e-01 : f32
    %214 = vector.broadcast %cst_263 : f32 to vector<8x128xf32>
    %215 = arith.mulf %214, %211 : vector<8x128xf32>
    %216 = arith.select %213, %211, %215 : vector<8x128xi1>, vector<8x128xf32>
    %217 = arith.truncf %216 : vector<8x128xf32> to vector<8x128xbf16>
    %c2_264 = arith.constant 2 : index
    %c0_265 = arith.constant 0 : index
    %c0_266 = arith.constant 0 : index
    %218 = vector.load %arg4[%c2_264, %c0_265, %c0_266] : memref<16x128x128xbf16, #tpu.memory_space<vmem>>, vector<1x128x128xbf16>
    %219 = vector.shape_cast %218 : vector<1x128x128xbf16> to vector<128x128xbf16>
    %cst_267 = arith.constant dense<0.000000e+00> : vector<8x128xf32>
    %220 = tpu.matmul %217, %219, %cst_267 {dimension_numbers = #tpu.dot_dimension_numbers<[1], [0], [0], [1], [0, 0, 1, 1], [], []>} : vector<8x128xbf16>, vector<128x128xbf16>, vector<8x128xf32> -> vector<8x128xf32>
    %221 = arith.addf %172, %220 : vector<8x128xf32>
    %cst_268 = arith.constant 0.000000e+00 : f32
    %222 = vector.broadcast %cst_268 : f32 to vector<8x128xf32>
    %c0_269 = arith.constant 0 : index
    %c0_270 = arith.constant 0 : index
    %c0_271 = arith.constant 0 : index
    %223 = vector.load %arg2[%c0_269, %c0_270, %c0_271] : memref<9x128x128xbf16, #tpu.memory_space<vmem>>, vector<1x128x128xbf16>
    %224 = vector.shape_cast %223 : vector<1x128x128xbf16> to vector<128x128xbf16>
    %cst_272 = arith.constant dense<0.000000e+00> : vector<8x128xf32>
    %225 = tpu.matmul %7, %224, %cst_272 {dimension_numbers = #tpu.dot_dimension_numbers<[1], [0], [0], [1], [0, 0, 1, 1], [], []>} : vector<8x128xbf16>, vector<128x128xbf16>, vector<8x128xf32> -> vector<8x128xf32>
    %226 = arith.addf %222, %225 : vector<8x128xf32>
    %c1_273 = arith.constant 1 : index
    %c0_274 = arith.constant 0 : index
    %c0_275 = arith.constant 0 : index
    %227 = vector.load %arg2[%c1_273, %c0_274, %c0_275] : memref<9x128x128xbf16, #tpu.memory_space<vmem>>, vector<1x128x128xbf16>
    %228 = vector.shape_cast %227 : vector<1x128x128xbf16> to vector<128x128xbf16>
    %cst_276 = arith.constant dense<0.000000e+00> : vector<8x128xf32>
    %229 = tpu.matmul %9, %228, %cst_276 {dimension_numbers = #tpu.dot_dimension_numbers<[1], [0], [0], [1], [0, 0, 1, 1], [], []>} : vector<8x128xbf16>, vector<128x128xbf16>, vector<8x128xf32> -> vector<8x128xf32>
    %230 = arith.addf %226, %229 : vector<8x128xf32>
    %c2_277 = arith.constant 2 : index
    %c0_278 = arith.constant 0 : index
    %c0_279 = arith.constant 0 : index
    %231 = vector.load %arg2[%c2_277, %c0_278, %c0_279] : memref<9x128x128xbf16, #tpu.memory_space<vmem>>, vector<1x128x128xbf16>
    %232 = vector.shape_cast %231 : vector<1x128x128xbf16> to vector<128x128xbf16>
    %cst_280 = arith.constant dense<0.000000e+00> : vector<8x128xf32>
    %233 = tpu.matmul %11, %232, %cst_280 {dimension_numbers = #tpu.dot_dimension_numbers<[1], [0], [0], [1], [0, 0, 1, 1], [], []>} : vector<8x128xbf16>, vector<128x128xbf16>, vector<8x128xf32> -> vector<8x128xf32>
    %234 = arith.addf %230, %233 : vector<8x128xf32>
    %c3_281 = arith.constant 3 : index
    %c0_282 = arith.constant 0 : index
    %c0_283 = arith.constant 0 : index
    %235 = vector.load %arg2[%c3_281, %c0_282, %c0_283] : memref<9x128x128xbf16, #tpu.memory_space<vmem>>, vector<1x128x128xbf16>
    %236 = vector.shape_cast %235 : vector<1x128x128xbf16> to vector<128x128xbf16>
    %cst_284 = arith.constant dense<0.000000e+00> : vector<8x128xf32>
    %237 = tpu.matmul %19, %236, %cst_284 {dimension_numbers = #tpu.dot_dimension_numbers<[1], [0], [0], [1], [0, 0, 1, 1], [], []>} : vector<8x128xbf16>, vector<128x128xbf16>, vector<8x128xf32> -> vector<8x128xf32>
    %238 = arith.addf %234, %237 : vector<8x128xf32>
    %c4_285 = arith.constant 4 : index
    %c0_286 = arith.constant 0 : index
    %c0_287 = arith.constant 0 : index
    %239 = vector.load %arg2[%c4_285, %c0_286, %c0_287] : memref<9x128x128xbf16, #tpu.memory_space<vmem>>, vector<1x128x128xbf16>
    %240 = vector.shape_cast %239 : vector<1x128x128xbf16> to vector<128x128xbf16>
    %cst_288 = arith.constant dense<0.000000e+00> : vector<8x128xf32>
    %241 = tpu.matmul %21, %240, %cst_288 {dimension_numbers = #tpu.dot_dimension_numbers<[1], [0], [0], [1], [0, 0, 1, 1], [], []>} : vector<8x128xbf16>, vector<128x128xbf16>, vector<8x128xf32> -> vector<8x128xf32>
    %242 = arith.addf %238, %241 : vector<8x128xf32>
    %c5_289 = arith.constant 5 : index
    %c0_290 = arith.constant 0 : index
    %c0_291 = arith.constant 0 : index
    %243 = vector.load %arg2[%c5_289, %c0_290, %c0_291] : memref<9x128x128xbf16, #tpu.memory_space<vmem>>, vector<1x128x128xbf16>
    %244 = vector.shape_cast %243 : vector<1x128x128xbf16> to vector<128x128xbf16>
    %cst_292 = arith.constant dense<0.000000e+00> : vector<8x128xf32>
    %245 = tpu.matmul %23, %244, %cst_292 {dimension_numbers = #tpu.dot_dimension_numbers<[1], [0], [0], [1], [0, 0, 1, 1], [], []>} : vector<8x128xbf16>, vector<128x128xbf16>, vector<8x128xf32> -> vector<8x128xf32>
    %246 = arith.addf %242, %245 : vector<8x128xf32>
    %c6_293 = arith.constant 6 : index
    %c0_294 = arith.constant 0 : index
    %c0_295 = arith.constant 0 : index
    %247 = vector.load %arg2[%c6_293, %c0_294, %c0_295] : memref<9x128x128xbf16, #tpu.memory_space<vmem>>, vector<1x128x128xbf16>
    %248 = vector.shape_cast %247 : vector<1x128x128xbf16> to vector<128x128xbf16>
    %cst_296 = arith.constant dense<0.000000e+00> : vector<8x128xf32>
    %249 = tpu.matmul %31, %248, %cst_296 {dimension_numbers = #tpu.dot_dimension_numbers<[1], [0], [0], [1], [0, 0, 1, 1], [], []>} : vector<8x128xbf16>, vector<128x128xbf16>, vector<8x128xf32> -> vector<8x128xf32>
    %250 = arith.addf %246, %249 : vector<8x128xf32>
    %c7_297 = arith.constant 7 : index
    %c0_298 = arith.constant 0 : index
    %c0_299 = arith.constant 0 : index
    %251 = vector.load %arg2[%c7_297, %c0_298, %c0_299] : memref<9x128x128xbf16, #tpu.memory_space<vmem>>, vector<1x128x128xbf16>
    %252 = vector.shape_cast %251 : vector<1x128x128xbf16> to vector<128x128xbf16>
    %cst_300 = arith.constant dense<0.000000e+00> : vector<8x128xf32>
    %253 = tpu.matmul %33, %252, %cst_300 {dimension_numbers = #tpu.dot_dimension_numbers<[1], [0], [0], [1], [0, 0, 1, 1], [], []>} : vector<8x128xbf16>, vector<128x128xbf16>, vector<8x128xf32> -> vector<8x128xf32>
    %254 = arith.addf %250, %253 : vector<8x128xf32>
    %c8_301 = arith.constant 8 : index
    %c0_302 = arith.constant 0 : index
    %c0_303 = arith.constant 0 : index
    %255 = vector.load %arg2[%c8_301, %c0_302, %c0_303] : memref<9x128x128xbf16, #tpu.memory_space<vmem>>, vector<1x128x128xbf16>
    %256 = vector.shape_cast %255 : vector<1x128x128xbf16> to vector<128x128xbf16>
    %cst_304 = arith.constant dense<0.000000e+00> : vector<8x128xf32>
    %257 = tpu.matmul %35, %256, %cst_304 {dimension_numbers = #tpu.dot_dimension_numbers<[1], [0], [0], [1], [0, 0, 1, 1], [], []>} : vector<8x128xbf16>, vector<128x128xbf16>, vector<8x128xf32> -> vector<8x128xf32>
    %258 = arith.addf %254, %257 : vector<8x128xf32>
    %259 = vector.broadcast %72 : vector<1x128xf32> to vector<8x128xf32>
    %260 = arith.addf %258, %259 : vector<8x128xf32>
    %cst_305 = arith.constant 0.000000e+00 : f32
    %261 = vector.broadcast %cst_305 : f32 to vector<8x128xf32>
    %262 = arith.cmpf oge, %260, %261 : vector<8x128xf32>
    %cst_306 = arith.constant 2.000000e-01 : f32
    %263 = vector.broadcast %cst_306 : f32 to vector<8x128xf32>
    %264 = arith.mulf %263, %260 : vector<8x128xf32>
    %265 = arith.select %262, %260, %264 : vector<8x128xi1>, vector<8x128xf32>
    %266 = arith.truncf %265 : vector<8x128xf32> to vector<8x128xbf16>
    %c3_307 = arith.constant 3 : index
    %c0_308 = arith.constant 0 : index
    %c0_309 = arith.constant 0 : index
    %267 = vector.load %arg4[%c3_307, %c0_308, %c0_309] : memref<16x128x128xbf16, #tpu.memory_space<vmem>>, vector<1x128x128xbf16>
    %268 = vector.shape_cast %267 : vector<1x128x128xbf16> to vector<128x128xbf16>
    %cst_310 = arith.constant dense<0.000000e+00> : vector<8x128xf32>
    %269 = tpu.matmul %266, %268, %cst_310 {dimension_numbers = #tpu.dot_dimension_numbers<[1], [0], [0], [1], [0, 0, 1, 1], [], []>} : vector<8x128xbf16>, vector<128x128xbf16>, vector<8x128xf32> -> vector<8x128xf32>
    %270 = arith.addf %221, %269 : vector<8x128xf32>
    %cst_311 = arith.constant 0.000000e+00 : f32
    %271 = vector.broadcast %cst_311 : f32 to vector<8x128xf32>
    %c0_312 = arith.constant 0 : index
    %c0_313 = arith.constant 0 : index
    %c0_314 = arith.constant 0 : index
    %272 = vector.load %arg2[%c0_312, %c0_313, %c0_314] : memref<9x128x128xbf16, #tpu.memory_space<vmem>>, vector<1x128x128xbf16>
    %273 = vector.shape_cast %272 : vector<1x128x128xbf16> to vector<128x128xbf16>
    %cst_315 = arith.constant dense<0.000000e+00> : vector<8x128xf32>
    %274 = tpu.matmul %13, %273, %cst_315 {dimension_numbers = #tpu.dot_dimension_numbers<[1], [0], [0], [1], [0, 0, 1, 1], [], []>} : vector<8x128xbf16>, vector<128x128xbf16>, vector<8x128xf32> -> vector<8x128xf32>
    %275 = arith.addf %271, %274 : vector<8x128xf32>
    %c1_316 = arith.constant 1 : index
    %c0_317 = arith.constant 0 : index
    %c0_318 = arith.constant 0 : index
    %276 = vector.load %arg2[%c1_316, %c0_317, %c0_318] : memref<9x128x128xbf16, #tpu.memory_space<vmem>>, vector<1x128x128xbf16>
    %277 = vector.shape_cast %276 : vector<1x128x128xbf16> to vector<128x128xbf16>
    %cst_319 = arith.constant dense<0.000000e+00> : vector<8x128xf32>
    %278 = tpu.matmul %15, %277, %cst_319 {dimension_numbers = #tpu.dot_dimension_numbers<[1], [0], [0], [1], [0, 0, 1, 1], [], []>} : vector<8x128xbf16>, vector<128x128xbf16>, vector<8x128xf32> -> vector<8x128xf32>
    %279 = arith.addf %275, %278 : vector<8x128xf32>
    %c2_320 = arith.constant 2 : index
    %c0_321 = arith.constant 0 : index
    %c0_322 = arith.constant 0 : index
    %280 = vector.load %arg2[%c2_320, %c0_321, %c0_322] : memref<9x128x128xbf16, #tpu.memory_space<vmem>>, vector<1x128x128xbf16>
    %281 = vector.shape_cast %280 : vector<1x128x128xbf16> to vector<128x128xbf16>
    %cst_323 = arith.constant dense<0.000000e+00> : vector<8x128xf32>
    %282 = tpu.matmul %17, %281, %cst_323 {dimension_numbers = #tpu.dot_dimension_numbers<[1], [0], [0], [1], [0, 0, 1, 1], [], []>} : vector<8x128xbf16>, vector<128x128xbf16>, vector<8x128xf32> -> vector<8x128xf32>
    %283 = arith.addf %279, %282 : vector<8x128xf32>
    %c3_324 = arith.constant 3 : index
    %c0_325 = arith.constant 0 : index
    %c0_326 = arith.constant 0 : index
    %284 = vector.load %arg2[%c3_324, %c0_325, %c0_326] : memref<9x128x128xbf16, #tpu.memory_space<vmem>>, vector<1x128x128xbf16>
    %285 = vector.shape_cast %284 : vector<1x128x128xbf16> to vector<128x128xbf16>
    %cst_327 = arith.constant dense<0.000000e+00> : vector<8x128xf32>
    %286 = tpu.matmul %25, %285, %cst_327 {dimension_numbers = #tpu.dot_dimension_numbers<[1], [0], [0], [1], [0, 0, 1, 1], [], []>} : vector<8x128xbf16>, vector<128x128xbf16>, vector<8x128xf32> -> vector<8x128xf32>
    %287 = arith.addf %283, %286 : vector<8x128xf32>
    %c4_328 = arith.constant 4 : index
    %c0_329 = arith.constant 0 : index
    %c0_330 = arith.constant 0 : index
    %288 = vector.load %arg2[%c4_328, %c0_329, %c0_330] : memref<9x128x128xbf16, #tpu.memory_space<vmem>>, vector<1x128x128xbf16>
    %289 = vector.shape_cast %288 : vector<1x128x128xbf16> to vector<128x128xbf16>
    %cst_331 = arith.constant dense<0.000000e+00> : vector<8x128xf32>
    %290 = tpu.matmul %27, %289, %cst_331 {dimension_numbers = #tpu.dot_dimension_numbers<[1], [0], [0], [1], [0, 0, 1, 1], [], []>} : vector<8x128xbf16>, vector<128x128xbf16>, vector<8x128xf32> -> vector<8x128xf32>
    %291 = arith.addf %287, %290 : vector<8x128xf32>
    %c5_332 = arith.constant 5 : index
    %c0_333 = arith.constant 0 : index
    %c0_334 = arith.constant 0 : index
    %292 = vector.load %arg2[%c5_332, %c0_333, %c0_334] : memref<9x128x128xbf16, #tpu.memory_space<vmem>>, vector<1x128x128xbf16>
    %293 = vector.shape_cast %292 : vector<1x128x128xbf16> to vector<128x128xbf16>
    %cst_335 = arith.constant dense<0.000000e+00> : vector<8x128xf32>
    %294 = tpu.matmul %29, %293, %cst_335 {dimension_numbers = #tpu.dot_dimension_numbers<[1], [0], [0], [1], [0, 0, 1, 1], [], []>} : vector<8x128xbf16>, vector<128x128xbf16>, vector<8x128xf32> -> vector<8x128xf32>
    %295 = arith.addf %291, %294 : vector<8x128xf32>
    %c6_336 = arith.constant 6 : index
    %c0_337 = arith.constant 0 : index
    %c0_338 = arith.constant 0 : index
    %296 = vector.load %arg2[%c6_336, %c0_337, %c0_338] : memref<9x128x128xbf16, #tpu.memory_space<vmem>>, vector<1x128x128xbf16>
    %297 = vector.shape_cast %296 : vector<1x128x128xbf16> to vector<128x128xbf16>
    %cst_339 = arith.constant dense<0.000000e+00> : vector<8x128xf32>
    %298 = tpu.matmul %37, %297, %cst_339 {dimension_numbers = #tpu.dot_dimension_numbers<[1], [0], [0], [1], [0, 0, 1, 1], [], []>} : vector<8x128xbf16>, vector<128x128xbf16>, vector<8x128xf32> -> vector<8x128xf32>
    %299 = arith.addf %295, %298 : vector<8x128xf32>
    %c7_340 = arith.constant 7 : index
    %c0_341 = arith.constant 0 : index
    %c0_342 = arith.constant 0 : index
    %300 = vector.load %arg2[%c7_340, %c0_341, %c0_342] : memref<9x128x128xbf16, #tpu.memory_space<vmem>>, vector<1x128x128xbf16>
    %301 = vector.shape_cast %300 : vector<1x128x128xbf16> to vector<128x128xbf16>
    %cst_343 = arith.constant dense<0.000000e+00> : vector<8x128xf32>
    %302 = tpu.matmul %39, %301, %cst_343 {dimension_numbers = #tpu.dot_dimension_numbers<[1], [0], [0], [1], [0, 0, 1, 1], [], []>} : vector<8x128xbf16>, vector<128x128xbf16>, vector<8x128xf32> -> vector<8x128xf32>
    %303 = arith.addf %299, %302 : vector<8x128xf32>
    %c8_344 = arith.constant 8 : index
    %c0_345 = arith.constant 0 : index
    %c0_346 = arith.constant 0 : index
    %304 = vector.load %arg2[%c8_344, %c0_345, %c0_346] : memref<9x128x128xbf16, #tpu.memory_space<vmem>>, vector<1x128x128xbf16>
    %305 = vector.shape_cast %304 : vector<1x128x128xbf16> to vector<128x128xbf16>
    %cst_347 = arith.constant dense<0.000000e+00> : vector<8x128xf32>
    %306 = tpu.matmul %41, %305, %cst_347 {dimension_numbers = #tpu.dot_dimension_numbers<[1], [0], [0], [1], [0, 0, 1, 1], [], []>} : vector<8x128xbf16>, vector<128x128xbf16>, vector<8x128xf32> -> vector<8x128xf32>
    %307 = arith.addf %303, %306 : vector<8x128xf32>
    %308 = vector.broadcast %72 : vector<1x128xf32> to vector<8x128xf32>
    %309 = arith.addf %307, %308 : vector<8x128xf32>
    %cst_348 = arith.constant 0.000000e+00 : f32
    %310 = vector.broadcast %cst_348 : f32 to vector<8x128xf32>
    %311 = arith.cmpf oge, %309, %310 : vector<8x128xf32>
    %cst_349 = arith.constant 2.000000e-01 : f32
    %312 = vector.broadcast %cst_349 : f32 to vector<8x128xf32>
    %313 = arith.mulf %312, %309 : vector<8x128xf32>
    %314 = arith.select %311, %309, %313 : vector<8x128xi1>, vector<8x128xf32>
    %315 = arith.truncf %314 : vector<8x128xf32> to vector<8x128xbf16>
    %c4_350 = arith.constant 4 : index
    %c0_351 = arith.constant 0 : index
    %c0_352 = arith.constant 0 : index
    %316 = vector.load %arg4[%c4_350, %c0_351, %c0_352] : memref<16x128x128xbf16, #tpu.memory_space<vmem>>, vector<1x128x128xbf16>
    %317 = vector.shape_cast %316 : vector<1x128x128xbf16> to vector<128x128xbf16>
    %cst_353 = arith.constant dense<0.000000e+00> : vector<8x128xf32>
    %318 = tpu.matmul %315, %317, %cst_353 {dimension_numbers = #tpu.dot_dimension_numbers<[1], [0], [0], [1], [0, 0, 1, 1], [], []>} : vector<8x128xbf16>, vector<128x128xbf16>, vector<8x128xf32> -> vector<8x128xf32>
    %319 = arith.addf %270, %318 : vector<8x128xf32>
    %cst_354 = arith.constant 0.000000e+00 : f32
    %320 = vector.broadcast %cst_354 : f32 to vector<8x128xf32>
    %c0_355 = arith.constant 0 : index
    %c0_356 = arith.constant 0 : index
    %c0_357 = arith.constant 0 : index
    %321 = vector.load %arg2[%c0_355, %c0_356, %c0_357] : memref<9x128x128xbf16, #tpu.memory_space<vmem>>, vector<1x128x128xbf16>
    %322 = vector.shape_cast %321 : vector<1x128x128xbf16> to vector<128x128xbf16>
    %cst_358 = arith.constant dense<0.000000e+00> : vector<8x128xf32>
    %323 = tpu.matmul %15, %322, %cst_358 {dimension_numbers = #tpu.dot_dimension_numbers<[1], [0], [0], [1], [0, 0, 1, 1], [], []>} : vector<8x128xbf16>, vector<128x128xbf16>, vector<8x128xf32> -> vector<8x128xf32>
    %324 = arith.addf %320, %323 : vector<8x128xf32>
    %c1_359 = arith.constant 1 : index
    %c0_360 = arith.constant 0 : index
    %c0_361 = arith.constant 0 : index
    %325 = vector.load %arg2[%c1_359, %c0_360, %c0_361] : memref<9x128x128xbf16, #tpu.memory_space<vmem>>, vector<1x128x128xbf16>
    %326 = vector.shape_cast %325 : vector<1x128x128xbf16> to vector<128x128xbf16>
    %cst_362 = arith.constant dense<0.000000e+00> : vector<8x128xf32>
    %327 = tpu.matmul %17, %326, %cst_362 {dimension_numbers = #tpu.dot_dimension_numbers<[1], [0], [0], [1], [0, 0, 1, 1], [], []>} : vector<8x128xbf16>, vector<128x128xbf16>, vector<8x128xf32> -> vector<8x128xf32>
    %328 = arith.addf %324, %327 : vector<8x128xf32>
    %c2_363 = arith.constant 2 : index
    %c0_364 = arith.constant 0 : index
    %c0_365 = arith.constant 0 : index
    %329 = vector.load %arg2[%c2_363, %c0_364, %c0_365] : memref<9x128x128xbf16, #tpu.memory_space<vmem>>, vector<1x128x128xbf16>
    %330 = vector.shape_cast %329 : vector<1x128x128xbf16> to vector<128x128xbf16>
    %cst_366 = arith.constant dense<0.000000e+00> : vector<8x128xf32>
    %331 = tpu.matmul %19, %330, %cst_366 {dimension_numbers = #tpu.dot_dimension_numbers<[1], [0], [0], [1], [0, 0, 1, 1], [], []>} : vector<8x128xbf16>, vector<128x128xbf16>, vector<8x128xf32> -> vector<8x128xf32>
    %332 = arith.addf %328, %331 : vector<8x128xf32>
    %c3_367 = arith.constant 3 : index
    %c0_368 = arith.constant 0 : index
    %c0_369 = arith.constant 0 : index
    %333 = vector.load %arg2[%c3_367, %c0_368, %c0_369] : memref<9x128x128xbf16, #tpu.memory_space<vmem>>, vector<1x128x128xbf16>
    %334 = vector.shape_cast %333 : vector<1x128x128xbf16> to vector<128x128xbf16>
    %cst_370 = arith.constant dense<0.000000e+00> : vector<8x128xf32>
    %335 = tpu.matmul %27, %334, %cst_370 {dimension_numbers = #tpu.dot_dimension_numbers<[1], [0], [0], [1], [0, 0, 1, 1], [], []>} : vector<8x128xbf16>, vector<128x128xbf16>, vector<8x128xf32> -> vector<8x128xf32>
    %336 = arith.addf %332, %335 : vector<8x128xf32>
    %c4_371 = arith.constant 4 : index
    %c0_372 = arith.constant 0 : index
    %c0_373 = arith.constant 0 : index
    %337 = vector.load %arg2[%c4_371, %c0_372, %c0_373] : memref<9x128x128xbf16, #tpu.memory_space<vmem>>, vector<1x128x128xbf16>
    %338 = vector.shape_cast %337 : vector<1x128x128xbf16> to vector<128x128xbf16>
    %cst_374 = arith.constant dense<0.000000e+00> : vector<8x128xf32>
    %339 = tpu.matmul %29, %338, %cst_374 {dimension_numbers = #tpu.dot_dimension_numbers<[1], [0], [0], [1], [0, 0, 1, 1], [], []>} : vector<8x128xbf16>, vector<128x128xbf16>, vector<8x128xf32> -> vector<8x128xf32>
    %340 = arith.addf %336, %339 : vector<8x128xf32>
    %c5_375 = arith.constant 5 : index
    %c0_376 = arith.constant 0 : index
    %c0_377 = arith.constant 0 : index
    %341 = vector.load %arg2[%c5_375, %c0_376, %c0_377] : memref<9x128x128xbf16, #tpu.memory_space<vmem>>, vector<1x128x128xbf16>
    %342 = vector.shape_cast %341 : vector<1x128x128xbf16> to vector<128x128xbf16>
    %cst_378 = arith.constant dense<0.000000e+00> : vector<8x128xf32>
    %343 = tpu.matmul %31, %342, %cst_378 {dimension_numbers = #tpu.dot_dimension_numbers<[1], [0], [0], [1], [0, 0, 1, 1], [], []>} : vector<8x128xbf16>, vector<128x128xbf16>, vector<8x128xf32> -> vector<8x128xf32>
    %344 = arith.addf %340, %343 : vector<8x128xf32>
    %c6_379 = arith.constant 6 : index
    %c0_380 = arith.constant 0 : index
    %c0_381 = arith.constant 0 : index
    %345 = vector.load %arg2[%c6_379, %c0_380, %c0_381] : memref<9x128x128xbf16, #tpu.memory_space<vmem>>, vector<1x128x128xbf16>
    %346 = vector.shape_cast %345 : vector<1x128x128xbf16> to vector<128x128xbf16>
    %cst_382 = arith.constant dense<0.000000e+00> : vector<8x128xf32>
    %347 = tpu.matmul %39, %346, %cst_382 {dimension_numbers = #tpu.dot_dimension_numbers<[1], [0], [0], [1], [0, 0, 1, 1], [], []>} : vector<8x128xbf16>, vector<128x128xbf16>, vector<8x128xf32> -> vector<8x128xf32>
    %348 = arith.addf %344, %347 : vector<8x128xf32>
    %c7_383 = arith.constant 7 : index
    %c0_384 = arith.constant 0 : index
    %c0_385 = arith.constant 0 : index
    %349 = vector.load %arg2[%c7_383, %c0_384, %c0_385] : memref<9x128x128xbf16, #tpu.memory_space<vmem>>, vector<1x128x128xbf16>
    %350 = vector.shape_cast %349 : vector<1x128x128xbf16> to vector<128x128xbf16>
    %cst_386 = arith.constant dense<0.000000e+00> : vector<8x128xf32>
    %351 = tpu.matmul %41, %350, %cst_386 {dimension_numbers = #tpu.dot_dimension_numbers<[1], [0], [0], [1], [0, 0, 1, 1], [], []>} : vector<8x128xbf16>, vector<128x128xbf16>, vector<8x128xf32> -> vector<8x128xf32>
    %352 = arith.addf %348, %351 : vector<8x128xf32>
    %c8_387 = arith.constant 8 : index
    %c0_388 = arith.constant 0 : index
    %c0_389 = arith.constant 0 : index
    %353 = vector.load %arg2[%c8_387, %c0_388, %c0_389] : memref<9x128x128xbf16, #tpu.memory_space<vmem>>, vector<1x128x128xbf16>
    %354 = vector.shape_cast %353 : vector<1x128x128xbf16> to vector<128x128xbf16>
    %cst_390 = arith.constant dense<0.000000e+00> : vector<8x128xf32>
    %355 = tpu.matmul %43, %354, %cst_390 {dimension_numbers = #tpu.dot_dimension_numbers<[1], [0], [0], [1], [0, 0, 1, 1], [], []>} : vector<8x128xbf16>, vector<128x128xbf16>, vector<8x128xf32> -> vector<8x128xf32>
    %356 = arith.addf %352, %355 : vector<8x128xf32>
    %357 = vector.broadcast %72 : vector<1x128xf32> to vector<8x128xf32>
    %358 = arith.addf %356, %357 : vector<8x128xf32>
    %cst_391 = arith.constant 0.000000e+00 : f32
    %359 = vector.broadcast %cst_391 : f32 to vector<8x128xf32>
    %360 = arith.cmpf oge, %358, %359 : vector<8x128xf32>
    %cst_392 = arith.constant 2.000000e-01 : f32
    %361 = vector.broadcast %cst_392 : f32 to vector<8x128xf32>
    %362 = arith.mulf %361, %358 : vector<8x128xf32>
    %363 = arith.select %360, %358, %362 : vector<8x128xi1>, vector<8x128xf32>
    %364 = arith.truncf %363 : vector<8x128xf32> to vector<8x128xbf16>
    %c5_393 = arith.constant 5 : index
    %c0_394 = arith.constant 0 : index
    %c0_395 = arith.constant 0 : index
    %365 = vector.load %arg4[%c5_393, %c0_394, %c0_395] : memref<16x128x128xbf16, #tpu.memory_space<vmem>>, vector<1x128x128xbf16>
    %366 = vector.shape_cast %365 : vector<1x128x128xbf16> to vector<128x128xbf16>
    %cst_396 = arith.constant dense<0.000000e+00> : vector<8x128xf32>
    %367 = tpu.matmul %364, %366, %cst_396 {dimension_numbers = #tpu.dot_dimension_numbers<[1], [0], [0], [1], [0, 0, 1, 1], [], []>} : vector<8x128xbf16>, vector<128x128xbf16>, vector<8x128xf32> -> vector<8x128xf32>
    %368 = arith.addf %319, %367 : vector<8x128xf32>
    %cst_397 = arith.constant 0.000000e+00 : f32
    %369 = vector.broadcast %cst_397 : f32 to vector<8x128xf32>
    %c0_398 = arith.constant 0 : index
    %c0_399 = arith.constant 0 : index
    %c0_400 = arith.constant 0 : index
    %370 = vector.load %arg2[%c0_398, %c0_399, %c0_400] : memref<9x128x128xbf16, #tpu.memory_space<vmem>>, vector<1x128x128xbf16>
    %371 = vector.shape_cast %370 : vector<1x128x128xbf16> to vector<128x128xbf16>
    %cst_401 = arith.constant dense<0.000000e+00> : vector<8x128xf32>
    %372 = tpu.matmul %17, %371, %cst_401 {dimension_numbers = #tpu.dot_dimension_numbers<[1], [0], [0], [1], [0, 0, 1, 1], [], []>} : vector<8x128xbf16>, vector<128x128xbf16>, vector<8x128xf32> -> vector<8x128xf32>
    %373 = arith.addf %369, %372 : vector<8x128xf32>
    %c1_402 = arith.constant 1 : index
    %c0_403 = arith.constant 0 : index
    %c0_404 = arith.constant 0 : index
    %374 = vector.load %arg2[%c1_402, %c0_403, %c0_404] : memref<9x128x128xbf16, #tpu.memory_space<vmem>>, vector<1x128x128xbf16>
    %375 = vector.shape_cast %374 : vector<1x128x128xbf16> to vector<128x128xbf16>
    %cst_405 = arith.constant dense<0.000000e+00> : vector<8x128xf32>
    %376 = tpu.matmul %19, %375, %cst_405 {dimension_numbers = #tpu.dot_dimension_numbers<[1], [0], [0], [1], [0, 0, 1, 1], [], []>} : vector<8x128xbf16>, vector<128x128xbf16>, vector<8x128xf32> -> vector<8x128xf32>
    %377 = arith.addf %373, %376 : vector<8x128xf32>
    %c2_406 = arith.constant 2 : index
    %c0_407 = arith.constant 0 : index
    %c0_408 = arith.constant 0 : index
    %378 = vector.load %arg2[%c2_406, %c0_407, %c0_408] : memref<9x128x128xbf16, #tpu.memory_space<vmem>>, vector<1x128x128xbf16>
    %379 = vector.shape_cast %378 : vector<1x128x128xbf16> to vector<128x128xbf16>
    %cst_409 = arith.constant dense<0.000000e+00> : vector<8x128xf32>
    %380 = tpu.matmul %21, %379, %cst_409 {dimension_numbers = #tpu.dot_dimension_numbers<[1], [0], [0], [1], [0, 0, 1, 1], [], []>} : vector<8x128xbf16>, vector<128x128xbf16>, vector<8x128xf32> -> vector<8x128xf32>
    %381 = arith.addf %377, %380 : vector<8x128xf32>
    %c3_410 = arith.constant 3 : index
    %c0_411 = arith.constant 0 : index
    %c0_412 = arith.constant 0 : index
    %382 = vector.load %arg2[%c3_410, %c0_411, %c0_412] : memref<9x128x128xbf16, #tpu.memory_space<vmem>>, vector<1x128x128xbf16>
    %383 = vector.shape_cast %382 : vector<1x128x128xbf16> to vector<128x128xbf16>
    %cst_413 = arith.constant dense<0.000000e+00> : vector<8x128xf32>
    %384 = tpu.matmul %29, %383, %cst_413 {dimension_numbers = #tpu.dot_dimension_numbers<[1], [0], [0], [1], [0, 0, 1, 1], [], []>} : vector<8x128xbf16>, vector<128x128xbf16>, vector<8x128xf32> -> vector<8x128xf32>
    %385 = arith.addf %381, %384 : vector<8x128xf32>
    %c4_414 = arith.constant 4 : index
    %c0_415 = arith.constant 0 : index
    %c0_416 = arith.constant 0 : index
    %386 = vector.load %arg2[%c4_414, %c0_415, %c0_416] : memref<9x128x128xbf16, #tpu.memory_space<vmem>>, vector<1x128x128xbf16>
    %387 = vector.shape_cast %386 : vector<1x128x128xbf16> to vector<128x128xbf16>
    %cst_417 = arith.constant dense<0.000000e+00> : vector<8x128xf32>
    %388 = tpu.matmul %31, %387, %cst_417 {dimension_numbers = #tpu.dot_dimension_numbers<[1], [0], [0], [1], [0, 0, 1, 1], [], []>} : vector<8x128xbf16>, vector<128x128xbf16>, vector<8x128xf32> -> vector<8x128xf32>
    %389 = arith.addf %385, %388 : vector<8x128xf32>
    %c5_418 = arith.constant 5 : index
    %c0_419 = arith.constant 0 : index
    %c0_420 = arith.constant 0 : index
    %390 = vector.load %arg2[%c5_418, %c0_419, %c0_420] : memref<9x128x128xbf16, #tpu.memory_space<vmem>>, vector<1x128x128xbf16>
    %391 = vector.shape_cast %390 : vector<1x128x128xbf16> to vector<128x128xbf16>
    %cst_421 = arith.constant dense<0.000000e+00> : vector<8x128xf32>
    %392 = tpu.matmul %33, %391, %cst_421 {dimension_numbers = #tpu.dot_dimension_numbers<[1], [0], [0], [1], [0, 0, 1, 1], [], []>} : vector<8x128xbf16>, vector<128x128xbf16>, vector<8x128xf32> -> vector<8x128xf32>
    %393 = arith.addf %389, %392 : vector<8x128xf32>
    %c6_422 = arith.constant 6 : index
    %c0_423 = arith.constant 0 : index
    %c0_424 = arith.constant 0 : index
    %394 = vector.load %arg2[%c6_422, %c0_423, %c0_424] : memref<9x128x128xbf16, #tpu.memory_space<vmem>>, vector<1x128x128xbf16>
    %395 = vector.shape_cast %394 : vector<1x128x128xbf16> to vector<128x128xbf16>
    %cst_425 = arith.constant dense<0.000000e+00> : vector<8x128xf32>
    %396 = tpu.matmul %41, %395, %cst_425 {dimension_numbers = #tpu.dot_dimension_numbers<[1], [0], [0], [1], [0, 0, 1, 1], [], []>} : vector<8x128xbf16>, vector<128x128xbf16>, vector<8x128xf32> -> vector<8x128xf32>
    %397 = arith.addf %393, %396 : vector<8x128xf32>
    %c7_426 = arith.constant 7 : index
    %c0_427 = arith.constant 0 : index
    %c0_428 = arith.constant 0 : index
    %398 = vector.load %arg2[%c7_426, %c0_427, %c0_428] : memref<9x128x128xbf16, #tpu.memory_space<vmem>>, vector<1x128x128xbf16>
    %399 = vector.shape_cast %398 : vector<1x128x128xbf16> to vector<128x128xbf16>
    %cst_429 = arith.constant dense<0.000000e+00> : vector<8x128xf32>
    %400 = tpu.matmul %43, %399, %cst_429 {dimension_numbers = #tpu.dot_dimension_numbers<[1], [0], [0], [1], [0, 0, 1, 1], [], []>} : vector<8x128xbf16>, vector<128x128xbf16>, vector<8x128xf32> -> vector<8x128xf32>
    %401 = arith.addf %397, %400 : vector<8x128xf32>
    %c8_430 = arith.constant 8 : index
    %c0_431 = arith.constant 0 : index
    %c0_432 = arith.constant 0 : index
    %402 = vector.load %arg2[%c8_430, %c0_431, %c0_432] : memref<9x128x128xbf16, #tpu.memory_space<vmem>>, vector<1x128x128xbf16>
    %403 = vector.shape_cast %402 : vector<1x128x128xbf16> to vector<128x128xbf16>
    %cst_433 = arith.constant dense<0.000000e+00> : vector<8x128xf32>
    %404 = tpu.matmul %45, %403, %cst_433 {dimension_numbers = #tpu.dot_dimension_numbers<[1], [0], [0], [1], [0, 0, 1, 1], [], []>} : vector<8x128xbf16>, vector<128x128xbf16>, vector<8x128xf32> -> vector<8x128xf32>
    %405 = arith.addf %401, %404 : vector<8x128xf32>
    %406 = vector.broadcast %72 : vector<1x128xf32> to vector<8x128xf32>
    %407 = arith.addf %405, %406 : vector<8x128xf32>
    %cst_434 = arith.constant 0.000000e+00 : f32
    %408 = vector.broadcast %cst_434 : f32 to vector<8x128xf32>
    %409 = arith.cmpf oge, %407, %408 : vector<8x128xf32>
    %cst_435 = arith.constant 2.000000e-01 : f32
    %410 = vector.broadcast %cst_435 : f32 to vector<8x128xf32>
    %411 = arith.mulf %410, %407 : vector<8x128xf32>
    %412 = arith.select %409, %407, %411 : vector<8x128xi1>, vector<8x128xf32>
    %413 = arith.truncf %412 : vector<8x128xf32> to vector<8x128xbf16>
    %c6_436 = arith.constant 6 : index
    %c0_437 = arith.constant 0 : index
    %c0_438 = arith.constant 0 : index
    %414 = vector.load %arg4[%c6_436, %c0_437, %c0_438] : memref<16x128x128xbf16, #tpu.memory_space<vmem>>, vector<1x128x128xbf16>
    %415 = vector.shape_cast %414 : vector<1x128x128xbf16> to vector<128x128xbf16>
    %cst_439 = arith.constant dense<0.000000e+00> : vector<8x128xf32>
    %416 = tpu.matmul %413, %415, %cst_439 {dimension_numbers = #tpu.dot_dimension_numbers<[1], [0], [0], [1], [0, 0, 1, 1], [], []>} : vector<8x128xbf16>, vector<128x128xbf16>, vector<8x128xf32> -> vector<8x128xf32>
    %417 = arith.addf %368, %416 : vector<8x128xf32>
    %cst_440 = arith.constant 0.000000e+00 : f32
    %418 = vector.broadcast %cst_440 : f32 to vector<8x128xf32>
    %c0_441 = arith.constant 0 : index
    %c0_442 = arith.constant 0 : index
    %c0_443 = arith.constant 0 : index
    %419 = vector.load %arg2[%c0_441, %c0_442, %c0_443] : memref<9x128x128xbf16, #tpu.memory_space<vmem>>, vector<1x128x128xbf16>
    %420 = vector.shape_cast %419 : vector<1x128x128xbf16> to vector<128x128xbf16>
    %cst_444 = arith.constant dense<0.000000e+00> : vector<8x128xf32>
    %421 = tpu.matmul %19, %420, %cst_444 {dimension_numbers = #tpu.dot_dimension_numbers<[1], [0], [0], [1], [0, 0, 1, 1], [], []>} : vector<8x128xbf16>, vector<128x128xbf16>, vector<8x128xf32> -> vector<8x128xf32>
    %422 = arith.addf %418, %421 : vector<8x128xf32>
    %c1_445 = arith.constant 1 : index
    %c0_446 = arith.constant 0 : index
    %c0_447 = arith.constant 0 : index
    %423 = vector.load %arg2[%c1_445, %c0_446, %c0_447] : memref<9x128x128xbf16, #tpu.memory_space<vmem>>, vector<1x128x128xbf16>
    %424 = vector.shape_cast %423 : vector<1x128x128xbf16> to vector<128x128xbf16>
    %cst_448 = arith.constant dense<0.000000e+00> : vector<8x128xf32>
    %425 = tpu.matmul %21, %424, %cst_448 {dimension_numbers = #tpu.dot_dimension_numbers<[1], [0], [0], [1], [0, 0, 1, 1], [], []>} : vector<8x128xbf16>, vector<128x128xbf16>, vector<8x128xf32> -> vector<8x128xf32>
    %426 = arith.addf %422, %425 : vector<8x128xf32>
    %c2_449 = arith.constant 2 : index
    %c0_450 = arith.constant 0 : index
    %c0_451 = arith.constant 0 : index
    %427 = vector.load %arg2[%c2_449, %c0_450, %c0_451] : memref<9x128x128xbf16, #tpu.memory_space<vmem>>, vector<1x128x128xbf16>
    %428 = vector.shape_cast %427 : vector<1x128x128xbf16> to vector<128x128xbf16>
    %cst_452 = arith.constant dense<0.000000e+00> : vector<8x128xf32>
    %429 = tpu.matmul %23, %428, %cst_452 {dimension_numbers = #tpu.dot_dimension_numbers<[1], [0], [0], [1], [0, 0, 1, 1], [], []>} : vector<8x128xbf16>, vector<128x128xbf16>, vector<8x128xf32> -> vector<8x128xf32>
    %430 = arith.addf %426, %429 : vector<8x128xf32>
    %c3_453 = arith.constant 3 : index
    %c0_454 = arith.constant 0 : index
    %c0_455 = arith.constant 0 : index
    %431 = vector.load %arg2[%c3_453, %c0_454, %c0_455] : memref<9x128x128xbf16, #tpu.memory_space<vmem>>, vector<1x128x128xbf16>
    %432 = vector.shape_cast %431 : vector<1x128x128xbf16> to vector<128x128xbf16>
    %cst_456 = arith.constant dense<0.000000e+00> : vector<8x128xf32>
    %433 = tpu.matmul %31, %432, %cst_456 {dimension_numbers = #tpu.dot_dimension_numbers<[1], [0], [0], [1], [0, 0, 1, 1], [], []>} : vector<8x128xbf16>, vector<128x128xbf16>, vector<8x128xf32> -> vector<8x128xf32>
    %434 = arith.addf %430, %433 : vector<8x128xf32>
    %c4_457 = arith.constant 4 : index
    %c0_458 = arith.constant 0 : index
    %c0_459 = arith.constant 0 : index
    %435 = vector.load %arg2[%c4_457, %c0_458, %c0_459] : memref<9x128x128xbf16, #tpu.memory_space<vmem>>, vector<1x128x128xbf16>
    %436 = vector.shape_cast %435 : vector<1x128x128xbf16> to vector<128x128xbf16>
    %cst_460 = arith.constant dense<0.000000e+00> : vector<8x128xf32>
    %437 = tpu.matmul %33, %436, %cst_460 {dimension_numbers = #tpu.dot_dimension_numbers<[1], [0], [0], [1], [0, 0, 1, 1], [], []>} : vector<8x128xbf16>, vector<128x128xbf16>, vector<8x128xf32> -> vector<8x128xf32>
    %438 = arith.addf %434, %437 : vector<8x128xf32>
    %c5_461 = arith.constant 5 : index
    %c0_462 = arith.constant 0 : index
    %c0_463 = arith.constant 0 : index
    %439 = vector.load %arg2[%c5_461, %c0_462, %c0_463] : memref<9x128x128xbf16, #tpu.memory_space<vmem>>, vector<1x128x128xbf16>
    %440 = vector.shape_cast %439 : vector<1x128x128xbf16> to vector<128x128xbf16>
    %cst_464 = arith.constant dense<0.000000e+00> : vector<8x128xf32>
    %441 = tpu.matmul %35, %440, %cst_464 {dimension_numbers = #tpu.dot_dimension_numbers<[1], [0], [0], [1], [0, 0, 1, 1], [], []>} : vector<8x128xbf16>, vector<128x128xbf16>, vector<8x128xf32> -> vector<8x128xf32>
    %442 = arith.addf %438, %441 : vector<8x128xf32>
    %c6_465 = arith.constant 6 : index
    %c0_466 = arith.constant 0 : index
    %c0_467 = arith.constant 0 : index
    %443 = vector.load %arg2[%c6_465, %c0_466, %c0_467] : memref<9x128x128xbf16, #tpu.memory_space<vmem>>, vector<1x128x128xbf16>
    %444 = vector.shape_cast %443 : vector<1x128x128xbf16> to vector<128x128xbf16>
    %cst_468 = arith.constant dense<0.000000e+00> : vector<8x128xf32>
    %445 = tpu.matmul %43, %444, %cst_468 {dimension_numbers = #tpu.dot_dimension_numbers<[1], [0], [0], [1], [0, 0, 1, 1], [], []>} : vector<8x128xbf16>, vector<128x128xbf16>, vector<8x128xf32> -> vector<8x128xf32>
    %446 = arith.addf %442, %445 : vector<8x128xf32>
    %c7_469 = arith.constant 7 : index
    %c0_470 = arith.constant 0 : index
    %c0_471 = arith.constant 0 : index
    %447 = vector.load %arg2[%c7_469, %c0_470, %c0_471] : memref<9x128x128xbf16, #tpu.memory_space<vmem>>, vector<1x128x128xbf16>
    %448 = vector.shape_cast %447 : vector<1x128x128xbf16> to vector<128x128xbf16>
    %cst_472 = arith.constant dense<0.000000e+00> : vector<8x128xf32>
    %449 = tpu.matmul %45, %448, %cst_472 {dimension_numbers = #tpu.dot_dimension_numbers<[1], [0], [0], [1], [0, 0, 1, 1], [], []>} : vector<8x128xbf16>, vector<128x128xbf16>, vector<8x128xf32> -> vector<8x128xf32>
    %450 = arith.addf %446, %449 : vector<8x128xf32>
    %c8_473 = arith.constant 8 : index
    %c0_474 = arith.constant 0 : index
    %c0_475 = arith.constant 0 : index
    %451 = vector.load %arg2[%c8_473, %c0_474, %c0_475] : memref<9x128x128xbf16, #tpu.memory_space<vmem>>, vector<1x128x128xbf16>
    %452 = vector.shape_cast %451 : vector<1x128x128xbf16> to vector<128x128xbf16>
    %cst_476 = arith.constant dense<0.000000e+00> : vector<8x128xf32>
    %453 = tpu.matmul %47, %452, %cst_476 {dimension_numbers = #tpu.dot_dimension_numbers<[1], [0], [0], [1], [0, 0, 1, 1], [], []>} : vector<8x128xbf16>, vector<128x128xbf16>, vector<8x128xf32> -> vector<8x128xf32>
    %454 = arith.addf %450, %453 : vector<8x128xf32>
    %455 = vector.broadcast %72 : vector<1x128xf32> to vector<8x128xf32>
    %456 = arith.addf %454, %455 : vector<8x128xf32>
    %cst_477 = arith.constant 0.000000e+00 : f32
    %457 = vector.broadcast %cst_477 : f32 to vector<8x128xf32>
    %458 = arith.cmpf oge, %456, %457 : vector<8x128xf32>
    %cst_478 = arith.constant 2.000000e-01 : f32
    %459 = vector.broadcast %cst_478 : f32 to vector<8x128xf32>
    %460 = arith.mulf %459, %456 : vector<8x128xf32>
    %461 = arith.select %458, %456, %460 : vector<8x128xi1>, vector<8x128xf32>
    %462 = arith.truncf %461 : vector<8x128xf32> to vector<8x128xbf16>
    %c7_479 = arith.constant 7 : index
    %c0_480 = arith.constant 0 : index
    %c0_481 = arith.constant 0 : index
    %463 = vector.load %arg4[%c7_479, %c0_480, %c0_481] : memref<16x128x128xbf16, #tpu.memory_space<vmem>>, vector<1x128x128xbf16>
    %464 = vector.shape_cast %463 : vector<1x128x128xbf16> to vector<128x128xbf16>
    %cst_482 = arith.constant dense<0.000000e+00> : vector<8x128xf32>
    %465 = tpu.matmul %462, %464, %cst_482 {dimension_numbers = #tpu.dot_dimension_numbers<[1], [0], [0], [1], [0, 0, 1, 1], [], []>} : vector<8x128xbf16>, vector<128x128xbf16>, vector<8x128xf32> -> vector<8x128xf32>
    %466 = arith.addf %417, %465 : vector<8x128xf32>
    %cst_483 = arith.constant 0.000000e+00 : f32
    %467 = vector.broadcast %cst_483 : f32 to vector<8x128xf32>
    %c0_484 = arith.constant 0 : index
    %c0_485 = arith.constant 0 : index
    %c0_486 = arith.constant 0 : index
    %468 = vector.load %arg2[%c0_484, %c0_485, %c0_486] : memref<9x128x128xbf16, #tpu.memory_space<vmem>>, vector<1x128x128xbf16>
    %469 = vector.shape_cast %468 : vector<1x128x128xbf16> to vector<128x128xbf16>
    %cst_487 = arith.constant dense<0.000000e+00> : vector<8x128xf32>
    %470 = tpu.matmul %25, %469, %cst_487 {dimension_numbers = #tpu.dot_dimension_numbers<[1], [0], [0], [1], [0, 0, 1, 1], [], []>} : vector<8x128xbf16>, vector<128x128xbf16>, vector<8x128xf32> -> vector<8x128xf32>
    %471 = arith.addf %467, %470 : vector<8x128xf32>
    %c1_488 = arith.constant 1 : index
    %c0_489 = arith.constant 0 : index
    %c0_490 = arith.constant 0 : index
    %472 = vector.load %arg2[%c1_488, %c0_489, %c0_490] : memref<9x128x128xbf16, #tpu.memory_space<vmem>>, vector<1x128x128xbf16>
    %473 = vector.shape_cast %472 : vector<1x128x128xbf16> to vector<128x128xbf16>
    %cst_491 = arith.constant dense<0.000000e+00> : vector<8x128xf32>
    %474 = tpu.matmul %27, %473, %cst_491 {dimension_numbers = #tpu.dot_dimension_numbers<[1], [0], [0], [1], [0, 0, 1, 1], [], []>} : vector<8x128xbf16>, vector<128x128xbf16>, vector<8x128xf32> -> vector<8x128xf32>
    %475 = arith.addf %471, %474 : vector<8x128xf32>
    %c2_492 = arith.constant 2 : index
    %c0_493 = arith.constant 0 : index
    %c0_494 = arith.constant 0 : index
    %476 = vector.load %arg2[%c2_492, %c0_493, %c0_494] : memref<9x128x128xbf16, #tpu.memory_space<vmem>>, vector<1x128x128xbf16>
    %477 = vector.shape_cast %476 : vector<1x128x128xbf16> to vector<128x128xbf16>
    %cst_495 = arith.constant dense<0.000000e+00> : vector<8x128xf32>
    %478 = tpu.matmul %29, %477, %cst_495 {dimension_numbers = #tpu.dot_dimension_numbers<[1], [0], [0], [1], [0, 0, 1, 1], [], []>} : vector<8x128xbf16>, vector<128x128xbf16>, vector<8x128xf32> -> vector<8x128xf32>
    %479 = arith.addf %475, %478 : vector<8x128xf32>
    %c3_496 = arith.constant 3 : index
    %c0_497 = arith.constant 0 : index
    %c0_498 = arith.constant 0 : index
    %480 = vector.load %arg2[%c3_496, %c0_497, %c0_498] : memref<9x128x128xbf16, #tpu.memory_space<vmem>>, vector<1x128x128xbf16>
    %481 = vector.shape_cast %480 : vector<1x128x128xbf16> to vector<128x128xbf16>
    %cst_499 = arith.constant dense<0.000000e+00> : vector<8x128xf32>
    %482 = tpu.matmul %37, %481, %cst_499 {dimension_numbers = #tpu.dot_dimension_numbers<[1], [0], [0], [1], [0, 0, 1, 1], [], []>} : vector<8x128xbf16>, vector<128x128xbf16>, vector<8x128xf32> -> vector<8x128xf32>
    %483 = arith.addf %479, %482 : vector<8x128xf32>
    %c4_500 = arith.constant 4 : index
    %c0_501 = arith.constant 0 : index
    %c0_502 = arith.constant 0 : index
    %484 = vector.load %arg2[%c4_500, %c0_501, %c0_502] : memref<9x128x128xbf16, #tpu.memory_space<vmem>>, vector<1x128x128xbf16>
    %485 = vector.shape_cast %484 : vector<1x128x128xbf16> to vector<128x128xbf16>
    %cst_503 = arith.constant dense<0.000000e+00> : vector<8x128xf32>
    %486 = tpu.matmul %39, %485, %cst_503 {dimension_numbers = #tpu.dot_dimension_numbers<[1], [0], [0], [1], [0, 0, 1, 1], [], []>} : vector<8x128xbf16>, vector<128x128xbf16>, vector<8x128xf32> -> vector<8x128xf32>
    %487 = arith.addf %483, %486 : vector<8x128xf32>
    %c5_504 = arith.constant 5 : index
    %c0_505 = arith.constant 0 : index
    %c0_506 = arith.constant 0 : index
    %488 = vector.load %arg2[%c5_504, %c0_505, %c0_506] : memref<9x128x128xbf16, #tpu.memory_space<vmem>>, vector<1x128x128xbf16>
    %489 = vector.shape_cast %488 : vector<1x128x128xbf16> to vector<128x128xbf16>
    %cst_507 = arith.constant dense<0.000000e+00> : vector<8x128xf32>
    %490 = tpu.matmul %41, %489, %cst_507 {dimension_numbers = #tpu.dot_dimension_numbers<[1], [0], [0], [1], [0, 0, 1, 1], [], []>} : vector<8x128xbf16>, vector<128x128xbf16>, vector<8x128xf32> -> vector<8x128xf32>
    %491 = arith.addf %487, %490 : vector<8x128xf32>
    %c6_508 = arith.constant 6 : index
    %c0_509 = arith.constant 0 : index
    %c0_510 = arith.constant 0 : index
    %492 = vector.load %arg2[%c6_508, %c0_509, %c0_510] : memref<9x128x128xbf16, #tpu.memory_space<vmem>>, vector<1x128x128xbf16>
    %493 = vector.shape_cast %492 : vector<1x128x128xbf16> to vector<128x128xbf16>
    %cst_511 = arith.constant dense<0.000000e+00> : vector<8x128xf32>
    %494 = tpu.matmul %49, %493, %cst_511 {dimension_numbers = #tpu.dot_dimension_numbers<[1], [0], [0], [1], [0, 0, 1, 1], [], []>} : vector<8x128xbf16>, vector<128x128xbf16>, vector<8x128xf32> -> vector<8x128xf32>
    %495 = arith.addf %491, %494 : vector<8x128xf32>
    %c7_512 = arith.constant 7 : index
    %c0_513 = arith.constant 0 : index
    %c0_514 = arith.constant 0 : index
    %496 = vector.load %arg2[%c7_512, %c0_513, %c0_514] : memref<9x128x128xbf16, #tpu.memory_space<vmem>>, vector<1x128x128xbf16>
    %497 = vector.shape_cast %496 : vector<1x128x128xbf16> to vector<128x128xbf16>
    %cst_515 = arith.constant dense<0.000000e+00> : vector<8x128xf32>
    %498 = tpu.matmul %51, %497, %cst_515 {dimension_numbers = #tpu.dot_dimension_numbers<[1], [0], [0], [1], [0, 0, 1, 1], [], []>} : vector<8x128xbf16>, vector<128x128xbf16>, vector<8x128xf32> -> vector<8x128xf32>
    %499 = arith.addf %495, %498 : vector<8x128xf32>
    %c8_516 = arith.constant 8 : index
    %c0_517 = arith.constant 0 : index
    %c0_518 = arith.constant 0 : index
    %500 = vector.load %arg2[%c8_516, %c0_517, %c0_518] : memref<9x128x128xbf16, #tpu.memory_space<vmem>>, vector<1x128x128xbf16>
    %501 = vector.shape_cast %500 : vector<1x128x128xbf16> to vector<128x128xbf16>
    %cst_519 = arith.constant dense<0.000000e+00> : vector<8x128xf32>
    %502 = tpu.matmul %53, %501, %cst_519 {dimension_numbers = #tpu.dot_dimension_numbers<[1], [0], [0], [1], [0, 0, 1, 1], [], []>} : vector<8x128xbf16>, vector<128x128xbf16>, vector<8x128xf32> -> vector<8x128xf32>
    %503 = arith.addf %499, %502 : vector<8x128xf32>
    %504 = vector.broadcast %72 : vector<1x128xf32> to vector<8x128xf32>
    %505 = arith.addf %503, %504 : vector<8x128xf32>
    %cst_520 = arith.constant 0.000000e+00 : f32
    %506 = vector.broadcast %cst_520 : f32 to vector<8x128xf32>
    %507 = arith.cmpf oge, %505, %506 : vector<8x128xf32>
    %cst_521 = arith.constant 2.000000e-01 : f32
    %508 = vector.broadcast %cst_521 : f32 to vector<8x128xf32>
    %509 = arith.mulf %508, %505 : vector<8x128xf32>
    %510 = arith.select %507, %505, %509 : vector<8x128xi1>, vector<8x128xf32>
    %511 = arith.truncf %510 : vector<8x128xf32> to vector<8x128xbf16>
    %c8_522 = arith.constant 8 : index
    %c0_523 = arith.constant 0 : index
    %c0_524 = arith.constant 0 : index
    %512 = vector.load %arg4[%c8_522, %c0_523, %c0_524] : memref<16x128x128xbf16, #tpu.memory_space<vmem>>, vector<1x128x128xbf16>
    %513 = vector.shape_cast %512 : vector<1x128x128xbf16> to vector<128x128xbf16>
    %cst_525 = arith.constant dense<0.000000e+00> : vector<8x128xf32>
    %514 = tpu.matmul %511, %513, %cst_525 {dimension_numbers = #tpu.dot_dimension_numbers<[1], [0], [0], [1], [0, 0, 1, 1], [], []>} : vector<8x128xbf16>, vector<128x128xbf16>, vector<8x128xf32> -> vector<8x128xf32>
    %515 = arith.addf %466, %514 : vector<8x128xf32>
    %cst_526 = arith.constant 0.000000e+00 : f32
    %516 = vector.broadcast %cst_526 : f32 to vector<8x128xf32>
    %c0_527 = arith.constant 0 : index
    %c0_528 = arith.constant 0 : index
    %c0_529 = arith.constant 0 : index
    %517 = vector.load %arg2[%c0_527, %c0_528, %c0_529] : memref<9x128x128xbf16, #tpu.memory_space<vmem>>, vector<1x128x128xbf16>
    %518 = vector.shape_cast %517 : vector<1x128x128xbf16> to vector<128x128xbf16>
    %cst_530 = arith.constant dense<0.000000e+00> : vector<8x128xf32>
    %519 = tpu.matmul %27, %518, %cst_530 {dimension_numbers = #tpu.dot_dimension_numbers<[1], [0], [0], [1], [0, 0, 1, 1], [], []>} : vector<8x128xbf16>, vector<128x128xbf16>, vector<8x128xf32> -> vector<8x128xf32>
    %520 = arith.addf %516, %519 : vector<8x128xf32>
    %c1_531 = arith.constant 1 : index
    %c0_532 = arith.constant 0 : index
    %c0_533 = arith.constant 0 : index
    %521 = vector.load %arg2[%c1_531, %c0_532, %c0_533] : memref<9x128x128xbf16, #tpu.memory_space<vmem>>, vector<1x128x128xbf16>
    %522 = vector.shape_cast %521 : vector<1x128x128xbf16> to vector<128x128xbf16>
    %cst_534 = arith.constant dense<0.000000e+00> : vector<8x128xf32>
    %523 = tpu.matmul %29, %522, %cst_534 {dimension_numbers = #tpu.dot_dimension_numbers<[1], [0], [0], [1], [0, 0, 1, 1], [], []>} : vector<8x128xbf16>, vector<128x128xbf16>, vector<8x128xf32> -> vector<8x128xf32>
    %524 = arith.addf %520, %523 : vector<8x128xf32>
    %c2_535 = arith.constant 2 : index
    %c0_536 = arith.constant 0 : index
    %c0_537 = arith.constant 0 : index
    %525 = vector.load %arg2[%c2_535, %c0_536, %c0_537] : memref<9x128x128xbf16, #tpu.memory_space<vmem>>, vector<1x128x128xbf16>
    %526 = vector.shape_cast %525 : vector<1x128x128xbf16> to vector<128x128xbf16>
    %cst_538 = arith.constant dense<0.000000e+00> : vector<8x128xf32>
    %527 = tpu.matmul %31, %526, %cst_538 {dimension_numbers = #tpu.dot_dimension_numbers<[1], [0], [0], [1], [0, 0, 1, 1], [], []>} : vector<8x128xbf16>, vector<128x128xbf16>, vector<8x128xf32> -> vector<8x128xf32>
    %528 = arith.addf %524, %527 : vector<8x128xf32>
    %c3_539 = arith.constant 3 : index
    %c0_540 = arith.constant 0 : index
    %c0_541 = arith.constant 0 : index
    %529 = vector.load %arg2[%c3_539, %c0_540, %c0_541] : memref<9x128x128xbf16, #tpu.memory_space<vmem>>, vector<1x128x128xbf16>
    %530 = vector.shape_cast %529 : vector<1x128x128xbf16> to vector<128x128xbf16>
    %cst_542 = arith.constant dense<0.000000e+00> : vector<8x128xf32>
    %531 = tpu.matmul %39, %530, %cst_542 {dimension_numbers = #tpu.dot_dimension_numbers<[1], [0], [0], [1], [0, 0, 1, 1], [], []>} : vector<8x128xbf16>, vector<128x128xbf16>, vector<8x128xf32> -> vector<8x128xf32>
    %532 = arith.addf %528, %531 : vector<8x128xf32>
    %c4_543 = arith.constant 4 : index
    %c0_544 = arith.constant 0 : index
    %c0_545 = arith.constant 0 : index
    %533 = vector.load %arg2[%c4_543, %c0_544, %c0_545] : memref<9x128x128xbf16, #tpu.memory_space<vmem>>, vector<1x128x128xbf16>
    %534 = vector.shape_cast %533 : vector<1x128x128xbf16> to vector<128x128xbf16>
    %cst_546 = arith.constant dense<0.000000e+00> : vector<8x128xf32>
    %535 = tpu.matmul %41, %534, %cst_546 {dimension_numbers = #tpu.dot_dimension_numbers<[1], [0], [0], [1], [0, 0, 1, 1], [], []>} : vector<8x128xbf16>, vector<128x128xbf16>, vector<8x128xf32> -> vector<8x128xf32>
    %536 = arith.addf %532, %535 : vector<8x128xf32>
    %c5_547 = arith.constant 5 : index
    %c0_548 = arith.constant 0 : index
    %c0_549 = arith.constant 0 : index
    %537 = vector.load %arg2[%c5_547, %c0_548, %c0_549] : memref<9x128x128xbf16, #tpu.memory_space<vmem>>, vector<1x128x128xbf16>
    %538 = vector.shape_cast %537 : vector<1x128x128xbf16> to vector<128x128xbf16>
    %cst_550 = arith.constant dense<0.000000e+00> : vector<8x128xf32>
    %539 = tpu.matmul %43, %538, %cst_550 {dimension_numbers = #tpu.dot_dimension_numbers<[1], [0], [0], [1], [0, 0, 1, 1], [], []>} : vector<8x128xbf16>, vector<128x128xbf16>, vector<8x128xf32> -> vector<8x128xf32>
    %540 = arith.addf %536, %539 : vector<8x128xf32>
    %c6_551 = arith.constant 6 : index
    %c0_552 = arith.constant 0 : index
    %c0_553 = arith.constant 0 : index
    %541 = vector.load %arg2[%c6_551, %c0_552, %c0_553] : memref<9x128x128xbf16, #tpu.memory_space<vmem>>, vector<1x128x128xbf16>
    %542 = vector.shape_cast %541 : vector<1x128x128xbf16> to vector<128x128xbf16>
    %cst_554 = arith.constant dense<0.000000e+00> : vector<8x128xf32>
    %543 = tpu.matmul %51, %542, %cst_554 {dimension_numbers = #tpu.dot_dimension_numbers<[1], [0], [0], [1], [0, 0, 1, 1], [], []>} : vector<8x128xbf16>, vector<128x128xbf16>, vector<8x128xf32> -> vector<8x128xf32>
    %544 = arith.addf %540, %543 : vector<8x128xf32>
    %c7_555 = arith.constant 7 : index
    %c0_556 = arith.constant 0 : index
    %c0_557 = arith.constant 0 : index
    %545 = vector.load %arg2[%c7_555, %c0_556, %c0_557] : memref<9x128x128xbf16, #tpu.memory_space<vmem>>, vector<1x128x128xbf16>
    %546 = vector.shape_cast %545 : vector<1x128x128xbf16> to vector<128x128xbf16>
    %cst_558 = arith.constant dense<0.000000e+00> : vector<8x128xf32>
    %547 = tpu.matmul %53, %546, %cst_558 {dimension_numbers = #tpu.dot_dimension_numbers<[1], [0], [0], [1], [0, 0, 1, 1], [], []>} : vector<8x128xbf16>, vector<128x128xbf16>, vector<8x128xf32> -> vector<8x128xf32>
    %548 = arith.addf %544, %547 : vector<8x128xf32>
    %c8_559 = arith.constant 8 : index
    %c0_560 = arith.constant 0 : index
    %c0_561 = arith.constant 0 : index
    %549 = vector.load %arg2[%c8_559, %c0_560, %c0_561] : memref<9x128x128xbf16, #tpu.memory_space<vmem>>, vector<1x128x128xbf16>
    %550 = vector.shape_cast %549 : vector<1x128x128xbf16> to vector<128x128xbf16>
    %cst_562 = arith.constant dense<0.000000e+00> : vector<8x128xf32>
    %551 = tpu.matmul %55, %550, %cst_562 {dimension_numbers = #tpu.dot_dimension_numbers<[1], [0], [0], [1], [0, 0, 1, 1], [], []>} : vector<8x128xbf16>, vector<128x128xbf16>, vector<8x128xf32> -> vector<8x128xf32>
    %552 = arith.addf %548, %551 : vector<8x128xf32>
    %553 = vector.broadcast %72 : vector<1x128xf32> to vector<8x128xf32>
    %554 = arith.addf %552, %553 : vector<8x128xf32>
    %cst_563 = arith.constant 0.000000e+00 : f32
    %555 = vector.broadcast %cst_563 : f32 to vector<8x128xf32>
    %556 = arith.cmpf oge, %554, %555 : vector<8x128xf32>
    %cst_564 = arith.constant 2.000000e-01 : f32
    %557 = vector.broadcast %cst_564 : f32 to vector<8x128xf32>
    %558 = arith.mulf %557, %554 : vector<8x128xf32>
    %559 = arith.select %556, %554, %558 : vector<8x128xi1>, vector<8x128xf32>
    %560 = arith.truncf %559 : vector<8x128xf32> to vector<8x128xbf16>
    %c9 = arith.constant 9 : index
    %c0_565 = arith.constant 0 : index
    %c0_566 = arith.constant 0 : index
    %561 = vector.load %arg4[%c9, %c0_565, %c0_566] : memref<16x128x128xbf16, #tpu.memory_space<vmem>>, vector<1x128x128xbf16>
    %562 = vector.shape_cast %561 : vector<1x128x128xbf16> to vector<128x128xbf16>
    %cst_567 = arith.constant dense<0.000000e+00> : vector<8x128xf32>
    %563 = tpu.matmul %560, %562, %cst_567 {dimension_numbers = #tpu.dot_dimension_numbers<[1], [0], [0], [1], [0, 0, 1, 1], [], []>} : vector<8x128xbf16>, vector<128x128xbf16>, vector<8x128xf32> -> vector<8x128xf32>
    %564 = arith.addf %515, %563 : vector<8x128xf32>
    %cst_568 = arith.constant 0.000000e+00 : f32
    %565 = vector.broadcast %cst_568 : f32 to vector<8x128xf32>
    %c0_569 = arith.constant 0 : index
    %c0_570 = arith.constant 0 : index
    %c0_571 = arith.constant 0 : index
    %566 = vector.load %arg2[%c0_569, %c0_570, %c0_571] : memref<9x128x128xbf16, #tpu.memory_space<vmem>>, vector<1x128x128xbf16>
    %567 = vector.shape_cast %566 : vector<1x128x128xbf16> to vector<128x128xbf16>
    %cst_572 = arith.constant dense<0.000000e+00> : vector<8x128xf32>
    %568 = tpu.matmul %29, %567, %cst_572 {dimension_numbers = #tpu.dot_dimension_numbers<[1], [0], [0], [1], [0, 0, 1, 1], [], []>} : vector<8x128xbf16>, vector<128x128xbf16>, vector<8x128xf32> -> vector<8x128xf32>
    %569 = arith.addf %565, %568 : vector<8x128xf32>
    %c1_573 = arith.constant 1 : index
    %c0_574 = arith.constant 0 : index
    %c0_575 = arith.constant 0 : index
    %570 = vector.load %arg2[%c1_573, %c0_574, %c0_575] : memref<9x128x128xbf16, #tpu.memory_space<vmem>>, vector<1x128x128xbf16>
    %571 = vector.shape_cast %570 : vector<1x128x128xbf16> to vector<128x128xbf16>
    %cst_576 = arith.constant dense<0.000000e+00> : vector<8x128xf32>
    %572 = tpu.matmul %31, %571, %cst_576 {dimension_numbers = #tpu.dot_dimension_numbers<[1], [0], [0], [1], [0, 0, 1, 1], [], []>} : vector<8x128xbf16>, vector<128x128xbf16>, vector<8x128xf32> -> vector<8x128xf32>
    %573 = arith.addf %569, %572 : vector<8x128xf32>
    %c2_577 = arith.constant 2 : index
    %c0_578 = arith.constant 0 : index
    %c0_579 = arith.constant 0 : index
    %574 = vector.load %arg2[%c2_577, %c0_578, %c0_579] : memref<9x128x128xbf16, #tpu.memory_space<vmem>>, vector<1x128x128xbf16>
    %575 = vector.shape_cast %574 : vector<1x128x128xbf16> to vector<128x128xbf16>
    %cst_580 = arith.constant dense<0.000000e+00> : vector<8x128xf32>
    %576 = tpu.matmul %33, %575, %cst_580 {dimension_numbers = #tpu.dot_dimension_numbers<[1], [0], [0], [1], [0, 0, 1, 1], [], []>} : vector<8x128xbf16>, vector<128x128xbf16>, vector<8x128xf32> -> vector<8x128xf32>
    %577 = arith.addf %573, %576 : vector<8x128xf32>
    %c3_581 = arith.constant 3 : index
    %c0_582 = arith.constant 0 : index
    %c0_583 = arith.constant 0 : index
    %578 = vector.load %arg2[%c3_581, %c0_582, %c0_583] : memref<9x128x128xbf16, #tpu.memory_space<vmem>>, vector<1x128x128xbf16>
    %579 = vector.shape_cast %578 : vector<1x128x128xbf16> to vector<128x128xbf16>
    %cst_584 = arith.constant dense<0.000000e+00> : vector<8x128xf32>
    %580 = tpu.matmul %41, %579, %cst_584 {dimension_numbers = #tpu.dot_dimension_numbers<[1], [0], [0], [1], [0, 0, 1, 1], [], []>} : vector<8x128xbf16>, vector<128x128xbf16>, vector<8x128xf32> -> vector<8x128xf32>
    %581 = arith.addf %577, %580 : vector<8x128xf32>
    %c4_585 = arith.constant 4 : index
    %c0_586 = arith.constant 0 : index
    %c0_587 = arith.constant 0 : index
    %582 = vector.load %arg2[%c4_585, %c0_586, %c0_587] : memref<9x128x128xbf16, #tpu.memory_space<vmem>>, vector<1x128x128xbf16>
    %583 = vector.shape_cast %582 : vector<1x128x128xbf16> to vector<128x128xbf16>
    %cst_588 = arith.constant dense<0.000000e+00> : vector<8x128xf32>
    %584 = tpu.matmul %43, %583, %cst_588 {dimension_numbers = #tpu.dot_dimension_numbers<[1], [0], [0], [1], [0, 0, 1, 1], [], []>} : vector<8x128xbf16>, vector<128x128xbf16>, vector<8x128xf32> -> vector<8x128xf32>
    %585 = arith.addf %581, %584 : vector<8x128xf32>
    %c5_589 = arith.constant 5 : index
    %c0_590 = arith.constant 0 : index
    %c0_591 = arith.constant 0 : index
    %586 = vector.load %arg2[%c5_589, %c0_590, %c0_591] : memref<9x128x128xbf16, #tpu.memory_space<vmem>>, vector<1x128x128xbf16>
    %587 = vector.shape_cast %586 : vector<1x128x128xbf16> to vector<128x128xbf16>
    %cst_592 = arith.constant dense<0.000000e+00> : vector<8x128xf32>
    %588 = tpu.matmul %45, %587, %cst_592 {dimension_numbers = #tpu.dot_dimension_numbers<[1], [0], [0], [1], [0, 0, 1, 1], [], []>} : vector<8x128xbf16>, vector<128x128xbf16>, vector<8x128xf32> -> vector<8x128xf32>
    %589 = arith.addf %585, %588 : vector<8x128xf32>
    %c6_593 = arith.constant 6 : index
    %c0_594 = arith.constant 0 : index
    %c0_595 = arith.constant 0 : index
    %590 = vector.load %arg2[%c6_593, %c0_594, %c0_595] : memref<9x128x128xbf16, #tpu.memory_space<vmem>>, vector<1x128x128xbf16>
    %591 = vector.shape_cast %590 : vector<1x128x128xbf16> to vector<128x128xbf16>
    %cst_596 = arith.constant dense<0.000000e+00> : vector<8x128xf32>
    %592 = tpu.matmul %53, %591, %cst_596 {dimension_numbers = #tpu.dot_dimension_numbers<[1], [0], [0], [1], [0, 0, 1, 1], [], []>} : vector<8x128xbf16>, vector<128x128xbf16>, vector<8x128xf32> -> vector<8x128xf32>
    %593 = arith.addf %589, %592 : vector<8x128xf32>
    %c7_597 = arith.constant 7 : index
    %c0_598 = arith.constant 0 : index
    %c0_599 = arith.constant 0 : index
    %594 = vector.load %arg2[%c7_597, %c0_598, %c0_599] : memref<9x128x128xbf16, #tpu.memory_space<vmem>>, vector<1x128x128xbf16>
    %595 = vector.shape_cast %594 : vector<1x128x128xbf16> to vector<128x128xbf16>
    %cst_600 = arith.constant dense<0.000000e+00> : vector<8x128xf32>
    %596 = tpu.matmul %55, %595, %cst_600 {dimension_numbers = #tpu.dot_dimension_numbers<[1], [0], [0], [1], [0, 0, 1, 1], [], []>} : vector<8x128xbf16>, vector<128x128xbf16>, vector<8x128xf32> -> vector<8x128xf32>
    %597 = arith.addf %593, %596 : vector<8x128xf32>
    %c8_601 = arith.constant 8 : index
    %c0_602 = arith.constant 0 : index
    %c0_603 = arith.constant 0 : index
    %598 = vector.load %arg2[%c8_601, %c0_602, %c0_603] : memref<9x128x128xbf16, #tpu.memory_space<vmem>>, vector<1x128x128xbf16>
    %599 = vector.shape_cast %598 : vector<1x128x128xbf16> to vector<128x128xbf16>
    %cst_604 = arith.constant dense<0.000000e+00> : vector<8x128xf32>
    %600 = tpu.matmul %57, %599, %cst_604 {dimension_numbers = #tpu.dot_dimension_numbers<[1], [0], [0], [1], [0, 0, 1, 1], [], []>} : vector<8x128xbf16>, vector<128x128xbf16>, vector<8x128xf32> -> vector<8x128xf32>
    %601 = arith.addf %597, %600 : vector<8x128xf32>
    %602 = vector.broadcast %72 : vector<1x128xf32> to vector<8x128xf32>
    %603 = arith.addf %601, %602 : vector<8x128xf32>
    %cst_605 = arith.constant 0.000000e+00 : f32
    %604 = vector.broadcast %cst_605 : f32 to vector<8x128xf32>
    %605 = arith.cmpf oge, %603, %604 : vector<8x128xf32>
    %cst_606 = arith.constant 2.000000e-01 : f32
    %606 = vector.broadcast %cst_606 : f32 to vector<8x128xf32>
    %607 = arith.mulf %606, %603 : vector<8x128xf32>
    %608 = arith.select %605, %603, %607 : vector<8x128xi1>, vector<8x128xf32>
    %609 = arith.truncf %608 : vector<8x128xf32> to vector<8x128xbf16>
    %c10 = arith.constant 10 : index
    %c0_607 = arith.constant 0 : index
    %c0_608 = arith.constant 0 : index
    %610 = vector.load %arg4[%c10, %c0_607, %c0_608] : memref<16x128x128xbf16, #tpu.memory_space<vmem>>, vector<1x128x128xbf16>
    %611 = vector.shape_cast %610 : vector<1x128x128xbf16> to vector<128x128xbf16>
    %cst_609 = arith.constant dense<0.000000e+00> : vector<8x128xf32>
    %612 = tpu.matmul %609, %611, %cst_609 {dimension_numbers = #tpu.dot_dimension_numbers<[1], [0], [0], [1], [0, 0, 1, 1], [], []>} : vector<8x128xbf16>, vector<128x128xbf16>, vector<8x128xf32> -> vector<8x128xf32>
    %613 = arith.addf %564, %612 : vector<8x128xf32>
    %cst_610 = arith.constant 0.000000e+00 : f32
    %614 = vector.broadcast %cst_610 : f32 to vector<8x128xf32>
    %c0_611 = arith.constant 0 : index
    %c0_612 = arith.constant 0 : index
    %c0_613 = arith.constant 0 : index
    %615 = vector.load %arg2[%c0_611, %c0_612, %c0_613] : memref<9x128x128xbf16, #tpu.memory_space<vmem>>, vector<1x128x128xbf16>
    %616 = vector.shape_cast %615 : vector<1x128x128xbf16> to vector<128x128xbf16>
    %cst_614 = arith.constant dense<0.000000e+00> : vector<8x128xf32>
    %617 = tpu.matmul %31, %616, %cst_614 {dimension_numbers = #tpu.dot_dimension_numbers<[1], [0], [0], [1], [0, 0, 1, 1], [], []>} : vector<8x128xbf16>, vector<128x128xbf16>, vector<8x128xf32> -> vector<8x128xf32>
    %618 = arith.addf %614, %617 : vector<8x128xf32>
    %c1_615 = arith.constant 1 : index
    %c0_616 = arith.constant 0 : index
    %c0_617 = arith.constant 0 : index
    %619 = vector.load %arg2[%c1_615, %c0_616, %c0_617] : memref<9x128x128xbf16, #tpu.memory_space<vmem>>, vector<1x128x128xbf16>
    %620 = vector.shape_cast %619 : vector<1x128x128xbf16> to vector<128x128xbf16>
    %cst_618 = arith.constant dense<0.000000e+00> : vector<8x128xf32>
    %621 = tpu.matmul %33, %620, %cst_618 {dimension_numbers = #tpu.dot_dimension_numbers<[1], [0], [0], [1], [0, 0, 1, 1], [], []>} : vector<8x128xbf16>, vector<128x128xbf16>, vector<8x128xf32> -> vector<8x128xf32>
    %622 = arith.addf %618, %621 : vector<8x128xf32>
    %c2_619 = arith.constant 2 : index
    %c0_620 = arith.constant 0 : index
    %c0_621 = arith.constant 0 : index
    %623 = vector.load %arg2[%c2_619, %c0_620, %c0_621] : memref<9x128x128xbf16, #tpu.memory_space<vmem>>, vector<1x128x128xbf16>
    %624 = vector.shape_cast %623 : vector<1x128x128xbf16> to vector<128x128xbf16>
    %cst_622 = arith.constant dense<0.000000e+00> : vector<8x128xf32>
    %625 = tpu.matmul %35, %624, %cst_622 {dimension_numbers = #tpu.dot_dimension_numbers<[1], [0], [0], [1], [0, 0, 1, 1], [], []>} : vector<8x128xbf16>, vector<128x128xbf16>, vector<8x128xf32> -> vector<8x128xf32>
    %626 = arith.addf %622, %625 : vector<8x128xf32>
    %c3_623 = arith.constant 3 : index
    %c0_624 = arith.constant 0 : index
    %c0_625 = arith.constant 0 : index
    %627 = vector.load %arg2[%c3_623, %c0_624, %c0_625] : memref<9x128x128xbf16, #tpu.memory_space<vmem>>, vector<1x128x128xbf16>
    %628 = vector.shape_cast %627 : vector<1x128x128xbf16> to vector<128x128xbf16>
    %cst_626 = arith.constant dense<0.000000e+00> : vector<8x128xf32>
    %629 = tpu.matmul %43, %628, %cst_626 {dimension_numbers = #tpu.dot_dimension_numbers<[1], [0], [0], [1], [0, 0, 1, 1], [], []>} : vector<8x128xbf16>, vector<128x128xbf16>, vector<8x128xf32> -> vector<8x128xf32>
    %630 = arith.addf %626, %629 : vector<8x128xf32>
    %c4_627 = arith.constant 4 : index
    %c0_628 = arith.constant 0 : index
    %c0_629 = arith.constant 0 : index
    %631 = vector.load %arg2[%c4_627, %c0_628, %c0_629] : memref<9x128x128xbf16, #tpu.memory_space<vmem>>, vector<1x128x128xbf16>
    %632 = vector.shape_cast %631 : vector<1x128x128xbf16> to vector<128x128xbf16>
    %cst_630 = arith.constant dense<0.000000e+00> : vector<8x128xf32>
    %633 = tpu.matmul %45, %632, %cst_630 {dimension_numbers = #tpu.dot_dimension_numbers<[1], [0], [0], [1], [0, 0, 1, 1], [], []>} : vector<8x128xbf16>, vector<128x128xbf16>, vector<8x128xf32> -> vector<8x128xf32>
    %634 = arith.addf %630, %633 : vector<8x128xf32>
    %c5_631 = arith.constant 5 : index
    %c0_632 = arith.constant 0 : index
    %c0_633 = arith.constant 0 : index
    %635 = vector.load %arg2[%c5_631, %c0_632, %c0_633] : memref<9x128x128xbf16, #tpu.memory_space<vmem>>, vector<1x128x128xbf16>
    %636 = vector.shape_cast %635 : vector<1x128x128xbf16> to vector<128x128xbf16>
    %cst_634 = arith.constant dense<0.000000e+00> : vector<8x128xf32>
    %637 = tpu.matmul %47, %636, %cst_634 {dimension_numbers = #tpu.dot_dimension_numbers<[1], [0], [0], [1], [0, 0, 1, 1], [], []>} : vector<8x128xbf16>, vector<128x128xbf16>, vector<8x128xf32> -> vector<8x128xf32>
    %638 = arith.addf %634, %637 : vector<8x128xf32>
    %c6_635 = arith.constant 6 : index
    %c0_636 = arith.constant 0 : index
    %c0_637 = arith.constant 0 : index
    %639 = vector.load %arg2[%c6_635, %c0_636, %c0_637] : memref<9x128x128xbf16, #tpu.memory_space<vmem>>, vector<1x128x128xbf16>
    %640 = vector.shape_cast %639 : vector<1x128x128xbf16> to vector<128x128xbf16>
    %cst_638 = arith.constant dense<0.000000e+00> : vector<8x128xf32>
    %641 = tpu.matmul %55, %640, %cst_638 {dimension_numbers = #tpu.dot_dimension_numbers<[1], [0], [0], [1], [0, 0, 1, 1], [], []>} : vector<8x128xbf16>, vector<128x128xbf16>, vector<8x128xf32> -> vector<8x128xf32>
    %642 = arith.addf %638, %641 : vector<8x128xf32>
    %c7_639 = arith.constant 7 : index
    %c0_640 = arith.constant 0 : index
    %c0_641 = arith.constant 0 : index
    %643 = vector.load %arg2[%c7_639, %c0_640, %c0_641] : memref<9x128x128xbf16, #tpu.memory_space<vmem>>, vector<1x128x128xbf16>
    %644 = vector.shape_cast %643 : vector<1x128x128xbf16> to vector<128x128xbf16>
    %cst_642 = arith.constant dense<0.000000e+00> : vector<8x128xf32>
    %645 = tpu.matmul %57, %644, %cst_642 {dimension_numbers = #tpu.dot_dimension_numbers<[1], [0], [0], [1], [0, 0, 1, 1], [], []>} : vector<8x128xbf16>, vector<128x128xbf16>, vector<8x128xf32> -> vector<8x128xf32>
    %646 = arith.addf %642, %645 : vector<8x128xf32>
    %c8_643 = arith.constant 8 : index
    %c0_644 = arith.constant 0 : index
    %c0_645 = arith.constant 0 : index
    %647 = vector.load %arg2[%c8_643, %c0_644, %c0_645] : memref<9x128x128xbf16, #tpu.memory_space<vmem>>, vector<1x128x128xbf16>
    %648 = vector.shape_cast %647 : vector<1x128x128xbf16> to vector<128x128xbf16>
    %cst_646 = arith.constant dense<0.000000e+00> : vector<8x128xf32>
    %649 = tpu.matmul %59, %648, %cst_646 {dimension_numbers = #tpu.dot_dimension_numbers<[1], [0], [0], [1], [0, 0, 1, 1], [], []>} : vector<8x128xbf16>, vector<128x128xbf16>, vector<8x128xf32> -> vector<8x128xf32>
    %650 = arith.addf %646, %649 : vector<8x128xf32>
    %651 = vector.broadcast %72 : vector<1x128xf32> to vector<8x128xf32>
    %652 = arith.addf %650, %651 : vector<8x128xf32>
    %cst_647 = arith.constant 0.000000e+00 : f32
    %653 = vector.broadcast %cst_647 : f32 to vector<8x128xf32>
    %654 = arith.cmpf oge, %652, %653 : vector<8x128xf32>
    %cst_648 = arith.constant 2.000000e-01 : f32
    %655 = vector.broadcast %cst_648 : f32 to vector<8x128xf32>
    %656 = arith.mulf %655, %652 : vector<8x128xf32>
    %657 = arith.select %654, %652, %656 : vector<8x128xi1>, vector<8x128xf32>
    %658 = arith.truncf %657 : vector<8x128xf32> to vector<8x128xbf16>
    %c11 = arith.constant 11 : index
    %c0_649 = arith.constant 0 : index
    %c0_650 = arith.constant 0 : index
    %659 = vector.load %arg4[%c11, %c0_649, %c0_650] : memref<16x128x128xbf16, #tpu.memory_space<vmem>>, vector<1x128x128xbf16>
    %660 = vector.shape_cast %659 : vector<1x128x128xbf16> to vector<128x128xbf16>
    %cst_651 = arith.constant dense<0.000000e+00> : vector<8x128xf32>
    %661 = tpu.matmul %658, %660, %cst_651 {dimension_numbers = #tpu.dot_dimension_numbers<[1], [0], [0], [1], [0, 0, 1, 1], [], []>} : vector<8x128xbf16>, vector<128x128xbf16>, vector<8x128xf32> -> vector<8x128xf32>
    %662 = arith.addf %613, %661 : vector<8x128xf32>
    %cst_652 = arith.constant 0.000000e+00 : f32
    %663 = vector.broadcast %cst_652 : f32 to vector<8x128xf32>
    %c0_653 = arith.constant 0 : index
    %c0_654 = arith.constant 0 : index
    %c0_655 = arith.constant 0 : index
    %664 = vector.load %arg2[%c0_653, %c0_654, %c0_655] : memref<9x128x128xbf16, #tpu.memory_space<vmem>>, vector<1x128x128xbf16>
    %665 = vector.shape_cast %664 : vector<1x128x128xbf16> to vector<128x128xbf16>
    %cst_656 = arith.constant dense<0.000000e+00> : vector<8x128xf32>
    %666 = tpu.matmul %37, %665, %cst_656 {dimension_numbers = #tpu.dot_dimension_numbers<[1], [0], [0], [1], [0, 0, 1, 1], [], []>} : vector<8x128xbf16>, vector<128x128xbf16>, vector<8x128xf32> -> vector<8x128xf32>
    %667 = arith.addf %663, %666 : vector<8x128xf32>
    %c1_657 = arith.constant 1 : index
    %c0_658 = arith.constant 0 : index
    %c0_659 = arith.constant 0 : index
    %668 = vector.load %arg2[%c1_657, %c0_658, %c0_659] : memref<9x128x128xbf16, #tpu.memory_space<vmem>>, vector<1x128x128xbf16>
    %669 = vector.shape_cast %668 : vector<1x128x128xbf16> to vector<128x128xbf16>
    %cst_660 = arith.constant dense<0.000000e+00> : vector<8x128xf32>
    %670 = tpu.matmul %39, %669, %cst_660 {dimension_numbers = #tpu.dot_dimension_numbers<[1], [0], [0], [1], [0, 0, 1, 1], [], []>} : vector<8x128xbf16>, vector<128x128xbf16>, vector<8x128xf32> -> vector<8x128xf32>
    %671 = arith.addf %667, %670 : vector<8x128xf32>
    %c2_661 = arith.constant 2 : index
    %c0_662 = arith.constant 0 : index
    %c0_663 = arith.constant 0 : index
    %672 = vector.load %arg2[%c2_661, %c0_662, %c0_663] : memref<9x128x128xbf16, #tpu.memory_space<vmem>>, vector<1x128x128xbf16>
    %673 = vector.shape_cast %672 : vector<1x128x128xbf16> to vector<128x128xbf16>
    %cst_664 = arith.constant dense<0.000000e+00> : vector<8x128xf32>
    %674 = tpu.matmul %41, %673, %cst_664 {dimension_numbers = #tpu.dot_dimension_numbers<[1], [0], [0], [1], [0, 0, 1, 1], [], []>} : vector<8x128xbf16>, vector<128x128xbf16>, vector<8x128xf32> -> vector<8x128xf32>
    %675 = arith.addf %671, %674 : vector<8x128xf32>
    %c3_665 = arith.constant 3 : index
    %c0_666 = arith.constant 0 : index
    %c0_667 = arith.constant 0 : index
    %676 = vector.load %arg2[%c3_665, %c0_666, %c0_667] : memref<9x128x128xbf16, #tpu.memory_space<vmem>>, vector<1x128x128xbf16>
    %677 = vector.shape_cast %676 : vector<1x128x128xbf16> to vector<128x128xbf16>
    %cst_668 = arith.constant dense<0.000000e+00> : vector<8x128xf32>
    %678 = tpu.matmul %49, %677, %cst_668 {dimension_numbers = #tpu.dot_dimension_numbers<[1], [0], [0], [1], [0, 0, 1, 1], [], []>} : vector<8x128xbf16>, vector<128x128xbf16>, vector<8x128xf32> -> vector<8x128xf32>
    %679 = arith.addf %675, %678 : vector<8x128xf32>
    %c4_669 = arith.constant 4 : index
    %c0_670 = arith.constant 0 : index
    %c0_671 = arith.constant 0 : index
    %680 = vector.load %arg2[%c4_669, %c0_670, %c0_671] : memref<9x128x128xbf16, #tpu.memory_space<vmem>>, vector<1x128x128xbf16>
    %681 = vector.shape_cast %680 : vector<1x128x128xbf16> to vector<128x128xbf16>
    %cst_672 = arith.constant dense<0.000000e+00> : vector<8x128xf32>
    %682 = tpu.matmul %51, %681, %cst_672 {dimension_numbers = #tpu.dot_dimension_numbers<[1], [0], [0], [1], [0, 0, 1, 1], [], []>} : vector<8x128xbf16>, vector<128x128xbf16>, vector<8x128xf32> -> vector<8x128xf32>
    %683 = arith.addf %679, %682 : vector<8x128xf32>
    %c5_673 = arith.constant 5 : index
    %c0_674 = arith.constant 0 : index
    %c0_675 = arith.constant 0 : index
    %684 = vector.load %arg2[%c5_673, %c0_674, %c0_675] : memref<9x128x128xbf16, #tpu.memory_space<vmem>>, vector<1x128x128xbf16>
    %685 = vector.shape_cast %684 : vector<1x128x128xbf16> to vector<128x128xbf16>
    %cst_676 = arith.constant dense<0.000000e+00> : vector<8x128xf32>
    %686 = tpu.matmul %53, %685, %cst_676 {dimension_numbers = #tpu.dot_dimension_numbers<[1], [0], [0], [1], [0, 0, 1, 1], [], []>} : vector<8x128xbf16>, vector<128x128xbf16>, vector<8x128xf32> -> vector<8x128xf32>
    %687 = arith.addf %683, %686 : vector<8x128xf32>
    %c6_677 = arith.constant 6 : index
    %c0_678 = arith.constant 0 : index
    %c0_679 = arith.constant 0 : index
    %688 = vector.load %arg2[%c6_677, %c0_678, %c0_679] : memref<9x128x128xbf16, #tpu.memory_space<vmem>>, vector<1x128x128xbf16>
    %689 = vector.shape_cast %688 : vector<1x128x128xbf16> to vector<128x128xbf16>
    %cst_680 = arith.constant dense<0.000000e+00> : vector<8x128xf32>
    %690 = tpu.matmul %61, %689, %cst_680 {dimension_numbers = #tpu.dot_dimension_numbers<[1], [0], [0], [1], [0, 0, 1, 1], [], []>} : vector<8x128xbf16>, vector<128x128xbf16>, vector<8x128xf32> -> vector<8x128xf32>
    %691 = arith.addf %687, %690 : vector<8x128xf32>
    %c7_681 = arith.constant 7 : index
    %c0_682 = arith.constant 0 : index
    %c0_683 = arith.constant 0 : index
    %692 = vector.load %arg2[%c7_681, %c0_682, %c0_683] : memref<9x128x128xbf16, #tpu.memory_space<vmem>>, vector<1x128x128xbf16>
    %693 = vector.shape_cast %692 : vector<1x128x128xbf16> to vector<128x128xbf16>
    %cst_684 = arith.constant dense<0.000000e+00> : vector<8x128xf32>
    %694 = tpu.matmul %63, %693, %cst_684 {dimension_numbers = #tpu.dot_dimension_numbers<[1], [0], [0], [1], [0, 0, 1, 1], [], []>} : vector<8x128xbf16>, vector<128x128xbf16>, vector<8x128xf32> -> vector<8x128xf32>
    %695 = arith.addf %691, %694 : vector<8x128xf32>
    %c8_685 = arith.constant 8 : index
    %c0_686 = arith.constant 0 : index
    %c0_687 = arith.constant 0 : index
    %696 = vector.load %arg2[%c8_685, %c0_686, %c0_687] : memref<9x128x128xbf16, #tpu.memory_space<vmem>>, vector<1x128x128xbf16>
    %697 = vector.shape_cast %696 : vector<1x128x128xbf16> to vector<128x128xbf16>
    %cst_688 = arith.constant dense<0.000000e+00> : vector<8x128xf32>
    %698 = tpu.matmul %65, %697, %cst_688 {dimension_numbers = #tpu.dot_dimension_numbers<[1], [0], [0], [1], [0, 0, 1, 1], [], []>} : vector<8x128xbf16>, vector<128x128xbf16>, vector<8x128xf32> -> vector<8x128xf32>
    %699 = arith.addf %695, %698 : vector<8x128xf32>
    %700 = vector.broadcast %72 : vector<1x128xf32> to vector<8x128xf32>
    %701 = arith.addf %699, %700 : vector<8x128xf32>
    %cst_689 = arith.constant 0.000000e+00 : f32
    %702 = vector.broadcast %cst_689 : f32 to vector<8x128xf32>
    %703 = arith.cmpf oge, %701, %702 : vector<8x128xf32>
    %cst_690 = arith.constant 2.000000e-01 : f32
    %704 = vector.broadcast %cst_690 : f32 to vector<8x128xf32>
    %705 = arith.mulf %704, %701 : vector<8x128xf32>
    %706 = arith.select %703, %701, %705 : vector<8x128xi1>, vector<8x128xf32>
    %707 = arith.truncf %706 : vector<8x128xf32> to vector<8x128xbf16>
    %c12 = arith.constant 12 : index
    %c0_691 = arith.constant 0 : index
    %c0_692 = arith.constant 0 : index
    %708 = vector.load %arg4[%c12, %c0_691, %c0_692] : memref<16x128x128xbf16, #tpu.memory_space<vmem>>, vector<1x128x128xbf16>
    %709 = vector.shape_cast %708 : vector<1x128x128xbf16> to vector<128x128xbf16>
    %cst_693 = arith.constant dense<0.000000e+00> : vector<8x128xf32>
    %710 = tpu.matmul %707, %709, %cst_693 {dimension_numbers = #tpu.dot_dimension_numbers<[1], [0], [0], [1], [0, 0, 1, 1], [], []>} : vector<8x128xbf16>, vector<128x128xbf16>, vector<8x128xf32> -> vector<8x128xf32>
    %711 = arith.addf %662, %710 : vector<8x128xf32>
    %cst_694 = arith.constant 0.000000e+00 : f32
    %712 = vector.broadcast %cst_694 : f32 to vector<8x128xf32>
    %c0_695 = arith.constant 0 : index
    %c0_696 = arith.constant 0 : index
    %c0_697 = arith.constant 0 : index
    %713 = vector.load %arg2[%c0_695, %c0_696, %c0_697] : memref<9x128x128xbf16, #tpu.memory_space<vmem>>, vector<1x128x128xbf16>
    %714 = vector.shape_cast %713 : vector<1x128x128xbf16> to vector<128x128xbf16>
    %cst_698 = arith.constant dense<0.000000e+00> : vector<8x128xf32>
    %715 = tpu.matmul %39, %714, %cst_698 {dimension_numbers = #tpu.dot_dimension_numbers<[1], [0], [0], [1], [0, 0, 1, 1], [], []>} : vector<8x128xbf16>, vector<128x128xbf16>, vector<8x128xf32> -> vector<8x128xf32>
    %716 = arith.addf %712, %715 : vector<8x128xf32>
    %c1_699 = arith.constant 1 : index
    %c0_700 = arith.constant 0 : index
    %c0_701 = arith.constant 0 : index
    %717 = vector.load %arg2[%c1_699, %c0_700, %c0_701] : memref<9x128x128xbf16, #tpu.memory_space<vmem>>, vector<1x128x128xbf16>
    %718 = vector.shape_cast %717 : vector<1x128x128xbf16> to vector<128x128xbf16>
    %cst_702 = arith.constant dense<0.000000e+00> : vector<8x128xf32>
    %719 = tpu.matmul %41, %718, %cst_702 {dimension_numbers = #tpu.dot_dimension_numbers<[1], [0], [0], [1], [0, 0, 1, 1], [], []>} : vector<8x128xbf16>, vector<128x128xbf16>, vector<8x128xf32> -> vector<8x128xf32>
    %720 = arith.addf %716, %719 : vector<8x128xf32>
    %c2_703 = arith.constant 2 : index
    %c0_704 = arith.constant 0 : index
    %c0_705 = arith.constant 0 : index
    %721 = vector.load %arg2[%c2_703, %c0_704, %c0_705] : memref<9x128x128xbf16, #tpu.memory_space<vmem>>, vector<1x128x128xbf16>
    %722 = vector.shape_cast %721 : vector<1x128x128xbf16> to vector<128x128xbf16>
    %cst_706 = arith.constant dense<0.000000e+00> : vector<8x128xf32>
    %723 = tpu.matmul %43, %722, %cst_706 {dimension_numbers = #tpu.dot_dimension_numbers<[1], [0], [0], [1], [0, 0, 1, 1], [], []>} : vector<8x128xbf16>, vector<128x128xbf16>, vector<8x128xf32> -> vector<8x128xf32>
    %724 = arith.addf %720, %723 : vector<8x128xf32>
    %c3_707 = arith.constant 3 : index
    %c0_708 = arith.constant 0 : index
    %c0_709 = arith.constant 0 : index
    %725 = vector.load %arg2[%c3_707, %c0_708, %c0_709] : memref<9x128x128xbf16, #tpu.memory_space<vmem>>, vector<1x128x128xbf16>
    %726 = vector.shape_cast %725 : vector<1x128x128xbf16> to vector<128x128xbf16>
    %cst_710 = arith.constant dense<0.000000e+00> : vector<8x128xf32>
    %727 = tpu.matmul %51, %726, %cst_710 {dimension_numbers = #tpu.dot_dimension_numbers<[1], [0], [0], [1], [0, 0, 1, 1], [], []>} : vector<8x128xbf16>, vector<128x128xbf16>, vector<8x128xf32> -> vector<8x128xf32>
    %728 = arith.addf %724, %727 : vector<8x128xf32>
    %c4_711 = arith.constant 4 : index
    %c0_712 = arith.constant 0 : index
    %c0_713 = arith.constant 0 : index
    %729 = vector.load %arg2[%c4_711, %c0_712, %c0_713] : memref<9x128x128xbf16, #tpu.memory_space<vmem>>, vector<1x128x128xbf16>
    %730 = vector.shape_cast %729 : vector<1x128x128xbf16> to vector<128x128xbf16>
    %cst_714 = arith.constant dense<0.000000e+00> : vector<8x128xf32>
    %731 = tpu.matmul %53, %730, %cst_714 {dimension_numbers = #tpu.dot_dimension_numbers<[1], [0], [0], [1], [0, 0, 1, 1], [], []>} : vector<8x128xbf16>, vector<128x128xbf16>, vector<8x128xf32> -> vector<8x128xf32>
    %732 = arith.addf %728, %731 : vector<8x128xf32>
    %c5_715 = arith.constant 5 : index
    %c0_716 = arith.constant 0 : index
    %c0_717 = arith.constant 0 : index
    %733 = vector.load %arg2[%c5_715, %c0_716, %c0_717] : memref<9x128x128xbf16, #tpu.memory_space<vmem>>, vector<1x128x128xbf16>
    %734 = vector.shape_cast %733 : vector<1x128x128xbf16> to vector<128x128xbf16>
    %cst_718 = arith.constant dense<0.000000e+00> : vector<8x128xf32>
    %735 = tpu.matmul %55, %734, %cst_718 {dimension_numbers = #tpu.dot_dimension_numbers<[1], [0], [0], [1], [0, 0, 1, 1], [], []>} : vector<8x128xbf16>, vector<128x128xbf16>, vector<8x128xf32> -> vector<8x128xf32>
    %736 = arith.addf %732, %735 : vector<8x128xf32>
    %c6_719 = arith.constant 6 : index
    %c0_720 = arith.constant 0 : index
    %c0_721 = arith.constant 0 : index
    %737 = vector.load %arg2[%c6_719, %c0_720, %c0_721] : memref<9x128x128xbf16, #tpu.memory_space<vmem>>, vector<1x128x128xbf16>
    %738 = vector.shape_cast %737 : vector<1x128x128xbf16> to vector<128x128xbf16>
    %cst_722 = arith.constant dense<0.000000e+00> : vector<8x128xf32>
    %739 = tpu.matmul %63, %738, %cst_722 {dimension_numbers = #tpu.dot_dimension_numbers<[1], [0], [0], [1], [0, 0, 1, 1], [], []>} : vector<8x128xbf16>, vector<128x128xbf16>, vector<8x128xf32> -> vector<8x128xf32>
    %740 = arith.addf %736, %739 : vector<8x128xf32>
    %c7_723 = arith.constant 7 : index
    %c0_724 = arith.constant 0 : index
    %c0_725 = arith.constant 0 : index
    %741 = vector.load %arg2[%c7_723, %c0_724, %c0_725] : memref<9x128x128xbf16, #tpu.memory_space<vmem>>, vector<1x128x128xbf16>
    %742 = vector.shape_cast %741 : vector<1x128x128xbf16> to vector<128x128xbf16>
    %cst_726 = arith.constant dense<0.000000e+00> : vector<8x128xf32>
    %743 = tpu.matmul %65, %742, %cst_726 {dimension_numbers = #tpu.dot_dimension_numbers<[1], [0], [0], [1], [0, 0, 1, 1], [], []>} : vector<8x128xbf16>, vector<128x128xbf16>, vector<8x128xf32> -> vector<8x128xf32>
    %744 = arith.addf %740, %743 : vector<8x128xf32>
    %c8_727 = arith.constant 8 : index
    %c0_728 = arith.constant 0 : index
    %c0_729 = arith.constant 0 : index
    %745 = vector.load %arg2[%c8_727, %c0_728, %c0_729] : memref<9x128x128xbf16, #tpu.memory_space<vmem>>, vector<1x128x128xbf16>
    %746 = vector.shape_cast %745 : vector<1x128x128xbf16> to vector<128x128xbf16>
    %cst_730 = arith.constant dense<0.000000e+00> : vector<8x128xf32>
    %747 = tpu.matmul %67, %746, %cst_730 {dimension_numbers = #tpu.dot_dimension_numbers<[1], [0], [0], [1], [0, 0, 1, 1], [], []>} : vector<8x128xbf16>, vector<128x128xbf16>, vector<8x128xf32> -> vector<8x128xf32>
    %748 = arith.addf %744, %747 : vector<8x128xf32>
    %749 = vector.broadcast %72 : vector<1x128xf32> to vector<8x128xf32>
    %750 = arith.addf %748, %749 : vector<8x128xf32>
    %cst_731 = arith.constant 0.000000e+00 : f32
    %751 = vector.broadcast %cst_731 : f32 to vector<8x128xf32>
    %752 = arith.cmpf oge, %750, %751 : vector<8x128xf32>
    %cst_732 = arith.constant 2.000000e-01 : f32
    %753 = vector.broadcast %cst_732 : f32 to vector<8x128xf32>
    %754 = arith.mulf %753, %750 : vector<8x128xf32>
    %755 = arith.select %752, %750, %754 : vector<8x128xi1>, vector<8x128xf32>
    %756 = arith.truncf %755 : vector<8x128xf32> to vector<8x128xbf16>
    %c13 = arith.constant 13 : index
    %c0_733 = arith.constant 0 : index
    %c0_734 = arith.constant 0 : index
    %757 = vector.load %arg4[%c13, %c0_733, %c0_734] : memref<16x128x128xbf16, #tpu.memory_space<vmem>>, vector<1x128x128xbf16>
    %758 = vector.shape_cast %757 : vector<1x128x128xbf16> to vector<128x128xbf16>
    %cst_735 = arith.constant dense<0.000000e+00> : vector<8x128xf32>
    %759 = tpu.matmul %756, %758, %cst_735 {dimension_numbers = #tpu.dot_dimension_numbers<[1], [0], [0], [1], [0, 0, 1, 1], [], []>} : vector<8x128xbf16>, vector<128x128xbf16>, vector<8x128xf32> -> vector<8x128xf32>
    %760 = arith.addf %711, %759 : vector<8x128xf32>
    %cst_736 = arith.constant 0.000000e+00 : f32
    %761 = vector.broadcast %cst_736 : f32 to vector<8x128xf32>
    %c0_737 = arith.constant 0 : index
    %c0_738 = arith.constant 0 : index
    %c0_739 = arith.constant 0 : index
    %762 = vector.load %arg2[%c0_737, %c0_738, %c0_739] : memref<9x128x128xbf16, #tpu.memory_space<vmem>>, vector<1x128x128xbf16>
    %763 = vector.shape_cast %762 : vector<1x128x128xbf16> to vector<128x128xbf16>
    %cst_740 = arith.constant dense<0.000000e+00> : vector<8x128xf32>
    %764 = tpu.matmul %41, %763, %cst_740 {dimension_numbers = #tpu.dot_dimension_numbers<[1], [0], [0], [1], [0, 0, 1, 1], [], []>} : vector<8x128xbf16>, vector<128x128xbf16>, vector<8x128xf32> -> vector<8x128xf32>
    %765 = arith.addf %761, %764 : vector<8x128xf32>
    %c1_741 = arith.constant 1 : index
    %c0_742 = arith.constant 0 : index
    %c0_743 = arith.constant 0 : index
    %766 = vector.load %arg2[%c1_741, %c0_742, %c0_743] : memref<9x128x128xbf16, #tpu.memory_space<vmem>>, vector<1x128x128xbf16>
    %767 = vector.shape_cast %766 : vector<1x128x128xbf16> to vector<128x128xbf16>
    %cst_744 = arith.constant dense<0.000000e+00> : vector<8x128xf32>
    %768 = tpu.matmul %43, %767, %cst_744 {dimension_numbers = #tpu.dot_dimension_numbers<[1], [0], [0], [1], [0, 0, 1, 1], [], []>} : vector<8x128xbf16>, vector<128x128xbf16>, vector<8x128xf32> -> vector<8x128xf32>
    %769 = arith.addf %765, %768 : vector<8x128xf32>
    %c2_745 = arith.constant 2 : index
    %c0_746 = arith.constant 0 : index
    %c0_747 = arith.constant 0 : index
    %770 = vector.load %arg2[%c2_745, %c0_746, %c0_747] : memref<9x128x128xbf16, #tpu.memory_space<vmem>>, vector<1x128x128xbf16>
    %771 = vector.shape_cast %770 : vector<1x128x128xbf16> to vector<128x128xbf16>
    %cst_748 = arith.constant dense<0.000000e+00> : vector<8x128xf32>
    %772 = tpu.matmul %45, %771, %cst_748 {dimension_numbers = #tpu.dot_dimension_numbers<[1], [0], [0], [1], [0, 0, 1, 1], [], []>} : vector<8x128xbf16>, vector<128x128xbf16>, vector<8x128xf32> -> vector<8x128xf32>
    %773 = arith.addf %769, %772 : vector<8x128xf32>
    %c3_749 = arith.constant 3 : index
    %c0_750 = arith.constant 0 : index
    %c0_751 = arith.constant 0 : index
    %774 = vector.load %arg2[%c3_749, %c0_750, %c0_751] : memref<9x128x128xbf16, #tpu.memory_space<vmem>>, vector<1x128x128xbf16>
    %775 = vector.shape_cast %774 : vector<1x128x128xbf16> to vector<128x128xbf16>
    %cst_752 = arith.constant dense<0.000000e+00> : vector<8x128xf32>
    %776 = tpu.matmul %53, %775, %cst_752 {dimension_numbers = #tpu.dot_dimension_numbers<[1], [0], [0], [1], [0, 0, 1, 1], [], []>} : vector<8x128xbf16>, vector<128x128xbf16>, vector<8x128xf32> -> vector<8x128xf32>
    %777 = arith.addf %773, %776 : vector<8x128xf32>
    %c4_753 = arith.constant 4 : index
    %c0_754 = arith.constant 0 : index
    %c0_755 = arith.constant 0 : index
    %778 = vector.load %arg2[%c4_753, %c0_754, %c0_755] : memref<9x128x128xbf16, #tpu.memory_space<vmem>>, vector<1x128x128xbf16>
    %779 = vector.shape_cast %778 : vector<1x128x128xbf16> to vector<128x128xbf16>
    %cst_756 = arith.constant dense<0.000000e+00> : vector<8x128xf32>
    %780 = tpu.matmul %55, %779, %cst_756 {dimension_numbers = #tpu.dot_dimension_numbers<[1], [0], [0], [1], [0, 0, 1, 1], [], []>} : vector<8x128xbf16>, vector<128x128xbf16>, vector<8x128xf32> -> vector<8x128xf32>
    %781 = arith.addf %777, %780 : vector<8x128xf32>
    %c5_757 = arith.constant 5 : index
    %c0_758 = arith.constant 0 : index
    %c0_759 = arith.constant 0 : index
    %782 = vector.load %arg2[%c5_757, %c0_758, %c0_759] : memref<9x128x128xbf16, #tpu.memory_space<vmem>>, vector<1x128x128xbf16>
    %783 = vector.shape_cast %782 : vector<1x128x128xbf16> to vector<128x128xbf16>
    %cst_760 = arith.constant dense<0.000000e+00> : vector<8x128xf32>
    %784 = tpu.matmul %57, %783, %cst_760 {dimension_numbers = #tpu.dot_dimension_numbers<[1], [0], [0], [1], [0, 0, 1, 1], [], []>} : vector<8x128xbf16>, vector<128x128xbf16>, vector<8x128xf32> -> vector<8x128xf32>
    %785 = arith.addf %781, %784 : vector<8x128xf32>
    %c6_761 = arith.constant 6 : index
    %c0_762 = arith.constant 0 : index
    %c0_763 = arith.constant 0 : index
    %786 = vector.load %arg2[%c6_761, %c0_762, %c0_763] : memref<9x128x128xbf16, #tpu.memory_space<vmem>>, vector<1x128x128xbf16>
    %787 = vector.shape_cast %786 : vector<1x128x128xbf16> to vector<128x128xbf16>
    %cst_764 = arith.constant dense<0.000000e+00> : vector<8x128xf32>
    %788 = tpu.matmul %65, %787, %cst_764 {dimension_numbers = #tpu.dot_dimension_numbers<[1], [0], [0], [1], [0, 0, 1, 1], [], []>} : vector<8x128xbf16>, vector<128x128xbf16>, vector<8x128xf32> -> vector<8x128xf32>
    %789 = arith.addf %785, %788 : vector<8x128xf32>
    %c7_765 = arith.constant 7 : index
    %c0_766 = arith.constant 0 : index
    %c0_767 = arith.constant 0 : index
    %790 = vector.load %arg2[%c7_765, %c0_766, %c0_767] : memref<9x128x128xbf16, #tpu.memory_space<vmem>>, vector<1x128x128xbf16>
    %791 = vector.shape_cast %790 : vector<1x128x128xbf16> to vector<128x128xbf16>
    %cst_768 = arith.constant dense<0.000000e+00> : vector<8x128xf32>
    %792 = tpu.matmul %67, %791, %cst_768 {dimension_numbers = #tpu.dot_dimension_numbers<[1], [0], [0], [1], [0, 0, 1, 1], [], []>} : vector<8x128xbf16>, vector<128x128xbf16>, vector<8x128xf32> -> vector<8x128xf32>
    %793 = arith.addf %789, %792 : vector<8x128xf32>
    %c8_769 = arith.constant 8 : index
    %c0_770 = arith.constant 0 : index
    %c0_771 = arith.constant 0 : index
    %794 = vector.load %arg2[%c8_769, %c0_770, %c0_771] : memref<9x128x128xbf16, #tpu.memory_space<vmem>>, vector<1x128x128xbf16>
    %795 = vector.shape_cast %794 : vector<1x128x128xbf16> to vector<128x128xbf16>
    %cst_772 = arith.constant dense<0.000000e+00> : vector<8x128xf32>
    %796 = tpu.matmul %69, %795, %cst_772 {dimension_numbers = #tpu.dot_dimension_numbers<[1], [0], [0], [1], [0, 0, 1, 1], [], []>} : vector<8x128xbf16>, vector<128x128xbf16>, vector<8x128xf32> -> vector<8x128xf32>
    %797 = arith.addf %793, %796 : vector<8x128xf32>
    %798 = vector.broadcast %72 : vector<1x128xf32> to vector<8x128xf32>
    %799 = arith.addf %797, %798 : vector<8x128xf32>
    %cst_773 = arith.constant 0.000000e+00 : f32
    %800 = vector.broadcast %cst_773 : f32 to vector<8x128xf32>
    %801 = arith.cmpf oge, %799, %800 : vector<8x128xf32>
    %cst_774 = arith.constant 2.000000e-01 : f32
    %802 = vector.broadcast %cst_774 : f32 to vector<8x128xf32>
    %803 = arith.mulf %802, %799 : vector<8x128xf32>
    %804 = arith.select %801, %799, %803 : vector<8x128xi1>, vector<8x128xf32>
    %805 = arith.truncf %804 : vector<8x128xf32> to vector<8x128xbf16>
    %c14 = arith.constant 14 : index
    %c0_775 = arith.constant 0 : index
    %c0_776 = arith.constant 0 : index
    %806 = vector.load %arg4[%c14, %c0_775, %c0_776] : memref<16x128x128xbf16, #tpu.memory_space<vmem>>, vector<1x128x128xbf16>
    %807 = vector.shape_cast %806 : vector<1x128x128xbf16> to vector<128x128xbf16>
    %cst_777 = arith.constant dense<0.000000e+00> : vector<8x128xf32>
    %808 = tpu.matmul %805, %807, %cst_777 {dimension_numbers = #tpu.dot_dimension_numbers<[1], [0], [0], [1], [0, 0, 1, 1], [], []>} : vector<8x128xbf16>, vector<128x128xbf16>, vector<8x128xf32> -> vector<8x128xf32>
    %809 = arith.addf %760, %808 : vector<8x128xf32>
    %cst_778 = arith.constant 0.000000e+00 : f32
    %810 = vector.broadcast %cst_778 : f32 to vector<8x128xf32>
    %c0_779 = arith.constant 0 : index
    %c0_780 = arith.constant 0 : index
    %c0_781 = arith.constant 0 : index
    %811 = vector.load %arg2[%c0_779, %c0_780, %c0_781] : memref<9x128x128xbf16, #tpu.memory_space<vmem>>, vector<1x128x128xbf16>
    %812 = vector.shape_cast %811 : vector<1x128x128xbf16> to vector<128x128xbf16>
    %cst_782 = arith.constant dense<0.000000e+00> : vector<8x128xf32>
    %813 = tpu.matmul %43, %812, %cst_782 {dimension_numbers = #tpu.dot_dimension_numbers<[1], [0], [0], [1], [0, 0, 1, 1], [], []>} : vector<8x128xbf16>, vector<128x128xbf16>, vector<8x128xf32> -> vector<8x128xf32>
    %814 = arith.addf %810, %813 : vector<8x128xf32>
    %c1_783 = arith.constant 1 : index
    %c0_784 = arith.constant 0 : index
    %c0_785 = arith.constant 0 : index
    %815 = vector.load %arg2[%c1_783, %c0_784, %c0_785] : memref<9x128x128xbf16, #tpu.memory_space<vmem>>, vector<1x128x128xbf16>
    %816 = vector.shape_cast %815 : vector<1x128x128xbf16> to vector<128x128xbf16>
    %cst_786 = arith.constant dense<0.000000e+00> : vector<8x128xf32>
    %817 = tpu.matmul %45, %816, %cst_786 {dimension_numbers = #tpu.dot_dimension_numbers<[1], [0], [0], [1], [0, 0, 1, 1], [], []>} : vector<8x128xbf16>, vector<128x128xbf16>, vector<8x128xf32> -> vector<8x128xf32>
    %818 = arith.addf %814, %817 : vector<8x128xf32>
    %c2_787 = arith.constant 2 : index
    %c0_788 = arith.constant 0 : index
    %c0_789 = arith.constant 0 : index
    %819 = vector.load %arg2[%c2_787, %c0_788, %c0_789] : memref<9x128x128xbf16, #tpu.memory_space<vmem>>, vector<1x128x128xbf16>
    %820 = vector.shape_cast %819 : vector<1x128x128xbf16> to vector<128x128xbf16>
    %cst_790 = arith.constant dense<0.000000e+00> : vector<8x128xf32>
    %821 = tpu.matmul %47, %820, %cst_790 {dimension_numbers = #tpu.dot_dimension_numbers<[1], [0], [0], [1], [0, 0, 1, 1], [], []>} : vector<8x128xbf16>, vector<128x128xbf16>, vector<8x128xf32> -> vector<8x128xf32>
    %822 = arith.addf %818, %821 : vector<8x128xf32>
    %c3_791 = arith.constant 3 : index
    %c0_792 = arith.constant 0 : index
    %c0_793 = arith.constant 0 : index
    %823 = vector.load %arg2[%c3_791, %c0_792, %c0_793] : memref<9x128x128xbf16, #tpu.memory_space<vmem>>, vector<1x128x128xbf16>
    %824 = vector.shape_cast %823 : vector<1x128x128xbf16> to vector<128x128xbf16>
    %cst_794 = arith.constant dense<0.000000e+00> : vector<8x128xf32>
    %825 = tpu.matmul %55, %824, %cst_794 {dimension_numbers = #tpu.dot_dimension_numbers<[1], [0], [0], [1], [0, 0, 1, 1], [], []>} : vector<8x128xbf16>, vector<128x128xbf16>, vector<8x128xf32> -> vector<8x128xf32>
    %826 = arith.addf %822, %825 : vector<8x128xf32>
    %c4_795 = arith.constant 4 : index
    %c0_796 = arith.constant 0 : index
    %c0_797 = arith.constant 0 : index
    %827 = vector.load %arg2[%c4_795, %c0_796, %c0_797] : memref<9x128x128xbf16, #tpu.memory_space<vmem>>, vector<1x128x128xbf16>
    %828 = vector.shape_cast %827 : vector<1x128x128xbf16> to vector<128x128xbf16>
    %cst_798 = arith.constant dense<0.000000e+00> : vector<8x128xf32>
    %829 = tpu.matmul %57, %828, %cst_798 {dimension_numbers = #tpu.dot_dimension_numbers<[1], [0], [0], [1], [0, 0, 1, 1], [], []>} : vector<8x128xbf16>, vector<128x128xbf16>, vector<8x128xf32> -> vector<8x128xf32>
    %830 = arith.addf %826, %829 : vector<8x128xf32>
    %c5_799 = arith.constant 5 : index
    %c0_800 = arith.constant 0 : index
    %c0_801 = arith.constant 0 : index
    %831 = vector.load %arg2[%c5_799, %c0_800, %c0_801] : memref<9x128x128xbf16, #tpu.memory_space<vmem>>, vector<1x128x128xbf16>
    %832 = vector.shape_cast %831 : vector<1x128x128xbf16> to vector<128x128xbf16>
    %cst_802 = arith.constant dense<0.000000e+00> : vector<8x128xf32>
    %833 = tpu.matmul %59, %832, %cst_802 {dimension_numbers = #tpu.dot_dimension_numbers<[1], [0], [0], [1], [0, 0, 1, 1], [], []>} : vector<8x128xbf16>, vector<128x128xbf16>, vector<8x128xf32> -> vector<8x128xf32>
    %834 = arith.addf %830, %833 : vector<8x128xf32>
    %c6_803 = arith.constant 6 : index
    %c0_804 = arith.constant 0 : index
    %c0_805 = arith.constant 0 : index
    %835 = vector.load %arg2[%c6_803, %c0_804, %c0_805] : memref<9x128x128xbf16, #tpu.memory_space<vmem>>, vector<1x128x128xbf16>
    %836 = vector.shape_cast %835 : vector<1x128x128xbf16> to vector<128x128xbf16>
    %cst_806 = arith.constant dense<0.000000e+00> : vector<8x128xf32>
    %837 = tpu.matmul %67, %836, %cst_806 {dimension_numbers = #tpu.dot_dimension_numbers<[1], [0], [0], [1], [0, 0, 1, 1], [], []>} : vector<8x128xbf16>, vector<128x128xbf16>, vector<8x128xf32> -> vector<8x128xf32>
    %838 = arith.addf %834, %837 : vector<8x128xf32>
    %c7_807 = arith.constant 7 : index
    %c0_808 = arith.constant 0 : index
    %c0_809 = arith.constant 0 : index
    %839 = vector.load %arg2[%c7_807, %c0_808, %c0_809] : memref<9x128x128xbf16, #tpu.memory_space<vmem>>, vector<1x128x128xbf16>
    %840 = vector.shape_cast %839 : vector<1x128x128xbf16> to vector<128x128xbf16>
    %cst_810 = arith.constant dense<0.000000e+00> : vector<8x128xf32>
    %841 = tpu.matmul %69, %840, %cst_810 {dimension_numbers = #tpu.dot_dimension_numbers<[1], [0], [0], [1], [0, 0, 1, 1], [], []>} : vector<8x128xbf16>, vector<128x128xbf16>, vector<8x128xf32> -> vector<8x128xf32>
    %842 = arith.addf %838, %841 : vector<8x128xf32>
    %c8_811 = arith.constant 8 : index
    %c0_812 = arith.constant 0 : index
    %c0_813 = arith.constant 0 : index
    %843 = vector.load %arg2[%c8_811, %c0_812, %c0_813] : memref<9x128x128xbf16, #tpu.memory_space<vmem>>, vector<1x128x128xbf16>
    %844 = vector.shape_cast %843 : vector<1x128x128xbf16> to vector<128x128xbf16>
    %cst_814 = arith.constant dense<0.000000e+00> : vector<8x128xf32>
    %845 = tpu.matmul %71, %844, %cst_814 {dimension_numbers = #tpu.dot_dimension_numbers<[1], [0], [0], [1], [0, 0, 1, 1], [], []>} : vector<8x128xbf16>, vector<128x128xbf16>, vector<8x128xf32> -> vector<8x128xf32>
    %846 = arith.addf %842, %845 : vector<8x128xf32>
    %847 = vector.broadcast %72 : vector<1x128xf32> to vector<8x128xf32>
    %848 = arith.addf %846, %847 : vector<8x128xf32>
    %cst_815 = arith.constant 0.000000e+00 : f32
    %849 = vector.broadcast %cst_815 : f32 to vector<8x128xf32>
    %850 = arith.cmpf oge, %848, %849 : vector<8x128xf32>
    %cst_816 = arith.constant 2.000000e-01 : f32
    %851 = vector.broadcast %cst_816 : f32 to vector<8x128xf32>
    %852 = arith.mulf %851, %848 : vector<8x128xf32>
    %853 = arith.select %850, %848, %852 : vector<8x128xi1>, vector<8x128xf32>
    %854 = arith.truncf %853 : vector<8x128xf32> to vector<8x128xbf16>
    %c15 = arith.constant 15 : index
    %c0_817 = arith.constant 0 : index
    %c0_818 = arith.constant 0 : index
    %855 = vector.load %arg4[%c15, %c0_817, %c0_818] : memref<16x128x128xbf16, #tpu.memory_space<vmem>>, vector<1x128x128xbf16>
    %856 = vector.shape_cast %855 : vector<1x128x128xbf16> to vector<128x128xbf16>
    %cst_819 = arith.constant dense<0.000000e+00> : vector<8x128xf32>
    %857 = tpu.matmul %854, %856, %cst_819 {dimension_numbers = #tpu.dot_dimension_numbers<[1], [0], [0], [1], [0, 0, 1, 1], [], []>} : vector<8x128xbf16>, vector<128x128xbf16>, vector<8x128xf32> -> vector<8x128xf32>
    %858 = arith.addf %809, %857 : vector<8x128xf32>
    %859 = vector.broadcast %73 : vector<1x128xf32> to vector<8x128xf32>
    %860 = arith.addf %858, %859 : vector<8x128xf32>
    %cst_820 = arith.constant 0.000000e+00 : f32
    %861 = vector.broadcast %cst_820 : f32 to vector<8x128xf32>
    %862 = arith.cmpf oge, %860, %861 : vector<8x128xf32>
    %cst_821 = arith.constant 2.000000e-01 : f32
    %863 = vector.broadcast %cst_821 : f32 to vector<8x128xf32>
    %864 = arith.mulf %863, %860 : vector<8x128xf32>
    %865 = arith.select %862, %860, %864 : vector<8x128xi1>, vector<8x128xf32>
    %c0_822 = arith.constant 0 : index
    %c0_823 = arith.constant 0 : index
    %866 = vector.load %arg6[%c0_822, %c0_823] : memref<1x128xf32, #tpu.memory_space<vmem>>, vector<1x128xf32>
    %867 = vector.broadcast %866 : vector<1x128xf32> to vector<8x128xf32>
    %868 = arith.mulf %865, %867 : vector<8x128xf32>
    %cst_824 = arith.constant dense<0.000000e+00> : vector<8xf32>
    %869 = vector.multi_reduction <add>, %868, %cst_824 [1] : vector<8x128xf32> to vector<8xf32>
    %870 = vector.shape_cast %869 : vector<8xf32> to vector<8x1xf32>
    %c0_825 = arith.constant 0 : index
    %c0_826 = arith.constant 0 : index
    %871 = vector.load %arg7[%c0_825, %c0_826] : memref<1x1xf32, #tpu.memory_space<vmem>>, vector<1x1xf32>
    %872 = vector.broadcast %871 : vector<1x1xf32> to vector<8x1xf32>
    %873 = arith.addf %870, %872 : vector<8x1xf32>
    %874 = vector.shape_cast %873 : vector<8x1xf32> to vector<8x1xf32>
    %875 = vector.broadcast %874 : vector<8x1xf32> to vector<8x128xf32>
    %c0_827 = arith.constant 0 : index
    %c0_828 = arith.constant 0 : index
    %876 = vector.load %arg8[%c0_827, %c0_828] : memref<8x128xf32, #tpu.memory_space<vmem>>, vector<8x128xf32>
    tpu.vector_store %arg8[%c0_827, %c0_828], %875 {strides = array<i32>} : memref<8x128xf32, #tpu.memory_space<vmem>>, vector<8x128xf32>,
    return
  }
  func.func @transform_0(%arg0: i32) -> (i32, i32, i32, i32) {
    %c0_i32 = arith.constant 0 : i32
    %c0_i32_0 = arith.constant 0 : i32
    %c0_i32_1 = arith.constant 0 : i32
    %c0_i32_2 = arith.constant 0 : i32
    return %c0_i32, %c0_i32_0, %arg0, %c0_i32_1 : i32, i32, i32, i32
  }
  func.func @transform_1(%arg0: i32) -> (i32, i32, i32) {
    %c0_i32 = arith.constant 0 : i32
    %c0_i32_0 = arith.constant 0 : i32
    %c0_i32_1 = arith.constant 0 : i32
    %c0_i32_2 = arith.constant 0 : i32
    return %c0_i32, %c0_i32_0, %c0_i32_1 : i32, i32, i32
  }
  func.func @transform_2(%arg0: i32) -> (i32, i32) {
    %c0_i32 = arith.constant 0 : i32
    %c0_i32_0 = arith.constant 0 : i32
    %c0_i32_1 = arith.constant 0 : i32
    return %c0_i32, %c0_i32_0 : i32, i32
  }
  func.func @transform_3(%arg0: i32) -> (i32, i32, i32) {
    %c0_i32 = arith.constant 0 : i32
    %c0_i32_0 = arith.constant 0 : i32
    %c0_i32_1 = arith.constant 0 : i32
    %c0_i32_2 = arith.constant 0 : i32
    return %c0_i32, %c0_i32_0, %c0_i32_1 : i32, i32, i32
  }
  func.func @transform_4(%arg0: i32) -> (i32, i32) {
    %c0_i32 = arith.constant 0 : i32
    %c0_i32_0 = arith.constant 0 : i32
    %c0_i32_1 = arith.constant 0 : i32
    return %c0_i32, %c0_i32_0 : i32, i32
  }
  func.func @transform_5(%arg0: i32) -> (i32, i32) {
    %c0_i32 = arith.constant 0 : i32
    %c0_i32_0 = arith.constant 0 : i32
    %c0_i32_1 = arith.constant 0 : i32
    return %c0_i32, %c0_i32_0 : i32, i32
  }
  func.func @transform_6(%arg0: i32) -> (i32, i32) {
    %c0_i32 = arith.constant 0 : i32
    %c0_i32_0 = arith.constant 0 : i32
    %c0_i32_1 = arith.constant 0 : i32
    return %c0_i32, %c0_i32_0 : i32, i32
  }
  func.func @transform_7(%arg0: i32) -> (i32, i32) {
    %c0_i32 = arith.constant 0 : i32
    %c0_i32_0 = arith.constant 0 : i32
    return %arg0, %c0_i32 : i32, i32
  }
}

</mosaic_0001>

<bundles_post_ra>
// kernel: _lambda_.1
= control target key start
LH: loop header
LB: loop body
LE: loop exit
PB: predicated region body
PF: predicated region fallthrough
CT: control target
= control target key end

     0   :  { %s20757_s0 = inlined_call_operand.vmem [shape: bf16[6,6,16,128], index: 0, kind: input, shape index: {}]   ;;  %s20758_s1 = inlined_call_operand.vmem [shape: bf16[9,128,128], index: 1, kind: input, shape index: {}]   ;;  %s20759_s2 = inlined_call_operand.vmem [shape: f32[1,128], index: 2, kind: input, shape index: {}]   ;;  %s20760_s3 = inlined_call_operand.vmem [shape: bf16[16,128,128], index: 3, kind: input, shape index: {}]   ;;  %s20761_s4 = inlined_call_operand.vmem [shape: f32[1,128], index: 4, kind: input, shape index: {}]   ;;  %s20762_s5 = inlined_call_operand.vmem [shape: f32[1,128], index: 5, kind: input, shape index: {}]   ;;  %s20763_s6 = inlined_call_operand.<no memory space> [shape: f32[1,1], index: 6, kind: input, shape index: {}]   ;;  %s20764_s7 = inlined_call_operand.vmem [shape: f32[16,128], index: 7, kind: output, shape index: {}]  }
   0x1   :  { %v12_v0 = vstv %s20763_s6 }
   0x2   :  { %13 = vst [vmem:[#allocation2] sm:$0x1] %v12_v0 }
   0x3   :  { %s14853_s26 = smov 0   ;;  %s14855_s27 = smov 0  }
   0x4   :  { %s14857_s28 = smov 0  }
   0x5 LB: > { %s8864_s6 = sadd.s32 4294967295, %s14805_s28   ;;  %s14870_s29 = sadd.s32 1, %s14805_s28   ;;  %s14805_s28 = sphi %s14857_s28, %s21358_s28   ;;  %s14801_s27 = sphi %s14855_s27, %s21357_s27   ;;  %s14797_s26 = sphi %s14853_s26, %s21356_s26  }
   0x6   : > { %s23_s30 = ssub.s32 %s14805_s28, %s14870_s29  ;;  %s26_s8 = sadd.s32 1, %s14801_s27 }
   0x7   : > { %p24_p0 = scmp.eq.s32.totalorder %s23_s30, 0  ;;  %p33_p1 = scmp.ne.s32.totalorder %s14801_s27, %s14797_s26 }
   0x8   : > { %p34_p2 = scmp.eq.s32.totalorder %s14805_s28, 0  ;;  %p8867_p4 = scmp.ge.s32.totalorder %s14805_s28, 2 }
   0x9   : > { %s14879_s9 = scalar_select %p24_p0, %s14801_s27, %s26_s8  }
   0xa   : > { %p35_p3 = por %p34_p2, %p33_p1  ;;  %229 = sbr.rel (%p8867_p4) target bundleno = 43 (0x2b), region = 40 }
   0xf   : > { %232 = sbr.rel (!%p35_p3) target bundleno = 43 (0x2b), region = 44  ;;  %s234_s10 = sand.u32 (%p35_p3), 1, %s14801_s27  }
  0x10   : > { %s8868_s11 = sshll.u32 (%p35_p3), %s14805_s28, 2  ;;  %s14120_s12 = smul.u32 (%p35_p3), 144, %s234_s10 }
  0x11   : > { %s14887_s15 = scalar_lea.vmem (%p35_p3), %s20757_s0, %s8868_s11 }
  0x12   : > { %v255_v1 = vld [vmem:[%s14887_s15] sm:$0xf] (%p35_p3)  ;;  %v257_v2 = vld [vmem:[%s14887_s15 + $0x8] sm:$0xf] (%p35_p3)  ;;  %v259_v3 = vld [vmem:[%s14887_s15 + $0x10] sm:$0xf] (%p35_p3) }
  0x13   : > { %v261_v4 = vld [vmem:[%s14887_s15 + $0x18] sm:$0xf] (%p35_p3)  ;;  %v263_v5 = vld [vmem:[%s14887_s15 + $0x20] sm:$0xf] (%p35_p3)  ;;  %s14894_s16 = scalar_lea.vmem (%p35_p3), [#allocation3], %s14120_s12 }
  0x14   : > { %256 = vst [vmem:[%s14894_s16] sm:$0xf] %v255_v1  ;;  %258 = vst [vmem:[%s14894_s16 + $0x4] sm:$0xf] %v257_v2  ;;  %v265_v6 = vld [vmem:[%s14887_s15 + $0x28] sm:$0xf] }
  0x15   : > { %260 = vst [vmem:[%s14894_s16 + $0x8] sm:$0xf] %v259_v3  ;;  %262 = vst [vmem:[%s14894_s16 + $0xc] sm:$0xf] %v261_v4  ;;  %v267_v7 = vld [vmem:[%s14887_s15 + $0x30] sm:$0xf] }
  0x16   : > { %264 = vst [vmem:[%s14894_s16 + $0x10] sm:$0xf] %v263_v5  ;;  %v269_v8 = vld [vmem:[%s14887_s15 + $0x38] sm:$0xf]  ;;  %266 = vst [vmem:[%s14894_s16 + $0x14] sm:$0xf] %v265_v6 }
  0x17   : > { %268 = vst [vmem:[%s14894_s16 + $0x18] sm:$0xf] %v267_v7  ;;  %270 = vst [vmem:[%s14894_s16 + $0x1c] sm:$0xf] %v269_v8  ;;  %v271_v9 = vld [vmem:[%s14887_s15 + $0x40] sm:$0xf] }
  0x18   : > { %v273_v10 = vld [vmem:[%s14887_s15 + $0x48] sm:$0xf]  ;;  %v275_v11 = vld [vmem:[%s14887_s15 + $0x50] sm:$0xf]  ;;  %272 = vst [vmem:[%s14894_s16 + $0x20] sm:$0xf] %v271_v9 }
  0x19   : > { %274 = vst [vmem:[%s14894_s16 + $0x24] sm:$0xf] %v273_v10  ;;  %276 = vst [vmem:[%s14894_s16 + $0x28] sm:$0xf] %v275_v11  ;;  %v277_v12 = vld [vmem:[%s14887_s15 + $0x58] sm:$0xf] }
  0x1a   : > { %v279_v13 = vld [vmem:[%s14887_s15 + $0x60] sm:$0xf]  ;;  %v281_v14 = vld [vmem:[%s14887_s15 + $0x68] sm:$0xf]  ;;  %278 = vst [vmem:[%s14894_s16 + $0x2c] sm:$0xf] %v277_v12 }
  0x1b   : > { %280 = vst [vmem:[%s14894_s16 + $0x30] sm:$0xf] %v279_v13  ;;  %282 = vst [vmem:[%s14894_s16 + $0x34] sm:$0xf] %v281_v14  ;;  %v283_v15 = vld [vmem:[%s14887_s15 + $0x70] sm:$0xf] }
  0x1c   : > { %v285_v16 = vld [vmem:[%s14887_s15 + $0x78] sm:$0xf]  ;;  %v287_v17 = vld [vmem:[%s14887_s15 + $0x80] sm:$0xf]  ;;  %284 = vst [vmem:[%s14894_s16 + $0x38] sm:$0xf] %v283_v15 }
  0x1d   : > { %286 = vst [vmem:[%s14894_s16 + $0x3c] sm:$0xf] %v285_v16  ;;  %288 = vst [vmem:[%s14894_s16 + $0x40] sm:$0xf] %v287_v17  ;;  %v289_v18 = vld [vmem:[%s14887_s15 + $0x88] sm:$0xf] }
  0x1e   : > { %v291_v19 = vld [vmem:[%s14887_s15 + $0x90] sm:$0xf]  ;;  %v293_v20 = vld [vmem:[%s14887_s15 + $0x98] sm:$0xf]  ;;  %290 = vst [vmem:[%s14894_s16 + $0x44] sm:$0xf] %v289_v18 }
  0x1f   : > { %292 = vst [vmem:[%s14894_s16 + $0x48] sm:$0xf] %v291_v19  ;;  %294 = vst [vmem:[%s14894_s16 + $0x4c] sm:$0xf] %v293_v20  ;;  %v295_v21 = vld [vmem:[%s14887_s15 + $0xa0] sm:$0xf] }
  0x20   : > { %v297_v22 = vld [vmem:[%s14887_s15 + $0xa8] sm:$0xf]  ;;  %v299_v23 = vld [vmem:[%s14887_s15 + $0xb0] sm:$0xf]  ;;  %296 = vst [vmem:[%s14894_s16 + $0x50] sm:$0xf] %v295_v21 }
  0x21   : > { %298 = vst [vmem:[%s14894_s16 + $0x54] sm:$0xf] %v297_v22  ;;  %300 = vst [vmem:[%s14894_s16 + $0x58] sm:$0xf] %v299_v23  ;;  %v301_v24 = vld [vmem:[%s14887_s15 + $0xb8] sm:$0xf] }
  0x22   : > { %v303_v25 = vld [vmem:[%s14887_s15 + $0xc0] sm:$0xf]  ;;  %v305_v26 = vld [vmem:[%s14887_s15 + $0xc8] sm:$0xf]  ;;  %302 = vst [vmem:[%s14894_s16 + $0x5c] sm:$0xf] %v301_v24 }
  0x23   : > { %304 = vst [vmem:[%s14894_s16 + $0x60] sm:$0xf] %v303_v25  ;;  %306 = vst [vmem:[%s14894_s16 + $0x64] sm:$0xf] %v305_v26  ;;  %v307_v27 = vld [vmem:[%s14887_s15 + $0xd0] sm:$0xf] }
  0x24   : > { %v309_v28 = vld [vmem:[%s14887_s15 + $0xd8] sm:$0xf]  ;;  %v311_v29 = vld [vmem:[%s14887_s15 + $0xe0] sm:$0xf]  ;;  %308 = vst [vmem:[%s14894_s16 + $0x68] sm:$0xf] %v307_v27 }
  0x25   : > { %310 = vst [vmem:[%s14894_s16 + $0x6c] sm:$0xf] %v309_v28  ;;  %312 = vst [vmem:[%s14894_s16 + $0x70] sm:$0xf] %v311_v29  ;;  %v313_v30 = vld [vmem:[%s14887_s15 + $0xe8] sm:$0xf] }
  0x26   : > { %v315_v31 = vld [vmem:[%s14887_s15 + $0xf0] sm:$0xf]  ;;  %v317_v32 = vld [vmem:[%s14887_s15 + $0xf8] sm:$0xf]  ;;  %314 = vst [vmem:[%s14894_s16 + $0x74] sm:$0xf] %v313_v30 }
  0x27   : > { %316 = vst [vmem:[%s14894_s16 + $0x78] sm:$0xf] %v315_v31  ;;  %318 = vst [vmem:[%s14894_s16 + $0x7c] sm:$0xf] %v317_v32  ;;  %v319_v33 = vld [vmem:[%s14887_s15 + $0x100] sm:$0xf] }
  0x28   : > { %v321_v34 = vld [vmem:[%s14887_s15 + $0x108] sm:$0xf]  ;;  %v323_v35 = vld [vmem:[%s14887_s15 + $0x110] sm:$0xf]  ;;  %320 = vst [vmem:[%s14894_s16 + $0x80] sm:$0xf] %v319_v33 }
  0x29   : > { %322 = vst [vmem:[%s14894_s16 + $0x84] sm:$0xf] %v321_v34  ;;  %324 = vst [vmem:[%s14894_s16 + $0x88] sm:$0xf] %v323_v35  ;;  %v325_v36 = vld [vmem:[%s14887_s15 + $0x118] sm:$0xf] }
  0x2a   : > { %326 = vst [vmem:[%s14894_s16 + $0x8c] sm:$0xf] %v325_v36 }
  0x2b PF: > { %p8869_p5 = scmp.ge.s32.totalorder %s14805_s28, 1  ;;  %p421_p6 = scmp.lt.s32.totalorder %s14805_s28, 3 }
  0x2d   : > { %p422_p7 = pnand %p8869_p5, %p421_p6 }
  0x2f   : > { %425 = sbr.rel (%p422_p7) target bundleno = 5690 (0x163a), region = 85 }
  0x34   : > { %v14150_v37 = vld [vmem:[%s20758_s1 + $0x78] sm:$0xff]   ;;  %v20848_v38 = vmov 0.0   ;;  %v14152_v40 = vld [vmem:[%s20758_s1 + $0x70] sm:$0xff]   ;;  %vm14808_vm0 = vmmov 0   ;;  %v14154_v42 = vld [vmem:[%s20758_s1 + $0x68] sm:$0xff]   ;;  %s428_s21 = sand.u32 1, %s14797_s26  }
  0x35   : > { %10920 = vmatprep.subr.bf16.mxu0 %v20848_v38  ;;  %10940 = vmatprep.subr.bf16.mxu1 %v20848_v38  ;;  %v14151_v39 = vld [vmem:[%s20758_s1 + $0x38] sm:$0xff]   ;;  %v14153_v41 = vld [vmem:[%s20758_s1 + $0x30] sm:$0xff]   ;;  %v14155_v43 = vld [vmem:[%s20758_s1 + $0x28] sm:$0xff]   ;;  %s14121_s24 = smul.u32 144, %s428_s21  ;;  %p458_p8 = scmp.lt.s32.totalorder %s8864_s6, 1 }
  0x36   : > { %10921 = vmatpush3.bf16.msra.mxu0 %v14150_v37  ;;  %10936 = vmatprep.mubr.msk.bf16.mxu0 %vm14808_vm0, %v20848_v38  ;;  %v14156_v44 = vld [vmem:[%s20758_s1 + $0x60] sm:$0xff]   ;;  %v14158_v46 = vld [vmem:[%s20758_s1 + $0x58] sm:$0xff]   ;;  %v14160_v48 = vld [vmem:[%s20758_s1 + $0x50] sm:$0xff]  }
  0x37   : > { %10941 = vmatpush3.bf16.msra.mxu1 %v14151_v39  ;;  %10922 = vmatprep.subr.bf16.mxu0 %v20848_v38  ;;  %v14157_v45 = vld [vmem:[%s20758_s1 + $0x20] sm:$0xff]   ;;  %v14159_v47 = vld [vmem:[%s20758_s1 + $0x18] sm:$0xff]   ;;  %v14161_v49 = vld [vmem:[%s20758_s1 + $0x10] sm:$0xff]   ;;  %s15034_s14 = scalar_lea.vmem [#allocation3], %s14121_s24  ;;  %s21360_s6 = smov (!%p458_p8, %s8864_s6), 1 }
  0x38   : > { %10942 = vmatprep.subr.bf16.mxu1 %v20848_v38  ;;  %10956 = vmatprep.mubr.msk.bf16.mxu1 %vm14808_vm0, %v20848_v38  ;;  %v14162_v50 = vld [vmem:[%s20758_s1 + $0x48] sm:$0xff]   ;;  %v14164_v52 = vld [vmem:[%s20758_s1 + $0x40] sm:$0xff]   ;;  %v14166_v56 = vld [vmem:[%s20758_s1 + $0xb8] sm:$0xff]   ;;  %s8870_s10 = sshll.u32 %s21360_s6, 3 }
  0x39   : > { %v14163_v51 = vld [vmem:[%s20758_s1 + $0x8] sm:$0xff]   ;;  %v14165_v53 = vld [vmem:[%s20758_s1] sm:$0xff]   ;;  %v14167_v57 = vld [vmem:[%s20758_s1 + $0xf8] sm:$0xff]   ;;  %s461_s13 = scalar_lea.vmem %s20764_s7, %s8870_s10 }
  0x3a   : > { %10923 = vmatpush3.bf16.msra.mxu0 %v14152_v40  ;;  %v8871_v54 = vld [vmem:[%s15034_s14 + $0x4] sm:$0xf]  ;;  %v463_v55 = vld [vmem:[%s15034_s14] sm:$0xf]  ;;  %v15115_v8 = vld [vmem:[%s15034_s14 + $0x8] sm:$0xf] }
  0x3b   : > { %10943 = vmatpush3.bf16.msra.mxu1 %v14153_v41  ;;  %10924 = vmatprep.subr.bf16.mxu0 %v20848_v38  ;;  %v14168_v58 = vld [vmem:[%s20758_s1 + $0xb0] sm:$0xff]   ;;  %v14170_v60 = vld [vmem:[%s20758_s1 + $0xa8] sm:$0xff]   ;;  %v14172_v62 = vld [vmem:[%s20758_s1 + $0xa0] sm:$0xff]  }
  0x3c   : > { %10944 = vmatprep.subr.bf16.mxu1 %v20848_v38  ;;  %v14169_v59 = vld [vmem:[%s20758_s1 + $0xf0] sm:$0xff]   ;;  %v14171_v61 = vld [vmem:[%s20758_s1 + $0xe8] sm:$0xff]   ;;  %v14173_v63 = vld [vmem:[%s20758_s1 + $0xe0] sm:$0xff]  }
  0x3d   : > { %v14174_v0 = vld [vmem:[%s20758_s1 + $0x98] sm:$0xff]   ;;  %v15085_v2 = vld [vmem:[%s20758_s1 + $0x90] sm:$0xff]   ;;  %v15096_v4 = vld [vmem:[%s20758_s1 + $0x88] sm:$0xff]  }
  0x3e   : > { %10925 = vmatpush3.bf16.msra.mxu0 %v14154_v42  ;;  %v14175_v1 = vld [vmem:[%s20758_s1 + $0xd8] sm:$0xff]   ;;  %v14177_v3 = vld [vmem:[%s20758_s1 + $0xd0] sm:$0xff]   ;;  %v14179_v5 = vld [vmem:[%s20758_s1 + $0xc8] sm:$0xff]  }
  0x3f   : > { %10945 = vmatpush3.bf16.msra.mxu1 %v14155_v43  ;;  %10926 = vmatprep.subr.bf16.mxu0 %v20848_v38  ;;  %v15107_v6 = vld [vmem:[%s20758_s1 + $0x80] sm:$0xff]   ;;  %v8876_v9 = vld [vmem:[%s15034_s14 + $0x18] sm:$0xf]  ;;  %v15136_v12 = vld [vmem:[%s20758_s1 + $0x130] sm:$0xff]  }
  0x40   : > { %10946 = vmatprep.subr.bf16.mxu1 %v20848_v38  ;;  %v14181_v7 = vld [vmem:[%s20758_s1 + $0xc0] sm:$0xff]   ;;  %v15122_v10 = vld [vmem:[%s20758_s1 + $0x138] sm:$0xff]   ;;  %v15143_v13 = vld [vmem:[%s20758_s1 + $0x170] sm:$0xff]  }
  0x41   : > { %v15128_v11 = vld [vmem:[%s20758_s1 + $0x178] sm:$0xff]   ;;  %v15154_v14 = vld [vmem:[%s20758_s1 + $0x128] sm:$0xff]   ;;  %v15168_v16 = vld [vmem:[%s20758_s1 + $0x120] sm:$0xff]  }
  0x42   : > { %10927 = vmatpush3.bf16.msra.mxu0 %v14156_v44  ;;  %v15161_v15 = vld [vmem:[%s20758_s1 + $0x168] sm:$0xff]   ;;  %v15175_v17 = vld [vmem:[%s20758_s1 + $0x160] sm:$0xff]   ;;  %v15181_v18 = vld [vmem:[%s20758_s1 + $0x118] sm:$0xff]  }
  0x43   : > { %10947 = vmatpush3.bf16.msra.mxu1 %v14157_v45  ;;  %10928 = vmatprep.subr.bf16.mxu0 %v20848_v38  ;;  %v15186_v19 = vld [vmem:[%s20758_s1 + $0x158] sm:$0xff]   ;;  %v15195_v20 = vld [vmem:[%s20758_s1 + $0x110] sm:$0xff]   ;;  %v15209_v22 = vld [vmem:[%s20758_s1 + $0x108] sm:$0xff]  }
  0x44   : > { %10948 = vmatprep.subr.bf16.mxu1 %v20848_v38  ;;  %v15200_v21 = vld [vmem:[%s20758_s1 + $0x150] sm:$0xff]   ;;  %v15214_v23 = vld [vmem:[%s20758_s1 + $0x148] sm:$0xff]   ;;  %v15223_v24 = vld [vmem:[%s20758_s1 + $0x100] sm:$0xff]  }
  0x45   : > { %v15228_v25 = vld [vmem:[%s20758_s1 + $0x140] sm:$0xff]   ;;  %v15240_v27 = vld [vmem:[%s20758_s1 + $0x1b8] sm:$0xff]   ;;  %v15257_v30 = vld [vmem:[%s20758_s1 + $0x1b0] sm:$0xff]  }
  0x46   : > { %10929 = vmatpush3.bf16.msra.mxu0 %v14158_v46  ;;  %v15235_v26 = vld [vmem:[%s15034_s14 + $0x1c] sm:$0xf]  ;;  %v15243_v28 = vld [vmem:[%s15034_s14 + $0x20] sm:$0xf]  ;;  %v8882_v45 = vld [vmem:[%s15034_s14 + $0x30] sm:$0xf] }
  0x47   : > { %10949 = vmatpush3.bf16.msra.mxu1 %v14159_v47  ;;  %10930 = vmatprep.subr.bf16.mxu0 %v20848_v38  ;;  %v15248_v29 = vld [vmem:[%s20758_s1 + $0x1f8] sm:$0xff]   ;;  %v15263_v31 = vld [vmem:[%s20758_s1 + $0x1f0] sm:$0xff]   ;;  %v15273_v32 = vld [vmem:[%s20758_s1 + $0x1a8] sm:$0xff]  }
  0x48   : > { %10950 = vmatprep.subr.bf16.mxu1 %v20848_v38  ;;  %v15280_v33 = vld [vmem:[%s20758_s1 + $0x1e8] sm:$0xff]   ;;  %v15291_v34 = vld [vmem:[%s20758_s1 + $0x1a0] sm:$0xff]   ;;  %v15305_v36 = vld [vmem:[%s20758_s1 + $0x198] sm:$0xff]  }
  0x49   : > { %v15296_v35 = vld [vmem:[%s20758_s1 + $0x1e0] sm:$0xff]   ;;  %v15310_v37 = vld [vmem:[%s20758_s1 + $0x1d8] sm:$0xff]   ;;  %v15319_v39 = vld [vmem:[%s20758_s1 + $0x190] sm:$0xff]  }
  0x4a   : > { %10931 = vmatpush3.bf16.msra.mxu0 %v14160_v48  ;;  %v15324_v40 = vld [vmem:[%s20758_s1 + $0x1d0] sm:$0xff]   ;;  %v15333_v41 = vld [vmem:[%s20758_s1 + $0x188] sm:$0xff]   ;;  %v15347_v43 = vld [vmem:[%s20758_s1 + $0x180] sm:$0xff]  }
  0x4b   : > { %10951 = vmatpush3.bf16.msra.mxu1 %v14161_v49  ;;  %10932 = vmatprep.subr.bf16.mxu0 %v20848_v38  ;;  %v15338_v42 = vld [vmem:[%s20758_s1 + $0x1c8] sm:$0xff]   ;;  %v15352_v44 = vld [vmem:[%s20758_s1 + $0x1c0] sm:$0xff]   ;;  %v15362_v46 = vld [vmem:[%s20758_s1 + $0x238] sm:$0xff]  }
  0x4c   : > { %10952 = vmatprep.subr.bf16.mxu1 %v20848_v38  ;;  %v15365_v47 = vld [vmem:[%s15034_s14 + $0x34] sm:$0xf] }
  0x4d   : > { %v15374_v48 = vld [vmem:[%s20758_s1 + $0x230] sm:$0xff]   ;;  %v15381_v49 = vld [vmem:[%s20758_s1 + $0x78] sm:$0xff]  }
  0x4e   : > { %10933 = vmatpush3.bf16.msra.mxu0 %v14162_v50  ;;  %v15389_v50 = vld [vmem:[%s20758_s1 + $0x228] sm:$0xff]  }
  0x4f   : > { %10953 = vmatpush3.bf16.msra.mxu1 %v14163_v51  ;;  %10934 = vmatprep.subr.bf16.mxu0 %v20848_v38  ;;  %v15399_v51 = vld [vmem:[%s20758_s1 + $0x70] sm:$0xff]  }
  0x50   : > { %10954 = vmatprep.subr.bf16.mxu1 %v20848_v38 }
  0x52   : > { %10935 = vmatpush3.bf16.msra.mxu0 %v14164_v52  ;;  %v15407_v52 = vld [vmem:[%s20758_s1 + $0x220] sm:$0xff]  }
  0x53   : > { %10955 = vmatpush3.bf16.msra.mxu1 %v14165_v53  ;;  %10960 = vmatprep.subr.bf16.mxu0 %v20848_v38  ;;  %v15413_v53 = vld [vmem:[%s20758_s1 + $0x68] sm:$0xff]  }
  0x54   : > { %10980 = vmatprep.subr.bf16.mxu1 %v20848_v38 }
  0x55   : > { %10937 = vmatmul.mubr.bf16.vlgmr.msra.gmra.mxu0 %v8871_v54  ;;  %v15421_v54 = vld [vmem:[%s20758_s1 + $0x218] sm:$0xff]  }
  0x56   : > { %10957 = vmatmul.mubr.bf16.vlgmr.msra.gmra.mxu1 %v463_v55  ;;  %10961 = vmatpush3.bf16.msra.mxu0 %v14166_v56  ;;  %v15427_v55 = vld [vmem:[%s20758_s1 + $0x60] sm:$0xff]   ;;  %v15435_v56 = vld [vmem:[%s20758_s1 + $0x210] sm:$0xff]  }
  0x57   : > { %10981 = vmatpush3.bf16.msra.mxu1 %v14167_v57  ;;  %10962 = vmatprep.subr.bf16.mxu0 %v20848_v38  ;;  %v15441_v57 = vld [vmem:[%s20758_s1 + $0x58] sm:$0xff]  }
  0x58   : > { %10982 = vmatprep.subr.bf16.mxu1 %v20848_v38  ;;  %10976 = vmatprep.mubr.msk.bf16.mxu0 %vm14808_vm0, %v20848_v38 }
  0x59   : > { %10996 = vmatprep.mubr.msk.bf16.mxu1 %vm14808_vm0, %v20848_v38 }
  0x5a   : > { %10963 = vmatpush3.bf16.msra.mxu0 %v14168_v58  ;;  %v15449_v58 = vld [vmem:[%s20758_s1 + $0x208] sm:$0xff]  }
  0x5b   : > { %10983 = vmatpush3.bf16.msra.mxu1 %v14169_v59  ;;  %10964 = vmatprep.subr.bf16.mxu0 %v20848_v38  ;;  %v15455_v59 = vld [vmem:[%s20758_s1 + $0x50] sm:$0xff]  }
  0x5c   : > { %10984 = vmatprep.subr.bf16.mxu1 %v20848_v38  ;;  %21020 = vst [vmem:[#allocation4_spill] sm:$0xff] %v15455_v59 }
  0x5e   : > { %10965 = vmatpush3.bf16.msra.mxu0 %v14170_v60  ;;  %v15463_v60 = vld [vmem:[%s20758_s1 + $0x200] sm:$0xff]  }
  0x5f   : > { %10985 = vmatpush3.bf16.msra.mxu1 %v14171_v61  ;;  %10966 = vmatprep.subr.bf16.mxu0 %v20848_v38  ;;  %v15469_v61 = vld [vmem:[%s20758_s1 + $0x48] sm:$0xff]  }
  0x60   : > { %10986 = vmatprep.subr.bf16.mxu1 %v20848_v38  ;;  %21021 = vst [vmem:[#allocation5_spill] sm:$0xff] %v15469_v61 }
  0x62   : > { %10967 = vmatpush3.bf16.msra.mxu0 %v14172_v62  ;;  %v15475_v62 = vld [vmem:[%s15034_s14 + $0x38] sm:$0xf] }
  0x63   : > { %10987 = vmatpush3.bf16.msra.mxu1 %v14173_v63  ;;  %10968 = vmatprep.subr.bf16.mxu0 %v20848_v38  ;;  %v15481_v63 = vld [vmem:[%s20758_s1 + $0x40] sm:$0xff]  }
  0x64   : > { %10988 = vmatprep.subr.bf16.mxu1 %v20848_v38  ;;  %21022 = vst [vmem:[#allocation6_spill] sm:$0xff] %v15481_v63 }
  0x66   : > { %10969 = vmatpush3.bf16.msra.mxu0 %v14174_v0  ;;  %v15491_v0 = vld [vmem:[%s20758_s1 + $0x38] sm:$0xff]  }
  0x67   : > { %10989 = vmatpush3.bf16.msra.mxu1 %v14175_v1  ;;  %10970 = vmatprep.subr.bf16.mxu0 %v20848_v38  ;;  %v15497_v1 = vld [vmem:[%s20758_s1 + $0xb8] sm:$0xff]  }
  0x68   : > { %10990 = vmatprep.subr.bf16.mxu1 %v20848_v38  ;;  %21023 = vst [vmem:[#allocation7_spill] sm:$0xff] %v15497_v1 }
  0x6a   : > { %10971 = vmatpush3.bf16.msra.mxu0 %v15085_v2 }
  0x6b   : > { %10991 = vmatpush3.bf16.msra.mxu1 %v14177_v3  ;;  %10972 = vmatprep.subr.bf16.mxu0 %v20848_v38  ;;  %v15509_v3 = vld [vmem:[%s20758_s1 + $0x30] sm:$0xff]  }
  0x6c   : > { %10992 = vmatprep.subr.bf16.mxu1 %v20848_v38 }
  0x6e   : > { %10973 = vmatpush3.bf16.msra.mxu0 %v15096_v4 }
  0x6f   : > { %10993 = vmatpush3.bf16.msra.mxu1 %v14179_v5  ;;  %10974 = vmatprep.subr.bf16.mxu0 %v20848_v38  ;;  %v15515_v5 = vld [vmem:[%s20758_s1 + $0xb0] sm:$0xff]  }
  0x70   : > { %10994 = vmatprep.subr.bf16.mxu1 %v20848_v38  ;;  %21024 = vst [vmem:[#allocation8_spill] sm:$0xff] %v15515_v5 }
  0x72   : > { %10975 = vmatpush3.bf16.msra.mxu0 %v15107_v6 }
  0x73   : > { %10995 = vmatpush3.bf16.msra.mxu1 %v14181_v7  ;;  %11000 = vmatprep.subr.bf16.mxu0 %v20848_v38  ;;  %v15523_v7 = vld [vmem:[%s20758_s1 + $0x28] sm:$0xff]  }
  0x74   : > { %11020 = vmatprep.subr.bf16.mxu1 %v20848_v38 }
  0x75   : > { %10977 = vmatmul.mubr.bf16.vlgmr.msra.gmra.mxu0 %v15115_v8 }
  0x76   : > { %10997 = vmatmul.mubr.bf16.vlgmr.msra.gmra.mxu1 %v8876_v9  ;;  %11001 = vmatpush3.bf16.msra.mxu0 %v15122_v10  ;;  %v15537_v9 = vld [vmem:[%s20758_s1 + $0x20] sm:$0xff]  }
  0x77   : > { %11021 = vmatpush3.bf16.msra.mxu1 %v15128_v11  ;;  %11002 = vmatprep.subr.bf16.mxu0 %v20848_v38 }
  0x78   : > { %11022 = vmatprep.subr.bf16.mxu1 %v20848_v38  ;;  %11016 = vmatprep.mubr.msk.bf16.mxu0 %vm14808_vm0, %v20848_v38 }
  0x79   : > { %11036 = vmatprep.mubr.msk.bf16.mxu1 %vm14808_vm0, %v20848_v38 }
  0x7a   : > { %11003 = vmatpush3.bf16.msra.mxu0 %v15136_v12 }
  0x7b   : > { %11023 = vmatpush3.bf16.msra.mxu1 %v15143_v13  ;;  %11004 = vmatprep.subr.bf16.mxu0 %v20848_v38 }
  0x7c   : > { %11024 = vmatprep.subr.bf16.mxu1 %v20848_v38 }
  0x7e   : > { %11005 = vmatpush3.bf16.msra.mxu0 %v15154_v14 }
  0x7f   : > { %11025 = vmatpush3.bf16.msra.mxu1 %v15161_v15  ;;  %11006 = vmatprep.subr.bf16.mxu0 %v20848_v38 }
  0x80   : > { %11026 = vmatprep.subr.bf16.mxu1 %v20848_v38 }
  0x82   : > { %11007 = vmatpush3.bf16.msra.mxu0 %v15168_v16 }
  0x83   : > { %11027 = vmatpush3.bf16.msra.mxu1 %v15175_v17  ;;  %11008 = vmatprep.subr.bf16.mxu0 %v20848_v38 }
  0x84   : > { %11028 = vmatprep.subr.bf16.mxu1 %v20848_v38 }
  0x86   : > { %11009 = vmatpush3.bf16.msra.mxu0 %v15181_v18 }
  0x87   : > { %11029 = vmatpush3.bf16.msra.mxu1 %v15186_v19  ;;  %11010 = vmatprep.subr.bf16.mxu0 %v20848_v38 }
  0x88   : > { %11030 = vmatprep.subr.bf16.mxu1 %v20848_v38 }
  0x8a   : > { %11011 = vmatpush3.bf16.msra.mxu0 %v15195_v20 }
  0x8b   : > { %11031 = vmatpush3.bf16.msra.mxu1 %v15200_v21  ;;  %11012 = vmatprep.subr.bf16.mxu0 %v20848_v38 }
  0x8c   : > { %11032 = vmatprep.subr.bf16.mxu1 %v20848_v38 }
  0x8e   : > { %11013 = vmatpush3.bf16.msra.mxu0 %v15209_v22 }
  0x8f   : > { %11033 = vmatpush3.bf16.msra.mxu1 %v15214_v23  ;;  %11014 = vmatprep.subr.bf16.mxu0 %v20848_v38 }
  0x90   : > { %11034 = vmatprep.subr.bf16.mxu1 %v20848_v38 }
  0x92   : > { %11015 = vmatpush3.bf16.msra.mxu0 %v15223_v24 }
  0x93   : > { %11035 = vmatpush3.bf16.msra.mxu1 %v15228_v25  ;;  %11040 = vmatprep.subr.bf16.mxu0 %v20848_v38 }
  0x94   : > { %11060 = vmatprep.subr.bf16.mxu1 %v20848_v38 }
  0x95   : > { %11017 = vmatmul.mubr.bf16.vlgmr.msra.gmra.mxu0 %v15235_v26 }
  0x96   : > { %11037 = vmatmul.mubr.bf16.vlgmr.msra.gmra.mxu1 %v15243_v28  ;;  %11041 = vmatpush3.bf16.msra.mxu0 %v15240_v27 }
  0x97   : > { %11061 = vmatpush3.bf16.msra.mxu1 %v15248_v29  ;;  %11042 = vmatprep.subr.bf16.mxu0 %v20848_v38 }
  0x98   : > { %11062 = vmatprep.subr.bf16.mxu1 %v20848_v38  ;;  %11056 = vmatprep.mubr.msk.bf16.mxu0 %vm14808_vm0, %v20848_v38 }
  0x99   : > { %11076 = vmatprep.mubr.msk.bf16.mxu1 %vm14808_vm0, %v20848_v38 }
  0x9a   : > { %11043 = vmatpush3.bf16.msra.mxu0 %v15257_v30 }
  0x9b   : > { %11063 = vmatpush3.bf16.msra.mxu1 %v15263_v31  ;;  %11044 = vmatprep.subr.bf16.mxu0 %v20848_v38 }
  0x9c   : > { %11064 = vmatprep.subr.bf16.mxu1 %v20848_v38 }
  0x9e   : > { %11045 = vmatpush3.bf16.msra.mxu0 %v15273_v32 }
  0x9f   : > { %11065 = vmatpush3.bf16.msra.mxu1 %v15280_v33  ;;  %11046 = vmatprep.subr.bf16.mxu0 %v20848_v38 }
  0xa0   : > { %11066 = vmatprep.subr.bf16.mxu1 %v20848_v38 }
  0xa2   : > { %11047 = vmatpush3.bf16.msra.mxu0 %v15291_v34 }
  0xa3   : > { %11067 = vmatpush3.bf16.msra.mxu1 %v15296_v35  ;;  %11048 = vmatprep.subr.bf16.mxu0 %v20848_v38 }
  0xa4   : > { %11068 = vmatprep.subr.bf16.mxu1 %v20848_v38 }
  0xa6   : > { %11049 = vmatpush3.bf16.msra.mxu0 %v15305_v36 }
  0xa7   : > { %11069 = vmatpush3.bf16.msra.mxu1 %v15310_v37  ;;  %11050 = vmatprep.subr.bf16.mxu0 %v20848_v38 }
  0xa8   : > { %11070 = vmatprep.subr.bf16.mxu1 %v20848_v38 }
  0xaa   : > { %11051 = vmatpush3.bf16.msra.mxu0 %v15319_v39 }
  0xab   : > { %11071 = vmatpush3.bf16.msra.mxu1 %v15324_v40  ;;  %11052 = vmatprep.subr.bf16.mxu0 %v20848_v38 }
  0xac   : > { %11072 = vmatprep.subr.bf16.mxu1 %v20848_v38 }
  0xae   : > { %11053 = vmatpush3.bf16.msra.mxu0 %v15333_v41 }
  0xaf   : > { %11073 = vmatpush3.bf16.msra.mxu1 %v15338_v42  ;;  %11054 = vmatprep.subr.bf16.mxu0 %v20848_v38 }
  0xb0   : > { %11074 = vmatprep.subr.bf16.mxu1 %v20848_v38 }
  0xb2   : > { %11055 = vmatpush3.bf16.msra.mxu0 %v15347_v43 }
  0xb3   : > { %11075 = vmatpush3.bf16.msra.mxu1 %v15352_v44  ;;  %11080 = vmatprep.subr.bf16.mxu0 %v20848_v38 }
  0xb4   : > { %11100 = vmatprep.subr.bf16.mxu1 %v20848_v38 }
  0xb5   : > { %11057 = vmatmul.mubr.bf16.vlgmr.msra.gmra.mxu0 %v8882_v45  ;;  %v15543_v45 = vld [vmem:[%s20758_s1 + $0xa0] sm:$0xff]  }
  0xb6   : > { %11077 = vmatmul.mubr.bf16.vlgmr.msra.gmra.mxu1 %v15365_v47  ;;  %11081 = vmatpush3.bf16.msra.mxu0 %v15362_v46  ;;  %21026 = vst [vmem:[#allocation10_spill] sm:$0xff] %v15543_v45 }
  0xb7   : > { %11101 = vmatpush3.bf16.msra.mxu1 %v15381_v49  ;;  %11082 = vmatprep.subr.bf16.mxu0 %v20848_v38 }
  0xb8   : > { %11102 = vmatprep.subr.bf16.mxu1 %v20848_v38  ;;  %11096 = vmatprep.mubr.msk.bf16.mxu0 %vm14808_vm0, %v20848_v38 }
  0xb9   : > { %11116 = vmatprep.mubr.msk.bf16.mxu1 %vm14808_vm0, %v20848_v38 }
  0xba   : > { %11083 = vmatpush3.bf16.msra.mxu0 %v15374_v48 }
  0xbb   : > { %11103 = vmatpush3.bf16.msra.mxu1 %v15399_v51  ;;  %11084 = vmatprep.subr.bf16.mxu0 %v20848_v38 }
  0xbc   : > { %11104 = vmatprep.subr.bf16.mxu1 %v20848_v38 }
  0xbe   : > { %11085 = vmatpush3.bf16.msra.mxu0 %v15389_v50 }
  0xbf   : > { %11105 = vmatpush3.bf16.msra.mxu1 %v15413_v53  ;;  %11086 = vmatprep.subr.bf16.mxu0 %v20848_v38 }
  0xc0   : > { %11106 = vmatprep.subr.bf16.mxu1 %v20848_v38 }
  0xc2   : > { %11087 = vmatpush3.bf16.msra.mxu0 %v15407_v52 }
  0xc3   : > { %11107 = vmatpush3.bf16.msra.mxu1 %v15427_v55  ;;  %11088 = vmatprep.subr.bf16.mxu0 %v20848_v38 }
  0xc4   : > { %11108 = vmatprep.subr.bf16.mxu1 %v20848_v38 }
  0xc6   : > { %11089 = vmatpush3.bf16.msra.mxu0 %v15421_v54 }
  0xc7   : > { %11109 = vmatpush3.bf16.msra.mxu1 %v15441_v57  ;;  %11090 = vmatprep.subr.bf16.mxu0 %v20848_v38 }
  0xc8   : > { %11110 = vmatprep.subr.bf16.mxu1 %v20848_v38 }
  0xca   : > { %11091 = vmatpush3.bf16.msra.mxu0 %v15435_v56 }
  0xcb   : > { %11111 = vmatpush3.bf16.msra.mxu1 %v15455_v59  ;;  %11092 = vmatprep.subr.bf16.mxu0 %v20848_v38 }
  0xcc   : > { %11112 = vmatprep.subr.bf16.mxu1 %v20848_v38 }
  0xce   : > { %11093 = vmatpush3.bf16.msra.mxu0 %v15449_v58 }
  0xcf   : > { %11113 = vmatpush3.bf16.msra.mxu1 %v15469_v61  ;;  %11094 = vmatprep.subr.bf16.mxu0 %v20848_v38 }
  0xd0   : > { %11114 = vmatprep.subr.bf16.mxu1 %v20848_v38 }
  0xd2   : > { %11095 = vmatpush3.bf16.msra.mxu0 %v15463_v60 }
  0xd3   : > { %11115 = vmatpush3.bf16.msra.mxu1 %v15481_v63  ;;  %11120 = vmatprep.subr.bf16.mxu0 %v20848_v38  ;;  %v15597_v63 = vld [vmem:[%s20758_s1 + $0xf8] sm:$0xff]  }
  0xd4   : > { %11140 = vmatprep.subr.bf16.mxu1 %v20848_v38 }
  0xd5   : > { %11097 = vmatmul.mubr.bf16.vlgmr.msra.gmra.mxu0 %v15475_v62 }
  0xd6   : > { %11117 = vmatmul.mubr.bf16.vlgmr.msra.gmra.mxu1 %v15115_v8  ;;  %11121 = vmatpush3.bf16.msra.mxu0 %v15491_v0  ;;  %v15529_v8 = vld [vmem:[%s20758_s1 + $0xa8] sm:$0xff]  }
  0xd7   : > { %11141 = vmatpush3.bf16.msra.mxu1 %v15497_v1  ;;  %11122 = vmatprep.subr.bf16.mxu0 %v20848_v38  ;;  %21025 = vst [vmem:[#allocation9_spill] sm:$0xff] %v15529_v8  ;;  %v15588_v1 = vld [vmem:[%s15034_s14 + $0xc] sm:$0xf] }
  0xd8   : > { %11142 = vmatprep.subr.bf16.mxu1 %v20848_v38  ;;  %11136 = vmatprep.mubr.msk.bf16.mxu0 %vm14808_vm0, %v20848_v38  ;;  %21028 = vst [vmem:[#allocation12_spill] sm:$0xff] %v15588_v1 }
  0xd9   : > { %11156 = vmatprep.mubr.msk.bf16.mxu1 %vm14808_vm0, %v20848_v38 }
  0xda   : > { %11123 = vmatpush3.bf16.msra.mxu0 %v15509_v3 }
  0xdb   : > { %11143 = vmatpush3.bf16.msra.mxu1 %v15515_v5  ;;  %11124 = vmatprep.subr.bf16.mxu0 %v20848_v38  ;;  %v15557_v5 = vld [vmem:[%s20758_s1 + $0x98] sm:$0xff]  }
  0xdc   : > { %11144 = vmatprep.subr.bf16.mxu1 %v20848_v38  ;;  %21027 = vst [vmem:[#allocation11_spill] sm:$0xff] %v15557_v5 }
  0xde   : > { %11125 = vmatpush3.bf16.msra.mxu0 %v15523_v7 }
  0xdf   : > { %11145 = vmatpush3.bf16.msra.mxu1 %v15529_v8  ;;  %11126 = vmatprep.subr.bf16.mxu0 %v20848_v38  ;;  %v15551_v8 = vld [vmem:[%s20758_s1 + $0x18] sm:$0xff]  }
  0xe0   : > { %11146 = vmatprep.subr.bf16.mxu1 %v20848_v38 }
  0xe2   : > { %11127 = vmatpush3.bf16.msra.mxu0 %v15537_v9 }
  0xe3   : > { %11147 = vmatpush3.bf16.msra.mxu1 %v15543_v45  ;;  %11128 = vmatprep.subr.bf16.mxu0 %v20848_v38  ;;  %v15565_v45 = vld [vmem:[%s20758_s1 + $0x10] sm:$0xff]  }
  0xe4   : > { %11148 = vmatprep.subr.bf16.mxu1 %v20848_v38 }
  0xe6   : > { %11129 = vmatpush3.bf16.msra.mxu0 %v15551_v8 }
  0xe7   : > { %11149 = vmatpush3.bf16.msra.mxu1 %v15557_v5  ;;  %11130 = vmatprep.subr.bf16.mxu0 %v20848_v38  ;;  %v15574_v5 = vld [vmem:[%s20758_s1 + $0x8] sm:$0xff]  }
  0xe8   : > { %11150 = vmatprep.subr.bf16.mxu1 %v20848_v38 }
  0xea   : > { %11131 = vmatpush3.bf16.msra.mxu0 %v15565_v45 }
  0xeb   : > { %11151 = vmatpush3.bf16.msra.mxu1 %v15085_v2  ;;  %11132 = vmatprep.subr.bf16.mxu0 %v20848_v38  ;;  %v15583_v2 = vld [vmem:[%s20758_s1] sm:$0xff]  }
  0xec   : > { %11152 = vmatprep.subr.bf16.mxu1 %v20848_v38 }
  0xee   : > { %11133 = vmatpush3.bf16.msra.mxu0 %v15574_v5 }
  0xef   : > { %11153 = vmatpush3.bf16.msra.mxu1 %v15096_v4  ;;  %11134 = vmatprep.subr.bf16.mxu0 %v20848_v38  ;;  %v14371_v4 = vld [vmem:[%s15034_s14 + $0x4] sm:$0xf] }
  0xf0   : > { %11154 = vmatprep.subr.bf16.mxu1 %v20848_v38 }
  0xf2   : > { %11135 = vmatpush3.bf16.msra.mxu0 %v15583_v2 }
  0xf3   : > { %11155 = vmatpush3.bf16.msra.mxu1 %v15107_v6  ;;  %11160 = vmatprep.subr.bf16.mxu0 %v20848_v38  ;;  %v15610_v6 = vld [vmem:[%s20758_s1 + $0xf0] sm:$0xff]  }
  0xf4   : > { %11180 = vmatprep.subr.bf16.mxu1 %v20848_v38 }
  0xf5   : > { %11137 = vmatmul.mubr.bf16.vlgmr.msra.gmra.mxu0 %v14371_v4 }
  0xf6   : > { %11157 = vmatmul.mubr.bf16.vlgmr.msra.gmra.mxu1 %v15588_v1  ;;  %11161 = vmatpush3.bf16.msra.mxu0 %v15597_v63 }
  0xf7   : > { %11181 = vmatpush3.bf16.msra.mxu1 %v15122_v10  ;;  %11162 = vmatprep.subr.bf16.mxu0 %v20848_v38  ;;  %v15619_v10 = vld [vmem:[%s20758_s1 + $0xe8] sm:$0xff]  }
  0xf8   : > { %11182 = vmatprep.subr.bf16.mxu1 %v20848_v38  ;;  %11176 = vmatprep.mubr.msk.bf16.mxu0 %vm14808_vm0, %v20848_v38 }
  0xf9   : > { %11196 = vmatprep.mubr.msk.bf16.mxu1 %vm14808_vm0, %v20848_v38 }
  0xfa   : > { %11163 = vmatpush3.bf16.msra.mxu0 %v15610_v6 }
  0xfb   : > { %11183 = vmatpush3.bf16.msra.mxu1 %v15136_v12  ;;  %11164 = vmatprep.subr.bf16.mxu0 %v20848_v38  ;;  %v15628_v12 = vld [vmem:[%s20758_s1 + $0xe0] sm:$0xff]  }
  0xfc   : > { %11184 = vmatprep.subr.bf16.mxu1 %v20848_v38 }
  0xfe   : > { %11165 = vmatpush3.bf16.msra.mxu0 %v15619_v10 }
  0xff   : > { %11185 = vmatpush3.bf16.msra.mxu1 %v15154_v14  ;;  %11166 = vmatprep.subr.bf16.mxu0 %v20848_v38  ;;  %v15637_v14 = vld [vmem:[%s20758_s1 + $0xd8] sm:$0xff]  }
 0x100   : > { %11186 = vmatprep.subr.bf16.mxu1 %v20848_v38 }
 0x102   : > { %11167 = vmatpush3.bf16.msra.mxu0 %v15628_v12 }
 0x103   : > { %11187 = vmatpush3.bf16.msra.mxu1 %v15168_v16  ;;  %11168 = vmatprep.subr.bf16.mxu0 %v20848_v38  ;;  %v15646_v16 = vld [vmem:[%s20758_s1 + $0xd0] sm:$0xff]  }
 0x104   : > { %11188 = vmatprep.subr.bf16.mxu1 %v20848_v38 }
 0x106   : > { %11169 = vmatpush3.bf16.msra.mxu0 %v15637_v14 }
 0x107   : > { %11189 = vmatpush3.bf16.msra.mxu1 %v15181_v18  ;;  %11170 = vmatprep.subr.bf16.mxu0 %v20848_v38  ;;  %v15655_v18 = vld [vmem:[%s20758_s1 + $0xc8] sm:$0xff]  }
 0x108   : > { %11190 = vmatprep.subr.bf16.mxu1 %v20848_v38 }
 0x10a   : > { %11171 = vmatpush3.bf16.msra.mxu0 %v15646_v16 }
 0x10b   : > { %11191 = vmatpush3.bf16.msra.mxu1 %v15195_v20  ;;  %11172 = vmatprep.subr.bf16.mxu0 %v20848_v38  ;;  %v15664_v20 = vld [vmem:[%s20758_s1 + $0xc0] sm:$0xff]  }
 0x10c   : > { %11192 = vmatprep.subr.bf16.mxu1 %v20848_v38 }
 0x10e   : > { %11173 = vmatpush3.bf16.msra.mxu0 %v15655_v18 }
 0x10f   : > { %11193 = vmatpush3.bf16.msra.mxu1 %v15209_v22  ;;  %11174 = vmatprep.subr.bf16.mxu0 %v20848_v38 }
 0x110   : > { %11194 = vmatprep.subr.bf16.mxu1 %v20848_v38 }
 0x112   : > { %11175 = vmatpush3.bf16.msra.mxu0 %v15664_v20 }
 0x113   : > { %11195 = vmatpush3.bf16.msra.mxu1 %v15223_v24  ;;  %11200 = vmatprep.subr.bf16.mxu0 %v20848_v38 }
 0x114   : > { %11220 = vmatprep.subr.bf16.mxu1 %v20848_v38 }
 0x115   : > { %v651_v4 = vpop.f32.mrf.mxu0  ;;  %11177 = vmatmul.mubr.bf16.vlgmr.msra.gmra.mxu0 %v15235_v26 }
 0x116   : > { %v739_v22 = vpop.f32.mrf.mxu1  ;;  %11197 = vmatmul.mubr.bf16.vlgmr.msra.gmra.mxu1 %v15243_v28  ;;  %11201 = vmatpush3.bf16.msra.mxu0 %v15128_v11 }
 0x117   : > { %v740_v1 = vadd.f32 %v739_v22, %v651_v4  ;;  %11221 = vmatpush3.bf16.msra.mxu1 %v15240_v27  ;;  %v10938_v61 = vpop.f32.mrf.mxu0  ;;  %11202 = vmatprep.subr.bf16.mxu0 %v20848_v38 }
 0x118   : > { %v10958_v59 = vpop.f32.mrf.mxu1  ;;  %11222 = vmatprep.subr.bf16.mxu1 %v20848_v38  ;;  %11216 = vmatprep.mubr.msk.bf16.mxu0 %vm14808_vm0, %v20848_v38 }
 0x119   : > { %v654_v24 = vpop.f32.mrf.mxu0  ;;  %11236 = vmatprep.mubr.msk.bf16.mxu1 %vm14808_vm0, %v20848_v38 }
 0x11a   : > { %v742_v26 = vpop.f32.mrf.mxu1  ;;  %11203 = vmatpush3.bf16.msra.mxu0 %v15143_v13  ;;  %v15706_v13 = vld [vmem:[%s15034_s14 + $0x24] sm:$0xf] }
 0x11b   : > { %11223 = vmatpush3.bf16.msra.mxu1 %v15257_v30  ;;  %v10939_v11 = vpop.f32.mrf.mxu0  ;;  %11204 = vmatprep.subr.bf16.mxu0 %v20848_v38  ;;  %v14230_v24 = vld [vmem:[%s20760_s3 + $0x78] sm:$0xff]   ;;  %v14231_v26 = vld [vmem:[%s20760_s3 + $0x70] sm:$0xff]  }
 0x11c   : > { %v10959_v27 = vpop.f32.mrf.mxu1  ;;  %11224 = vmatprep.subr.bf16.mxu1 %v20848_v38  ;;  %v14232_v11 = vld [vmem:[%s20760_s3 + $0x68] sm:$0xff]  }
 0x11d   : > { %v14233_v27 = vld [vmem:[%s20760_s3 + $0x60] sm:$0xff]  }
 0x11e   : > { %11205 = vmatpush3.bf16.msra.mxu0 %v15161_v15 }
 0x11f   : > { %11225 = vmatpush3.bf16.msra.mxu1 %v15273_v32  ;;  %11206 = vmatprep.subr.bf16.mxu0 %v20848_v38 }
 0x120   : > { %11226 = vmatprep.subr.bf16.mxu1 %v20848_v38 }
 0x122   : > { %11207 = vmatpush3.bf16.msra.mxu0 %v15175_v17 }
 0x123   : > { %11227 = vmatpush3.bf16.msra.mxu1 %v15291_v34  ;;  %11208 = vmatprep.subr.bf16.mxu0 %v20848_v38 }
 0x124   : > { %11228 = vmatprep.subr.bf16.mxu1 %v20848_v38 }
 0x126   : > { %11209 = vmatpush3.bf16.msra.mxu0 %v15186_v19 }
 0x127   : > { %11229 = vmatpush3.bf16.msra.mxu1 %v15305_v36  ;;  %11210 = vmatprep.subr.bf16.mxu0 %v20848_v38 }
 0x128   : > { %11230 = vmatprep.subr.bf16.mxu1 %v20848_v38 }
 0x12a   : > { %11211 = vmatpush3.bf16.msra.mxu0 %v15200_v21 }
 0x12b   : > { %11231 = vmatpush3.bf16.msra.mxu1 %v15319_v39  ;;  %11212 = vmatprep.subr.bf16.mxu0 %v20848_v38 }
 0x12c   : > { %11232 = vmatprep.subr.bf16.mxu1 %v20848_v38 }
 0x12e   : > { %11213 = vmatpush3.bf16.msra.mxu0 %v15214_v23 }
 0x12f   : > { %11233 = vmatpush3.bf16.msra.mxu1 %v15333_v41  ;;  %11214 = vmatprep.subr.bf16.mxu0 %v20848_v38 }
 0x130   : > { %11234 = vmatprep.subr.bf16.mxu1 %v20848_v38 }
 0x132   : > { %11215 = vmatpush3.bf16.msra.mxu0 %v15228_v25 }
 0x133   : > { %11235 = vmatpush3.bf16.msra.mxu1 %v15347_v43  ;;  %11240 = vmatprep.subr.bf16.mxu0 %v20848_v38  ;;  %v14224_v43 = vld [vmem:[%s20760_s3 + $0x28] sm:$0xff]  }
 0x134   : > { %11260 = vmatprep.subr.bf16.mxu1 %v20848_v38 }
 0x135   : > { %v844_v15 = vpop.f32.mrf.mxu0  ;;  %11217 = vmatmul.mubr.bf16.vlgmr.msra.gmra.mxu0 %v15706_v13 }
 0x136   : > { %v850_v17 = vadd.f32 %v844_v15, %v740_v1  ;;  %v950_v19 = vpop.f32.mrf.mxu1  ;;  %11237 = vmatmul.mubr.bf16.vlgmr.msra.gmra.mxu1 %v15365_v47  ;;  %11241 = vmatpush3.bf16.msra.mxu0 %v15248_v29  ;;  %v14226_v47 = vld [vmem:[%s20760_s3 + $0x18] sm:$0xff]  }
 0x137   : > { %11261 = vmatpush3.bf16.msra.mxu1 %v15362_v46  ;;  %v10978_v21 = vpop.f32.mrf.mxu0  ;;  %11242 = vmatprep.subr.bf16.mxu0 %v20848_v38  ;;  %v14225_v46 = vld [vmem:[%s20760_s3 + $0x20] sm:$0xff]  }
 0x138   : > { %v15716_v23 = vadd.f32 %v950_v19, %v850_v17  ;;  %v10998_v25 = vpop.f32.mrf.mxu1  ;;  %11262 = vmatprep.subr.bf16.mxu1 %v20848_v38  ;;  %11256 = vmatprep.mubr.msk.bf16.mxu0 %vm14808_vm0, %v20848_v38  ;;  %v14234_v17 = vld [vmem:[%s20760_s3 + $0x58] sm:$0xff]  }
 0x139   : > { %v847_v28 = vpop.f32.mrf.mxu0  ;;  %11276 = vmatprep.mubr.msk.bf16.mxu1 %vm14808_vm0, %v20848_v38 }
 0x13a   : > { %v953_v30 = vpop.f32.mrf.mxu1  ;;  %11243 = vmatpush3.bf16.msra.mxu0 %v15263_v31  ;;  %v15750_v31 = vld [vmem:[%s15034_s14 + $0x3c] sm:$0xf] }
 0x13b   : > { %11263 = vmatpush3.bf16.msra.mxu1 %v15374_v48  ;;  %v10979_v29 = vpop.f32.mrf.mxu0  ;;  %11244 = vmatprep.subr.bf16.mxu0 %v20848_v38  ;;  %v14227_v48 = vld [vmem:[%s20760_s3 + $0x10] sm:$0xff]  }
 0x13c   : > { %v10999_v32 = vpop.f32.mrf.mxu1  ;;  %11264 = vmatprep.subr.bf16.mxu1 %v20848_v38  ;;  %v14235_v28 = vld [vmem:[%s20760_s3 + $0x50] sm:$0xff]  }
 0x13e   : > { %11245 = vmatpush3.bf16.msra.mxu0 %v15280_v33  ;;  %v14222_v33 = vld [vmem:[%s20760_s3 + $0x38] sm:$0xff]  }
 0x13f   : > { %11265 = vmatpush3.bf16.msra.mxu1 %v15389_v50  ;;  %11246 = vmatprep.subr.bf16.mxu0 %v20848_v38  ;;  %v14228_v50 = vld [vmem:[%s20760_s3 + $0x8] sm:$0xff]  }
 0x140   : > { %11266 = vmatprep.subr.bf16.mxu1 %v20848_v38 }
 0x142   : > { %11247 = vmatpush3.bf16.msra.mxu0 %v15296_v35 }
 0x143   : > { %11267 = vmatpush3.bf16.msra.mxu1 %v15407_v52  ;;  %11248 = vmatprep.subr.bf16.mxu0 %v20848_v38  ;;  %v14229_v52 = vld [vmem:[%s20760_s3] sm:$0xff]  }
 0x144   : > { %11268 = vmatprep.subr.bf16.mxu1 %v20848_v38 }
 0x146   : > { %11249 = vmatpush3.bf16.msra.mxu0 %v15310_v37  ;;  %v14223_v37 = vld [vmem:[%s20760_s3 + $0x30] sm:$0xff]  }
 0x147   : > { %11269 = vmatpush3.bf16.msra.mxu1 %v15421_v54  ;;  %11250 = vmatprep.subr.bf16.mxu0 %v20848_v38 }
 0x148   : > { %11270 = vmatprep.subr.bf16.mxu1 %v20848_v38 }
 0x14a   : > { %11251 = vmatpush3.bf16.msra.mxu0 %v15324_v40 }
 0x14b   : > { %11271 = vmatpush3.bf16.msra.mxu1 %v15435_v56  ;;  %11252 = vmatprep.subr.bf16.mxu0 %v20848_v38 }
 0x14c   : > { %11272 = vmatprep.subr.bf16.mxu1 %v20848_v38 }
 0x14e   : > { %11253 = vmatpush3.bf16.msra.mxu0 %v15338_v42 }
 0x14f   : > { %11273 = vmatpush3.bf16.msra.mxu1 %v15449_v58  ;;  %11254 = vmatprep.subr.bf16.mxu0 %v20848_v38 }
 0x150   : > { %11274 = vmatprep.subr.bf16.mxu1 %v20848_v38 }
 0x152   : > { %11255 = vmatpush3.bf16.msra.mxu0 %v15352_v44 }
 0x153   : > { %11275 = vmatpush3.bf16.msra.mxu1 %v15463_v60  ;;  %11280 = vmatprep.subr.bf16.mxu0 %v20848_v38 }
 0x154   : > { %11300 = vmatprep.subr.bf16.mxu1 %v20848_v38 }
 0x155   : > { %v1056_v34 = vpop.f32.mrf.mxu0  ;;  %11257 = vmatmul.mubr.bf16.vlgmr.msra.gmra.mxu0 %v15475_v62 }
 0x156   : > { %v1162_v35 = vpop.f32.mrf.mxu1  ;;  %11277 = vmatmul.mubr.bf16.vlgmr.msra.gmra.mxu1 %v15750_v31  ;;  %11296 = vmatprep.mubr.msk.bf16.mxu0 %vm14808_vm0, %v20848_v38  ;;  %v1062_v15 = vadd.f32 %v1056_v34, %v15716_v23  ;;  %v15819_v23 = vld [vmem:[%s20759_s2] ss:$0 sm:$0xff] }
 0x157   : > { %v11018_v36 = vpop.f32.mrf.mxu0  ;;  %11301 = vmatpush3.bf16.msra.mxu1 %v14222_v33  ;;  %11316 = vmatprep.mubr.msk.bf16.mxu1 %vm14808_vm0, %v20848_v38 }
 0x158   : > { %v11038_v39 = vpop.f32.mrf.mxu1  ;;  %11302 = vmatprep.subr.bf16.mxu1 %v20848_v38  ;;  %11281 = vmatpush3.bf16.msra.mxu0 %v14230_v24  ;;  %v1168_v19 = vadd.f32 %v1162_v35, %v1062_v15  ;;  %v14236_v36 = vld [vmem:[%s20760_s3 + $0x48] sm:$0xff]  }
 0x159   : > { %v1059_v40 = vpop.f32.mrf.mxu0  ;;  %11282 = vmatprep.subr.bf16.mxu0 %v20848_v38 }
 0x15a   : > { %v1165_v41 = vpop.f32.mrf.mxu1 }
 0x15b   : > { %v11019_v42 = vpop.f32.mrf.mxu0  ;;  %11303 = vmatpush3.bf16.msra.mxu1 %v14223_v37 }
 0x15c   : > { %v11039_v44 = vpop.f32.mrf.mxu1  ;;  %11304 = vmatprep.subr.bf16.mxu1 %v20848_v38  ;;  %11283 = vmatpush3.bf16.msra.mxu0 %v14231_v26 }
 0x15d   : > { %11284 = vmatprep.subr.bf16.mxu0 %v20848_v38  ;;  %v14237_v44 = vld [vmem:[%s20760_s3 + $0x40] sm:$0xff]  }
 0x15f   : > { %11305 = vmatpush3.bf16.msra.mxu1 %v14224_v43 }
 0x160   : > { %11306 = vmatprep.subr.bf16.mxu1 %v20848_v38  ;;  %11285 = vmatpush3.bf16.msra.mxu0 %v14232_v11  ;;  %v15921_v11 = vld [vmem:[%s20758_s1 + $0x148] sm:$0xff]  }
 0x161   : > { %11286 = vmatprep.subr.bf16.mxu0 %v20848_v38 }
 0x163   : > { %11307 = vmatpush3.bf16.msra.mxu1 %v14225_v46 }
 0x164   : > { %11308 = vmatprep.subr.bf16.mxu1 %v20848_v38  ;;  %11287 = vmatpush3.bf16.msra.mxu0 %v14233_v27 }
 0x165   : > { %11288 = vmatprep.subr.bf16.mxu0 %v20848_v38 }
 0x167   : > { %11309 = vmatpush3.bf16.msra.mxu1 %v14226_v47 }
 0x168   : > { %11310 = vmatprep.subr.bf16.mxu1 %v20848_v38  ;;  %11289 = vmatpush3.bf16.msra.mxu0 %v14234_v17 }
 0x169   : > { %11290 = vmatprep.subr.bf16.mxu0 %v20848_v38 }
 0x16b   : > { %11311 = vmatpush3.bf16.msra.mxu1 %v14227_v48 }
 0x16c   : > { %11312 = vmatprep.subr.bf16.mxu1 %v20848_v38  ;;  %11291 = vmatpush3.bf16.msra.mxu0 %v14235_v28  ;;  %v15939_v28 = vld [vmem:[%s20758_s1 + $0x1f8] sm:$0xff]  }
 0x16d   : > { %11292 = vmatprep.subr.bf16.mxu0 %v20848_v38 }
 0x16f   : > { %11313 = vmatpush3.bf16.msra.mxu1 %v14228_v50 }
 0x170   : > { %11314 = vmatprep.subr.bf16.mxu1 %v20848_v38  ;;  %11293 = vmatpush3.bf16.msra.mxu0 %v14236_v36 }
 0x171   : > { %11294 = vmatprep.subr.bf16.mxu0 %v20848_v38 }
 0x173   : > { %11315 = vmatpush3.bf16.msra.mxu1 %v14229_v52 }
 0x174   : > { %11340 = vmatprep.subr.bf16.mxu1 %v20848_v38  ;;  %11295 = vmatpush3.bf16.msra.mxu0 %v14237_v44 }
 0x175   : > { %v1268_v54 = vpop.f32.mrf.mxu0  ;;  %11320 = vmatprep.subr.bf16.mxu0 %v20848_v38 }
 0x176   : > { %v1374_v56 = vpop.f32.mrf.mxu1  ;;  %v1274_v21 = vadd.f32 %v1268_v54, %v1168_v19 }
 0x177   : > { %v11058_v58 = vpop.f32.mrf.mxu0 }
 0x178   : > { %v11078_v59 = vpop.f32.mrf.mxu1  ;;  %v1380_v25 = vadd.f32 %v1374_v56, %v1274_v21  ;;  %v15928_v21 = vld [vmem:[%s20758_s1 + $0x140] sm:$0xff]  }
 0x179   : > { %v1271_v61 = vpop.f32.mrf.mxu0  ;;  %v15900_v59 = vld [vmem:[%s20758_s1 + $0x160] sm:$0xff]  }
 0x17a   : > { %v1377_v1 = vpop.f32.mrf.mxu1  ;;  %v15907_v61 = vld [vmem:[%s20758_s1 + $0x158] sm:$0xff]  }
 0x17b   : > { %v11059_v4 = vpop.f32.mrf.mxu0  ;;  %v15914_v1 = vld [vmem:[%s20758_s1 + $0x150] sm:$0xff]  }
 0x17c   : > { %v11079_v22 = vpop.f32.mrf.mxu1 }
 0x195   : > { %v1480_v30 = vpop.f32.mrf.mxu0 }
 0x196   : > { %v1486_v29 = vadd.f32 %v1480_v30, %v1380_v25  ;;  %v1548_v32 = vpop.f32.mrf.mxu1  ;;  %v15933_v25 = vld [vmem:[%s15034_s14 + $0x28] sm:$0xf]  ;;  %v15948_v30 = vld [vmem:[%s20758_s1 + $0x1f0] sm:$0xff]  }
 0x197   : > { %v11098_v33 = vpop.f32.mrf.mxu0 }
 0x198   : > { %v1493_v34 = vadd.f32 %v15819_v23, %v1486_v29  ;;  %v11118_v35 = vpop.f32.mrf.mxu1 }
 0x199   : > { %v1483_v37 = vpop.f32.mrf.mxu0  ;;  %v15963_v35 = vld [vmem:[%s20758_s1 + $0x1e0] sm:$0xff]  }
 0x19a   : > { %vm1494_vm1 = vcmp.ge.f32.partialorder %v1493_v34, 0.0  ;;  %v1495_v39 = vmul.f32 0.2, %v1493_v34  ;;  %v1551_v40 = vpop.f32.mrf.mxu1  ;;  %21030 = vst [vmem:[#allocation14_spill] sm:$0xff] %v15963_v35  ;;  %v15970_v37 = vld [vmem:[%s20758_s1 + $0x1d8] sm:$0xff]  }
 0x19b   : > { %v11099_v41 = vpop.f32.mrf.mxu0  ;;  %21031 = vst [vmem:[#allocation15_spill] sm:$0xff] %v15970_v37 }
 0x19c   : > { %v1496_v42 = vsel %vm1494_vm1, %v1493_v34, %v1495_v39  ;;  %v11119_v43 = vpop.f32.mrf.mxu1 }
 0x19d   : > { %v1497_v46 = vpack.c.bf16 %v1496_v42, %v1496_v42 }
 0x19f   : > { %11317 = vmatmul.mubr.bf16.vlgmr.msra.gmra.mxu1 %v1497_v46  ;;  %v15977_v46 = vld [vmem:[%s20758_s1 + $0x1d0] sm:$0xff]  }
 0x1a0   : > { %11341 = vmatpush3.bf16.msra.mxu1 %v15491_v0  ;;  %11356 = vmatprep.mubr.msk.bf16.mxu1 %vm14808_vm0, %v20848_v38  ;;  %21032 = vst [vmem:[#allocation16_spill] sm:$0xff] %v15977_v46 }
 0x1a1   : > { %11342 = vmatprep.subr.bf16.mxu1 %v20848_v38 }
 0x1a4   : > { %11343 = vmatpush3.bf16.msra.mxu1 %v15509_v3 }
 0x1a5   : > { %11344 = vmatprep.subr.bf16.mxu1 %v20848_v38 }
 0x1a8   : > { %11345 = vmatpush3.bf16.msra.mxu1 %v15523_v7 }
 0x1a9   : > { %11346 = vmatprep.subr.bf16.mxu1 %v20848_v38 }
 0x1ac   : > { %11347 = vmatpush3.bf16.msra.mxu1 %v15537_v9 }
 0x1ad   : > { %11348 = vmatprep.subr.bf16.mxu1 %v20848_v38 }
 0x1b0   : > { %11349 = vmatpush3.bf16.msra.mxu1 %v15551_v8 }
 0x1b1   : > { %11350 = vmatprep.subr.bf16.mxu1 %v20848_v38 }
 0x1b4   : > { %11351 = vmatpush3.bf16.msra.mxu1 %v15565_v45  ;;  %v14380_v45 = vld [vmem:[%s15034_s14 + $0x8] sm:$0xf] }
 0x1b5   : > { %v1588_v0 = vpop.f32.mrf.mxu0  ;;  %11352 = vmatprep.subr.bf16.mxu1 %v20848_v38 }
 0x1b6   : > { %v1589_v3 = vadd.f32 %v1588_v0, %v1548_v32  ;;  %v1628_v47 = vpop.f32.mrf.mxu1  ;;  %v15956_v32 = vld [vmem:[%s20758_s1 + $0x1e8] sm:$0xff]  }
 0x1b7   : > { %v11138_v48 = vpop.f32.mrf.mxu0  ;;  %21029 = vst [vmem:[#allocation13_spill] sm:$0xff] %v15956_v32 }
 0x1b8   : > { %v15845_v7 = vadd.f32 %v1628_v47, %v1589_v3  ;;  %v11158_v50 = vpop.f32.mrf.mxu1  ;;  %11353 = vmatpush3.bf16.msra.mxu1 %v15574_v5 }
 0x1b9   : > { %v1591_v9 = vpop.f32.mrf.mxu0  ;;  %11354 = vmatprep.subr.bf16.mxu1 %v20848_v38 }
 0x1ba   : > { %v1631_v8 = vpop.f32.mrf.mxu1  ;;  %v15985_v9 = vld [vmem:[%s20758_s1 + $0x1c8] sm:$0xff]  }
 0x1bb   : > { %v11139_v52 = vpop.f32.mrf.mxu0  ;;  %21033 = vst [vmem:[#allocation17_spill] sm:$0xff] %v15985_v9 }
 0x1bc   : > { %v11159_v54 = vpop.f32.mrf.mxu1  ;;  %11355 = vmatpush3.bf16.msra.mxu1 %v15583_v2 }
 0x1bd   : > { %11380 = vmatprep.subr.bf16.mxu1 %v20848_v38  ;;  %v15992_v54 = vld [vmem:[%s20758_s1 + $0x1c0] sm:$0xff]  }
 0x1be   : > { %21034 = vst [vmem:[#allocation18_spill] sm:$0xff] %v15992_v54 }
 0x1bf   : > { %11357 = vmatmul.mubr.bf16.vlgmr.msra.gmra.mxu1 %v14380_v45  ;;  %v21036_v45 = vld [vmem:[#allocation5_spill] sm:$0xff] }
 0x1c0   : > { %11381 = vmatpush3.bf16.msra.mxu1 %v15597_v63  ;;  %11396 = vmatprep.mubr.msk.bf16.mxu1 %vm14808_vm0, %v20848_v38 }
 0x1c1   : > { %11382 = vmatprep.subr.bf16.mxu1 %v20848_v38 }
 0x1c4   : > { %11383 = vmatpush3.bf16.msra.mxu1 %v15610_v6 }
 0x1c5   : > { %11384 = vmatprep.subr.bf16.mxu1 %v20848_v38 }
 0x1c8   : > { %11385 = vmatpush3.bf16.msra.mxu1 %v15619_v10 }
 0x1c9   : > { %11386 = vmatprep.subr.bf16.mxu1 %v20848_v38 }
 0x1cc   : > { %11387 = vmatpush3.bf16.msra.mxu1 %v15628_v12 }
 0x1cd   : > { %11388 = vmatprep.subr.bf16.mxu1 %v20848_v38 }
 0x1d0   : > { %11389 = vmatpush3.bf16.msra.mxu1 %v15637_v14  ;;  %v15871_v14 = vld [vmem:[%s15034_s14 + $0x20] sm:$0xf] }
 0x1d1   : > { %11390 = vmatprep.subr.bf16.mxu1 %v20848_v38 }
 0x1d4   : > { %11391 = vmatpush3.bf16.msra.mxu1 %v15646_v16  ;;  %v15877_v16 = vld [vmem:[%s20758_s1 + $0x178] sm:$0xff]  }
 0x1d5   : > { %v1669_v63 = vpop.f32.mrf.mxu0  ;;  %11392 = vmatprep.subr.bf16.mxu1 %v20848_v38 }
 0x1d6   : > { %v1710_v5 = vpop.f32.mrf.mxu1  ;;  %v1675_v29 = vadd.f32 %v1669_v63, %v15845_v7  ;;  %v21041_v63 = vld [vmem:[#allocation9_spill] sm:$0xff] }
 0x1d7   : > { %v11178_v2 = vpop.f32.mrf.mxu0 }
 0x1d8   : > { %v11198_v6 = vpop.f32.mrf.mxu1  ;;  %11393 = vmatpush3.bf16.msra.mxu1 %v15655_v18  ;;  %v15886_v18 = vld [vmem:[%s20758_s1 + $0x170] sm:$0xff]   ;;  %v1716_v33 = vadd.f32 %v1710_v5, %v1675_v29  ;;  %v21043_v2 = vld [vmem:[#allocation11_spill] sm:$0xff] }
 0x1d9   : > { %v1672_v10 = vpop.f32.mrf.mxu0  ;;  %11394 = vmatprep.subr.bf16.mxu1 %v20848_v38  ;;  %v21042_v5 = vld [vmem:[#allocation10_spill] sm:$0xff] }
 0x1da   : > { %v1713_v12 = vpop.f32.mrf.mxu1  ;;  %v16033_v6 = vld [vmem:[%s20758_s1 + $0x90] sm:$0xff]   ;;  %v16040_v10 = vld [vmem:[%s20758_s1 + $0x88] sm:$0xff]  }
 0x1db   : > { %v11179_v56 = vpop.f32.mrf.mxu0  ;;  %v16047_v12 = vld [vmem:[%s20758_s1 + $0x80] sm:$0xff]   ;;  %v16097_v29 = vld [vmem:[%s20758_s1 + $0x110] sm:$0xff]  }
 0x1dc   : > { %v11199_v58 = vpop.f32.mrf.mxu1  ;;  %11395 = vmatpush3.bf16.msra.mxu1 %v15664_v20  ;;  %v15893_v20 = vld [vmem:[%s20758_s1 + $0x168] sm:$0xff]   ;;  %v16051_v56 = vld [vmem:[%s15034_s14 + $0x10] sm:$0xf] }
 0x1dd   : > { %11420 = vmatprep.subr.bf16.mxu1 %v20848_v38 }
 0x1df   : > { %11397 = vmatmul.mubr.bf16.vlgmr.msra.gmra.mxu1 %v15871_v14 }
 0x1e0   : > { %11421 = vmatpush3.bf16.msra.mxu1 %v15877_v16  ;;  %11436 = vmatprep.mubr.msk.bf16.mxu1 %vm14808_vm0, %v20848_v38 }
 0x1e1   : > { %11422 = vmatprep.subr.bf16.mxu1 %v20848_v38 }
 0x1e4   : > { %11423 = vmatpush3.bf16.msra.mxu1 %v15886_v18 }
 0x1e5   : > { %11424 = vmatprep.subr.bf16.mxu1 %v20848_v38 }
 0x1e8   : > { %11425 = vmatpush3.bf16.msra.mxu1 %v15893_v20 }
 0x1e9   : > { %11426 = vmatprep.subr.bf16.mxu1 %v20848_v38 }
 0x1ec   : > { %11427 = vmatpush3.bf16.msra.mxu1 %v15900_v59 }
 0x1ed   : > { %11428 = vmatprep.subr.bf16.mxu1 %v20848_v38 }
 0x1f0   : > { %11429 = vmatpush3.bf16.msra.mxu1 %v15907_v61 }
 0x1f1   : > { %11430 = vmatprep.subr.bf16.mxu1 %v20848_v38 }
 0x1f4   : > { %11431 = vmatpush3.bf16.msra.mxu1 %v15914_v1 }
 0x1f5   : > { %v1751_v4 = vpop.f32.mrf.mxu0  ;;  %11432 = vmatprep.subr.bf16.mxu1 %v20848_v38 }
 0x1f6   : > { %v1792_v22 = vpop.f32.mrf.mxu1  ;;  %v1757_v34 = vadd.f32 %v1751_v4, %v1716_v33  ;;  %v16104_v33 = vld [vmem:[%s20758_s1 + $0x108] sm:$0xff]  }
 0x1f7   : > { %v11218_v24 = vpop.f32.mrf.mxu0 }
 0x1f8   : > { %v11238_v26 = vpop.f32.mrf.mxu1  ;;  %11433 = vmatpush3.bf16.msra.mxu1 %v15921_v11  ;;  %v1798_v36 = vadd.f32 %v1792_v22, %v1757_v34  ;;  %v16060_v22 = vld [vmem:[%s20758_s1 + $0x138] sm:$0xff]   ;;  %v16111_v34 = vld [vmem:[%s20758_s1 + $0x100] sm:$0xff]  }
 0x1f9   : > { %v1754_v27 = vpop.f32.mrf.mxu0  ;;  %11434 = vmatprep.subr.bf16.mxu1 %v20848_v38 }
 0x1fa   : > { %v1795_v15 = vpop.f32.mrf.mxu1  ;;  %v16069_v27 = vld [vmem:[%s20758_s1 + $0x130] sm:$0xff]  }
 0x1fb   : > { %v11219_v17 = vpop.f32.mrf.mxu0  ;;  %v16076_v15 = vld [vmem:[%s20758_s1 + $0x128] sm:$0xff]  }
 0x1fc   : > { %v11239_v19 = vpop.f32.mrf.mxu1  ;;  %11435 = vmatpush3.bf16.msra.mxu1 %v15928_v21  ;;  %v16083_v17 = vld [vmem:[%s20758_s1 + $0x120] sm:$0xff]  }
 0x1fd   : > { %11460 = vmatprep.subr.bf16.mxu1 %v20848_v38  ;;  %v16090_v19 = vld [vmem:[%s20758_s1 + $0x118] sm:$0xff]  }
 0x1ff   : > { %11437 = vmatmul.mubr.bf16.vlgmr.msra.gmra.mxu1 %v15933_v25 }
 0x200   : > { %11461 = vmatpush3.bf16.msra.mxu1 %v15939_v28  ;;  %11476 = vmatprep.mubr.msk.bf16.mxu1 %vm14808_vm0, %v20848_v38 }
 0x201   : > { %11462 = vmatprep.subr.bf16.mxu1 %v20848_v38 }
 0x204   : > { %11463 = vmatpush3.bf16.msra.mxu1 %v15948_v30 }
 0x205   : > { %11464 = vmatprep.subr.bf16.mxu1 %v20848_v38 }
 0x208   : > { %11465 = vmatpush3.bf16.msra.mxu1 %v15956_v32 }
 0x209   : > { %11466 = vmatprep.subr.bf16.mxu1 %v20848_v38 }
 0x20c   : > { %11467 = vmatpush3.bf16.msra.mxu1 %v15963_v35 }
 0x20d   : > { %11468 = vmatprep.subr.bf16.mxu1 %v20848_v38 }
 0x210   : > { %11469 = vmatpush3.bf16.msra.mxu1 %v15970_v37 }
 0x211   : > { %11470 = vmatprep.subr.bf16.mxu1 %v20848_v38 }
 0x214   : > { %11471 = vmatpush3.bf16.msra.mxu1 %v15977_v46 }
 0x215   : > { %v1833_v39 = vpop.f32.mrf.mxu0  ;;  %11472 = vmatprep.subr.bf16.mxu1 %v20848_v38 }
 0x216   : > { %v1839_v40 = vadd.f32 %v1833_v39, %v1798_v36  ;;  %v1874_v41 = vpop.f32.mrf.mxu1  ;;  %v16121_v39 = vld [vmem:[%s20758_s1 + $0x1b8] sm:$0xff]  }
 0x217   : > { %v11258_v42 = vpop.f32.mrf.mxu0 }
 0x218   : > { %v1880_v43 = vadd.f32 %v1874_v41, %v1839_v40  ;;  %v11278_v44 = vpop.f32.mrf.mxu1  ;;  %11473 = vmatpush3.bf16.msra.mxu1 %v15985_v9 }
 0x219   : > { %v1836_v0 = vpop.f32.mrf.mxu0  ;;  %11474 = vmatprep.subr.bf16.mxu1 %v20848_v38  ;;  %v16144_v44 = vld [vmem:[%s20758_s1 + $0x1a0] sm:$0xff]  }
 0x21a   : > { %v1881_v3 = vadd.f32 %v15819_v23, %v1880_v43  ;;  %v1877_v47 = vpop.f32.mrf.mxu1  ;;  %v16137_v43 = vld [vmem:[%s20758_s1 + $0x1a8] sm:$0xff]   ;;  %v16151_v0 = vld [vmem:[%s20758_s1 + $0x198] sm:$0xff]  }
 0x21b   : > { %v11259_v48 = vpop.f32.mrf.mxu0  ;;  %v16165_v47 = vld [vmem:[%s20758_s1 + $0x188] sm:$0xff]  }
 0x21c   : > { %vm1882_vm2 = vcmp.ge.f32.partialorder %v1881_v3, 0.0  ;;  %v1883_v7 = vmul.f32 0.2, %v1881_v3  ;;  %v11279_v50 = vpop.f32.mrf.mxu1  ;;  %11475 = vmatpush3.bf16.msra.mxu1 %v15992_v54  ;;  %v16172_v48 = vld [vmem:[%s20758_s1 + $0x180] sm:$0xff]  }
 0x21d   : > { %11500 = vmatprep.subr.bf16.mxu1 %v20848_v38 }
 0x21e   : > { %v1884_v8 = vsel %vm1882_vm2, %v1881_v3, %v1883_v7  ;;  %v16158_v3 = vld [vmem:[%s20758_s1 + $0x190] sm:$0xff]   ;;  %v16180_v7 = vld [vmem:[%s20758_s1 + $0x238] sm:$0xff]  }
 0x21f   : > { %v1885_v52 = vpack.c.bf16 %v1884_v8, %v1884_v8  ;;  %11477 = vmatmul.mubr.bf16.vlgmr.msra.gmra.mxu1 %v15750_v31 }
 0x220   : > { %11516 = vmatprep.mubr.msk.bf16.mxu1 %vm14808_vm0, %v20848_v38 }
 0x221   : > { %11297 = vmatmul.mubr.bf16.vlgmr.msra.gmra.mxu0 %v1885_v52  ;;  %v16191_v52 = vld [vmem:[%s20758_s1 + $0x230] sm:$0xff]  }
 0x222   : > { %11321 = vmatpush3.bf16.msra.mxu0 %v15381_v49  ;;  %11336 = vmatprep.mubr.msk.bf16.mxu0 %vm14808_vm0, %v20848_v38  ;;  %v21035_v49 = vld [vmem:[#allocation4_spill] sm:$0xff] }
 0x223   : > { %11322 = vmatprep.subr.bf16.mxu0 %v20848_v38 }
 0x226   : > { %11323 = vmatpush3.bf16.msra.mxu0 %v15399_v51  ;;  %v21037_v51 = vld [vmem:[#allocation6_spill] sm:$0xff] }
 0x227   : > { %11324 = vmatprep.subr.bf16.mxu0 %v20848_v38 }
 0x22a   : > { %11325 = vmatpush3.bf16.msra.mxu0 %v15413_v53  ;;  %v21038_v53 = vld [vmem:[#allocation12_spill] sm:$0xff] }
 0x22b   : > { %11326 = vmatprep.subr.bf16.mxu0 %v20848_v38 }
 0x22e   : > { %11327 = vmatpush3.bf16.msra.mxu0 %v15427_v55  ;;  %v21039_v55 = vld [vmem:[#allocation7_spill] sm:$0xff] }
 0x22f   : > { %11328 = vmatprep.subr.bf16.mxu0 %v20848_v38 }
 0x232   : > { %11329 = vmatpush3.bf16.msra.mxu0 %v15441_v57  ;;  %v21040_v57 = vld [vmem:[#allocation8_spill] sm:$0xff] }
 0x233   : > { %11330 = vmatprep.subr.bf16.mxu0 %v20848_v38 }
 0x236   : > { %11331 = vmatpush3.bf16.msra.mxu0 %v21035_v49 }
 0x237   : > { %11332 = vmatprep.subr.bf16.mxu0 %v20848_v38 }
 0x23a   : > { %11333 = vmatpush3.bf16.msra.mxu0 %v21036_v45  ;;  %v16198_v45 = vld [vmem:[%s20758_s1 + $0x228] sm:$0xff]  }
 0x23b   : > { %11334 = vmatprep.subr.bf16.mxu0 %v20848_v38 }
 0x23e   : > { %11335 = vmatpush3.bf16.msra.mxu0 %v21037_v51 }
 0x23f   : > { %11360 = vmatprep.subr.bf16.mxu0 %v20848_v38 }
 0x241   : > { %11337 = vmatmul.mubr.bf16.vlgmr.msra.gmra.mxu0 %v21038_v53  ;;  %v16205_v53 = vld [vmem:[%s20758_s1 + $0x220] sm:$0xff]  }
 0x242   : > { %11361 = vmatpush3.bf16.msra.mxu0 %v21039_v55  ;;  %11376 = vmatprep.mubr.msk.bf16.mxu0 %vm14808_vm0, %v20848_v38 }
 0x243   : > { %11362 = vmatprep.subr.bf16.mxu0 %v20848_v38 }
 0x246   : > { %11363 = vmatpush3.bf16.msra.mxu0 %v21040_v57 }
 0x247   : > { %11364 = vmatprep.subr.bf16.mxu0 %v20848_v38 }
 0x24a   : > { %11365 = vmatpush3.bf16.msra.mxu0 %v21041_v63 }
 0x24b   : > { %11366 = vmatprep.subr.bf16.mxu0 %v20848_v38 }
 0x24e   : > { %11367 = vmatpush3.bf16.msra.mxu0 %v21042_v5 }
 0x24f   : > { %11368 = vmatprep.subr.bf16.mxu0 %v20848_v38 }
 0x252   : > { %11369 = vmatpush3.bf16.msra.mxu0 %v21043_v2 }
 0x253   : > { %11370 = vmatprep.subr.bf16.mxu0 %v20848_v38 }
 0x256   : > { %11371 = vmatpush3.bf16.msra.mxu0 %v16033_v6 }
 0x257   : > { %11372 = vmatprep.subr.bf16.mxu0 %v20848_v38 }
 0x25a   : > { %11373 = vmatpush3.bf16.msra.mxu0 %v16040_v10 }
 0x25b   : > { %11374 = vmatprep.subr.bf16.mxu0 %v20848_v38 }
 0x25e   : > { %11375 = vmatpush3.bf16.msra.mxu0 %v16047_v12 }
 0x25f   : > { %v16053_v58 = vpop.f32.mrf.mxu1  ;;  %11400 = vmatprep.subr.bf16.mxu0 %v20848_v38 }
 0x260   : > { %21044 = vst [vmem:[#allocation4_spill] sm:$0xff] %v16053_v58  ;;  %v16257_v58 = vld [vmem:[%s20758_s1 + $0x68] sm:$0xff]  }
 0x261   : > { %11377 = vmatmul.mubr.bf16.vlgmr.msra.gmra.mxu0 %v16051_v56  ;;  %v11318_v4 = vpop.f32.mrf.mxu1 }
 0x262   : > { %11401 = vmatpush3.bf16.msra.mxu0 %v16060_v22  ;;  %11416 = vmatprep.mubr.msk.bf16.mxu0 %vm14808_vm0, %v20848_v38  ;;  %v16212_v4 = vld [vmem:[%s20758_s1 + $0x218] sm:$0xff]  }
 0x263   : > { %v2076_v24 = vpop.f32.mrf.mxu1  ;;  %11402 = vmatprep.subr.bf16.mxu0 %v20848_v38 }
 0x264   : > { %v16219_v24 = vld [vmem:[%s20758_s1 + $0x210] sm:$0xff]  }
 0x265   : > { %v11319_v26 = vpop.f32.mrf.mxu1 }
 0x266   : > { %11403 = vmatpush3.bf16.msra.mxu0 %v16069_v27  ;;  %v16226_v26 = vld [vmem:[%s20758_s1 + $0x208] sm:$0xff]  }
 0x267   : > { %11404 = vmatprep.subr.bf16.mxu0 %v20848_v38 }
 0x26a   : > { %11405 = vmatpush3.bf16.msra.mxu0 %v16076_v15 }
 0x26b   : > { %11406 = vmatprep.subr.bf16.mxu0 %v20848_v38 }
 0x26e   : > { %11407 = vmatpush3.bf16.msra.mxu0 %v16083_v17 }
 0x26f   : > { %11408 = vmatprep.subr.bf16.mxu0 %v20848_v38 }
 0x272   : > { %11409 = vmatpush3.bf16.msra.mxu0 %v16090_v19 }
 0x273   : > { %11410 = vmatprep.subr.bf16.mxu0 %v20848_v38 }
 0x276   : > { %11411 = vmatpush3.bf16.msra.mxu0 %v16097_v29 }
 0x277   : > { %11412 = vmatprep.subr.bf16.mxu0 %v20848_v38 }
 0x27a   : > { %11413 = vmatpush3.bf16.msra.mxu0 %v16104_v33 }
 0x27b   : > { %11414 = vmatprep.subr.bf16.mxu0 %v20848_v38 }
 0x27e   : > { %11415 = vmatpush3.bf16.msra.mxu0 %v16111_v34 }
 0x27f   : > { %11440 = vmatprep.subr.bf16.mxu0 %v20848_v38  ;;  %v16116_v36 = vpop.f32.mrf.mxu1 }
 0x281   : > { %11417 = vmatmul.mubr.bf16.vlgmr.msra.gmra.mxu0 %v15706_v13  ;;  %v11358_v40 = vpop.f32.mrf.mxu1  ;;  %v16130_v13 = vld [vmem:[%s20758_s1 + $0x1b0] sm:$0xff]  }
 0x282   : > { %11441 = vmatpush3.bf16.msra.mxu0 %v16121_v39  ;;  %11456 = vmatprep.mubr.msk.bf16.mxu0 %vm14808_vm0, %v20848_v38  ;;  %v16232_v40 = vld [vmem:[%s15034_s14 + $0x40] sm:$0xf] }
 0x283   : > { %11442 = vmatprep.subr.bf16.mxu0 %v20848_v38  ;;  %v2156_v41 = vpop.f32.mrf.mxu1  ;;  %21045 = vst [vmem:[#allocation5_spill] sm:$0xff] %v16232_v40 }
 0x284   : > { %v16239_v41 = vld [vmem:[%s20758_s1 + $0x78] sm:$0xff]  }
 0x285   : > { %v11359_v42 = vpop.f32.mrf.mxu1 }
 0x286   : > { %11443 = vmatpush3.bf16.msra.mxu0 %v16130_v13 }
 0x287   : > { %11444 = vmatprep.subr.bf16.mxu0 %v20848_v38 }
 0x28a   : > { %11445 = vmatpush3.bf16.msra.mxu0 %v16137_v43 }
 0x28b   : > { %11446 = vmatprep.subr.bf16.mxu0 %v20848_v38 }
 0x28e   : > { %11447 = vmatpush3.bf16.msra.mxu0 %v16144_v44 }
 0x28f   : > { %11448 = vmatprep.subr.bf16.mxu0 %v20848_v38 }
 0x292   : > { %11449 = vmatpush3.bf16.msra.mxu0 %v16151_v0 }
 0x293   : > { %11450 = vmatprep.subr.bf16.mxu0 %v20848_v38 }
 0x296   : > { %11451 = vmatpush3.bf16.msra.mxu0 %v16158_v3 }
 0x297   : > { %11452 = vmatprep.subr.bf16.mxu0 %v20848_v38 }
 0x29a   : > { %11453 = vmatpush3.bf16.msra.mxu0 %v16165_v47 }
 0x29b   : > { %11454 = vmatprep.subr.bf16.mxu0 %v20848_v38 }
 0x29e   : > { %11455 = vmatpush3.bf16.msra.mxu0 %v16172_v48 }
 0x29f   : > { %11480 = vmatprep.subr.bf16.mxu0 %v20848_v38  ;;  %v16186_v50 = vpop.f32.mrf.mxu1 }
 0x2a1   : > { %11457 = vmatmul.mubr.bf16.vlgmr.msra.gmra.mxu0 %v15475_v62  ;;  %v11398_v8 = vpop.f32.mrf.mxu1 }
 0x2a2   : > { %11481 = vmatpush3.bf16.msra.mxu0 %v16180_v7  ;;  %11496 = vmatprep.mubr.msk.bf16.mxu0 %vm14808_vm0, %v20848_v38  ;;  %v16250_v8 = vld [vmem:[%s20758_s1 + $0x70] sm:$0xff]  }
 0x2a3   : > { %11482 = vmatprep.subr.bf16.mxu0 %v20848_v38  ;;  %v2237_v62 = vpop.f32.mrf.mxu1 }
 0x2a5   : > { %v11399_v49 = vpop.f32.mrf.mxu1 }
 0x2a6   : > { %11483 = vmatpush3.bf16.msra.mxu0 %v16191_v52 }
 0x2a7   : > { %11484 = vmatprep.subr.bf16.mxu0 %v20848_v38 }
 0x2aa   : > { %11485 = vmatpush3.bf16.msra.mxu0 %v16198_v45 }
 0x2ab   : > { %11486 = vmatprep.subr.bf16.mxu0 %v20848_v38 }
 0x2ae   : > { %11487 = vmatpush3.bf16.msra.mxu0 %v16205_v53 }
 0x2af   : > { %11488 = vmatprep.subr.bf16.mxu0 %v20848_v38 }
 0x2b2   : > { %11489 = vmatpush3.bf16.msra.mxu0 %v16212_v4 }
 0x2b3   : > { %11490 = vmatprep.subr.bf16.mxu0 %v20848_v38 }
 0x2b6   : > { %11491 = vmatpush3.bf16.msra.mxu0 %v16219_v24 }
 0x2b7   : > { %11492 = vmatprep.subr.bf16.mxu0 %v20848_v38 }
 0x2ba   : > { %11493 = vmatpush3.bf16.msra.mxu0 %v16226_v26 }
 0x2bb   : > { %11494 = vmatprep.subr.bf16.mxu0 %v20848_v38 }
 0x2be   : > { %11495 = vmatpush3.bf16.msra.mxu0 %v15463_v60 }
 0x2bf   : > { %11520 = vmatprep.subr.bf16.mxu0 %v20848_v38  ;;  %v16244_v42 = vpop.f32.mrf.mxu1 }
 0x2c1   : > { %11497 = vmatmul.mubr.bf16.vlgmr.msra.gmra.mxu0 %v16232_v40  ;;  %v11438_v60 = vpop.f32.mrf.mxu1  ;;  %v16285_v40 = vld [vmem:[%s20758_s1 + $0x48] sm:$0xff]  }
 0x2c2   : > { %11521 = vmatpush3.bf16.msra.mxu0 %v16239_v41  ;;  %11536 = vmatprep.mubr.msk.bf16.mxu0 %vm14808_vm0, %v20848_v38  ;;  %v16264_v60 = vld [vmem:[%s20758_s1 + $0x60] sm:$0xff]  }
 0x2c3   : > { %11522 = vmatprep.subr.bf16.mxu0 %v20848_v38  ;;  %v2319_v62 = vpop.f32.mrf.mxu1 }
 0x2c4   : > { %v16271_v62 = vld [vmem:[%s20758_s1 + $0x58] sm:$0xff]  }
 0x2c5   : > { %v11439_v49 = vpop.f32.mrf.mxu1 }
 0x2c6   : > { %11523 = vmatpush3.bf16.msra.mxu0 %v16250_v8  ;;  %v16278_v49 = vld [vmem:[%s20758_s1 + $0x50] sm:$0xff]  }
 0x2c7   : > { %11524 = vmatprep.subr.bf16.mxu0 %v20848_v38 }
 0x2ca   : > { %11525 = vmatpush3.bf16.msra.mxu0 %v16257_v58 }
 0x2cb   : > { %11526 = vmatprep.subr.bf16.mxu0 %v20848_v38 }
 0x2ce   : > { %11527 = vmatpush3.bf16.msra.mxu0 %v16264_v60 }
 0x2cf   : > { %11528 = vmatprep.subr.bf16.mxu0 %v20848_v38 }
 0x2d2   : > { %11529 = vmatpush3.bf16.msra.mxu0 %v16271_v62 }
 0x2d3   : > { %11530 = vmatprep.subr.bf16.mxu0 %v20848_v38 }
 0x2d6   : > { %11531 = vmatpush3.bf16.msra.mxu0 %v16278_v49 }
 0x2d7   : > { %11532 = vmatprep.subr.bf16.mxu0 %v20848_v38 }
 0x2da   : > { %11533 = vmatpush3.bf16.msra.mxu0 %v16285_v40 }
 0x2db   : > { %11534 = vmatprep.subr.bf16.mxu0 %v20848_v38 }
 0x2de   : > { %11535 = vmatpush3.bf16.msra.mxu0 %v21037_v51 }
 0x2df   : > { %11560 = vmatprep.subr.bf16.mxu0 %v20848_v38  ;;  %v16297_v46 = vpop.f32.mrf.mxu1 }
 0x2e1   : > { %v16291_v54 = vpop.f32.mrf.mxu0  ;;  %11537 = vmatmul.mubr.bf16.vlgmr.msra.gmra.mxu0 %v16051_v56  ;;  %v11478_v35 = vpop.f32.mrf.mxu1 }
 0x2e2   : > { %21046 = vst [vmem:[#allocation6_spill] sm:$0xff] %v16291_v54  ;;  %11561 = vmatpush3.bf16.msra.mxu0 %v21039_v55  ;;  %11576 = vmatprep.mubr.msk.bf16.mxu0 %vm14808_vm0, %v20848_v38  ;;  %v14238_v54 = vld [vmem:[%s20760_s3 + $0xb8] sm:$0xff]   ;;  %v14240_v35 = vld [vmem:[%s20760_s3 + $0xa8] sm:$0xff]  }
 0x2e3   : > { %v11298_v9 = vpop.f32.mrf.mxu0  ;;  %11562 = vmatprep.subr.bf16.mxu0 %v20848_v38  ;;  %v2401_v56 = vpop.f32.mrf.mxu1  ;;  %11501 = vmatpush3.bf16.msra.mxu1 %v14238_v54  ;;  %v14242_v54 = vld [vmem:[%s20760_s3 + $0x98] sm:$0xff]  }
 0x2e4   : > { %v14239_v9 = vld [vmem:[%s20760_s3 + $0xb0] sm:$0xff]   ;;  %11502 = vmatprep.subr.bf16.mxu1 %v20848_v38  ;;  %v14245_v56 = vld [vmem:[%s20760_s3 + $0x80] sm:$0xff]  }
 0x2e5   : > { %v1988_v37 = vpop.f32.mrf.mxu0  ;;  %v11479_v55 = vpop.f32.mrf.mxu1 }
 0x2e6   : > { %11563 = vmatpush3.bf16.msra.mxu0 %v21040_v57  ;;  %v14241_v37 = vld [vmem:[%s20760_s3 + $0xa0] sm:$0xff]   ;;  %v14243_v57 = vld [vmem:[%s20760_s3 + $0x90] sm:$0xff]  }
 0x2e7   : > { %v11299_v51 = vpop.f32.mrf.mxu0  ;;  %11564 = vmatprep.subr.bf16.mxu0 %v20848_v38  ;;  %11503 = vmatpush3.bf16.msra.mxu1 %v14239_v9 }
 0x2e8   : > { %11504 = vmatprep.subr.bf16.mxu1 %v20848_v38 }
 0x2ea   : > { %11565 = vmatpush3.bf16.msra.mxu0 %v21041_v63 }
 0x2eb   : > { %11566 = vmatprep.subr.bf16.mxu0 %v20848_v38  ;;  %11505 = vmatpush3.bf16.msra.mxu1 %v14240_v35 }
 0x2ec   : > { %11506 = vmatprep.subr.bf16.mxu1 %v20848_v38 }
 0x2ee   : > { %11567 = vmatpush3.bf16.msra.mxu0 %v21042_v5  ;;  %v14244_v5 = vld [vmem:[%s20760_s3 + $0x88] sm:$0xff]  }
 0x2ef   : > { %11568 = vmatprep.subr.bf16.mxu0 %v20848_v38  ;;  %11507 = vmatpush3.bf16.msra.mxu1 %v14241_v37 }
 0x2f0   : > { %11508 = vmatprep.subr.bf16.mxu1 %v20848_v38 }
 0x2f2   : > { %11569 = vmatpush3.bf16.msra.mxu0 %v21043_v2 }
 0x2f3   : > { %11570 = vmatprep.subr.bf16.mxu0 %v20848_v38  ;;  %11509 = vmatpush3.bf16.msra.mxu1 %v14242_v54 }
 0x2f4   : > { %11510 = vmatprep.subr.bf16.mxu1 %v20848_v38 }
 0x2f6   : > { %11571 = vmatpush3.bf16.msra.mxu0 %v16033_v6 }
 0x2f7   : > { %11572 = vmatprep.subr.bf16.mxu0 %v20848_v38  ;;  %11511 = vmatpush3.bf16.msra.mxu1 %v14243_v57 }
 0x2f8   : > { %11512 = vmatprep.subr.bf16.mxu1 %v20848_v38 }
 0x2fa   : > { %11573 = vmatpush3.bf16.msra.mxu0 %v16040_v10 }
 0x2fb   : > { %11574 = vmatprep.subr.bf16.mxu0 %v20848_v38  ;;  %11513 = vmatpush3.bf16.msra.mxu1 %v14244_v5 }
 0x2fc   : > { %11514 = vmatprep.subr.bf16.mxu1 %v20848_v38 }
 0x2fe   : > { %11575 = vmatpush3.bf16.msra.mxu0 %v16047_v12 }
 0x2ff   : > { %11600 = vmatprep.subr.bf16.mxu0 %v20848_v38  ;;  %11515 = vmatpush3.bf16.msra.mxu1 %v14245_v56 }
 0x300   : > { %11540 = vmatprep.subr.bf16.mxu1 %v20848_v38 }
 0x301   : > { %v2113_v63 = vpop.f32.mrf.mxu0 }
 0x302   : > { %v2154_v55 = vadd.f32 %v16116_v36, %v2113_v63 }
 0x303   : > { %v11338_v2 = vpop.f32.mrf.mxu0 }
 0x304   : > { %v8875_v2 = vld [vmem:[%s15034_s14 + $0x14] sm:$0xf] }
 0x305   : > { %v2116_v51 = vpop.f32.mrf.mxu0  ;;  %11577 = vmatmul.mubr.bf16.vlgmr.msra.gmra.mxu0 %v8875_v2 }
 0x306   : > { %11601 = vmatpush3.bf16.msra.mxu0 %v16060_v22  ;;  %11616 = vmatprep.mubr.msk.bf16.mxu0 %vm14808_vm0, %v20848_v38 }
 0x307   : > { %v11339_v9 = vpop.f32.mrf.mxu0  ;;  %11602 = vmatprep.subr.bf16.mxu0 %v20848_v38 }
 0x30a   : > { %11603 = vmatpush3.bf16.msra.mxu0 %v16069_v27 }
 0x30b   : > { %11604 = vmatprep.subr.bf16.mxu0 %v20848_v38 }
 0x30e   : > { %11605 = vmatpush3.bf16.msra.mxu0 %v16076_v15 }
 0x30f   : > { %11606 = vmatprep.subr.bf16.mxu0 %v20848_v38 }
 0x312   : > { %11607 = vmatpush3.bf16.msra.mxu0 %v16083_v17 }
 0x313   : > { %11608 = vmatprep.subr.bf16.mxu0 %v20848_v38 }
 0x316   : > { %11609 = vmatpush3.bf16.msra.mxu0 %v16090_v19 }
 0x317   : > { %11610 = vmatprep.subr.bf16.mxu0 %v20848_v38 }
 0x31a   : > { %11611 = vmatpush3.bf16.msra.mxu0 %v16097_v29 }
 0x31b   : > { %11612 = vmatprep.subr.bf16.mxu0 %v20848_v38 }
 0x31e   : > { %11613 = vmatpush3.bf16.msra.mxu0 %v16104_v33 }
 0x31f   : > { %11614 = vmatprep.subr.bf16.mxu0 %v20848_v38 }
 0x321   : > { %v2193_v35 = vpop.f32.mrf.mxu0 }
 0x322   : > { %v2199_v37 = vadd.f32 %v2193_v35, %v2154_v55  ;;  %11615 = vmatpush3.bf16.msra.mxu0 %v16111_v34 }
 0x323   : > { %v11378_v54 = vpop.f32.mrf.mxu0  ;;  %11640 = vmatprep.subr.bf16.mxu0 %v20848_v38 }
 0x324   : > { %v2240_v55 = vadd.f32 %v16186_v50, %v2199_v37 }
 0x325   : > { %v2196_v57 = vpop.f32.mrf.mxu0  ;;  %11617 = vmatmul.mubr.bf16.vlgmr.msra.gmra.mxu0 %v15933_v25 }
 0x326   : > { %11641 = vmatpush3.bf16.msra.mxu0 %v16121_v39  ;;  %11656 = vmatprep.mubr.msk.bf16.mxu0 %vm14808_vm0, %v20848_v38 }
 0x327   : > { %v11379_v32 = vpop.f32.mrf.mxu0  ;;  %11642 = vmatprep.subr.bf16.mxu0 %v20848_v38 }
 0x32a   : > { %11643 = vmatpush3.bf16.msra.mxu0 %v16130_v13 }
 0x32b   : > { %11644 = vmatprep.subr.bf16.mxu0 %v20848_v38 }
 0x32e   : > { %11645 = vmatpush3.bf16.msra.mxu0 %v16137_v43 }
 0x32f   : > { %11646 = vmatprep.subr.bf16.mxu0 %v20848_v38 }
 0x332   : > { %11647 = vmatpush3.bf16.msra.mxu0 %v16144_v44 }
 0x333   : > { %11648 = vmatprep.subr.bf16.mxu0 %v20848_v38 }
 0x336   : > { %11649 = vmatpush3.bf16.msra.mxu0 %v16151_v0 }
 0x337   : > { %11650 = vmatprep.subr.bf16.mxu0 %v20848_v38 }
 0x33a   : > { %11651 = vmatpush3.bf16.msra.mxu0 %v16158_v3 }
 0x33b   : > { %11652 = vmatprep.subr.bf16.mxu0 %v20848_v38 }
 0x33e   : > { %11653 = vmatpush3.bf16.msra.mxu0 %v16165_v47 }
 0x33f   : > { %11654 = vmatprep.subr.bf16.mxu0 %v20848_v38 }
 0x341   : > { %v2275_v32 = vpop.f32.mrf.mxu0 }
 0x342   : > { %11655 = vmatpush3.bf16.msra.mxu0 %v16172_v48 }
 0x343   : > { %v11418_v36 = vpop.f32.mrf.mxu0  ;;  %11680 = vmatprep.subr.bf16.mxu0 %v20848_v38 }
 0x345   : > { %v2278_v63 = vpop.f32.mrf.mxu0  ;;  %11657 = vmatmul.mubr.bf16.vlgmr.msra.gmra.mxu0 %v15750_v31  ;;  %v2281_v31 = vadd.f32 %v2275_v32, %v2240_v55  ;;  %v16450_v55 = vld [vmem:[%s20758_s1 + $0x20] sm:$0xff]  }
 0x346   : > { %11681 = vmatpush3.bf16.msra.mxu0 %v16180_v7  ;;  %11696 = vmatprep.mubr.msk.bf16.mxu0 %vm14808_vm0, %v20848_v38  ;;  %v8887_v63 = vld [vmem:[%s15034_s14 + $0x44] sm:$0xf] }
 0x347   : > { %v11419_v5 = vpop.f32.mrf.mxu0  ;;  %11682 = vmatprep.subr.bf16.mxu0 %v20848_v38  ;;  %v2322_v35 = vadd.f32 %v16244_v42, %v2281_v31  ;;  %v16409_v42 = vld [vmem:[%s20758_s1 + $0x200] sm:$0xff]   ;;  %v16459_v31 = vld [vmem:[%s20758_s1 + $0x18] sm:$0xff]  }
 0x34a   : > { %11683 = vmatpush3.bf16.msra.mxu0 %v16191_v52 }
 0x34b   : > { %11684 = vmatprep.subr.bf16.mxu0 %v20848_v38 }
 0x34e   : > { %11685 = vmatpush3.bf16.msra.mxu0 %v16198_v45 }
 0x34f   : > { %11686 = vmatprep.subr.bf16.mxu0 %v20848_v38 }
 0x352   : > { %11687 = vmatpush3.bf16.msra.mxu0 %v16205_v53 }
 0x353   : > { %11688 = vmatprep.subr.bf16.mxu0 %v20848_v38 }
 0x356   : > { %11689 = vmatpush3.bf16.msra.mxu0 %v16212_v4 }
 0x357   : > { %11690 = vmatprep.subr.bf16.mxu0 %v20848_v38 }
 0x35a   : > { %11691 = vmatpush3.bf16.msra.mxu0 %v16219_v24 }
 0x35b   : > { %11692 = vmatprep.subr.bf16.mxu0 %v20848_v38 }
 0x35e   : > { %11693 = vmatpush3.bf16.msra.mxu0 %v16226_v26 }
 0x35f   : > { %11694 = vmatprep.subr.bf16.mxu0 %v20848_v38 }
 0x361   : > { %v2357_v25 = vpop.f32.mrf.mxu0 }
 0x362   : > { %v2363_v54 = vadd.f32 %v2357_v25, %v2322_v35  ;;  %11695 = vmatpush3.bf16.msra.mxu0 %v16409_v42  ;;  %v16468_v35 = vld [vmem:[%s20758_s1 + $0x10] sm:$0xff]  }
 0x363   : > { %v11458_v51 = vpop.f32.mrf.mxu0  ;;  %11720 = vmatprep.subr.bf16.mxu0 %v20848_v38 }
 0x364   : > { %v2404_v57 = vadd.f32 %v16297_v46, %v2363_v54 }
 0x365   : > { %v2360_v56 = vpop.f32.mrf.mxu0  ;;  %11697 = vmatmul.mubr.bf16.vlgmr.msra.gmra.mxu0 %v8887_v63  ;;  %v16497_v63 = vld [vmem:[%s15034_s14 + $0x1c] sm:$0xf] }
 0x366   : > { %11721 = vmatpush3.bf16.msra.mxu0 %v16239_v41  ;;  %11736 = vmatprep.mubr.msk.bf16.mxu0 %vm14808_vm0, %v20848_v38  ;;  %v16432_v56 = vld [vmem:[%s20758_s1 + $0x30] sm:$0xff]   ;;  %21047 = vst [vmem:[#allocation12_spill] sm:$0xff] %v16497_v63 }
 0x367   : > { %v11459_v9 = vpop.f32.mrf.mxu0  ;;  %11722 = vmatprep.subr.bf16.mxu0 %v20848_v38 }
 0x368   : > { %v16441_v9 = vld [vmem:[%s20758_s1 + $0x28] sm:$0xff]  }
 0x36a   : > { %11723 = vmatpush3.bf16.msra.mxu0 %v16250_v8 }
 0x36b   : > { %11724 = vmatprep.subr.bf16.mxu0 %v20848_v38 }
 0x36e   : > { %11725 = vmatpush3.bf16.msra.mxu0 %v16257_v58 }
 0x36f   : > { %11726 = vmatprep.subr.bf16.mxu0 %v20848_v38 }
 0x372   : > { %11727 = vmatpush3.bf16.msra.mxu0 %v16264_v60 }
 0x373   : > { %11728 = vmatprep.subr.bf16.mxu0 %v20848_v38 }
 0x376   : > { %11729 = vmatpush3.bf16.msra.mxu0 %v16271_v62 }
 0x377   : > { %11730 = vmatprep.subr.bf16.mxu0 %v20848_v38 }
 0x37a   : > { %11731 = vmatpush3.bf16.msra.mxu0 %v16278_v49 }
 0x37b   : > { %11732 = vmatprep.subr.bf16.mxu0 %v20848_v38 }
 0x37e   : > { %11733 = vmatpush3.bf16.msra.mxu0 %v16285_v40 }
 0x37f   : > { %11734 = vmatprep.subr.bf16.mxu0 %v20848_v38 }
 0x381   : > { %v2439_v50 = vpop.f32.mrf.mxu0 }
 0x382   : > { %v2445_v37 = vadd.f32 %v2439_v50, %v2404_v57  ;;  %v16479_v50 = vld [vmem:[%s20758_s1 + $0x8] sm:$0xff]  }
 0x383   : > { %v11498_v2 = vpop.f32.mrf.mxu0 }
 0x384   : > { %v2446_v32 = vadd.f32 %v15819_v23, %v2445_v37  ;;  %v16421_v23 = vld [vmem:[%s20758_s1 + $0x38] sm:$0xff]   ;;  %v16486_v2 = vld [vmem:[%s20758_s1 + $0x40] sm:$0xff]  }
 0x385   : > { %v2442_v36 = vpop.f32.mrf.mxu0  ;;  %11735 = vmatpush3.bf16.msra.mxu0 %v16486_v2 }
 0x386   : > { %vm2447_vm3 = vcmp.ge.f32.partialorder %v2446_v32, 0.0  ;;  %v2448_v46 = vmul.f32 0.2, %v2446_v32  ;;  %11760 = vmatprep.subr.bf16.mxu0 %v20848_v38  ;;  %v16493_v36 = vld [vmem:[%s20758_s1] sm:$0xff]  }
 0x387   : > { %v11499_v5 = vpop.f32.mrf.mxu0 }
 0x388   : > { %v2449_v25 = vsel %vm2447_vm3, %v2446_v32, %v2448_v46  ;;  %11737 = vmatmul.mubr.bf16.vlgmr.msra.gmra.mxu0 %v16497_v63  ;;  %v16504_v46 = vld [vmem:[%s20758_s1 + $0xb8] sm:$0xff]   ;;  %v16558_v63 = vld [vmem:[%s20758_s1 + $0xe0] sm:$0xff]  }
 0x389   : > { %v2450_v51 = vpack.c.bf16 %v2449_v25, %v2449_v25  ;;  %11761 = vmatpush3.bf16.msra.mxu0 %v16504_v46  ;;  %11776 = vmatprep.mubr.msk.bf16.mxu0 %vm14808_vm0, %v20848_v38  ;;  %v14443_v5 = vld [vmem:[%s15034_s14 + $0xc] sm:$0xf]  ;;  %21050 = vst [vmem:[#allocation9_spill] sm:$0xff] %v16558_v63 }
 0x38a   : > { %11762 = vmatprep.subr.bf16.mxu0 %v20848_v38  ;;  %v16514_v25 = vld [vmem:[%s20758_s1 + $0xf8] sm:$0xff]  }
 0x38b   : > { %11517 = vmatmul.mubr.bf16.vlgmr.msra.gmra.mxu1 %v2450_v51  ;;  %v16523_v51 = vld [vmem:[%s20758_s1 + $0xb0] sm:$0xff]  }
 0x38c   : > { %11541 = vmatpush3.bf16.msra.mxu1 %v16421_v23  ;;  %11556 = vmatprep.mubr.msk.bf16.mxu1 %vm14808_vm0, %v20848_v38 }
 0x38d   : > { %11542 = vmatprep.subr.bf16.mxu1 %v20848_v38  ;;  %11763 = vmatpush3.bf16.msra.mxu0 %v16523_v51 }
 0x38e   : > { %11764 = vmatprep.subr.bf16.mxu0 %v20848_v38 }
 0x390   : > { %11543 = vmatpush3.bf16.msra.mxu1 %v16432_v56 }
 0x391   : > { %11544 = vmatprep.subr.bf16.mxu1 %v20848_v38 }
 0x394   : > { %11545 = vmatpush3.bf16.msra.mxu1 %v16441_v9 }
 0x395   : > { %11546 = vmatprep.subr.bf16.mxu1 %v20848_v38 }
 0x398   : > { %11547 = vmatpush3.bf16.msra.mxu1 %v16450_v55 }
 0x399   : > { %11548 = vmatprep.subr.bf16.mxu1 %v20848_v38 }
 0x39c   : > { %11549 = vmatpush3.bf16.msra.mxu1 %v16459_v31 }
 0x39d   : > { %11550 = vmatprep.subr.bf16.mxu1 %v20848_v38 }
 0x3a0   : > { %11551 = vmatpush3.bf16.msra.mxu1 %v16468_v35 }
 0x3a1   : > { %11552 = vmatprep.subr.bf16.mxu1 %v20848_v38  ;;  %v16472_v54 = vpop.f32.mrf.mxu0 }
 0x3a3   : > { %v11538_v57 = vpop.f32.mrf.mxu0 }
 0x3a4   : > { %11553 = vmatpush3.bf16.msra.mxu1 %v16479_v50  ;;  %v16530_v57 = vld [vmem:[%s20758_s1 + $0xf0] sm:$0xff]  }
 0x3a5   : > { %11554 = vmatprep.subr.bf16.mxu1 %v20848_v38  ;;  %v2594_v37 = vpop.f32.mrf.mxu0 }
 0x3a6   : > { %v16537_v37 = vld [vmem:[%s20758_s1 + $0xa8] sm:$0xff]  }
 0x3a7   : > { %v11539_v32 = vpop.f32.mrf.mxu0  ;;  %11765 = vmatpush3.bf16.msra.mxu0 %v16537_v37 }
 0x3a8   : > { %11555 = vmatpush3.bf16.msra.mxu1 %v16493_v36  ;;  %11766 = vmatprep.subr.bf16.mxu0 %v20848_v38  ;;  %v16544_v32 = vld [vmem:[%s20758_s1 + $0xe8] sm:$0xff]  }
 0x3a9   : > { %11580 = vmatprep.subr.bf16.mxu1 %v20848_v38  ;;  %21048 = vst [vmem:[#allocation7_spill] sm:$0xff] %v16544_v32 }
 0x3ab   : > { %11557 = vmatmul.mubr.bf16.vlgmr.msra.gmra.mxu1 %v14443_v5  ;;  %v16551_v5 = vld [vmem:[%s20758_s1 + $0xa0] sm:$0xff]  }
 0x3ac   : > { %11581 = vmatpush3.bf16.msra.mxu1 %v16514_v25  ;;  %11596 = vmatprep.mubr.msk.bf16.mxu1 %vm14808_vm0, %v20848_v38  ;;  %21049 = vst [vmem:[#allocation8_spill] sm:$0xff] %v16551_v5 }
 0x3ad   : > { %11582 = vmatprep.subr.bf16.mxu1 %v20848_v38  ;;  %11767 = vmatpush3.bf16.msra.mxu0 %v16551_v5  ;;  %v16572_v5 = vld [vmem:[%s20758_s1 + $0xd8] sm:$0xff]  }
 0x3ae   : > { %11768 = vmatprep.subr.bf16.mxu0 %v20848_v38 }
 0x3b0   : > { %11583 = vmatpush3.bf16.msra.mxu1 %v16530_v57 }
 0x3b1   : > { %11584 = vmatprep.subr.bf16.mxu1 %v20848_v38 }
 0x3b4   : > { %11585 = vmatpush3.bf16.msra.mxu1 %v16544_v32  ;;  %v16565_v32 = vld [vmem:[%s20758_s1 + $0x98] sm:$0xff]  }
 0x3b5   : > { %11586 = vmatprep.subr.bf16.mxu1 %v20848_v38  ;;  %11769 = vmatpush3.bf16.msra.mxu0 %v16565_v32 }
 0x3b6   : > { %11770 = vmatprep.subr.bf16.mxu0 %v20848_v38 }
 0x3b8   : > { %11587 = vmatpush3.bf16.msra.mxu1 %v16558_v63  ;;  %v16581_v63 = vld [vmem:[%s20758_s1 + $0xd0] sm:$0xff]  }
 0x3b9   : > { %11588 = vmatprep.subr.bf16.mxu1 %v20848_v38  ;;  %11771 = vmatpush3.bf16.msra.mxu0 %v16033_v6  ;;  %21051 = vst [vmem:[#allocation10_spill] sm:$0xff] %v16581_v63  ;;  %v16590_v6 = vld [vmem:[%s20758_s1 + $0xc8] sm:$0xff]  }
 0x3ba   : > { %11772 = vmatprep.subr.bf16.mxu0 %v20848_v38 }
 0x3bc   : > { %11589 = vmatpush3.bf16.msra.mxu1 %v16572_v5 }
 0x3bd   : > { %11590 = vmatprep.subr.bf16.mxu1 %v20848_v38  ;;  %11773 = vmatpush3.bf16.msra.mxu0 %v16040_v10  ;;  %v16609_v10 = vld [vmem:[%s15034_s14 + $0x24] sm:$0xf] }
 0x3be   : > { %11774 = vmatprep.subr.bf16.mxu0 %v20848_v38 }
 0x3c0   : > { %11591 = vmatpush3.bf16.msra.mxu1 %v16581_v63  ;;  %v16599_v63 = vld [vmem:[%s20758_s1 + $0xc0] sm:$0xff]  }
 0x3c1   : > { %11592 = vmatprep.subr.bf16.mxu1 %v20848_v38  ;;  %11775 = vmatpush3.bf16.msra.mxu0 %v16047_v12  ;;  %v21057_v12 = vld [vmem:[#allocation18_spill] sm:$0xff] }
 0x3c2   : > { %11800 = vmatprep.subr.bf16.mxu0 %v20848_v38 }
 0x3c4   : > { %11593 = vmatpush3.bf16.msra.mxu1 %v16590_v6  ;;  %11777 = vmatmul.mubr.bf16.vlgmr.msra.gmra.mxu0 %v15871_v14  ;;  %v8881_v14 = vld [vmem:[%s15034_s14 + $0x2c] sm:$0xf] }
 0x3c5   : > { %11594 = vmatprep.subr.bf16.mxu1 %v20848_v38  ;;  %11801 = vmatpush3.bf16.msra.mxu0 %v16060_v22 }
 0x3c6   : > { %11802 = vmatprep.subr.bf16.mxu0 %v20848_v38  ;;  %11816 = vmatprep.mubr.msk.bf16.mxu0 %vm14808_vm0, %v20848_v38 }
 0x3c8   : > { %11595 = vmatpush3.bf16.msra.mxu1 %v16599_v63 }
 0x3c9   : > { %11620 = vmatprep.subr.bf16.mxu1 %v20848_v38  ;;  %11803 = vmatpush3.bf16.msra.mxu0 %v16069_v27 }
 0x3ca   : > { %11804 = vmatprep.subr.bf16.mxu0 %v20848_v38 }
 0x3cb   : > { %11597 = vmatmul.mubr.bf16.vlgmr.msra.gmra.mxu1 %v16609_v10 }
 0x3cc   : > { %11621 = vmatpush3.bf16.msra.mxu1 %v15877_v16  ;;  %11636 = vmatprep.mubr.msk.bf16.mxu1 %vm14808_vm0, %v20848_v38  ;;  %v16644_v16 = vpop.f32.mrf.mxu0 }
 0x3cd   : > { %11622 = vmatprep.subr.bf16.mxu1 %v20848_v38  ;;  %11805 = vmatpush3.bf16.msra.mxu0 %v16076_v15  ;;  %v21058_v15 = vld [vmem:[#allocation5_spill] sm:$0xff] }
 0x3ce   : > { %11806 = vmatprep.subr.bf16.mxu0 %v20848_v38 }
 0x3d0   : > { %11623 = vmatpush3.bf16.msra.mxu1 %v15886_v18  ;;  %v16647_v18 = vld [vmem:[%s15034_s14 + $0x34] sm:$0xf] }
 0x3d1   : > { %11624 = vmatprep.subr.bf16.mxu1 %v20848_v38  ;;  %11807 = vmatpush3.bf16.msra.mxu0 %v16083_v17 }
 0x3d2   : > { %11808 = vmatprep.subr.bf16.mxu0 %v20848_v38 }
 0x3d4   : > { %11625 = vmatpush3.bf16.msra.mxu1 %v15893_v20  ;;  %v11578_v20 = vpop.f32.mrf.mxu0 }
 0x3d5   : > { %11626 = vmatprep.subr.bf16.mxu1 %v20848_v38  ;;  %11809 = vmatpush3.bf16.msra.mxu0 %v16090_v19  ;;  %v21060_v20 = vld [vmem:[#allocation4_spill] sm:$0xff] }
 0x3d6   : > { %11810 = vmatprep.subr.bf16.mxu0 %v20848_v38 }
 0x3d8   : > { %11627 = vmatpush3.bf16.msra.mxu1 %v15900_v59  ;;  %v2674_v59 = vpop.f32.mrf.mxu0 }
 0x3d9   : > { %11628 = vmatprep.subr.bf16.mxu1 %v20848_v38  ;;  %11811 = vmatpush3.bf16.msra.mxu0 %v16097_v29 }
 0x3da   : > { %11812 = vmatprep.subr.bf16.mxu0 %v20848_v38 }
 0x3dc   : > { %11629 = vmatpush3.bf16.msra.mxu1 %v15907_v61  ;;  %v11579_v61 = vpop.f32.mrf.mxu0 }
 0x3dd   : > { %11630 = vmatprep.subr.bf16.mxu1 %v20848_v38  ;;  %11813 = vmatpush3.bf16.msra.mxu0 %v16104_v33 }
 0x3de   : > { %11814 = vmatprep.subr.bf16.mxu0 %v20848_v38 }
 0x3e0   : > { %11631 = vmatpush3.bf16.msra.mxu1 %v15914_v1  ;;  %v21052_v1 = vld [vmem:[#allocation13_spill] sm:$0xff] }
 0x3e1   : > { %11632 = vmatprep.subr.bf16.mxu1 %v20848_v38  ;;  %11815 = vmatpush3.bf16.msra.mxu0 %v16111_v34 }
 0x3e2   : > { %11840 = vmatprep.subr.bf16.mxu0 %v20848_v38 }
 0x3e4   : > { %11633 = vmatpush3.bf16.msra.mxu1 %v15921_v11  ;;  %11817 = vmatmul.mubr.bf16.vlgmr.msra.gmra.mxu0 %v16647_v18  ;;  %v21053_v11 = vld [vmem:[#allocation14_spill] sm:$0xff] }
 0x3e5   : > { %11634 = vmatprep.subr.bf16.mxu1 %v20848_v38  ;;  %11841 = vmatpush3.bf16.msra.mxu0 %v16121_v39  ;;  %v16686_v22 = vpop.f32.mrf.mxu0 }
 0x3e6   : > { %11842 = vmatprep.subr.bf16.mxu0 %v20848_v38  ;;  %11856 = vmatprep.mubr.msk.bf16.mxu0 %vm14808_vm0, %v20848_v38 }
 0x3e7   : > { %v11618_v27 = vpop.f32.mrf.mxu0 }
 0x3e8   : > { %11635 = vmatpush3.bf16.msra.mxu1 %v15928_v21  ;;  %v21054_v21 = vld [vmem:[#allocation15_spill] sm:$0xff] }
 0x3e9   : > { %11660 = vmatprep.subr.bf16.mxu1 %v20848_v38  ;;  %11843 = vmatpush3.bf16.msra.mxu0 %v16130_v13  ;;  %v2756_v17 = vpop.f32.mrf.mxu0  ;;  %v14246_v13 = vld [vmem:[%s20760_s3 + $0xf8] sm:$0xff]  }
 0x3ea   : > { %11844 = vmatprep.subr.bf16.mxu0 %v20848_v38  ;;  %v14253_v17 = vld [vmem:[%s20760_s3 + $0xc0] sm:$0xff]  }
 0x3eb   : > { %11637 = vmatmul.mubr.bf16.vlgmr.msra.gmra.mxu1 %v8881_v14  ;;  %v11619_v19 = vpop.f32.mrf.mxu0  ;;  %v21059_v14 = vld [vmem:[#allocation6_spill] sm:$0xff] }
 0x3ec   : > { %11661 = vmatpush3.bf16.msra.mxu1 %v15939_v28  ;;  %11676 = vmatprep.mubr.msk.bf16.mxu1 %vm14808_vm0, %v20848_v38  ;;  %v21055_v28 = vld [vmem:[#allocation16_spill] sm:$0xff]  ;;  %v2074_v59 = vadd.f32 %v21060_v20, %v21059_v14 }
 0x3ed   : > { %11662 = vmatprep.subr.bf16.mxu1 %v20848_v38  ;;  %11845 = vmatpush3.bf16.msra.mxu0 %v16137_v43  ;;  %v14247_v43 = vld [vmem:[%s20760_s3 + $0xf0] sm:$0xff]  }
 0x3ee   : > { %11846 = vmatprep.subr.bf16.mxu0 %v20848_v38 }
 0x3f0   : > { %11663 = vmatpush3.bf16.msra.mxu1 %v15948_v30  ;;  %v21056_v30 = vld [vmem:[#allocation17_spill] sm:$0xff] }
 0x3f1   : > { %11664 = vmatprep.subr.bf16.mxu1 %v20848_v38  ;;  %11847 = vmatpush3.bf16.msra.mxu0 %v16144_v44  ;;  %v14248_v44 = vld [vmem:[%s20760_s3 + $0xe8] sm:$0xff]  }
 0x3f2   : > { %11848 = vmatprep.subr.bf16.mxu0 %v20848_v38 }
 0x3f4   : > { %11665 = vmatpush3.bf16.msra.mxu1 %v21052_v1 }
 0x3f5   : > { %11666 = vmatprep.subr.bf16.mxu1 %v20848_v38  ;;  %11849 = vmatpush3.bf16.msra.mxu0 %v16151_v0  ;;  %v14249_v0 = vld [vmem:[%s20760_s3 + $0xe0] sm:$0xff]  }
 0x3f6   : > { %11850 = vmatprep.subr.bf16.mxu0 %v20848_v38 }
 0x3f8   : > { %11667 = vmatpush3.bf16.msra.mxu1 %v21053_v11 }
 0x3f9   : > { %11668 = vmatprep.subr.bf16.mxu1 %v20848_v38  ;;  %11851 = vmatpush3.bf16.msra.mxu0 %v16158_v3  ;;  %v14250_v3 = vld [vmem:[%s20760_s3 + $0xd8] sm:$0xff]  }
 0x3fa   : > { %11852 = vmatprep.subr.bf16.mxu0 %v20848_v38 }
 0x3fc   : > { %11669 = vmatpush3.bf16.msra.mxu1 %v21054_v21 }
 0x3fd   : > { %11670 = vmatprep.subr.bf16.mxu1 %v20848_v38  ;;  %11853 = vmatpush3.bf16.msra.mxu0 %v16165_v47 }
 0x3fe   : > { %11854 = vmatprep.subr.bf16.mxu0 %v20848_v38 }
 0x400   : > { %11671 = vmatpush3.bf16.msra.mxu1 %v21055_v28 }
 0x401   : > { %11672 = vmatprep.subr.bf16.mxu1 %v20848_v38  ;;  %11855 = vmatpush3.bf16.msra.mxu0 %v16172_v48  ;;  %v14251_v48 = vld [vmem:[%s20760_s3 + $0xd0] sm:$0xff]  }
 0x402   : > { %11880 = vmatprep.subr.bf16.mxu0 %v20848_v38 }
 0x404   : > { %11673 = vmatpush3.bf16.msra.mxu1 %v21056_v30  ;;  %v14252_v30 = vld [vmem:[%s20760_s3 + $0xc8] sm:$0xff]  }
 0x405   : > { %11674 = vmatprep.subr.bf16.mxu1 %v20848_v38  ;;  %v16692_v29 = vpop.f32.mrf.mxu0 }
 0x407   : > { %v11658_v33 = vpop.f32.mrf.mxu0 }
 0x408   : > { %11675 = vmatpush3.bf16.msra.mxu1 %v21057_v12 }
 0x409   : > { %11700 = vmatprep.subr.bf16.mxu1 %v20848_v38  ;;  %v2838_v34 = vpop.f32.mrf.mxu0 }
 0x40b   : > { %11677 = vmatmul.mubr.bf16.vlgmr.msra.gmra.mxu1 %v21058_v15  ;;  %v11659_v39 = vpop.f32.mrf.mxu0 }
 0x40c   : > { %11716 = vmatprep.mubr.msk.bf16.mxu1 %vm14808_vm0, %v20848_v38  ;;  %11701 = vmatpush3.bf16.msra.mxu1 %v14246_v13 }
 0x40d   : > { %11702 = vmatprep.subr.bf16.mxu1 %v20848_v38 }
 0x410   : > { %11703 = vmatpush3.bf16.msra.mxu1 %v14247_v43 }
 0x411   : > { %11704 = vmatprep.subr.bf16.mxu1 %v20848_v38 }
 0x414   : > { %11705 = vmatpush3.bf16.msra.mxu1 %v14248_v44 }
 0x415   : > { %11706 = vmatprep.subr.bf16.mxu1 %v20848_v38 }
 0x418   : > { %11707 = vmatpush3.bf16.msra.mxu1 %v14249_v0 }
 0x419   : > { %11708 = vmatprep.subr.bf16.mxu1 %v20848_v38 }
 0x41c   : > { %11709 = vmatpush3.bf16.msra.mxu1 %v14250_v3 }
 0x41d   : > { %11710 = vmatprep.subr.bf16.mxu1 %v20848_v38 }
 0x420   : > { %11711 = vmatpush3.bf16.msra.mxu1 %v14251_v48 }
 0x421   : > { %11712 = vmatprep.subr.bf16.mxu1 %v20848_v38 }
 0x424   : > { %11713 = vmatpush3.bf16.msra.mxu1 %v14252_v30 }
 0x425   : > { %v2917_v47 = vpop.f32.mrf.mxu0  ;;  %11714 = vmatprep.subr.bf16.mxu1 %v20848_v38 }
 0x427   : > { %v11698_v61 = vpop.f32.mrf.mxu0 }
 0x428   : > { %11715 = vmatpush3.bf16.msra.mxu1 %v14253_v17 }
 0x429   : > { %v2920_v21 = vpop.f32.mrf.mxu0  ;;  %11740 = vmatprep.subr.bf16.mxu1 %v20848_v38 }
 0x42b   : > { %v11699_v12 = vpop.f32.mrf.mxu0 }
 0x44b   : > { %v2550_v1 = vpop.f32.mrf.mxu1 }
 0x44c   : > { %v16719_v11 = vadd.f32 %v2550_v1, %v2074_v59  ;;  %v8888_v59 = vld [vmem:[%s15034_s14 + $0x48] sm:$0xf] }
 0x44d   : > { %v11518_v28 = vpop.f32.mrf.mxu1  ;;  %11857 = vmatmul.mubr.bf16.vlgmr.msra.gmra.mxu0 %v8888_v59 }
 0x44e   : > { %11881 = vmatpush3.bf16.msra.mxu0 %v16180_v7  ;;  %11896 = vmatprep.mubr.msk.bf16.mxu0 %vm14808_vm0, %v20848_v38 }
 0x44f   : > { %v2553_v27 = vpop.f32.mrf.mxu1  ;;  %11882 = vmatprep.subr.bf16.mxu0 %v20848_v38 }
 0x450   : > { %v16767_v27 = vpop.f32.mrf.mxu0 }
 0x451   : > { %v11519_v15 = vpop.f32.mrf.mxu1 }
 0x452   : > { %11883 = vmatpush3.bf16.msra.mxu0 %v16191_v52  ;;  %v11738_v15 = vpop.f32.mrf.mxu0 }
 0x453   : > { %11884 = vmatprep.subr.bf16.mxu0 %v20848_v38 }
 0x456   : > { %11885 = vmatpush3.bf16.msra.mxu0 %v16198_v45 }
 0x457   : > { %11886 = vmatprep.subr.bf16.mxu0 %v20848_v38 }
 0x45a   : > { %11887 = vmatpush3.bf16.msra.mxu0 %v16205_v53 }
 0x45b   : > { %11888 = vmatprep.subr.bf16.mxu0 %v20848_v38 }
 0x45e   : > { %11889 = vmatpush3.bf16.msra.mxu0 %v16212_v4  ;;  %v16754_v4 = vld [vmem:[%s20759_s2] ss:$0 sm:$0xff] }
 0x45f   : > { %11890 = vmatprep.subr.bf16.mxu0 %v20848_v38 }
 0x462   : > { %11891 = vmatpush3.bf16.msra.mxu0 %v16219_v24 }
 0x463   : > { %11892 = vmatprep.subr.bf16.mxu0 %v20848_v38 }
 0x466   : > { %11893 = vmatpush3.bf16.msra.mxu0 %v16226_v26 }
 0x467   : > { %11894 = vmatprep.subr.bf16.mxu0 %v20848_v38 }
 0x46a   : > { %11895 = vmatpush3.bf16.msra.mxu0 %v16409_v42 }
 0x46b   : > { %v2631_v19 = vpop.f32.mrf.mxu1  ;;  %11920 = vmatprep.subr.bf16.mxu0 %v20848_v38 }
 0x46c   : > { %v2632_v61 = vadd.f32 %v2631_v19, %v16472_v54  ;;  %v21066_v19 = vld [vmem:[#allocation10_spill] sm:$0xff] }
 0x46d   : > { %v11558_v33 = vpop.f32.mrf.mxu1 }
 0x46e   : > { %v2677_v1 = vadd.f32 %v16644_v16, %v2632_v61  ;;  %v16842_v33 = vld [vmem:[%s20758_s1 + $0x88] sm:$0xff]   ;;  %v16910_v61 = vld [vmem:[%s20758_s1 + $0x120] sm:$0xff]  }
 0x46f   : > { %v2634_v34 = vpop.f32.mrf.mxu1 }
 0x470   : > { %v16851_v34 = vld [vmem:[%s20758_s1 + $0x80] sm:$0xff]  }
 0x471   : > { %v11559_v39 = vpop.f32.mrf.mxu1 }
 0x472   : > { %v16861_v39 = vld [vmem:[%s20758_s1 + $0x138] sm:$0xff]  }
 0x48b   : > { %v2712_v13 = vpop.f32.mrf.mxu1 }
 0x48c   : > { %v2718_v21 = vadd.f32 %v2712_v13, %v2677_v1  ;;  %v14465_v13 = vld [vmem:[%s15034_s14 + $0x30] sm:$0xf] }
 0x48d   : > { %v11598_v43 = vpop.f32.mrf.mxu1 }
 0x48e   : > { %v2759_v7 = vadd.f32 %v16686_v22, %v2718_v21  ;;  %v16871_v43 = vld [vmem:[%s20758_s1 + $0x178] sm:$0xff]   ;;  %v16917_v21 = vld [vmem:[%s20758_s1 + $0x160] sm:$0xff]  }
 0x48f   : > { %v2715_v44 = vpop.f32.mrf.mxu1 }
 0x490   : > { %v16880_v44 = vld [vmem:[%s20758_s1 + $0x130] sm:$0xff]  }
 0x491   : > { %v11599_v0 = vpop.f32.mrf.mxu1 }
 0x492   : > { %v16887_v0 = vld [vmem:[%s20758_s1 + $0x170] sm:$0xff]  }
 0x4ab   : > { %v2794_v3 = vpop.f32.mrf.mxu1 }
 0x4ac   : > { %v2800_v52 = vadd.f32 %v2794_v3, %v2759_v7  ;;  %v16924_v7 = vld [vmem:[%s20758_s1 + $0x118] sm:$0xff]  }
 0x4ad   : > { %v11638_v48 = vpop.f32.mrf.mxu1 }
 0x4ae   : > { %v2841_v45 = vadd.f32 %v16692_v29, %v2800_v52  ;;  %v16759_v29 = vld [vmem:[%s15034_s14 + $0x50] sm:$0xf]  ;;  %v16896_v48 = vld [vmem:[%s20758_s1 + $0x128] sm:$0xff]   ;;  %v16931_v52 = vld [vmem:[%s20758_s1 + $0x158] sm:$0xff]  }
 0x4af   : > { %v2797_v14 = vpop.f32.mrf.mxu1  ;;  %21061 = vst [vmem:[#allocation11_spill] sm:$0xff] %v16759_v29  ;;  %11897 = vmatmul.mubr.bf16.vlgmr.msra.gmra.mxu0 %v16759_v29  ;;  %v17082_v29 = vld [vmem:[%s20758_s1 + $0x1c8] sm:$0xff]  }
 0x4b0   : > { %11921 = vmatpush3.bf16.msra.mxu0 %v16239_v41  ;;  %11936 = vmatprep.mubr.msk.bf16.mxu0 %vm14808_vm0, %v20848_v38  ;;  %v3072_v41 = vpop.f32.mrf.mxu0  ;;  %21085 = vst [vmem:[#allocation25_spill] sm:$0xff] %v17082_v29 }
 0x4b1   : > { %v11639_v20 = vpop.f32.mrf.mxu1  ;;  %11922 = vmatprep.subr.bf16.mxu0 %v20848_v38  ;;  %v17019_v41 = vld [vmem:[%s20758_s1 + $0x1a8] sm:$0xff]  }
 0x4b2   : > { %v11739_v17 = vpop.f32.mrf.mxu0  ;;  %v16903_v20 = vld [vmem:[%s20758_s1 + $0x168] sm:$0xff]  }
 0x4b4   : > { %11923 = vmatpush3.bf16.msra.mxu0 %v16250_v8  ;;  %v21063_v8 = vld [vmem:[#allocation7_spill] sm:$0xff]  ;;  %v16891_v3 = vpop.f32.mrf.mxu0 }
 0x4b5   : > { %11924 = vmatprep.subr.bf16.mxu0 %v20848_v38 }
 0x4b6   : > { %v11778_v14 = vpop.f32.mrf.mxu0 }
 0x4b7   : > { %v17033_v14 = vld [vmem:[%s20758_s1 + $0x1a0] sm:$0xff]  }
 0x4b8   : > { %11925 = vmatpush3.bf16.msra.mxu0 %v16257_v58  ;;  %v16801_v58 = vld [vmem:[%s15034_s14 + $0x20] sm:$0xf]  ;;  %v3152_v59 = vpop.f32.mrf.mxu0  ;;  %21078 = vst [vmem:[#allocation10_spill] sm:$0xff] %v17033_v14 }
 0x4b9   : > { %11926 = vmatprep.subr.bf16.mxu0 %v20848_v38  ;;  %21062 = vst [vmem:[#allocation13_spill] sm:$0xff] %v16801_v58 }
 0x4ba   : > { %v11779_v1 = vpop.f32.mrf.mxu0 }
 0x4bb   : > { %v17040_v1 = vld [vmem:[%s20758_s1 + $0x1e0] sm:$0xff]  }
 0x4bc   : > { %11927 = vmatpush3.bf16.msra.mxu0 %v16264_v60  ;;  %v21064_v60 = vld [vmem:[#allocation8_spill] sm:$0xff]  ;;  %v17014_v15 = vpop.f32.mrf.mxu0  ;;  %21079 = vst [vmem:[#allocation19_spill] sm:$0xff] %v17040_v1 }
 0x4bd   : > { %11928 = vmatprep.subr.bf16.mxu0 %v20848_v38  ;;  %21076 = vst [vmem:[#allocation8_spill] sm:$0xff] %v17019_v41 }
 0x4be   : > { %v11818_v17 = vpop.f32.mrf.mxu0 }
 0x4bf   : > { %v17047_v17 = vld [vmem:[%s20758_s1 + $0x198] sm:$0xff]  }
 0x4c0   : > { %11929 = vmatpush3.bf16.msra.mxu0 %v16271_v62  ;;  %v21065_v62 = vld [vmem:[#allocation9_spill] sm:$0xff]  ;;  %21080 = vst [vmem:[#allocation20_spill] sm:$0xff] %v17047_v17 }
 0x4c1   : > { %11930 = vmatprep.subr.bf16.mxu0 %v20848_v38 }
 0x4c4   : > { %11931 = vmatpush3.bf16.msra.mxu0 %v16278_v49  ;;  %v16833_v49 = vld [vmem:[%s20758_s1 + $0x90] sm:$0xff]  }
 0x4c5   : > { %11932 = vmatprep.subr.bf16.mxu0 %v20848_v38 }
 0x4c8   : > { %11933 = vmatpush3.bf16.msra.mxu0 %v16285_v40  ;;  %v14460_v40 = vld [vmem:[%s15034_s14 + $0x18] sm:$0xf] }
 0x4c9   : > { %11934 = vmatprep.subr.bf16.mxu0 %v20848_v38 }
 0x4cb   : > { %v2876_v54 = vpop.f32.mrf.mxu1 }
 0x4cc   : > { %v2882_v16 = vadd.f32 %v2876_v54, %v2841_v45  ;;  %11935 = vmatpush3.bf16.msra.mxu0 %v16486_v2  ;;  %v16938_v45 = vld [vmem:[%s20758_s1 + $0x110] sm:$0xff]  }
 0x4cd   : > { %v11678_v28 = vpop.f32.mrf.mxu1  ;;  %11960 = vmatprep.subr.bf16.mxu0 %v20848_v38  ;;  %v16945_v54 = vld [vmem:[%s20758_s1 + $0x150] sm:$0xff]  }
 0x4ce   : > { %v2923_v53 = vadd.f32 %v2917_v47, %v2882_v16  ;;  %21067 = vst [vmem:[#allocation14_spill] sm:$0xff] %v16945_v54  ;;  %v16952_v16 = vld [vmem:[%s20758_s1 + $0x108] sm:$0xff]  }
 0x4cf   : > { %v2879_v22 = vpop.f32.mrf.mxu1  ;;  %11937 = vmatmul.mubr.bf16.vlgmr.msra.gmra.mxu0 %v16801_v58  ;;  %v16959_v28 = vld [vmem:[%s20758_s1 + $0x148] sm:$0xff]  }
 0x4d0   : > { %v2924_v24 = vadd.f32 %v16754_v4, %v2923_v53  ;;  %11961 = vmatpush3.bf16.msra.mxu0 %v16504_v46  ;;  %11976 = vmatprep.mubr.msk.bf16.mxu0 %vm14808_vm0, %v20848_v38  ;;  %21068 = vst [vmem:[#allocation15_spill] sm:$0xff] %v16959_v28  ;;  %v16966_v53 = vld [vmem:[%s20758_s1 + $0x100] sm:$0xff]   ;;  %v17075_v58 = vld [vmem:[%s20758_s1 + $0x188] sm:$0xff]  }
 0x4d1   : > { %v11679_v30 = vpop.f32.mrf.mxu1  ;;  %11962 = vmatprep.subr.bf16.mxu0 %v20848_v38  ;;  %21069 = vst [vmem:[#allocation16_spill] sm:$0xff] %v16966_v53  ;;  %v16973_v22 = vld [vmem:[%s20758_s1 + $0x140] sm:$0xff]   ;;  %21084 = vst [vmem:[#allocation24_spill] sm:$0xff] %v17075_v58 }
 0x4d2   : > { %vm2925_vm4 = vcmp.ge.f32.partialorder %v2924_v24, 0.0  ;;  %v2926_v12 = vmul.f32 0.2, %v2924_v24  ;;  %21070 = vst [vmem:[#allocation17_spill] sm:$0xff] %v16973_v22  ;;  %v16984_v30 = vld [vmem:[%s20758_s1 + $0x1b8] sm:$0xff]  }
 0x4d3   : > { %21072 = vst [vmem:[#allocation5_spill] sm:$0xff] %v16984_v30 }
 0x4d4   : > { %v2927_v26 = vsel %vm2925_vm4, %v2924_v24, %v2926_v12  ;;  %11963 = vmatpush3.bf16.msra.mxu0 %v16523_v51  ;;  %v16977_v24 = vld [vmem:[%s15034_s14 + $0x38] sm:$0xf] }
 0x4d5   : > { %v2928_v47 = vpack.c.bf16 %v2927_v26, %v2927_v26  ;;  %11964 = vmatprep.subr.bf16.mxu0 %v20848_v38  ;;  %21071 = vst [vmem:[#allocation18_spill] sm:$0xff] %v16977_v24  ;;  %v16994_v12 = vld [vmem:[%s20758_s1 + $0x1f8] sm:$0xff]   ;;  %v17003_v26 = vld [vmem:[%s20758_s1 + $0x1b0] sm:$0xff]  }
 0x4d6   : > { %21073 = vst [vmem:[#allocation6_spill] sm:$0xff] %v16994_v12  ;;  %21074 = vst [vmem:[#allocation4_spill] sm:$0xff] %v17003_v26 }
 0x4d7   : > { %11717 = vmatmul.mubr.bf16.vlgmr.msra.gmra.mxu1 %v2928_v47  ;;  %v17010_v47 = vld [vmem:[%s20758_s1 + $0x1f0] sm:$0xff]  }
 0x4d8   : > { %11741 = vmatpush3.bf16.msra.mxu1 %v16421_v23  ;;  %11756 = vmatprep.mubr.msk.bf16.mxu1 %vm14808_vm0, %v20848_v38  ;;  %21075 = vst [vmem:[#allocation7_spill] sm:$0xff] %v17010_v47 }
 0x4d9   : > { %11742 = vmatprep.subr.bf16.mxu1 %v20848_v38  ;;  %11965 = vmatpush3.bf16.msra.mxu0 %v16537_v37 }
 0x4da   : > { %11966 = vmatprep.subr.bf16.mxu0 %v20848_v38 }
 0x4dc   : > { %11743 = vmatpush3.bf16.msra.mxu1 %v16432_v56 }
 0x4dd   : > { %11744 = vmatprep.subr.bf16.mxu1 %v20848_v38  ;;  %11967 = vmatpush3.bf16.msra.mxu0 %v21064_v60 }
 0x4de   : > { %11968 = vmatprep.subr.bf16.mxu0 %v20848_v38 }
 0x4e0   : > { %11745 = vmatpush3.bf16.msra.mxu1 %v16441_v9 }
 0x4e1   : > { %11746 = vmatprep.subr.bf16.mxu1 %v20848_v38  ;;  %11969 = vmatpush3.bf16.msra.mxu0 %v16565_v32 }
 0x4e2   : > { %11970 = vmatprep.subr.bf16.mxu0 %v20848_v38 }
 0x4e4   : > { %11747 = vmatpush3.bf16.msra.mxu1 %v16450_v55 }
 0x4e5   : > { %11748 = vmatprep.subr.bf16.mxu1 %v20848_v38  ;;  %11971 = vmatpush3.bf16.msra.mxu0 %v16833_v49 }
 0x4e6   : > { %11972 = vmatprep.subr.bf16.mxu0 %v20848_v38 }
 0x4e8   : > { %11749 = vmatpush3.bf16.msra.mxu1 %v16459_v31 }
 0x4e9   : > { %11750 = vmatprep.subr.bf16.mxu1 %v20848_v38  ;;  %11973 = vmatpush3.bf16.msra.mxu0 %v16842_v33 }
 0x4ea   : > { %11974 = vmatprep.subr.bf16.mxu0 %v20848_v38 }
 0x4ec   : > { %11751 = vmatpush3.bf16.msra.mxu1 %v16468_v35 }
 0x4ed   : > { %11752 = vmatprep.subr.bf16.mxu1 %v20848_v38  ;;  %11975 = vmatpush3.bf16.msra.mxu0 %v16851_v34 }
 0x4ee   : > { %12000 = vmatprep.subr.bf16.mxu0 %v20848_v38 }
 0x4f0   : > { %11753 = vmatpush3.bf16.msra.mxu1 %v16479_v50  ;;  %11977 = vmatmul.mubr.bf16.vlgmr.msra.gmra.mxu0 %v16609_v10 }
 0x4f1   : > { %11754 = vmatprep.subr.bf16.mxu1 %v20848_v38  ;;  %12001 = vmatpush3.bf16.msra.mxu0 %v16861_v39 }
 0x4f2   : > { %12002 = vmatprep.subr.bf16.mxu0 %v20848_v38  ;;  %12016 = vmatprep.mubr.msk.bf16.mxu0 %vm14808_vm0, %v20848_v38 }
 0x4f4   : > { %11755 = vmatpush3.bf16.msra.mxu1 %v16493_v36 }
 0x4f5   : > { %11780 = vmatprep.subr.bf16.mxu1 %v20848_v38  ;;  %12003 = vmatpush3.bf16.msra.mxu0 %v16880_v44 }
 0x4f6   : > { %12004 = vmatprep.subr.bf16.mxu0 %v20848_v38 }
 0x4f7   : > { %11757 = vmatmul.mubr.bf16.vlgmr.msra.gmra.mxu1 %v14460_v40  ;;  %v17026_v40 = vld [vmem:[%s20758_s1 + $0x1e8] sm:$0xff]  }
 0x4f8   : > { %11781 = vmatpush3.bf16.msra.mxu1 %v16514_v25  ;;  %11796 = vmatprep.mubr.msk.bf16.mxu1 %vm14808_vm0, %v20848_v38  ;;  %21077 = vst [vmem:[#allocation9_spill] sm:$0xff] %v17026_v40 }
 0x4f9   : > { %11782 = vmatprep.subr.bf16.mxu1 %v20848_v38  ;;  %12005 = vmatpush3.bf16.msra.mxu0 %v16896_v48 }
 0x4fa   : > { %12006 = vmatprep.subr.bf16.mxu0 %v20848_v38 }
 0x4fc   : > { %11783 = vmatpush3.bf16.msra.mxu1 %v16530_v57 }
 0x4fd   : > { %11784 = vmatprep.subr.bf16.mxu1 %v20848_v38  ;;  %12007 = vmatpush3.bf16.msra.mxu0 %v16910_v61 }
 0x4fe   : > { %12008 = vmatprep.subr.bf16.mxu0 %v20848_v38 }
 0x500   : > { %11785 = vmatpush3.bf16.msra.mxu1 %v21063_v8 }
 0x501   : > { %11786 = vmatprep.subr.bf16.mxu1 %v20848_v38  ;;  %12009 = vmatpush3.bf16.msra.mxu0 %v16924_v7 }
 0x502   : > { %12010 = vmatprep.subr.bf16.mxu0 %v20848_v38 }
 0x504   : > { %11787 = vmatpush3.bf16.msra.mxu1 %v21065_v62 }
 0x505   : > { %11788 = vmatprep.subr.bf16.mxu1 %v20848_v38  ;;  %12011 = vmatpush3.bf16.msra.mxu0 %v16938_v45 }
 0x506   : > { %12012 = vmatprep.subr.bf16.mxu0 %v20848_v38 }
 0x508   : > { %11789 = vmatpush3.bf16.msra.mxu1 %v16572_v5 }
 0x509   : > { %11790 = vmatprep.subr.bf16.mxu1 %v20848_v38  ;;  %12013 = vmatpush3.bf16.msra.mxu0 %v16952_v16 }
 0x50a   : > { %12014 = vmatprep.subr.bf16.mxu0 %v20848_v38 }
 0x50c   : > { %11791 = vmatpush3.bf16.msra.mxu1 %v21066_v19 }
 0x50d   : > { %11792 = vmatprep.subr.bf16.mxu1 %v20848_v38  ;;  %12015 = vmatpush3.bf16.msra.mxu0 %v16966_v53 }
 0x50e   : > { %12040 = vmatprep.subr.bf16.mxu0 %v20848_v38 }
 0x510   : > { %11793 = vmatpush3.bf16.msra.mxu1 %v16590_v6  ;;  %12017 = vmatmul.mubr.bf16.vlgmr.msra.gmra.mxu0 %v16977_v24 }
 0x511   : > { %11794 = vmatprep.subr.bf16.mxu1 %v20848_v38  ;;  %12041 = vmatpush3.bf16.msra.mxu0 %v16984_v30 }
 0x512   : > { %12042 = vmatprep.subr.bf16.mxu0 %v20848_v38  ;;  %12056 = vmatprep.mubr.msk.bf16.mxu0 %vm14808_vm0, %v20848_v38 }
 0x514   : > { %11795 = vmatpush3.bf16.msra.mxu1 %v16599_v63 }
 0x515   : > { %11820 = vmatprep.subr.bf16.mxu1 %v20848_v38  ;;  %12043 = vmatpush3.bf16.msra.mxu0 %v17003_v26 }
 0x516   : > { %12044 = vmatprep.subr.bf16.mxu0 %v20848_v38 }
 0x517   : > { %11797 = vmatmul.mubr.bf16.vlgmr.msra.gmra.mxu1 %v14465_v13  ;;  %v3234_v13 = vpop.f32.mrf.mxu0 }
 0x518   : > { %11821 = vmatpush3.bf16.msra.mxu1 %v16871_v43  ;;  %11836 = vmatprep.mubr.msk.bf16.mxu1 %vm14808_vm0, %v20848_v38  ;;  %v17054_v13 = vld [vmem:[%s20758_s1 + $0x1d8] sm:$0xff]  }
 0x519   : > { %11822 = vmatprep.subr.bf16.mxu1 %v20848_v38  ;;  %12045 = vmatpush3.bf16.msra.mxu0 %v17019_v41  ;;  %v11819_v59 = vpop.f32.mrf.mxu0  ;;  %21081 = vst [vmem:[#allocation21_spill] sm:$0xff] %v17054_v13 }
 0x51a   : > { %12046 = vmatprep.subr.bf16.mxu0 %v20848_v38  ;;  %v17061_v59 = vld [vmem:[%s20758_s1 + $0x190] sm:$0xff]  }
 0x51b   : > { %21082 = vst [vmem:[#allocation22_spill] sm:$0xff] %v17061_v59 }
 0x51c   : > { %11823 = vmatpush3.bf16.msra.mxu1 %v16887_v0 }
 0x51d   : > { %11824 = vmatprep.subr.bf16.mxu1 %v20848_v38  ;;  %12047 = vmatpush3.bf16.msra.mxu0 %v17033_v14 }
 0x51e   : > { %12048 = vmatprep.subr.bf16.mxu0 %v20848_v38 }
 0x520   : > { %11825 = vmatpush3.bf16.msra.mxu1 %v16903_v20 }
 0x521   : > { %11826 = vmatprep.subr.bf16.mxu1 %v20848_v38  ;;  %12049 = vmatpush3.bf16.msra.mxu0 %v17047_v17  ;;  %v14255_v17 = vld [vmem:[%s20760_s3 + $0x130] sm:$0xff]  }
 0x522   : > { %12050 = vmatprep.subr.bf16.mxu0 %v20848_v38 }
 0x524   : > { %11827 = vmatpush3.bf16.msra.mxu1 %v16917_v21 }
 0x525   : > { %11828 = vmatprep.subr.bf16.mxu1 %v20848_v38  ;;  %12051 = vmatpush3.bf16.msra.mxu0 %v17061_v59 }
 0x526   : > { %12052 = vmatprep.subr.bf16.mxu0 %v20848_v38 }
 0x528   : > { %11829 = vmatpush3.bf16.msra.mxu1 %v16931_v52 }
 0x529   : > { %11830 = vmatprep.subr.bf16.mxu1 %v20848_v38  ;;  %12053 = vmatpush3.bf16.msra.mxu0 %v17075_v58  ;;  %v8889_v58 = vld [vmem:[%s15034_s14 + $0x4c] sm:$0xf] }
 0x52a   : > { %12054 = vmatprep.subr.bf16.mxu0 %v20848_v38 }
 0x52c   : > { %11831 = vmatpush3.bf16.msra.mxu1 %v16945_v54  ;;  %v17196_v54 = vld [vmem:[%s15034_s14 + $0x54] sm:$0xf] }
 0x52d   : > { %11832 = vmatprep.subr.bf16.mxu1 %v20848_v38  ;;  %21096 = vst [vmem:[#allocation36_spill] sm:$0xff] %v17196_v54 }
 0x530   : > { %11833 = vmatpush3.bf16.msra.mxu1 %v16959_v28 }
 0x531   : > { %11834 = vmatprep.subr.bf16.mxu1 %v20848_v38 }
 0x534   : > { %11835 = vmatpush3.bf16.msra.mxu1 %v16973_v22 }
 0x535   : > { %11860 = vmatprep.subr.bf16.mxu1 %v20848_v38 }
 0x537   : > { %11837 = vmatmul.mubr.bf16.vlgmr.msra.gmra.mxu1 %v16977_v24  ;;  %v17068_v24 = vld [vmem:[%s20758_s1 + $0x1d0] sm:$0xff]  }
 0x538   : > { %11861 = vmatpush3.bf16.msra.mxu1 %v16994_v12  ;;  %11876 = vmatprep.mubr.msk.bf16.mxu1 %vm14808_vm0, %v20848_v38  ;;  %21083 = vst [vmem:[#allocation23_spill] sm:$0xff] %v17068_v24 }
 0x539   : > { %11862 = vmatprep.subr.bf16.mxu1 %v20848_v38 }
 0x53c   : > { %11863 = vmatpush3.bf16.msra.mxu1 %v17010_v47 }
 0x53d   : > { %11864 = vmatprep.subr.bf16.mxu1 %v20848_v38 }
 0x540   : > { %11865 = vmatpush3.bf16.msra.mxu1 %v17026_v40 }
 0x541   : > { %11866 = vmatprep.subr.bf16.mxu1 %v20848_v38 }
 0x544   : > { %11867 = vmatpush3.bf16.msra.mxu1 %v17040_v1 }
 0x545   : > { %11868 = vmatprep.subr.bf16.mxu1 %v20848_v38 }
 0x548   : > { %11869 = vmatpush3.bf16.msra.mxu1 %v17054_v13  ;;  %v17097_v13 = vld [vmem:[%s20758_s1 + $0x1c0] sm:$0xff]  }
 0x549   : > { %11870 = vmatprep.subr.bf16.mxu1 %v20848_v38  ;;  %21087 = vst [vmem:[#allocation27_spill] sm:$0xff] %v17097_v13 }
 0x54c   : > { %11871 = vmatpush3.bf16.msra.mxu1 %v17068_v24  ;;  %v17089_v24 = vld [vmem:[%s20758_s1 + $0x180] sm:$0xff]  }
 0x54d   : > { %11872 = vmatprep.subr.bf16.mxu1 %v20848_v38  ;;  %21086 = vst [vmem:[#allocation26_spill] sm:$0xff] %v17089_v24  ;;  %12055 = vmatpush3.bf16.msra.mxu0 %v17089_v24 }
 0x54e   : > { %12080 = vmatprep.subr.bf16.mxu0 %v20848_v38 }
 0x550   : > { %11873 = vmatpush3.bf16.msra.mxu1 %v17082_v29  ;;  %12057 = vmatmul.mubr.bf16.vlgmr.msra.gmra.mxu0 %v8889_v58  ;;  %v17104_v29 = vld [vmem:[%s20758_s1 + $0x238] sm:$0xff]  }
 0x551   : > { %11874 = vmatprep.subr.bf16.mxu1 %v20848_v38  ;;  %21088 = vst [vmem:[#allocation28_spill] sm:$0xff] %v17104_v29  ;;  %12081 = vmatpush3.bf16.msra.mxu0 %v17104_v29  ;;  %v17122_v29 = vld [vmem:[%s20758_s1 + $0x228] sm:$0xff]  }
 0x552   : > { %12082 = vmatprep.subr.bf16.mxu0 %v20848_v38  ;;  %12096 = vmatprep.mubr.msk.bf16.mxu0 %vm14808_vm0, %v20848_v38  ;;  %21090 = vst [vmem:[#allocation30_spill] sm:$0xff] %v17122_v29 }
 0x554   : > { %11875 = vmatpush3.bf16.msra.mxu1 %v17097_v13  ;;  %v17115_v13 = vld [vmem:[%s20758_s1 + $0x230] sm:$0xff]  }
 0x555   : > { %11900 = vmatprep.subr.bf16.mxu1 %v20848_v38  ;;  %21089 = vst [vmem:[#allocation29_spill] sm:$0xff] %v17115_v13  ;;  %12083 = vmatpush3.bf16.msra.mxu0 %v17115_v13  ;;  %v17136_v13 = vld [vmem:[%s20758_s1 + $0x218] sm:$0xff]  }
 0x556   : > { %12084 = vmatprep.subr.bf16.mxu0 %v20848_v38  ;;  %21092 = vst [vmem:[#allocation32_spill] sm:$0xff] %v17136_v13 }
 0x557   : > { %11877 = vmatmul.mubr.bf16.vlgmr.msra.gmra.mxu1 %v8889_v58  ;;  %v17129_v58 = vld [vmem:[%s20758_s1 + $0x220] sm:$0xff]  }
 0x558   : > { %11916 = vmatprep.mubr.msk.bf16.mxu1 %vm14808_vm0, %v20848_v38  ;;  %21091 = vst [vmem:[#allocation31_spill] sm:$0xff] %v17129_v58 }
 0x559   : > { %12085 = vmatpush3.bf16.msra.mxu0 %v17122_v29  ;;  %v17143_v29 = vld [vmem:[%s20758_s1 + $0x210] sm:$0xff]  }
 0x55a   : > { %12086 = vmatprep.subr.bf16.mxu0 %v20848_v38  ;;  %21093 = vst [vmem:[#allocation33_spill] sm:$0xff] %v17143_v29 }
 0x55d   : > { %12087 = vmatpush3.bf16.msra.mxu0 %v17129_v58  ;;  %v17150_v58 = vld [vmem:[%s20758_s1 + $0x208] sm:$0xff]  }
 0x55e   : > { %12088 = vmatprep.subr.bf16.mxu0 %v20848_v38  ;;  %21094 = vst [vmem:[#allocation34_spill] sm:$0xff] %v17150_v58 }
 0x561   : > { %12089 = vmatpush3.bf16.msra.mxu0 %v17136_v13  ;;  %v3313_v13 = vpop.f32.mrf.mxu0 }
 0x562   : > { %12090 = vmatprep.subr.bf16.mxu0 %v20848_v38 }
 0x563   : > { %v11858_v24 = vpop.f32.mrf.mxu0 }
 0x564   : > { %v14257_v24 = vld [vmem:[%s20760_s3 + $0x120] sm:$0xff]  }
 0x565   : > { %12091 = vmatpush3.bf16.msra.mxu0 %v17143_v29  ;;  %v3316_v59 = vpop.f32.mrf.mxu0  ;;  %v14254_v29 = vld [vmem:[%s20760_s3 + $0x138] sm:$0xff]  }
 0x566   : > { %12092 = vmatprep.subr.bf16.mxu0 %v20848_v38  ;;  %11901 = vmatpush3.bf16.msra.mxu1 %v14254_v29  ;;  %v14258_v29 = vld [vmem:[%s20760_s3 + $0x118] sm:$0xff]  }
 0x567   : > { %v11859_v1 = vpop.f32.mrf.mxu0  ;;  %11902 = vmatprep.subr.bf16.mxu1 %v20848_v38 }
 0x569   : > { %12093 = vmatpush3.bf16.msra.mxu0 %v17150_v58 }
 0x56a   : > { %12094 = vmatprep.subr.bf16.mxu0 %v20848_v38  ;;  %11903 = vmatpush3.bf16.msra.mxu1 %v14255_v17  ;;  %v14259_v17 = vld [vmem:[%s20760_s3 + $0x110] sm:$0xff]  }
 0x56b   : > { %11904 = vmatprep.subr.bf16.mxu1 %v20848_v38 }
 0x56d   : > { %12095 = vmatpush3.bf16.msra.mxu0 %v16409_v42  ;;  %v14256_v42 = vld [vmem:[%s20760_s3 + $0x128] sm:$0xff]  }
 0x56e   : > { %12120 = vmatprep.subr.bf16.mxu0 %v20848_v38  ;;  %11905 = vmatpush3.bf16.msra.mxu1 %v14256_v42 }
 0x56f   : > { %11906 = vmatprep.subr.bf16.mxu1 %v20848_v38  ;;  %v3395_v1 = vpop.f32.mrf.mxu0 }
 0x570   : > { %12097 = vmatmul.mubr.bf16.vlgmr.msra.gmra.mxu0 %v17196_v54 }
 0x571   : > { %v11898_v59 = vpop.f32.mrf.mxu0 }
 0x572   : > { %11907 = vmatpush3.bf16.msra.mxu1 %v14257_v24 }
 0x573   : > { %11908 = vmatprep.subr.bf16.mxu1 %v20848_v38  ;;  %v3398_v24 = vpop.f32.mrf.mxu0 }
 0x575   : > { %v11899_v14 = vpop.f32.mrf.mxu0 }
 0x576   : > { %11909 = vmatpush3.bf16.msra.mxu1 %v14258_v29  ;;  %v14260_v29 = vld [vmem:[%s20760_s3 + $0x108] sm:$0xff]  }
 0x577   : > { %11910 = vmatprep.subr.bf16.mxu1 %v20848_v38 }
 0x57a   : > { %11911 = vmatpush3.bf16.msra.mxu1 %v14259_v17  ;;  %v14261_v17 = vld [vmem:[%s20760_s3 + $0x100] sm:$0xff]  }
 0x57b   : > { %11912 = vmatprep.subr.bf16.mxu1 %v20848_v38 }
 0x57e   : > { %11913 = vmatpush3.bf16.msra.mxu1 %v14260_v29 }
 0x57f   : > { %11914 = vmatprep.subr.bf16.mxu1 %v20848_v38 }
 0x582   : > { %11915 = vmatpush3.bf16.msra.mxu1 %v14261_v17 }
 0x583   : > { %11940 = vmatprep.subr.bf16.mxu1 %v20848_v38 }
 0x597   : > { %v3028_v42 = vpop.f32.mrf.mxu1 }
 0x598   : > { %v17180_v58 = vadd.f32 %v3028_v42, %v16719_v11 }
 0x599   : > { %v11718_v40 = vpop.f32.mrf.mxu1 }
 0x59a   : > { %21095 = vst [vmem:[#allocation35_spill] sm:$0xff] %v17180_v58 }
 0x59b   : > { %v3031_v47 = vpop.f32.mrf.mxu1 }
 0x59d   : > { %v11719_v41 = vpop.f32.mrf.mxu1 }
 0x5b7   : > { %v3109_v11 = vpop.f32.mrf.mxu1 }
 0x5b8   : > { %v3110_v22 = vadd.f32 %v3109_v11, %v16767_v27  ;;  %v17202_v27 = vld [vmem:[%s20758_s1 + $0x78] sm:$0xff]  }
 0x5b9   : > { %v11758_v59 = vpop.f32.mrf.mxu1  ;;  %12121 = vmatpush3.bf16.msra.mxu0 %v17202_v27 }
 0x5ba   : > { %v3155_v30 = vadd.f32 %v16891_v3, %v3110_v22  ;;  %v17213_v22 = vld [vmem:[%s20758_s1 + $0x70] sm:$0xff]  }
 0x5bb   : > { %v3112_v40 = vpop.f32.mrf.mxu1 }
 0x5bd   : > { %v11759_v42 = vpop.f32.mrf.mxu1 }
 0x5d7   : > { %v3190_v24 = vpop.f32.mrf.mxu1 }
 0x5d8   : > { %v3196_v17 = vadd.f32 %v3190_v24, %v3155_v30 }
 0x5d9   : > { %v11798_v58 = vpop.f32.mrf.mxu1 }
 0x5da   : > { %v3237_v38 = vadd.f32 %v17014_v15, %v3196_v17  ;;  %v21113_v17 = vld [vmem:[#allocation22_spill] sm:$0xff] }
 0x5db   : > { %v3193_v12 = vpop.f32.mrf.mxu1 }
 0x5dd   : > { %v11799_v14 = vpop.f32.mrf.mxu1 }
 0x5f7   : > { %v3272_v47 = vpop.f32.mrf.mxu1 }
 0x5f8   : > { %v3278_v28 = vadd.f32 %v3272_v47, %v3237_v38  ;;  %v21097_v38 = vmov 0.0   ;;  %v21111_v47 = vld [vmem:[#allocation20_spill] sm:$0xff] }
 0x5f9   : > { %v11838_v29 = vpop.f32.mrf.mxu1  ;;  %12136 = vmatprep.mubr.msk.bf16.mxu0 %vm14808_vm0, %v21097_v38  ;;  %12122 = vmatprep.subr.bf16.mxu0 %v21097_v38 }
 0x5fa   : > { %v3319_v59 = vadd.f32 %v3313_v13, %v3278_v28  ;;  %12123 = vmatpush3.bf16.msra.mxu0 %v17213_v22  ;;  %v17224_v13 = vld [vmem:[%s20758_s1 + $0x68] sm:$0xff]  }
 0x5fb   : > { %v3275_v26 = vpop.f32.mrf.mxu1  ;;  %12124 = vmatprep.subr.bf16.mxu0 %v21097_v38 }
 0x5fd   : > { %v11839_v41 = vpop.f32.mrf.mxu1 }
 0x5fe   : > { %12125 = vmatpush3.bf16.msra.mxu0 %v17224_v13  ;;  %v21112_v41 = vld [vmem:[#allocation19_spill] sm:$0xff] }
 0x5ff   : > { %12126 = vmatprep.subr.bf16.mxu0 %v21097_v38 }
 0x617   : > { %v3354_v40 = vpop.f32.mrf.mxu1 }
 0x618   : > { %v3360_v42 = vadd.f32 %v3354_v40, %v3319_v59  ;;  %v21114_v59 = vld [vmem:[#allocation21_spill] sm:$0xff]  ;;  %v21115_v40 = vld [vmem:[#allocation24_spill] sm:$0xff] }
 0x619   : > { %v11878_v53 = vpop.f32.mrf.mxu1 }
 0x61a   : > { %v3401_v58 = vadd.f32 %v3395_v1, %v3360_v42  ;;  %v17208_v53 = vpop.f32.mrf.mxu0  ;;  %v17233_v1 = vld [vmem:[%s20758_s1 + $0x60] sm:$0xff]  }
 0x61b   : > { %v3357_v12 = vpop.f32.mrf.mxu1  ;;  %12127 = vmatpush3.bf16.msra.mxu0 %v17233_v1  ;;  %v21116_v42 = vld [vmem:[#allocation23_spill] sm:$0xff] }
 0x61c   : > { %v3402_v14 = vadd.f32 %v16754_v4, %v3401_v58  ;;  %v11938_v30 = vpop.f32.mrf.mxu0  ;;  %12128 = vmatprep.subr.bf16.mxu0 %v21097_v38  ;;  %v21117_v58 = vld [vmem:[#allocation26_spill] sm:$0xff]  ;;  %v21118_v12 = vld [vmem:[#allocation25_spill] sm:$0xff] }
 0x61d   : > { %v11879_v29 = vpop.f32.mrf.mxu1 }
 0x61e   : > { %vm3403_vm5 = vcmp.ge.f32.partialorder %v3402_v14, 0.0  ;;  %v3404_v26 = vmul.f32 0.2, %v3402_v14  ;;  %v3550_v15 = vpop.f32.mrf.mxu0  ;;  %v21120_v29 = vld [vmem:[#allocation28_spill] sm:$0xff] }
 0x620   : > { %v3405_v3 = vsel %vm3403_vm5, %v3402_v14, %v3404_v26  ;;  %v21119_v14 = vld [vmem:[#allocation11_spill] sm:$0xff] }
 0x621   : > { %v3406_v28 = vpack.c.bf16 %v3405_v3, %v3405_v3  ;;  %v21121_v26 = vld [vmem:[#allocation27_spill] sm:$0xff]  ;;  %v21122_v3 = vld [vmem:[#allocation29_spill] sm:$0xff] }
 0x623   : > { %11917 = vmatmul.mubr.bf16.vlgmr.msra.gmra.mxu1 %v3406_v28  ;;  %v21123_v28 = vld [vmem:[#allocation30_spill] sm:$0xff] }
 0x624   : > { %11941 = vmatpush3.bf16.msra.mxu1 %v16421_v23  ;;  %11956 = vmatprep.mubr.msk.bf16.mxu1 %vm14808_vm0, %v21097_v38  ;;  %v11939_v23 = vpop.f32.mrf.mxu0 }
 0x625   : > { %11942 = vmatprep.subr.bf16.mxu1 %v21097_v38  ;;  %v21124_v23 = vld [vmem:[#allocation31_spill] sm:$0xff] }
 0x628   : > { %11943 = vmatpush3.bf16.msra.mxu1 %v16432_v56  ;;  %v17242_v56 = vld [vmem:[%s20758_s1 + $0x58] sm:$0xff]  }
 0x629   : > { %11944 = vmatprep.subr.bf16.mxu1 %v21097_v38  ;;  %12129 = vmatpush3.bf16.msra.mxu0 %v17242_v56 }
 0x62a   : > { %12130 = vmatprep.subr.bf16.mxu0 %v21097_v38 }
 0x62c   : > { %11945 = vmatpush3.bf16.msra.mxu1 %v16441_v9  ;;  %v17251_v9 = vld [vmem:[%s20758_s1 + $0x50] sm:$0xff]  }
 0x62d   : > { %11946 = vmatprep.subr.bf16.mxu1 %v21097_v38  ;;  %12131 = vmatpush3.bf16.msra.mxu0 %v17251_v9 }
 0x62e   : > { %12132 = vmatprep.subr.bf16.mxu0 %v21097_v38 }
 0x630   : > { %11947 = vmatpush3.bf16.msra.mxu1 %v16450_v55  ;;  %v17260_v55 = vld [vmem:[%s20758_s1 + $0x48] sm:$0xff]  }
 0x631   : > { %11948 = vmatprep.subr.bf16.mxu1 %v21097_v38  ;;  %12133 = vmatpush3.bf16.msra.mxu0 %v17260_v55 }
 0x632   : > { %12134 = vmatprep.subr.bf16.mxu0 %v21097_v38 }
 0x634   : > { %11949 = vmatpush3.bf16.msra.mxu1 %v16459_v31  ;;  %v21098_v31 = vld [vmem:[#allocation12_spill] sm:$0xff] }
 0x635   : > { %11950 = vmatprep.subr.bf16.mxu1 %v21097_v38  ;;  %12135 = vmatpush3.bf16.msra.mxu0 %v16486_v2 }
 0x636   : > { %12160 = vmatprep.subr.bf16.mxu0 %v21097_v38 }
 0x638   : > { %11951 = vmatpush3.bf16.msra.mxu1 %v16468_v35  ;;  %12137 = vmatmul.mubr.bf16.vlgmr.msra.gmra.mxu0 %v16609_v10  ;;  %v17309_v35 = vld [vmem:[%s15034_s14 + $0x28] sm:$0xf]  ;;  %v21107_v10 = vld [vmem:[#allocation8_spill] sm:$0xff] }
 0x639   : > { %11952 = vmatprep.subr.bf16.mxu1 %v21097_v38  ;;  %12161 = vmatpush3.bf16.msra.mxu0 %v16504_v46  ;;  %v21099_v46 = vld [vmem:[#allocation14_spill] sm:$0xff] }
 0x63a   : > { %12176 = vmatprep.mubr.msk.bf16.mxu0 %vm14808_vm0, %v21097_v38  ;;  %12162 = vmatprep.subr.bf16.mxu0 %v21097_v38 }
 0x63c   : > { %11953 = vmatpush3.bf16.msra.mxu1 %v16479_v50  ;;  %v17329_v50 = vpop.f32.mrf.mxu0 }
 0x63d   : > { %11954 = vmatprep.subr.bf16.mxu1 %v21097_v38  ;;  %12163 = vmatpush3.bf16.msra.mxu0 %v16523_v51  ;;  %v21101_v51 = vld [vmem:[#allocation15_spill] sm:$0xff] }
 0x63e   : > { %12164 = vmatprep.subr.bf16.mxu0 %v21097_v38  ;;  %v11978_v2 = vpop.f32.mrf.mxu0 }
 0x640   : > { %11955 = vmatpush3.bf16.msra.mxu1 %v16493_v36  ;;  %v3630_v36 = vpop.f32.mrf.mxu0 }
 0x641   : > { %11980 = vmatprep.subr.bf16.mxu1 %v21097_v38  ;;  %12165 = vmatpush3.bf16.msra.mxu0 %v16537_v37  ;;  %v21103_v37 = vld [vmem:[#allocation5_spill] sm:$0xff]  ;;  %v21125_v36 = vld [vmem:[#allocation32_spill] sm:$0xff] }
 0x642   : > { %12166 = vmatprep.subr.bf16.mxu0 %v21097_v38 }
 0x643   : > { %11957 = vmatmul.mubr.bf16.vlgmr.msra.gmra.mxu1 %v21098_v31 }
 0x644   : > { %11981 = vmatpush3.bf16.msra.mxu1 %v16514_v25  ;;  %11996 = vmatprep.mubr.msk.bf16.mxu1 %vm14808_vm0, %v21097_v38  ;;  %v21100_v25 = vld [vmem:[#allocation16_spill] sm:$0xff] }
 0x645   : > { %11982 = vmatprep.subr.bf16.mxu1 %v21097_v38  ;;  %12167 = vmatpush3.bf16.msra.mxu0 %v21064_v60 }
 0x646   : > { %12168 = vmatprep.subr.bf16.mxu0 %v21097_v38 }
 0x648   : > { %11983 = vmatpush3.bf16.msra.mxu1 %v16530_v57  ;;  %v17352_v57 = vld [vmem:[%s15034_s14 + $0x3c] sm:$0xf] }
 0x649   : > { %11984 = vmatprep.subr.bf16.mxu1 %v21097_v38  ;;  %12169 = vmatpush3.bf16.msra.mxu0 %v16565_v32  ;;  %21102 = vst [vmem:[#allocation12_spill] sm:$0xff] %v17352_v57  ;;  %v21104_v32 = vld [vmem:[#allocation17_spill] sm:$0xff] }
 0x64a   : > { %12170 = vmatprep.subr.bf16.mxu0 %v21097_v38 }
 0x64c   : > { %11985 = vmatpush3.bf16.msra.mxu1 %v21063_v8 }
 0x64d   : > { %11986 = vmatprep.subr.bf16.mxu1 %v21097_v38  ;;  %12171 = vmatpush3.bf16.msra.mxu0 %v16833_v49 }
 0x64e   : > { %12172 = vmatprep.subr.bf16.mxu0 %v21097_v38 }
 0x650   : > { %11987 = vmatpush3.bf16.msra.mxu1 %v21065_v62  ;;  %v21109_v62 = vld [vmem:[#allocation10_spill] sm:$0xff] }
 0x651   : > { %11988 = vmatprep.subr.bf16.mxu1 %v21097_v38  ;;  %12173 = vmatpush3.bf16.msra.mxu0 %v16842_v33 }
 0x652   : > { %12174 = vmatprep.subr.bf16.mxu0 %v21097_v38 }
 0x654   : > { %11989 = vmatpush3.bf16.msra.mxu1 %v16572_v5  ;;  %v21105_v5 = vld [vmem:[#allocation4_spill] sm:$0xff] }
 0x655   : > { %11990 = vmatprep.subr.bf16.mxu1 %v21097_v38  ;;  %12175 = vmatpush3.bf16.msra.mxu0 %v16851_v34 }
 0x656   : > { %12200 = vmatprep.subr.bf16.mxu0 %v21097_v38 }
 0x658   : > { %11991 = vmatpush3.bf16.msra.mxu1 %v21066_v19  ;;  %12177 = vmatmul.mubr.bf16.vlgmr.msra.gmra.mxu0 %v17309_v35  ;;  %v21110_v19 = vld [vmem:[#allocation9_spill] sm:$0xff] }
 0x659   : > { %11992 = vmatprep.subr.bf16.mxu1 %v21097_v38  ;;  %12201 = vmatpush3.bf16.msra.mxu0 %v16861_v39 }
 0x65a   : > { %12216 = vmatprep.mubr.msk.bf16.mxu0 %vm14808_vm0, %v21097_v38  ;;  %12202 = vmatprep.subr.bf16.mxu0 %v21097_v38 }
 0x65c   : > { %11993 = vmatpush3.bf16.msra.mxu1 %v16590_v6  ;;  %v21106_v6 = vld [vmem:[#allocation6_spill] sm:$0xff] }
 0x65d   : > { %11994 = vmatprep.subr.bf16.mxu1 %v21097_v38  ;;  %12203 = vmatpush3.bf16.msra.mxu0 %v16880_v44 }
 0x65e   : > { %12204 = vmatprep.subr.bf16.mxu0 %v21097_v38 }
 0x660   : > { %11995 = vmatpush3.bf16.msra.mxu1 %v16599_v63  ;;  %v11979_v63 = vpop.f32.mrf.mxu0 }
 0x661   : > { %12020 = vmatprep.subr.bf16.mxu1 %v21097_v38  ;;  %12205 = vmatpush3.bf16.msra.mxu0 %v16896_v48  ;;  %v21126_v63 = vld [vmem:[#allocation33_spill] sm:$0xff] }
 0x662   : > { %12206 = vmatprep.subr.bf16.mxu0 %v21097_v38  ;;  %v17372_v8 = vpop.f32.mrf.mxu0 }
 0x663   : > { %11997 = vmatmul.mubr.bf16.vlgmr.msra.gmra.mxu1 %v16647_v18  ;;  %v21108_v18 = vld [vmem:[#allocation7_spill] sm:$0xff] }
 0x664   : > { %12021 = vmatpush3.bf16.msra.mxu1 %v16871_v43  ;;  %12036 = vmatprep.mubr.msk.bf16.mxu1 %vm14808_vm0, %v21097_v38  ;;  %v12018_v60 = vpop.f32.mrf.mxu0 }
 0x665   : > { %12022 = vmatprep.subr.bf16.mxu1 %v21097_v38  ;;  %12207 = vmatpush3.bf16.msra.mxu0 %v16910_v61  ;;  %v21127_v60 = vld [vmem:[#allocation34_spill] sm:$0xff] }
 0x666   : > { %12208 = vmatprep.subr.bf16.mxu0 %v21097_v38  ;;  %v3712_v11 = vpop.f32.mrf.mxu0 }
 0x667   : > { %v17421_v11 = vld [vmem:[%s20758_s1 + $0x200] sm:$0xff]  }
 0x668   : > { %12023 = vmatpush3.bf16.msra.mxu1 %v16887_v0  ;;  %v12019_v24 = vpop.f32.mrf.mxu0  ;;  %21128 = vst [vmem:[#allocation14_spill] sm:$0xff] %v17421_v11 }
 0x669   : > { %12024 = vmatprep.subr.bf16.mxu1 %v21097_v38  ;;  %12209 = vmatpush3.bf16.msra.mxu0 %v16924_v7  ;;  %v14262_v24 = vld [vmem:[%s20760_s3 + $0x178] sm:$0xff]  }
 0x66a   : > { %12210 = vmatprep.subr.bf16.mxu0 %v21097_v38  ;;  %v17408_v30 = vpop.f32.mrf.mxu0 }
 0x66c   : > { %12025 = vmatpush3.bf16.msra.mxu1 %v16903_v20  ;;  %v12058_v15 = vpop.f32.mrf.mxu0 }
 0x66d   : > { %12026 = vmatprep.subr.bf16.mxu1 %v21097_v38  ;;  %12211 = vmatpush3.bf16.msra.mxu0 %v16938_v45  ;;  %v14264_v15 = vld [vmem:[%s20760_s3 + $0x168] sm:$0xff]  }
 0x66e   : > { %12212 = vmatprep.subr.bf16.mxu0 %v21097_v38  ;;  %v3794_v31 = vpop.f32.mrf.mxu0 }
 0x66f   : > { %v14265_v31 = vld [vmem:[%s20760_s3 + $0x160] sm:$0xff]  }
 0x670   : > { %12027 = vmatpush3.bf16.msra.mxu1 %v16917_v21  ;;  %v12059_v2 = vpop.f32.mrf.mxu0 }
 0x671   : > { %12028 = vmatprep.subr.bf16.mxu1 %v21097_v38  ;;  %12213 = vmatpush3.bf16.msra.mxu0 %v16952_v16  ;;  %v14266_v2 = vld [vmem:[%s20760_s3 + $0x158] sm:$0xff]  }
 0x672   : > { %12214 = vmatprep.subr.bf16.mxu0 %v21097_v38 }
 0x674   : > { %12029 = vmatpush3.bf16.msra.mxu1 %v16931_v52 }
 0x675   : > { %12030 = vmatprep.subr.bf16.mxu1 %v21097_v38  ;;  %12215 = vmatpush3.bf16.msra.mxu0 %v21100_v25 }
 0x676   : > { %12240 = vmatprep.subr.bf16.mxu0 %v21097_v38 }
 0x678   : > { %12031 = vmatpush3.bf16.msra.mxu1 %v21099_v46  ;;  %12217 = vmatmul.mubr.bf16.vlgmr.msra.gmra.mxu0 %v17352_v57 }
 0x679   : > { %12032 = vmatprep.subr.bf16.mxu1 %v21097_v38  ;;  %12241 = vmatpush3.bf16.msra.mxu0 %v21103_v37 }
 0x67a   : > { %12256 = vmatprep.mubr.msk.bf16.mxu0 %vm14808_vm0, %v21097_v38  ;;  %12242 = vmatprep.subr.bf16.mxu0 %v21097_v38 }
 0x67c   : > { %12033 = vmatpush3.bf16.msra.mxu1 %v21101_v51 }
 0x67d   : > { %12034 = vmatprep.subr.bf16.mxu1 %v21097_v38  ;;  %12243 = vmatpush3.bf16.msra.mxu0 %v21105_v5 }
 0x67e   : > { %12244 = vmatprep.subr.bf16.mxu0 %v21097_v38 }
 0x680   : > { %12035 = vmatpush3.bf16.msra.mxu1 %v21104_v32 }
 0x681   : > { %12060 = vmatprep.subr.bf16.mxu1 %v21097_v38  ;;  %12245 = vmatpush3.bf16.msra.mxu0 %v21107_v10 }
 0x682   : > { %12246 = vmatprep.subr.bf16.mxu0 %v21097_v38 }
 0x683   : > { %12037 = vmatmul.mubr.bf16.vlgmr.msra.gmra.mxu1 %v17352_v57 }
 0x684   : > { %12061 = vmatpush3.bf16.msra.mxu1 %v21106_v6  ;;  %12076 = vmatprep.mubr.msk.bf16.mxu1 %vm14808_vm0, %v21097_v38 }
 0x685   : > { %12062 = vmatprep.subr.bf16.mxu1 %v21097_v38  ;;  %12247 = vmatpush3.bf16.msra.mxu0 %v21109_v62 }
 0x686   : > { %12248 = vmatprep.subr.bf16.mxu0 %v21097_v38 }
 0x688   : > { %12063 = vmatpush3.bf16.msra.mxu1 %v21108_v18 }
 0x689   : > { %12064 = vmatprep.subr.bf16.mxu1 %v21097_v38  ;;  %12249 = vmatpush3.bf16.msra.mxu0 %v21111_v47 }
 0x68a   : > { %12250 = vmatprep.subr.bf16.mxu0 %v21097_v38 }
 0x68c   : > { %12065 = vmatpush3.bf16.msra.mxu1 %v21110_v19 }
 0x68d   : > { %12066 = vmatprep.subr.bf16.mxu1 %v21097_v38  ;;  %12251 = vmatpush3.bf16.msra.mxu0 %v21113_v17 }
 0x68e   : > { %12252 = vmatprep.subr.bf16.mxu0 %v21097_v38 }
 0x690   : > { %12067 = vmatpush3.bf16.msra.mxu1 %v21112_v41 }
 0x691   : > { %12068 = vmatprep.subr.bf16.mxu1 %v21097_v38  ;;  %12253 = vmatpush3.bf16.msra.mxu0 %v21115_v40 }
 0x692   : > { %12254 = vmatprep.subr.bf16.mxu0 %v21097_v38 }
 0x694   : > { %12069 = vmatpush3.bf16.msra.mxu1 %v21114_v59 }
 0x695   : > { %12070 = vmatprep.subr.bf16.mxu1 %v21097_v38  ;;  %12255 = vmatpush3.bf16.msra.mxu0 %v21117_v58 }
 0x696   : > { %12280 = vmatprep.subr.bf16.mxu0 %v21097_v38 }
 0x698   : > { %12071 = vmatpush3.bf16.msra.mxu1 %v21116_v42  ;;  %12257 = vmatmul.mubr.bf16.vlgmr.msra.gmra.mxu0 %v21119_v14 }
 0x699   : > { %12072 = vmatprep.subr.bf16.mxu1 %v21097_v38  ;;  %12281 = vmatpush3.bf16.msra.mxu0 %v21120_v29 }
 0x69a   : > { %12296 = vmatprep.mubr.msk.bf16.mxu0 %vm14808_vm0, %v21097_v38  ;;  %12282 = vmatprep.subr.bf16.mxu0 %v21097_v38 }
 0x69c   : > { %12073 = vmatpush3.bf16.msra.mxu1 %v21118_v12 }
 0x69d   : > { %12074 = vmatprep.subr.bf16.mxu1 %v21097_v38  ;;  %12283 = vmatpush3.bf16.msra.mxu0 %v21122_v3 }
 0x69e   : > { %12284 = vmatprep.subr.bf16.mxu0 %v21097_v38 }
 0x6a0   : > { %12075 = vmatpush3.bf16.msra.mxu1 %v21121_v26 }
 0x6a1   : > { %12100 = vmatprep.subr.bf16.mxu1 %v21097_v38  ;;  %12285 = vmatpush3.bf16.msra.mxu0 %v21123_v28 }
 0x6a2   : > { %12286 = vmatprep.subr.bf16.mxu0 %v21097_v38 }
 0x6a3   : > { %12077 = vmatmul.mubr.bf16.vlgmr.msra.gmra.mxu1 %v21119_v14  ;;  %v14263_v14 = vld [vmem:[%s20760_s3 + $0x170] sm:$0xff]  }
 0x6a4   : > { %12116 = vmatprep.mubr.msk.bf16.mxu1 %vm14808_vm0, %v21097_v38  ;;  %12101 = vmatpush3.bf16.msra.mxu1 %v14262_v24  ;;  %v3873_v24 = vpop.f32.mrf.mxu0 }
 0x6a5   : > { %12287 = vmatpush3.bf16.msra.mxu0 %v21124_v23  ;;  %12102 = vmatprep.subr.bf16.mxu1 %v21097_v38 }
 0x6a6   : > { %12288 = vmatprep.subr.bf16.mxu0 %v21097_v38 }
 0x6a8   : > { %12103 = vmatpush3.bf16.msra.mxu1 %v14263_v14  ;;  %v12098_v14 = vpop.f32.mrf.mxu0 }
 0x6a9   : > { %12289 = vmatpush3.bf16.msra.mxu0 %v21125_v36  ;;  %12104 = vmatprep.subr.bf16.mxu1 %v21097_v38 }
 0x6aa   : > { %12290 = vmatprep.subr.bf16.mxu0 %v21097_v38  ;;  %v3876_v57 = vpop.f32.mrf.mxu0 }
 0x6ab   : > { %v14269_v57 = vld [vmem:[%s20760_s3 + $0x140] sm:$0xff]  }
 0x6ac   : > { %12105 = vmatpush3.bf16.msra.mxu1 %v14264_v15  ;;  %v14267_v15 = vld [vmem:[%s20760_s3 + $0x150] sm:$0xff]  }
 0x6ad   : > { %12291 = vmatpush3.bf16.msra.mxu0 %v21126_v63  ;;  %12106 = vmatprep.subr.bf16.mxu1 %v21097_v38  ;;  %v12099_v63 = vpop.f32.mrf.mxu0 }
 0x6ae   : > { %12292 = vmatprep.subr.bf16.mxu0 %v21097_v38 }
 0x6b0   : > { %12107 = vmatpush3.bf16.msra.mxu1 %v14265_v31 }
 0x6b1   : > { %12293 = vmatpush3.bf16.msra.mxu0 %v21127_v60  ;;  %12108 = vmatprep.subr.bf16.mxu1 %v21097_v38  ;;  %v21129_v60 = vld [vmem:[#allocation35_spill] sm:$0xff] }
 0x6b2   : > { %12294 = vmatprep.subr.bf16.mxu0 %v21097_v38 }
 0x6b4   : > { %12109 = vmatpush3.bf16.msra.mxu1 %v14266_v2  ;;  %v14268_v2 = vld [vmem:[%s20760_s3 + $0x148] sm:$0xff]  }
 0x6b5   : > { %12295 = vmatpush3.bf16.msra.mxu0 %v17421_v11  ;;  %12110 = vmatprep.subr.bf16.mxu1 %v21097_v38 }
 0x6b6   : > { %12320 = vmatprep.subr.bf16.mxu0 %v21097_v38 }
 0x6b8   : > { %12111 = vmatpush3.bf16.msra.mxu1 %v14267_v15 }
 0x6b9   : > { %12112 = vmatprep.subr.bf16.mxu1 %v21097_v38 }
 0x6bc   : > { %12113 = vmatpush3.bf16.msra.mxu1 %v14268_v2 }
 0x6bd   : > { %12114 = vmatprep.subr.bf16.mxu1 %v21097_v38 }
 0x6c0   : > { %12115 = vmatpush3.bf16.msra.mxu1 %v14269_v57 }
 0x6c1   : > { %12140 = vmatprep.subr.bf16.mxu1 %v21097_v38 }
 0x6e3   : > { %v3506_v11 = vpop.f32.mrf.mxu1 }
 0x6e4   : > { %v17449_v31 = vadd.f32 %v3506_v11, %v21129_v60 }
 0x6e5   : > { %v11918_v36 = vpop.f32.mrf.mxu1 }
 0x6e6   : > { %21130 = vst [vmem:[#allocation16_spill] sm:$0xff] %v17449_v31 }
 0x6e7   : > { %v3509_v23 = vpop.f32.mrf.mxu1 }
 0x6e9   : > { %v11919_v14 = vpop.f32.mrf.mxu1 }
 0x703   : > { %v3587_v63 = vpop.f32.mrf.mxu1 }
 0x704   : > { %v3588_v29 = vadd.f32 %v3587_v63, %v17208_v53  ;;  %v17517_v63 = vld [vmem:[%s20758_s1 + $0x18] sm:$0xff]  }
 0x705   : > { %v11958_v60 = vpop.f32.mrf.mxu1 }
 0x706   : > { %v3633_v54 = vadd.f32 %v17329_v50, %v3588_v29 }
 0x707   : > { %v3590_v11 = vpop.f32.mrf.mxu1 }
 0x709   : > { %v11959_v36 = vpop.f32.mrf.mxu1 }
 0x723   : > { %v3668_v15 = vpop.f32.mrf.mxu1 }
 0x724   : > { %v3674_v57 = vadd.f32 %v3668_v15, %v3633_v54  ;;  %v17526_v15 = vld [vmem:[%s20758_s1 + $0x10] sm:$0xff]  }
 0x725   : > { %v11998_v31 = vpop.f32.mrf.mxu1 }
 0x726   : > { %v3715_v12 = vadd.f32 %v17372_v8, %v3674_v57  ;;  %v17473_v8 = vpop.f32.mrf.mxu0  ;;  %v17549_v57 = vld [vmem:[%s20758_s1 + $0xb8] sm:$0xff]  }
 0x727   : > { %v3671_v28 = vpop.f32.mrf.mxu1 }
 0x729   : > { %v11999_v3 = vpop.f32.mrf.mxu1 }
 0x743   : > { %v3750_v23 = vpop.f32.mrf.mxu1 }
 0x744   : > { %v3756_v58 = vadd.f32 %v3750_v23, %v3715_v12  ;;  %v17490_v12 = vld [vmem:[%s20758_s1 + $0x30] sm:$0xff]   ;;  %v17534_v23 = vld [vmem:[%s20758_s1 + $0x40] sm:$0xff]  }
 0x745   : > { %v12038_v2 = vpop.f32.mrf.mxu1 }
 0x746   : > { %v3797_v60 = vadd.f32 %v17408_v30, %v3756_v58  ;;  %v17499_v30 = vld [vmem:[%s20758_s1 + $0x28] sm:$0xff]  }
 0x747   : > { %v3753_v26 = vpop.f32.mrf.mxu1 }
 0x748   : > { %v17466_v26 = vld [vmem:[%s15034_s14 + $0x58] sm:$0xf] }
 0x749   : > { %v12039_v14 = vpop.f32.mrf.mxu1  ;;  %12297 = vmatmul.mubr.bf16.vlgmr.msra.gmra.mxu0 %v17466_v26 }
 0x74a   : > { %12321 = vmatpush3.bf16.msra.mxu0 %v17202_v27  ;;  %12336 = vmatprep.mubr.msk.bf16.mxu0 %vm14808_vm0, %v21097_v38  ;;  %v17540_v14 = vld [vmem:[%s20758_s1 + $0x8] sm:$0xff]  }
 0x74b   : > { %12322 = vmatprep.subr.bf16.mxu0 %v21097_v38 }
 0x74e   : > { %12323 = vmatpush3.bf16.msra.mxu0 %v17213_v22 }
 0x74f   : > { %12324 = vmatprep.subr.bf16.mxu0 %v21097_v38 }
 0x752   : > { %12325 = vmatpush3.bf16.msra.mxu0 %v17224_v13 }
 0x753   : > { %12326 = vmatprep.subr.bf16.mxu0 %v21097_v38 }
 0x756   : > { %12327 = vmatpush3.bf16.msra.mxu0 %v17233_v1 }
 0x757   : > { %12328 = vmatprep.subr.bf16.mxu0 %v21097_v38 }
 0x75a   : > { %12329 = vmatpush3.bf16.msra.mxu0 %v17242_v56 }
 0x75b   : > { %12330 = vmatprep.subr.bf16.mxu0 %v21097_v38 }
 0x75e   : > { %12331 = vmatpush3.bf16.msra.mxu0 %v17251_v9 }
 0x75f   : > { %12332 = vmatprep.subr.bf16.mxu0 %v21097_v38 }
 0x762   : > { %12333 = vmatpush3.bf16.msra.mxu0 %v17260_v55 }
 0x763   : > { %v3832_v11 = vpop.f32.mrf.mxu1  ;;  %12334 = vmatprep.subr.bf16.mxu0 %v21097_v38 }
 0x764   : > { %v3838_v36 = vadd.f32 %v3832_v11, %v3797_v60  ;;  %v17557_v60 = vld [vmem:[%s20758_s1] sm:$0xff]   ;;  %v17566_v11 = vld [vmem:[%s20758_s1 + $0xb0] sm:$0xff]  }
 0x765   : > { %v12078_v31 = vpop.f32.mrf.mxu1 }
 0x766   : > { %v3879_v28 = vadd.f32 %v3873_v24, %v3838_v36  ;;  %v17508_v24 = vld [vmem:[%s20758_s1 + $0x20] sm:$0xff]   ;;  %12335 = vmatpush3.bf16.msra.mxu0 %v17534_v23  ;;  %v17572_v36 = vld [vmem:[%s20758_s1 + $0xf8] sm:$0xff]   ;;  %v17582_v31 = vld [vmem:[%s20758_s1 + $0xa8] sm:$0xff]  }
 0x767   : > { %v3835_v3 = vpop.f32.mrf.mxu1  ;;  %12360 = vmatprep.subr.bf16.mxu0 %v21097_v38 }
 0x768   : > { %v3880_v2 = vadd.f32 %v16754_v4, %v3879_v28  ;;  %v17479_v4 = vld [vmem:[%s20758_s1 + $0x38] sm:$0xff]   ;;  %v17588_v28 = vld [vmem:[%s20758_s1 + $0xf0] sm:$0xff]   ;;  %v17596_v3 = vld [vmem:[%s20758_s1 + $0xa0] sm:$0xff]  }
 0x769   : > { %v12079_v42 = vpop.f32.mrf.mxu1  ;;  %12337 = vmatmul.mubr.bf16.vlgmr.msra.gmra.mxu0 %v17309_v35  ;;  %v21131_v35 = vld [vmem:[#allocation13_spill] sm:$0xff] }
 0x76a   : > { %vm3881_vm6 = vcmp.ge.f32.partialorder %v3880_v2, 0.0  ;;  %v3882_v53 = vmul.f32 0.2, %v3880_v2  ;;  %v12138_v42 = vpop.f32.mrf.mxu0  ;;  %12361 = vmatpush3.bf16.msra.mxu0 %v17549_v57  ;;  %12376 = vmatprep.mubr.msk.bf16.mxu0 %vm14808_vm0, %v21097_v38 }
 0x76b   : > { %12362 = vmatprep.subr.bf16.mxu0 %v21097_v38  ;;  %v17634_v42 = vld [vmem:[%s20758_s1 + $0xd0] sm:$0xff]  }
 0x76c   : > { %v3883_v54 = vsel %vm3881_vm6, %v3880_v2, %v3882_v53  ;;  %v4028_v58 = vpop.f32.mrf.mxu0  ;;  %v17602_v2 = vld [vmem:[%s20758_s1 + $0xe8] sm:$0xff]   ;;  %v17610_v53 = vld [vmem:[%s20758_s1 + $0x98] sm:$0xff]  }
 0x76d   : > { %v3884_v50 = vpack.c.bf16 %v3883_v54, %v3883_v54  ;;  %v17616_v54 = vld [vmem:[%s20758_s1 + $0xe0] sm:$0xff]   ;;  %v21132_v58 = vld [vmem:[#allocation18_spill] sm:$0xff] }
 0x76e   : > { %v12139_v29 = vpop.f32.mrf.mxu0  ;;  %12363 = vmatpush3.bf16.msra.mxu0 %v17566_v11 }
 0x76f   : > { %12117 = vmatmul.mubr.bf16.vlgmr.msra.gmra.mxu1 %v3884_v50  ;;  %12364 = vmatprep.subr.bf16.mxu0 %v21097_v38  ;;  %v17625_v50 = vld [vmem:[%s20758_s1 + $0xd8] sm:$0xff]  }
 0x770   : > { %12141 = vmatpush3.bf16.msra.mxu1 %v17479_v4  ;;  %12156 = vmatprep.mubr.msk.bf16.mxu1 %vm14808_vm0, %v21097_v38 }
 0x771   : > { %12142 = vmatprep.subr.bf16.mxu1 %v21097_v38 }
 0x772   : > { %12365 = vmatpush3.bf16.msra.mxu0 %v17582_v31 }
 0x773   : > { %12366 = vmatprep.subr.bf16.mxu0 %v21097_v38 }
 0x774   : > { %12143 = vmatpush3.bf16.msra.mxu1 %v17490_v12 }
 0x775   : > { %12144 = vmatprep.subr.bf16.mxu1 %v21097_v38 }
 0x776   : > { %12367 = vmatpush3.bf16.msra.mxu0 %v17596_v3 }
 0x777   : > { %12368 = vmatprep.subr.bf16.mxu0 %v21097_v38 }
 0x778   : > { %12145 = vmatpush3.bf16.msra.mxu1 %v17499_v30 }
 0x779   : > { %12146 = vmatprep.subr.bf16.mxu1 %v21097_v38 }
 0x77a   : > { %12369 = vmatpush3.bf16.msra.mxu0 %v17610_v53 }
 0x77b   : > { %12370 = vmatprep.subr.bf16.mxu0 %v21097_v38 }
 0x77c   : > { %12147 = vmatpush3.bf16.msra.mxu1 %v17508_v24 }
 0x77d   : > { %12148 = vmatprep.subr.bf16.mxu1 %v21097_v38 }
 0x77e   : > { %12371 = vmatpush3.bf16.msra.mxu0 %v16833_v49  ;;  %v17643_v49 = vld [vmem:[%s20758_s1 + $0xc8] sm:$0xff]  }
 0x77f   : > { %12372 = vmatprep.subr.bf16.mxu0 %v21097_v38 }
 0x780   : > { %12149 = vmatpush3.bf16.msra.mxu1 %v17517_v63 }
 0x781   : > { %12150 = vmatprep.subr.bf16.mxu1 %v21097_v38 }
 0x782   : > { %12373 = vmatpush3.bf16.msra.mxu0 %v16842_v33  ;;  %v14536_v33 = vld [vmem:[%s15034_s14 + $0x2c] sm:$0xf] }
 0x783   : > { %12374 = vmatprep.subr.bf16.mxu0 %v21097_v38 }
 0x784   : > { %12151 = vmatpush3.bf16.msra.mxu1 %v17526_v15 }
 0x785   : > { %12152 = vmatprep.subr.bf16.mxu1 %v21097_v38 }
 0x786   : > { %12375 = vmatpush3.bf16.msra.mxu0 %v16851_v34  ;;  %v17655_v34 = vld [vmem:[%s20758_s1 + $0xc0] sm:$0xff]  }
 0x787   : > { %12400 = vmatprep.subr.bf16.mxu0 %v21097_v38 }
 0x788   : > { %12153 = vmatpush3.bf16.msra.mxu1 %v17540_v14 }
 0x789   : > { %12154 = vmatprep.subr.bf16.mxu1 %v21097_v38  ;;  %12377 = vmatmul.mubr.bf16.vlgmr.msra.gmra.mxu0 %v14536_v33  ;;  %v14274_v33 = vld [vmem:[%s20760_s3 + $0x198] sm:$0xff]  }
 0x78a   : > { %12401 = vmatpush3.bf16.msra.mxu0 %v16861_v39  ;;  %12416 = vmatprep.mubr.msk.bf16.mxu0 %vm14808_vm0, %v21097_v38  ;;  %v17671_v39 = vpop.f32.mrf.mxu0 }
 0x78b   : > { %12402 = vmatprep.subr.bf16.mxu0 %v21097_v38 }
 0x78c   : > { %12155 = vmatpush3.bf16.msra.mxu1 %v17557_v60 }
 0x78d   : > { %12180 = vmatprep.subr.bf16.mxu1 %v21097_v38 }
 0x78e   : > { %12403 = vmatpush3.bf16.msra.mxu0 %v16880_v44  ;;  %v12178_v44 = vpop.f32.mrf.mxu0 }
 0x78f   : > { %12157 = vmatmul.mubr.bf16.vlgmr.msra.gmra.mxu1 %v21131_v35  ;;  %12404 = vmatprep.subr.bf16.mxu0 %v21097_v38  ;;  %v14273_v35 = vld [vmem:[%s20760_s3 + $0x1a0] sm:$0xff]  }
 0x790   : > { %12181 = vmatpush3.bf16.msra.mxu1 %v17572_v36  ;;  %12196 = vmatprep.mubr.msk.bf16.mxu1 %vm14808_vm0, %v21097_v38 }
 0x791   : > { %12182 = vmatprep.subr.bf16.mxu1 %v21097_v38 }
 0x792   : > { %12405 = vmatpush3.bf16.msra.mxu0 %v16896_v48 }
 0x793   : > { %12406 = vmatprep.subr.bf16.mxu0 %v21097_v38 }
 0x794   : > { %12183 = vmatpush3.bf16.msra.mxu1 %v17588_v28 }
 0x795   : > { %12184 = vmatprep.subr.bf16.mxu1 %v21097_v38 }
 0x796   : > { %12407 = vmatpush3.bf16.msra.mxu0 %v16910_v61 }
 0x797   : > { %12408 = vmatprep.subr.bf16.mxu0 %v21097_v38 }
 0x798   : > { %12185 = vmatpush3.bf16.msra.mxu1 %v17602_v2 }
 0x799   : > { %12186 = vmatprep.subr.bf16.mxu1 %v21097_v38 }
 0x79a   : > { %12409 = vmatpush3.bf16.msra.mxu0 %v16924_v7  ;;  %v21133_v7 = vld [vmem:[#allocation23_spill] sm:$0xff] }
 0x79b   : > { %12410 = vmatprep.subr.bf16.mxu0 %v21097_v38 }
 0x79c   : > { %12187 = vmatpush3.bf16.msra.mxu1 %v17616_v54 }
 0x79d   : > { %12188 = vmatprep.subr.bf16.mxu1 %v21097_v38 }
 0x79e   : > { %12411 = vmatpush3.bf16.msra.mxu0 %v16938_v45  ;;  %v21135_v45 = vld [vmem:[#allocation25_spill] sm:$0xff] }
 0x79f   : > { %12412 = vmatprep.subr.bf16.mxu0 %v21097_v38 }
 0x7a0   : > { %12189 = vmatpush3.bf16.msra.mxu1 %v17625_v50 }
 0x7a1   : > { %12190 = vmatprep.subr.bf16.mxu1 %v21097_v38 }
 0x7a2   : > { %12413 = vmatpush3.bf16.msra.mxu0 %v16952_v16  ;;  %v21136_v16 = vld [vmem:[#allocation36_spill] sm:$0xff] }
 0x7a3   : > { %12414 = vmatprep.subr.bf16.mxu0 %v21097_v38 }
 0x7a4   : > { %12191 = vmatpush3.bf16.msra.mxu1 %v17634_v42 }
 0x7a5   : > { %12192 = vmatprep.subr.bf16.mxu1 %v21097_v38 }
 0x7a6   : > { %12415 = vmatpush3.bf16.msra.mxu0 %v21100_v25  ;;  %v21138_v25 = vld [vmem:[#allocation27_spill] sm:$0xff] }
 0x7a7   : > { %12440 = vmatprep.subr.bf16.mxu0 %v21097_v38 }
 0x7a8   : > { %12193 = vmatpush3.bf16.msra.mxu1 %v17643_v49 }
 0x7a9   : > { %12194 = vmatprep.subr.bf16.mxu1 %v21097_v38 }
 0x7ac   : > { %12195 = vmatpush3.bf16.msra.mxu1 %v17655_v34 }
 0x7ad   : > { %12220 = vmatprep.subr.bf16.mxu1 %v21097_v38 }
 0x7af   : > { %12197 = vmatmul.mubr.bf16.vlgmr.msra.gmra.mxu1 %v21132_v58 }
 0x7b0   : > { %12221 = vmatpush3.bf16.msra.mxu1 %v16871_v43  ;;  %12236 = vmatprep.mubr.msk.bf16.mxu1 %vm14808_vm0, %v21097_v38  ;;  %v4108_v43 = vpop.f32.mrf.mxu0 }
 0x7b1   : > { %12222 = vmatprep.subr.bf16.mxu1 %v21097_v38  ;;  %v14275_v43 = vld [vmem:[%s20760_s3 + $0x190] sm:$0xff]  }
 0x7b2   : > { %v12179_v29 = vpop.f32.mrf.mxu0 }
 0x7b4   : > { %12223 = vmatpush3.bf16.msra.mxu1 %v16887_v0  ;;  %v14538_v0 = vld [vmem:[%s15034_s14 + $0x40] sm:$0xf]  ;;  %v17710_v48 = vpop.f32.mrf.mxu0 }
 0x7b5   : > { %12224 = vmatprep.subr.bf16.mxu1 %v21097_v38  ;;  %12417 = vmatmul.mubr.bf16.vlgmr.msra.gmra.mxu0 %v14538_v0 }
 0x7b6   : > { %12441 = vmatpush3.bf16.msra.mxu0 %v21103_v37  ;;  %12456 = vmatprep.mubr.msk.bf16.mxu0 %vm14808_vm0, %v21097_v38  ;;  %v21140_v37 = vld [vmem:[#allocation30_spill] sm:$0xff] }
 0x7b7   : > { %12442 = vmatprep.subr.bf16.mxu0 %v21097_v38 }
 0x7b8   : > { %12225 = vmatpush3.bf16.msra.mxu1 %v16903_v20  ;;  %v12218_v20 = vpop.f32.mrf.mxu0 }
 0x7b9   : > { %12226 = vmatprep.subr.bf16.mxu1 %v21097_v38  ;;  %v21146_v20 = vld [vmem:[#allocation16_spill] sm:$0xff] }
 0x7ba   : > { %12443 = vmatpush3.bf16.msra.mxu0 %v21105_v5  ;;  %v4190_v61 = vpop.f32.mrf.mxu0 }
 0x7bb   : > { %12444 = vmatprep.subr.bf16.mxu0 %v21097_v38 }
 0x7bc   : > { %12227 = vmatpush3.bf16.msra.mxu1 %v16917_v21  ;;  %v12219_v21 = vpop.f32.mrf.mxu0 }
 0x7bd   : > { %12228 = vmatprep.subr.bf16.mxu1 %v21097_v38 }
 0x7be   : > { %12445 = vmatpush3.bf16.msra.mxu0 %v21107_v10 }
 0x7bf   : > { %12446 = vmatprep.subr.bf16.mxu0 %v21097_v38 }
 0x7c0   : > { %12229 = vmatpush3.bf16.msra.mxu1 %v16931_v52  ;;  %v21134_v52 = vld [vmem:[#allocation26_spill] sm:$0xff] }
 0x7c1   : > { %12230 = vmatprep.subr.bf16.mxu1 %v21097_v38 }
 0x7c2   : > { %12447 = vmatpush3.bf16.msra.mxu0 %v21109_v62  ;;  %v21142_v62 = vld [vmem:[#allocation32_spill] sm:$0xff] }
 0x7c3   : > { %12448 = vmatprep.subr.bf16.mxu0 %v21097_v38 }
 0x7c4   : > { %12231 = vmatpush3.bf16.msra.mxu1 %v21099_v46  ;;  %v21137_v46 = vld [vmem:[#allocation28_spill] sm:$0xff] }
 0x7c5   : > { %12232 = vmatprep.subr.bf16.mxu1 %v21097_v38 }
 0x7c6   : > { %12449 = vmatpush3.bf16.msra.mxu0 %v21111_v47  ;;  %v21144_v47 = vld [vmem:[#allocation34_spill] sm:$0xff] }
 0x7c7   : > { %12450 = vmatprep.subr.bf16.mxu0 %v21097_v38 }
 0x7c8   : > { %12233 = vmatpush3.bf16.msra.mxu1 %v21101_v51  ;;  %v21139_v51 = vld [vmem:[#allocation29_spill] sm:$0xff] }
 0x7c9   : > { %12234 = vmatprep.subr.bf16.mxu1 %v21097_v38 }
 0x7ca   : > { %12451 = vmatpush3.bf16.msra.mxu0 %v21113_v17  ;;  %v14270_v17 = vld [vmem:[%s20760_s3 + $0x1b8] sm:$0xff]  }
 0x7cb   : > { %12452 = vmatprep.subr.bf16.mxu0 %v21097_v38 }
 0x7cc   : > { %12235 = vmatpush3.bf16.msra.mxu1 %v21104_v32  ;;  %v17746_v32 = vpop.f32.mrf.mxu0 }
 0x7cd   : > { %12260 = vmatprep.subr.bf16.mxu1 %v21097_v38 }
 0x7ce   : > { %12453 = vmatpush3.bf16.msra.mxu0 %v21115_v40  ;;  %v12258_v5 = vpop.f32.mrf.mxu0  ;;  %v14272_v40 = vld [vmem:[%s20760_s3 + $0x1a8] sm:$0xff]  }
 0x7cf   : > { %12237 = vmatmul.mubr.bf16.vlgmr.msra.gmra.mxu1 %v14538_v0  ;;  %12454 = vmatprep.subr.bf16.mxu0 %v21097_v38 }
 0x7d0   : > { %12261 = vmatpush3.bf16.msra.mxu1 %v21106_v6  ;;  %12276 = vmatprep.mubr.msk.bf16.mxu1 %vm14808_vm0, %v21097_v38  ;;  %v21141_v6 = vld [vmem:[#allocation31_spill] sm:$0xff]  ;;  %v4272_v10 = vpop.f32.mrf.mxu0 }
 0x7d1   : > { %12262 = vmatprep.subr.bf16.mxu1 %v21097_v38 }
 0x7d2   : > { %12455 = vmatpush3.bf16.msra.mxu0 %v21134_v52  ;;  %v14276_v52 = vld [vmem:[%s20760_s3 + $0x188] sm:$0xff]  }
 0x7d3   : > { %12480 = vmatprep.subr.bf16.mxu0 %v21097_v38 }
 0x7d4   : > { %12263 = vmatpush3.bf16.msra.mxu1 %v21108_v18  ;;  %v12259_v18 = vpop.f32.mrf.mxu0 }
 0x7d5   : > { %12264 = vmatprep.subr.bf16.mxu1 %v21097_v38  ;;  %12457 = vmatmul.mubr.bf16.vlgmr.msra.gmra.mxu0 %v21136_v16 }
 0x7d6   : > { %12481 = vmatpush3.bf16.msra.mxu0 %v21137_v46  ;;  %12496 = vmatprep.mubr.msk.bf16.mxu0 %vm14808_vm0, %v21097_v38  ;;  %v14277_v46 = vld [vmem:[%s20760_s3 + $0x180] sm:$0xff]  }
 0x7d7   : > { %12482 = vmatprep.subr.bf16.mxu0 %v21097_v38 }
 0x7d8   : > { %12265 = vmatpush3.bf16.msra.mxu1 %v21110_v19  ;;  %v21143_v19 = vld [vmem:[#allocation33_spill] sm:$0xff] }
 0x7d9   : > { %12266 = vmatprep.subr.bf16.mxu1 %v21097_v38 }
 0x7da   : > { %12483 = vmatpush3.bf16.msra.mxu0 %v21139_v51 }
 0x7db   : > { %12484 = vmatprep.subr.bf16.mxu0 %v21097_v38 }
 0x7dc   : > { %12267 = vmatpush3.bf16.msra.mxu1 %v21112_v41  ;;  %v21145_v41 = vld [vmem:[#allocation14_spill] sm:$0xff] }
 0x7dd   : > { %12268 = vmatprep.subr.bf16.mxu1 %v21097_v38 }
 0x7de   : > { %12485 = vmatpush3.bf16.msra.mxu0 %v21140_v37 }
 0x7df   : > { %12486 = vmatprep.subr.bf16.mxu0 %v21097_v38 }
 0x7e0   : > { %12269 = vmatpush3.bf16.msra.mxu1 %v21114_v59  ;;  %v14271_v59 = vld [vmem:[%s20760_s3 + $0x1b0] sm:$0xff]  }
 0x7e1   : > { %12270 = vmatprep.subr.bf16.mxu1 %v21097_v38 }
 0x7e2   : > { %12487 = vmatpush3.bf16.msra.mxu0 %v21141_v6 }
 0x7e3   : > { %12488 = vmatprep.subr.bf16.mxu0 %v21097_v38 }
 0x7e4   : > { %12271 = vmatpush3.bf16.msra.mxu1 %v21133_v7 }
 0x7e5   : > { %12272 = vmatprep.subr.bf16.mxu1 %v21097_v38 }
 0x7e6   : > { %12489 = vmatpush3.bf16.msra.mxu0 %v21142_v62 }
 0x7e7   : > { %12490 = vmatprep.subr.bf16.mxu0 %v21097_v38 }
 0x7e8   : > { %12273 = vmatpush3.bf16.msra.mxu1 %v21135_v45 }
 0x7e9   : > { %12274 = vmatprep.subr.bf16.mxu1 %v21097_v38 }
 0x7ea   : > { %12491 = vmatpush3.bf16.msra.mxu0 %v21143_v19 }
 0x7eb   : > { %12492 = vmatprep.subr.bf16.mxu0 %v21097_v38 }
 0x7ec   : > { %12275 = vmatpush3.bf16.msra.mxu1 %v21138_v25 }
 0x7ed   : > { %12300 = vmatprep.subr.bf16.mxu1 %v21097_v38 }
 0x7ee   : > { %12493 = vmatpush3.bf16.msra.mxu0 %v21144_v47 }
 0x7ef   : > { %12277 = vmatmul.mubr.bf16.vlgmr.msra.gmra.mxu1 %v21136_v16  ;;  %12494 = vmatprep.subr.bf16.mxu0 %v21097_v38 }
 0x7f0   : > { %12316 = vmatprep.mubr.msk.bf16.mxu1 %vm14808_vm0, %v21097_v38  ;;  %12301 = vmatpush3.bf16.msra.mxu1 %v14270_v17 }
 0x7f1   : > { %12302 = vmatprep.subr.bf16.mxu1 %v21097_v38 }
 0x7f2   : > { %12495 = vmatpush3.bf16.msra.mxu0 %v21145_v41 }
 0x7f3   : > { %12520 = vmatprep.subr.bf16.mxu0 %v21097_v38 }
 0x7f4   : > { %12303 = vmatpush3.bf16.msra.mxu1 %v14271_v59 }
 0x7f5   : > { %12304 = vmatprep.subr.bf16.mxu1 %v21097_v38 }
 0x7f8   : > { %12305 = vmatpush3.bf16.msra.mxu1 %v14272_v40 }
 0x7f9   : > { %12306 = vmatprep.subr.bf16.mxu1 %v21097_v38 }
 0x7fc   : > { %12307 = vmatpush3.bf16.msra.mxu1 %v14273_v35 }
 0x7fd   : > { %12308 = vmatprep.subr.bf16.mxu1 %v21097_v38 }
 0x800   : > { %12309 = vmatpush3.bf16.msra.mxu1 %v14274_v33 }
 0x801   : > { %12310 = vmatprep.subr.bf16.mxu1 %v21097_v38 }
 0x804   : > { %12311 = vmatpush3.bf16.msra.mxu1 %v14275_v43 }
 0x805   : > { %12312 = vmatprep.subr.bf16.mxu1 %v21097_v38 }
 0x808   : > { %12313 = vmatpush3.bf16.msra.mxu1 %v14276_v52  ;;  %v17800_v52 = vld [vmem:[%s20759_s2] ss:$0 sm:$0xff] }
 0x809   : > { %v4351_v58 = vpop.f32.mrf.mxu0  ;;  %12314 = vmatprep.subr.bf16.mxu1 %v21097_v38 }
 0x80b   : > { %v12298_v44 = vpop.f32.mrf.mxu0 }
 0x80c   : > { %12315 = vmatpush3.bf16.msra.mxu1 %v14277_v46 }
 0x80d   : > { %v4354_v29 = vpop.f32.mrf.mxu0  ;;  %12340 = vmatprep.subr.bf16.mxu1 %v21097_v38 }
 0x80f   : > { %v12299_v21 = vpop.f32.mrf.mxu0 }
 0x82f   : > { %v3984_v0 = vpop.f32.mrf.mxu1 }
 0x830   : > { %v17782_v61 = vadd.f32 %v3984_v0, %v21146_v20 }
 0x831   : > { %v12118_v7 = vpop.f32.mrf.mxu1 }
 0x833   : > { %v3987_v45 = vpop.f32.mrf.mxu1 }
 0x835   : > { %v12119_v16 = vpop.f32.mrf.mxu1 }
 0x84f   : > { %v4065_v25 = vpop.f32.mrf.mxu1 }
 0x850   : > { %v4066_v59 = vadd.f32 %v4065_v25, %v17473_v8  ;;  %v17897_v25 = vld [vmem:[%s15034_s14 + $0x38] sm:$0xf] }
 0x851   : > { %v12158_v51 = vpop.f32.mrf.mxu1 }
 0x852   : > { %v4111_v40 = vadd.f32 %v17671_v39, %v4066_v59  ;;  %v8893_v39 = vld [vmem:[%s15034_s14 + $0x5c] sm:$0xf] }
 0x853   : > { %v4068_v37 = vpop.f32.mrf.mxu1  ;;  %12497 = vmatmul.mubr.bf16.vlgmr.msra.gmra.mxu0 %v8893_v39  ;;  %v17903_v51 = vld [vmem:[%s20758_s1 + $0x138] sm:$0xff]   ;;  %v18038_v39 = vld [vmem:[%s20758_s1 + $0x1b0] sm:$0xff]  }
 0x854   : > { %12521 = vmatpush3.bf16.msra.mxu0 %v17202_v27  ;;  %12536 = vmatprep.mubr.msk.bf16.mxu0 %vm14808_vm0, %v21097_v38  ;;  %v21148_v37 = vld [vmem:[#allocation12_spill] sm:$0xff]  ;;  %21150 = vst [vmem:[#allocation17_spill] sm:$0xff] %v18038_v39 }
 0x855   : > { %v12159_v5 = vpop.f32.mrf.mxu1  ;;  %12522 = vmatprep.subr.bf16.mxu0 %v21097_v38 }
 0x856   : > { %v17915_v5 = vld [vmem:[%s20758_s1 + $0x130] sm:$0xff]  }
 0x858   : > { %12523 = vmatpush3.bf16.msra.mxu0 %v17213_v22 }
 0x859   : > { %12524 = vmatprep.subr.bf16.mxu0 %v21097_v38 }
 0x85c   : > { %12525 = vmatpush3.bf16.msra.mxu0 %v17224_v13  ;;  %v17841_v13 = vld [vmem:[%s15034_s14 + $0x34] sm:$0xf] }
 0x85d   : > { %12526 = vmatprep.subr.bf16.mxu0 %v21097_v38  ;;  %21147 = vst [vmem:[#allocation15_spill] sm:$0xff] %v17841_v13 }
 0x860   : > { %12527 = vmatpush3.bf16.msra.mxu0 %v17233_v1  ;;  %v14541_v1 = vld [vmem:[%s15034_s14 + $0x24] sm:$0xf] }
 0x861   : > { %12528 = vmatprep.subr.bf16.mxu0 %v21097_v38 }
 0x864   : > { %12529 = vmatpush3.bf16.msra.mxu0 %v17242_v56  ;;  %v17872_v56 = vld [vmem:[%s20758_s1 + $0x90] sm:$0xff]  }
 0x865   : > { %12530 = vmatprep.subr.bf16.mxu0 %v21097_v38 }
 0x868   : > { %12531 = vmatpush3.bf16.msra.mxu0 %v17251_v9  ;;  %v17881_v9 = vld [vmem:[%s20758_s1 + $0x88] sm:$0xff]  }
 0x869   : > { %12532 = vmatprep.subr.bf16.mxu0 %v21097_v38 }
 0x86c   : > { %12533 = vmatpush3.bf16.msra.mxu0 %v17260_v55  ;;  %v17890_v55 = vld [vmem:[%s20758_s1 + $0x80] sm:$0xff]  }
 0x86d   : > { %12534 = vmatprep.subr.bf16.mxu0 %v21097_v38 }
 0x86f   : > { %v4146_v6 = vpop.f32.mrf.mxu1 }
 0x870   : > { %v4152_v35 = vadd.f32 %v4146_v6, %v4111_v40  ;;  %12535 = vmatpush3.bf16.msra.mxu0 %v17534_v23  ;;  %v17921_v6 = vld [vmem:[%s20758_s1 + $0x178] sm:$0xff]  }
 0x871   : > { %v12198_v10 = vpop.f32.mrf.mxu1  ;;  %12560 = vmatprep.subr.bf16.mxu0 %v21097_v38  ;;  %v17961_v40 = vld [vmem:[%s20758_s1 + $0x118] sm:$0xff]  }
 0x872   : > { %v4193_v33 = vadd.f32 %v17710_v48, %v4152_v35  ;;  %v17931_v10 = vld [vmem:[%s20758_s1 + $0x128] sm:$0xff]   ;;  %v17967_v35 = vld [vmem:[%s20758_s1 + $0x160] sm:$0xff]  }
 0x873   : > { %v4149_v18 = vpop.f32.mrf.mxu1  ;;  %12537 = vmatmul.mubr.bf16.vlgmr.msra.gmra.mxu0 %v17841_v13  ;;  %v18132_v13 = vld [vmem:[%s20758_s1 + $0x1c8] sm:$0xff]  }
 0x874   : > { %12561 = vmatpush3.bf16.msra.mxu0 %v17549_v57  ;;  %12576 = vmatprep.mubr.msk.bf16.mxu0 %vm14808_vm0, %v21097_v38  ;;  %v17937_v18 = vld [vmem:[%s20758_s1 + $0x170] sm:$0xff]   ;;  %21163 = vst [vmem:[#allocation35_spill] sm:$0xff] %v18132_v13 }
 0x875   : > { %v12199_v62 = vpop.f32.mrf.mxu1  ;;  %12562 = vmatprep.subr.bf16.mxu0 %v21097_v38 }
 0x878   : > { %12563 = vmatpush3.bf16.msra.mxu0 %v17566_v11 }
 0x879   : > { %12564 = vmatprep.subr.bf16.mxu0 %v21097_v38 }
 0x87c   : > { %12565 = vmatpush3.bf16.msra.mxu0 %v17582_v31 }
 0x87d   : > { %12566 = vmatprep.subr.bf16.mxu0 %v21097_v38 }
 0x880   : > { %12567 = vmatpush3.bf16.msra.mxu0 %v17596_v3 }
 0x881   : > { %12568 = vmatprep.subr.bf16.mxu0 %v21097_v38 }
 0x884   : > { %12569 = vmatpush3.bf16.msra.mxu0 %v17610_v53 }
 0x885   : > { %12570 = vmatprep.subr.bf16.mxu0 %v21097_v38 }
 0x888   : > { %12571 = vmatpush3.bf16.msra.mxu0 %v17872_v56 }
 0x889   : > { %12572 = vmatprep.subr.bf16.mxu0 %v21097_v38 }
 0x88c   : > { %12573 = vmatpush3.bf16.msra.mxu0 %v17881_v9 }
 0x88d   : > { %12574 = vmatprep.subr.bf16.mxu0 %v21097_v38 }
 0x88f   : > { %v4228_v19 = vpop.f32.mrf.mxu1 }
 0x890   : > { %v4234_v44 = vadd.f32 %v4228_v19, %v4193_v33  ;;  %12575 = vmatpush3.bf16.msra.mxu0 %v17890_v55  ;;  %v17975_v33 = vld [vmem:[%s20758_s1 + $0x110] sm:$0xff]  }
 0x891   : > { %v12238_v47 = vpop.f32.mrf.mxu1  ;;  %12600 = vmatprep.subr.bf16.mxu0 %v21097_v38 }
 0x892   : > { %v4275_v43 = vadd.f32 %v17746_v32, %v4234_v44  ;;  %v17947_v47 = vld [vmem:[%s20758_s1 + $0x120] sm:$0xff]   ;;  %v17981_v44 = vld [vmem:[%s20758_s1 + $0x158] sm:$0xff]  }
 0x893   : > { %v4231_v41 = vpop.f32.mrf.mxu1  ;;  %12577 = vmatmul.mubr.bf16.vlgmr.msra.gmra.mxu0 %v17897_v25 }
 0x894   : > { %12601 = vmatpush3.bf16.msra.mxu0 %v17903_v51  ;;  %12616 = vmatprep.mubr.msk.bf16.mxu0 %vm14808_vm0, %v21097_v38  ;;  %v17953_v41 = vld [vmem:[%s20758_s1 + $0x168] sm:$0xff]  }
 0x895   : > { %v12239_v17 = vpop.f32.mrf.mxu1  ;;  %12602 = vmatprep.subr.bf16.mxu0 %v21097_v38 }
 0x898   : > { %12603 = vmatpush3.bf16.msra.mxu0 %v17915_v5 }
 0x899   : > { %12604 = vmatprep.subr.bf16.mxu0 %v21097_v38 }
 0x89c   : > { %12605 = vmatpush3.bf16.msra.mxu0 %v17931_v10 }
 0x89d   : > { %12606 = vmatprep.subr.bf16.mxu0 %v21097_v38 }
 0x8a0   : > { %12607 = vmatpush3.bf16.msra.mxu0 %v17947_v47 }
 0x8a1   : > { %12608 = vmatprep.subr.bf16.mxu0 %v21097_v38 }
 0x8a4   : > { %12609 = vmatpush3.bf16.msra.mxu0 %v17961_v40 }
 0x8a5   : > { %12610 = vmatprep.subr.bf16.mxu0 %v21097_v38 }
 0x8a8   : > { %12611 = vmatpush3.bf16.msra.mxu0 %v17975_v33 }
 0x8a9   : > { %12612 = vmatprep.subr.bf16.mxu0 %v21097_v38 }
 0x8af   : > { %v4310_v29 = vpop.f32.mrf.mxu1 }
 0x8b0   : > { %v4316_v0 = vadd.f32 %v4310_v29, %v4275_v43  ;;  %v17989_v43 = vld [vmem:[%s20758_s1 + $0x108] sm:$0xff]   ;;  %v17995_v29 = vld [vmem:[%s20758_s1 + $0x150] sm:$0xff]  }
 0x8b1   : > { %v12278_v20 = vpop.f32.mrf.mxu1  ;;  %12613 = vmatpush3.bf16.msra.mxu0 %v17989_v43 }
 0x8b2   : > { %v4357_v21 = vadd.f32 %v4351_v58, %v4316_v0  ;;  %v17808_v58 = vpop.f32.mrf.mxu0  ;;  %12614 = vmatprep.subr.bf16.mxu0 %v21097_v38  ;;  %v18003_v0 = vld [vmem:[%s20758_s1 + $0x100] sm:$0xff]   ;;  %v18009_v20 = vld [vmem:[%s20758_s1 + $0x148] sm:$0xff]  }
 0x8b3   : > { %v4313_v7 = vpop.f32.mrf.mxu1 }
 0x8b4   : > { %v4358_v8 = vadd.f32 %v17800_v52, %v4357_v21  ;;  %v12338_v27 = vpop.f32.mrf.mxu0  ;;  %v18015_v21 = vld [vmem:[%s15034_s14 + $0x4c] sm:$0xf] }
 0x8b5   : > { %v12279_v45 = vpop.f32.mrf.mxu1  ;;  %12615 = vmatpush3.bf16.msra.mxu0 %v18003_v0  ;;  %21149 = vst [vmem:[#allocation5_spill] sm:$0xff] %v18015_v21  ;;  %v18021_v7 = vld [vmem:[%s20758_s1 + $0x1b8] sm:$0xff]  }
 0x8b6   : > { %vm4359_vm7 = vcmp.ge.f32.partialorder %v4358_v8, 0.0  ;;  %v4360_v16 = vmul.f32 0.2, %v4358_v8  ;;  %v4506_v46 = vpop.f32.mrf.mxu0  ;;  %12640 = vmatprep.subr.bf16.mxu0 %v21097_v38  ;;  %v14564_v45 = vld [vmem:[%s15034_s14 + $0x44] sm:$0xf] }
 0x8b8   : > { %v4361_v48 = vsel %vm4359_vm7, %v4358_v8, %v4360_v16  ;;  %v12339_v22 = vpop.f32.mrf.mxu0  ;;  %12617 = vmatmul.mubr.bf16.vlgmr.msra.gmra.mxu0 %v18015_v21  ;;  %v18029_v8 = vld [vmem:[%s20758_s1 + $0x140] sm:$0xff]   ;;  %v18044_v16 = vld [vmem:[%s20758_s1 + $0x1f8] sm:$0xff]  }
 0x8b9   : > { %v4362_v32 = vpack.c.bf16 %v4361_v48, %v4361_v48  ;;  %12641 = vmatpush3.bf16.msra.mxu0 %v18021_v7  ;;  %12656 = vmatprep.mubr.msk.bf16.mxu0 %vm14808_vm0, %v21097_v38  ;;  %21151 = vst [vmem:[#allocation4_spill] sm:$0xff] %v18044_v16  ;;  %v18054_v48 = vld [vmem:[%s20758_s1 + $0x1a8] sm:$0xff]   ;;  %v18070_v22 = vld [vmem:[%s20758_s1 + $0x1a0] sm:$0xff]  }
 0x8ba   : > { %v17942_v62 = vpop.f32.mrf.mxu0  ;;  %12642 = vmatprep.subr.bf16.mxu0 %v21097_v38  ;;  %21152 = vst [vmem:[#allocation6_spill] sm:$0xff] %v18054_v48  ;;  %21154 = vst [vmem:[#allocation7_spill] sm:$0xff] %v18070_v22  ;;  %v18126_v21 = vld [vmem:[%s20758_s1 + $0x180] sm:$0xff]  }
 0x8bb   : > { %12317 = vmatmul.mubr.bf16.vlgmr.msra.gmra.mxu1 %v4362_v32  ;;  %v18060_v32 = vld [vmem:[%s20758_s1 + $0x1f0] sm:$0xff]   ;;  %21162 = vst [vmem:[#allocation11_spill] sm:$0xff] %v18126_v21 }
 0x8bc   : > { %12341 = vmatpush3.bf16.msra.mxu1 %v17479_v4  ;;  %12356 = vmatprep.mubr.msk.bf16.mxu1 %vm14808_vm0, %v21097_v38  ;;  %v12378_v19 = vpop.f32.mrf.mxu0  ;;  %21153 = vst [vmem:[#allocation8_spill] sm:$0xff] %v18060_v32 }
 0x8bd   : > { %12342 = vmatprep.subr.bf16.mxu1 %v21097_v38  ;;  %12643 = vmatpush3.bf16.msra.mxu0 %v18038_v39 }
 0x8be   : > { %v4586_v17 = vpop.f32.mrf.mxu0  ;;  %12644 = vmatprep.subr.bf16.mxu0 %v21097_v38 }
 0x8bf   : > { %v18084_v17 = vld [vmem:[%s20758_s1 + $0x198] sm:$0xff]  }
 0x8c0   : > { %12343 = vmatpush3.bf16.msra.mxu1 %v17490_v12  ;;  %v12379_v59 = vpop.f32.mrf.mxu0  ;;  %21156 = vst [vmem:[#allocation9_spill] sm:$0xff] %v18084_v17 }
 0x8c1   : > { %12344 = vmatprep.subr.bf16.mxu1 %v21097_v38  ;;  %12645 = vmatpush3.bf16.msra.mxu0 %v18054_v48  ;;  %v18090_v59 = vld [vmem:[%s20758_s1 + $0x1e0] sm:$0xff]  }
 0x8c2   : > { %12646 = vmatprep.subr.bf16.mxu0 %v21097_v38  ;;  %v18065_v27 = vpop.f32.mrf.mxu0  ;;  %21157 = vst [vmem:[#allocation20_spill] sm:$0xff] %v18090_v59 }
 0x8c4   : > { %12345 = vmatpush3.bf16.msra.mxu1 %v17499_v30  ;;  %v12418_v46 = vpop.f32.mrf.mxu0 }
 0x8c5   : > { %12346 = vmatprep.subr.bf16.mxu1 %v21097_v38  ;;  %12647 = vmatpush3.bf16.msra.mxu0 %v18070_v22  ;;  %v18104_v46 = vld [vmem:[%s20758_s1 + $0x1d8] sm:$0xff]  }
 0x8c6   : > { %12648 = vmatprep.subr.bf16.mxu0 %v21097_v38  ;;  %21159 = vst [vmem:[#allocation22_spill] sm:$0xff] %v18104_v46 }
 0x8c8   : > { %12347 = vmatpush3.bf16.msra.mxu1 %v17508_v24 }
 0x8c9   : > { %12348 = vmatprep.subr.bf16.mxu1 %v21097_v38  ;;  %12649 = vmatpush3.bf16.msra.mxu0 %v18084_v17 }
 0x8ca   : > { %12650 = vmatprep.subr.bf16.mxu0 %v21097_v38 }
 0x8cc   : > { %12349 = vmatpush3.bf16.msra.mxu1 %v17517_v63 }
 0x8cd   : > { %12350 = vmatprep.subr.bf16.mxu1 %v21097_v38 }
 0x8d0   : > { %12351 = vmatpush3.bf16.msra.mxu1 %v17526_v15 }
 0x8d1   : > { %12352 = vmatprep.subr.bf16.mxu1 %v21097_v38 }
 0x8d4   : > { %12353 = vmatpush3.bf16.msra.mxu1 %v17540_v14 }
 0x8d5   : > { %12354 = vmatprep.subr.bf16.mxu1 %v21097_v38 }
 0x8d8   : > { %12355 = vmatpush3.bf16.msra.mxu1 %v17557_v60 }
 0x8d9   : > { %12380 = vmatprep.subr.bf16.mxu1 %v21097_v38 }
 0x8db   : > { %12357 = vmatmul.mubr.bf16.vlgmr.msra.gmra.mxu1 %v14541_v1  ;;  %v18076_v1 = vld [vmem:[%s20758_s1 + $0x1e8] sm:$0xff]  }
 0x8dc   : > { %12381 = vmatpush3.bf16.msra.mxu1 %v17572_v36  ;;  %12396 = vmatprep.mubr.msk.bf16.mxu1 %vm14808_vm0, %v21097_v38  ;;  %21155 = vst [vmem:[#allocation10_spill] sm:$0xff] %v18076_v1 }
 0x8dd   : > { %12382 = vmatprep.subr.bf16.mxu1 %v21097_v38 }
 0x8e0   : > { %12383 = vmatpush3.bf16.msra.mxu1 %v17588_v28 }
 0x8e1   : > { %12384 = vmatprep.subr.bf16.mxu1 %v21097_v38 }
 0x8e4   : > { %12385 = vmatpush3.bf16.msra.mxu1 %v17602_v2 }
 0x8e5   : > { %12386 = vmatprep.subr.bf16.mxu1 %v21097_v38 }
 0x8e8   : > { %12387 = vmatpush3.bf16.msra.mxu1 %v17616_v54 }
 0x8e9   : > { %12388 = vmatprep.subr.bf16.mxu1 %v21097_v38 }
 0x8ec   : > { %12389 = vmatpush3.bf16.msra.mxu1 %v17625_v50 }
 0x8ed   : > { %12390 = vmatprep.subr.bf16.mxu1 %v21097_v38 }
 0x8f0   : > { %12391 = vmatpush3.bf16.msra.mxu1 %v17634_v42 }
 0x8f1   : > { %12392 = vmatprep.subr.bf16.mxu1 %v21097_v38 }
 0x8f4   : > { %12393 = vmatpush3.bf16.msra.mxu1 %v17643_v49 }
 0x8f5   : > { %12394 = vmatprep.subr.bf16.mxu1 %v21097_v38 }
 0x8f8   : > { %12395 = vmatpush3.bf16.msra.mxu1 %v17655_v34 }
 0x8f9   : > { %12420 = vmatprep.subr.bf16.mxu1 %v21097_v38 }
 0x8fb   : > { %12397 = vmatmul.mubr.bf16.vlgmr.msra.gmra.mxu1 %v21148_v37  ;;  %v4668_v37 = vpop.f32.mrf.mxu0 }
 0x8fc   : > { %12421 = vmatpush3.bf16.msra.mxu1 %v17921_v6  ;;  %12436 = vmatprep.mubr.msk.bf16.mxu1 %vm14808_vm0, %v21097_v38  ;;  %v18112_v37 = vld [vmem:[%s20758_s1 + $0x188] sm:$0xff]  }
 0x8fd   : > { %12422 = vmatprep.subr.bf16.mxu1 %v21097_v38  ;;  %v12419_v19 = vpop.f32.mrf.mxu0  ;;  %21160 = vst [vmem:[#allocation21_spill] sm:$0xff] %v18112_v37 }
 0x8fe   : > { %v18118_v19 = vld [vmem:[%s20758_s1 + $0x1d0] sm:$0xff]  }
 0x8ff   : > { %21161 = vst [vmem:[#allocation24_spill] sm:$0xff] %v18118_v19 }
 0x900   : > { %12423 = vmatpush3.bf16.msra.mxu1 %v17937_v18 }
 0x901   : > { %12424 = vmatprep.subr.bf16.mxu1 %v21097_v38 }
 0x904   : > { %12425 = vmatpush3.bf16.msra.mxu1 %v17953_v41 }
 0x905   : > { %12426 = vmatprep.subr.bf16.mxu1 %v21097_v38 }
 0x908   : > { %12427 = vmatpush3.bf16.msra.mxu1 %v17967_v35 }
 0x909   : > { %12428 = vmatprep.subr.bf16.mxu1 %v21097_v38 }
 0x90c   : > { %12429 = vmatpush3.bf16.msra.mxu1 %v17981_v44 }
 0x90d   : > { %12430 = vmatprep.subr.bf16.mxu1 %v21097_v38 }
 0x910   : > { %12431 = vmatpush3.bf16.msra.mxu1 %v17995_v29 }
 0x911   : > { %12432 = vmatprep.subr.bf16.mxu1 %v21097_v38 }
 0x914   : > { %12433 = vmatpush3.bf16.msra.mxu1 %v18009_v20 }
 0x915   : > { %12434 = vmatprep.subr.bf16.mxu1 %v21097_v38 }
 0x918   : > { %12435 = vmatpush3.bf16.msra.mxu1 %v18029_v8 }
 0x919   : > { %12460 = vmatprep.subr.bf16.mxu1 %v21097_v38 }
 0x91b   : > { %12437 = vmatmul.mubr.bf16.vlgmr.msra.gmra.mxu1 %v14564_v45  ;;  %v18098_v45 = vld [vmem:[%s20758_s1 + $0x190] sm:$0xff]  }
 0x91c   : > { %12461 = vmatpush3.bf16.msra.mxu1 %v18044_v16  ;;  %12476 = vmatprep.mubr.msk.bf16.mxu1 %vm14808_vm0, %v21097_v38  ;;  %21158 = vst [vmem:[#allocation19_spill] sm:$0xff] %v18098_v45  ;;  %v8894_v16 = vld [vmem:[%s15034_s14 + $0x60] sm:$0xf] }
 0x91d   : > { %12462 = vmatprep.subr.bf16.mxu1 %v21097_v38  ;;  %12651 = vmatpush3.bf16.msra.mxu0 %v18098_v45 }
 0x91e   : > { %12652 = vmatprep.subr.bf16.mxu0 %v21097_v38 }
 0x920   : > { %12463 = vmatpush3.bf16.msra.mxu1 %v18060_v32 }
 0x921   : > { %12464 = vmatprep.subr.bf16.mxu1 %v21097_v38  ;;  %12653 = vmatpush3.bf16.msra.mxu0 %v18112_v37  ;;  %v18140_v37 = vld [vmem:[%s20758_s1 + $0x1c0] sm:$0xff]  }
 0x922   : > { %12654 = vmatprep.subr.bf16.mxu0 %v21097_v38  ;;  %21164 = vst [vmem:[#allocation13_spill] sm:$0xff] %v18140_v37 }
 0x924   : > { %12465 = vmatpush3.bf16.msra.mxu1 %v18076_v1 }
 0x925   : > { %12466 = vmatprep.subr.bf16.mxu1 %v21097_v38  ;;  %12655 = vmatpush3.bf16.msra.mxu0 %v18126_v21  ;;  %v18147_v21 = vpop.f32.mrf.mxu0 }
 0x926   : > { %12680 = vmatprep.subr.bf16.mxu0 %v21097_v38 }
 0x928   : > { %12467 = vmatpush3.bf16.msra.mxu1 %v18090_v59  ;;  %12657 = vmatmul.mubr.bf16.vlgmr.msra.gmra.mxu0 %v8894_v16  ;;  %v18205_v16 = vld [vmem:[%s20758_s1 + $0x228] sm:$0xff]  }
 0x929   : > { %12468 = vmatprep.subr.bf16.mxu1 %v21097_v38  ;;  %12696 = vmatprep.mubr.msk.bf16.mxu0 %vm14808_vm0, %v21097_v38  ;;  %21168 = vst [vmem:[#allocation25_spill] sm:$0xff] %v18205_v16 }
 0x92c   : > { %12469 = vmatpush3.bf16.msra.mxu1 %v18104_v46  ;;  %v14278_v46 = vld [vmem:[%s20760_s3 + $0x1f8] sm:$0xff]  }
 0x92d   : > { %12470 = vmatprep.subr.bf16.mxu1 %v21097_v38 }
 0x930   : > { %12471 = vmatpush3.bf16.msra.mxu1 %v18118_v19 }
 0x931   : > { %12472 = vmatprep.subr.bf16.mxu1 %v21097_v38 }
 0x934   : > { %12473 = vmatpush3.bf16.msra.mxu1 %v18132_v13  ;;  %v12458_v13 = vpop.f32.mrf.mxu0 }
 0x935   : > { %12474 = vmatprep.subr.bf16.mxu1 %v21097_v38  ;;  %v14281_v13 = vld [vmem:[%s20760_s3 + $0x1e0] sm:$0xff]  }
 0x936   : > { %v4750_v19 = vpop.f32.mrf.mxu0 }
 0x937   : > { %v14283_v19 = vld [vmem:[%s20760_s3 + $0x1d0] sm:$0xff]  }
 0x938   : > { %12475 = vmatpush3.bf16.msra.mxu1 %v18140_v37  ;;  %v12459_v45 = vpop.f32.mrf.mxu0  ;;  %v14279_v37 = vld [vmem:[%s20760_s3 + $0x1f0] sm:$0xff]  }
 0x939   : > { %12500 = vmatprep.subr.bf16.mxu1 %v21097_v38  ;;  %v14282_v45 = vld [vmem:[%s20760_s3 + $0x1d8] sm:$0xff]  }
 0x93b   : > { %12477 = vmatmul.mubr.bf16.vlgmr.msra.gmra.mxu1 %v17466_v26  ;;  %v14280_v26 = vld [vmem:[%s20760_s3 + $0x1e8] sm:$0xff]  }
 0x93c   : > { %12516 = vmatprep.mubr.msk.bf16.mxu1 %vm14808_vm0, %v21097_v38  ;;  %12501 = vmatpush3.bf16.msra.mxu1 %v14278_v46  ;;  %v4829_v46 = vpop.f32.mrf.mxu0 }
 0x93d   : > { %12502 = vmatprep.subr.bf16.mxu1 %v21097_v38 }
 0x940   : > { %12503 = vmatpush3.bf16.msra.mxu1 %v14279_v37  ;;  %v12498_v37 = vpop.f32.mrf.mxu0 }
 0x941   : > { %12504 = vmatprep.subr.bf16.mxu1 %v21097_v38 }
 0x944   : > { %12505 = vmatpush3.bf16.msra.mxu1 %v14280_v26  ;;  %v4832_v26 = vpop.f32.mrf.mxu0 }
 0x945   : > { %12506 = vmatprep.subr.bf16.mxu1 %v21097_v38 }
 0x946   : > { %v12499_v59 = vpop.f32.mrf.mxu0 }
 0x948   : > { %12507 = vmatpush3.bf16.msra.mxu1 %v14281_v13 }
 0x949   : > { %12508 = vmatprep.subr.bf16.mxu1 %v21097_v38 }
 0x94c   : > { %12509 = vmatpush3.bf16.msra.mxu1 %v14282_v45  ;;  %v14284_v45 = vld [vmem:[%s20760_s3 + $0x1c8] sm:$0xff]  }
 0x94d   : > { %12510 = vmatprep.subr.bf16.mxu1 %v21097_v38 }
 0x950   : > { %12511 = vmatpush3.bf16.msra.mxu1 %v14283_v19  ;;  %v14285_v19 = vld [vmem:[%s20760_s3 + $0x1c0] sm:$0xff]  }
 0x951   : > { %12512 = vmatprep.subr.bf16.mxu1 %v21097_v38 }
 0x954   : > { %12513 = vmatpush3.bf16.msra.mxu1 %v14284_v45 }
 0x955   : > { %12514 = vmatprep.subr.bf16.mxu1 %v21097_v38 }
 0x958   : > { %12515 = vmatpush3.bf16.msra.mxu1 %v14285_v19  ;;  %v18188_v19 = vld [vmem:[%s20758_s1 + $0x238] sm:$0xff]  }
 0x959   : > { %12540 = vmatprep.subr.bf16.mxu1 %v21097_v38  ;;  %21166 = vst [vmem:[#allocation23_spill] sm:$0xff] %v18188_v19  ;;  %12681 = vmatpush3.bf16.msra.mxu0 %v18188_v19 }
 0x95a   : > { %12682 = vmatprep.subr.bf16.mxu0 %v21097_v38 }
 0x97b   : > { %v4462_v17 = vpop.f32.mrf.mxu1 }
 0x97c   : > { %v18173_v13 = vadd.f32 %v4462_v17, %v17782_v61 }
 0x97d   : > { %v12318_v22 = vpop.f32.mrf.mxu1 }
 0x97e   : > { %21165 = vst [vmem:[#allocation18_spill] sm:$0xff] %v18173_v13 }
 0x97f   : > { %v4465_v1 = vpop.f32.mrf.mxu1 }
 0x981   : > { %v12319_v37 = vpop.f32.mrf.mxu1 }
 0x99b   : > { %v4543_v61 = vpop.f32.mrf.mxu1 }
 0x99d   : > { %v12358_v17 = vpop.f32.mrf.mxu1 }
 0x99e   : > { %v18213_v17 = vld [vmem:[%s20758_s1 + $0x220] sm:$0xff]  }
 0x99f   : > { %v4546_v22 = vpop.f32.mrf.mxu1  ;;  %21169 = vst [vmem:[#allocation36_spill] sm:$0xff] %v18213_v17 }
 0x9a0   : > { %v18228_v22 = vld [vmem:[%s20758_s1 + $0x210] sm:$0xff]  }
 0x9a1   : > { %v12359_v59 = vpop.f32.mrf.mxu1  ;;  %21171 = vst [vmem:[#allocation27_spill] sm:$0xff] %v18228_v22 }
 0x9bb   : > { %v4624_v26 = vpop.f32.mrf.mxu1 }
 0x9bd   : > { %v12398_v13 = vpop.f32.mrf.mxu1 }
 0x9bf   : > { %v4627_v48 = vpop.f32.mrf.mxu1 }
 0x9c0   : > { %v18197_v48 = vld [vmem:[%s20758_s1 + $0x230] sm:$0xff]  }
 0x9c1   : > { %v12399_v1 = vpop.f32.mrf.mxu1  ;;  %21167 = vst [vmem:[#allocation26_spill] sm:$0xff] %v18197_v48  ;;  %12683 = vmatpush3.bf16.msra.mxu0 %v18197_v48 }
 0x9c2   : > { %12684 = vmatprep.subr.bf16.mxu0 %v21097_v38 }
 0x9c5   : > { %12685 = vmatpush3.bf16.msra.mxu0 %v18205_v16 }
 0x9c6   : > { %12686 = vmatprep.subr.bf16.mxu0 %v21097_v38 }
 0x9c9   : > { %12687 = vmatpush3.bf16.msra.mxu0 %v18213_v17 }
 0x9ca   : > { %12688 = vmatprep.subr.bf16.mxu0 %v21097_v38 }
 0x9db   : > { %v4706_v45 = vpop.f32.mrf.mxu1 }
 0x9dd   : > { %v12438_v32 = vpop.f32.mrf.mxu1 }
 0x9df   : > { %v4709_v39 = vpop.f32.mrf.mxu1 }
 0x9e0   : > { %v4544_v39 = vadd.f32 %v4543_v61, %v17808_v58  ;;  %v18221_v61 = vld [vmem:[%s20758_s1 + $0x218] sm:$0xff]  }
 0x9e1   : > { %v12439_v37 = vpop.f32.mrf.mxu1  ;;  %21170 = vst [vmem:[#allocation28_spill] sm:$0xff] %v18221_v61  ;;  %12689 = vmatpush3.bf16.msra.mxu0 %v18221_v61 }
 0x9e2   : > { %v4589_v32 = vadd.f32 %v17942_v62, %v4544_v39  ;;  %12690 = vmatprep.subr.bf16.mxu0 %v21097_v38 }
 0x9e4   : > { %v4630_v13 = vadd.f32 %v4624_v26, %v4589_v32 }
 0x9e5   : > { %12691 = vmatpush3.bf16.msra.mxu0 %v18228_v22 }
 0x9e6   : > { %v4671_v58 = vadd.f32 %v18065_v27, %v4630_v13  ;;  %12692 = vmatprep.subr.bf16.mxu0 %v21097_v38 }
 0x9e8   : > { %v4712_v62 = vadd.f32 %v4706_v45, %v4671_v58  ;;  %v18236_v45 = vld [vmem:[%s20758_s1 + $0x208] sm:$0xff]  }
 0x9e9   : > { %21172 = vst [vmem:[#allocation29_spill] sm:$0xff] %v18236_v45  ;;  %12693 = vmatpush3.bf16.msra.mxu0 %v18236_v45  ;;  %v18248_v58 = vld [vmem:[%s15034_s14 + $0x68] sm:$0xf] }
 0x9ea   : > { %v4753_v27 = vadd.f32 %v18147_v21, %v4712_v62  ;;  %12694 = vmatprep.subr.bf16.mxu0 %v21097_v38  ;;  %v18244_v21 = vld [vmem:[%s20758_s1 + $0x200] sm:$0xff]   ;;  %21174 = vst [vmem:[#allocation31_spill] sm:$0xff] %v18248_v58 }
 0x9eb   : > { %21173 = vst [vmem:[#allocation30_spill] sm:$0xff] %v18244_v21 }
 0x9ed   : > { %12695 = vmatpush3.bf16.msra.mxu0 %v18244_v21 }
 0x9ee   : > { %12720 = vmatprep.subr.bf16.mxu0 %v21097_v38 }
 0x9f0   : > { %12697 = vmatmul.mubr.bf16.vlgmr.msra.gmra.mxu0 %v18248_v58 }
 0x9f1   : > { %12736 = vmatprep.mubr.msk.bf16.mxu0 %vm14808_vm0, %v21097_v38 }
 0x9fb   : > { %v4788_v59 = vpop.f32.mrf.mxu1 }
 0x9fc   : > { %v4794_v26 = vadd.f32 %v4788_v59, %v4753_v27  ;;  %v18255_v59 = vld [vmem:[%s20758_s1 + $0x78] sm:$0xff]  }
 0x9fd   : > { %v12478_v1 = vpop.f32.mrf.mxu1  ;;  %12721 = vmatpush3.bf16.msra.mxu0 %v18255_v59 }
 0x9fe   : > { %v4835_v37 = vadd.f32 %v4829_v46, %v4794_v26  ;;  %12722 = vmatprep.subr.bf16.mxu0 %v21097_v38  ;;  %v18261_v26 = vpop.f32.mrf.mxu0 }
 0x9ff   : > { %v4791_v39 = vpop.f32.mrf.mxu1 }
 0xa00   : > { %v4836_v32 = vadd.f32 %v17800_v52, %v4835_v37  ;;  %v12538_v1 = vpop.f32.mrf.mxu0  ;;  %v18270_v37 = vld [vmem:[%s20758_s1 + $0x70] sm:$0xff]  }
 0xa01   : > { %v12479_v13 = vpop.f32.mrf.mxu1  ;;  %12723 = vmatpush3.bf16.msra.mxu0 %v18270_v37  ;;  %v21186_v1 = vld [vmem:[#allocation24_spill] sm:$0xff] }
 0xa02   : > { %vm4837_vm8 = vcmp.ge.f32.partialorder %v4836_v32, 0.0  ;;  %v4838_v62 = vmul.f32 0.2, %v4836_v32  ;;  %12724 = vmatprep.subr.bf16.mxu0 %v21097_v38  ;;  %v4984_v39 = vpop.f32.mrf.mxu0  ;;  %v18297_v13 = vld [vmem:[%s20758_s1 + $0x58] sm:$0xff]  }
 0xa03   : > { %v21187_v39 = vld [vmem:[#allocation21_spill] sm:$0xff] }
 0xa04   : > { %v4839_v46 = vsel %vm4837_vm8, %v4836_v32, %v4838_v62  ;;  %v18279_v32 = vld [vmem:[%s20758_s1 + $0x68] sm:$0xff]  }
 0xa05   : > { %v4840_v27 = vpack.c.bf16 %v4839_v46, %v4839_v46  ;;  %12725 = vmatpush3.bf16.msra.mxu0 %v18279_v32  ;;  %v21183_v62 = vld [vmem:[#allocation9_spill] sm:$0xff]  ;;  %v21184_v46 = vld [vmem:[#allocation22_spill] sm:$0xff] }
 0xa06   : > { %12726 = vmatprep.subr.bf16.mxu0 %v21097_v38 }
 0xa07   : > { %12517 = vmatmul.mubr.bf16.vlgmr.msra.gmra.mxu1 %v4840_v27  ;;  %v21185_v27 = vld [vmem:[#allocation19_spill] sm:$0xff] }
 0xa08   : > { %12541 = vmatpush3.bf16.msra.mxu1 %v17479_v4  ;;  %12556 = vmatprep.mubr.msk.bf16.mxu1 %vm14808_vm0, %v21097_v38  ;;  %v12539_v4 = vpop.f32.mrf.mxu0 }
 0xa09   : > { %12542 = vmatprep.subr.bf16.mxu1 %v21097_v38  ;;  %v21188_v4 = vld [vmem:[#allocation35_spill] sm:$0xff] }
 0xa0c   : > { %12543 = vmatpush3.bf16.msra.mxu1 %v17490_v12  ;;  %v18288_v12 = vld [vmem:[%s20758_s1 + $0x60] sm:$0xff]  }
 0xa0d   : > { %12544 = vmatprep.subr.bf16.mxu1 %v21097_v38  ;;  %12727 = vmatpush3.bf16.msra.mxu0 %v18288_v12 }
 0xa0e   : > { %12728 = vmatprep.subr.bf16.mxu0 %v21097_v38 }
 0xa10   : > { %12545 = vmatpush3.bf16.msra.mxu1 %v17499_v30  ;;  %v18306_v30 = vld [vmem:[%s20758_s1 + $0x50] sm:$0xff]  }
 0xa11   : > { %12546 = vmatprep.subr.bf16.mxu1 %v21097_v38  ;;  %12729 = vmatpush3.bf16.msra.mxu0 %v18297_v13 }
 0xa12   : > { %12730 = vmatprep.subr.bf16.mxu0 %v21097_v38 }
 0xa14   : > { %12547 = vmatpush3.bf16.msra.mxu1 %v17508_v24  ;;  %v18315_v24 = vld [vmem:[%s20758_s1 + $0x48] sm:$0xff]  }
 0xa15   : > { %12548 = vmatprep.subr.bf16.mxu1 %v21097_v38  ;;  %12731 = vmatpush3.bf16.msra.mxu0 %v18306_v30 }
 0xa16   : > { %12732 = vmatprep.subr.bf16.mxu0 %v21097_v38 }
 0xa18   : > { %12549 = vmatpush3.bf16.msra.mxu1 %v17517_v63  ;;  %v14595_v63 = vld [vmem:[%s15034_s14 + $0x30] sm:$0xf] }
 0xa19   : > { %12550 = vmatprep.subr.bf16.mxu1 %v21097_v38  ;;  %12733 = vmatpush3.bf16.msra.mxu0 %v18315_v24 }
 0xa1a   : > { %12734 = vmatprep.subr.bf16.mxu0 %v21097_v38 }
 0xa1c   : > { %12551 = vmatpush3.bf16.msra.mxu1 %v17526_v15  ;;  %v18363_v15 = vld [vmem:[%s15034_s14 + $0x3c] sm:$0xf] }
 0xa1d   : > { %12552 = vmatprep.subr.bf16.mxu1 %v21097_v38  ;;  %12735 = vmatpush3.bf16.msra.mxu0 %v17534_v23  ;;  %v14597_v23 = vld [vmem:[%s15034_s14 + $0x48] sm:$0xf] }
 0xa1e   : > { %12760 = vmatprep.subr.bf16.mxu0 %v21097_v38 }
 0xa20   : > { %12553 = vmatpush3.bf16.msra.mxu1 %v17540_v14  ;;  %12737 = vmatmul.mubr.bf16.vlgmr.msra.gmra.mxu0 %v17897_v25  ;;  %v18380_v14 = vpop.f32.mrf.mxu0  ;;  %v21182_v25 = vld [vmem:[#allocation20_spill] sm:$0xff] }
 0xa21   : > { %12554 = vmatprep.subr.bf16.mxu1 %v21097_v38  ;;  %12761 = vmatpush3.bf16.msra.mxu0 %v17549_v57 }
 0xa22   : > { %12762 = vmatprep.subr.bf16.mxu0 %v21097_v38  ;;  %12776 = vmatprep.mubr.msk.bf16.mxu0 %vm14808_vm0, %v21097_v38  ;;  %v12578_v57 = vpop.f32.mrf.mxu0 }
 0xa23   : > { %v21190_v57 = vld [vmem:[#allocation13_spill] sm:$0xff] }
 0xa24   : > { %12555 = vmatpush3.bf16.msra.mxu1 %v17557_v60  ;;  %v5064_v60 = vpop.f32.mrf.mxu0 }
 0xa25   : > { %12580 = vmatprep.subr.bf16.mxu1 %v21097_v38  ;;  %12763 = vmatpush3.bf16.msra.mxu0 %v17566_v11 }
 0xa26   : > { %12764 = vmatprep.subr.bf16.mxu0 %v21097_v38  ;;  %v12579_v11 = vpop.f32.mrf.mxu0 }
 0xa27   : > { %12557 = vmatmul.mubr.bf16.vlgmr.msra.gmra.mxu1 %v14595_v63  ;;  %v21189_v63 = vld [vmem:[#allocation11_spill] sm:$0xff] }
 0xa28   : > { %12581 = vmatpush3.bf16.msra.mxu1 %v17572_v36  ;;  %12596 = vmatprep.mubr.msk.bf16.mxu1 %vm14808_vm0, %v21097_v38  ;;  %v18406_v36 = vld [vmem:[%s15034_s14 + $0x50] sm:$0xf] }
 0xa29   : > { %12582 = vmatprep.subr.bf16.mxu1 %v21097_v38  ;;  %12765 = vmatpush3.bf16.msra.mxu0 %v17582_v31  ;;  %21175 = vst [vmem:[#allocation32_spill] sm:$0xff] %v18406_v36  ;;  %v21176_v31 = vld [vmem:[#allocation4_spill] sm:$0xff] }
 0xa2a   : > { %12766 = vmatprep.subr.bf16.mxu0 %v21097_v38 }
 0xa2c   : > { %12583 = vmatpush3.bf16.msra.mxu1 %v17588_v28  ;;  %v21177_v28 = vld [vmem:[#allocation17_spill] sm:$0xff] }
 0xa2d   : > { %12584 = vmatprep.subr.bf16.mxu1 %v21097_v38  ;;  %12767 = vmatpush3.bf16.msra.mxu0 %v17596_v3  ;;  %v21178_v3 = vld [vmem:[#allocation8_spill] sm:$0xff] }
 0xa2e   : > { %12768 = vmatprep.subr.bf16.mxu0 %v21097_v38 }
 0xa30   : > { %12585 = vmatpush3.bf16.msra.mxu1 %v17602_v2  ;;  %v18423_v2 = vpop.f32.mrf.mxu0 }
 0xa31   : > { %12586 = vmatprep.subr.bf16.mxu1 %v21097_v38  ;;  %12769 = vmatpush3.bf16.msra.mxu0 %v17610_v53  ;;  %v21179_v53 = vld [vmem:[#allocation6_spill] sm:$0xff] }
 0xa32   : > { %12770 = vmatprep.subr.bf16.mxu0 %v21097_v38 }
 0xa34   : > { %12587 = vmatpush3.bf16.msra.mxu1 %v17616_v54  ;;  %v12618_v54 = vpop.f32.mrf.mxu0 }
 0xa35   : > { %12588 = vmatprep.subr.bf16.mxu1 %v21097_v38  ;;  %12771 = vmatpush3.bf16.msra.mxu0 %v17872_v56 }
 0xa36   : > { %12772 = vmatprep.subr.bf16.mxu0 %v21097_v38 }
 0xa38   : > { %12589 = vmatpush3.bf16.msra.mxu1 %v17625_v50  ;;  %v21180_v50 = vld [vmem:[#allocation10_spill] sm:$0xff] }
 0xa39   : > { %12590 = vmatprep.subr.bf16.mxu1 %v21097_v38  ;;  %12773 = vmatpush3.bf16.msra.mxu0 %v17881_v9 }
 0xa3a   : > { %12774 = vmatprep.subr.bf16.mxu0 %v21097_v38 }
 0xa3c   : > { %12591 = vmatpush3.bf16.msra.mxu1 %v17634_v42  ;;  %v5146_v42 = vpop.f32.mrf.mxu0 }
 0xa3d   : > { %12592 = vmatprep.subr.bf16.mxu1 %v21097_v38  ;;  %12775 = vmatpush3.bf16.msra.mxu0 %v17890_v55 }
 0xa3e   : > { %12800 = vmatprep.subr.bf16.mxu0 %v21097_v38 }
 0xa40   : > { %12593 = vmatpush3.bf16.msra.mxu1 %v17643_v49  ;;  %12777 = vmatmul.mubr.bf16.vlgmr.msra.gmra.mxu0 %v18363_v15  ;;  %v21181_v49 = vld [vmem:[#allocation7_spill] sm:$0xff] }
 0xa41   : > { %12594 = vmatprep.subr.bf16.mxu1 %v21097_v38  ;;  %12801 = vmatpush3.bf16.msra.mxu0 %v17903_v51 }
 0xa42   : > { %12802 = vmatprep.subr.bf16.mxu0 %v21097_v38  ;;  %12816 = vmatprep.mubr.msk.bf16.mxu0 %vm14808_vm0, %v21097_v38 }
 0xa44   : > { %12595 = vmatpush3.bf16.msra.mxu1 %v17655_v34  ;;  %v12619_v34 = vpop.f32.mrf.mxu0 }
 0xa45   : > { %12620 = vmatprep.subr.bf16.mxu1 %v21097_v38  ;;  %12803 = vmatpush3.bf16.msra.mxu0 %v17915_v5  ;;  %v14286_v34 = vld [vmem:[%s20760_s3 + $0x238] sm:$0xff]  }
 0xa46   : > { %12804 = vmatprep.subr.bf16.mxu0 %v21097_v38  ;;  %v5225_v60 = vpop.f32.mrf.mxu0 }
 0xa47   : > { %12597 = vmatmul.mubr.bf16.vlgmr.msra.gmra.mxu1 %v14597_v23  ;;  %v8895_v23 = vld [vmem:[%s15034_s14 + $0x64] sm:$0xf] }
 0xa48   : > { %12621 = vmatpush3.bf16.msra.mxu1 %v17921_v6  ;;  %12636 = vmatprep.mubr.msk.bf16.mxu1 %vm14808_vm0, %v21097_v38  ;;  %v12658_v11 = vpop.f32.mrf.mxu0 }
 0xa49   : > { %12622 = vmatprep.subr.bf16.mxu1 %v21097_v38  ;;  %12805 = vmatpush3.bf16.msra.mxu0 %v17931_v10  ;;  %v14289_v11 = vld [vmem:[%s20760_s3 + $0x220] sm:$0xff]  }
 0xa4a   : > { %12806 = vmatprep.subr.bf16.mxu0 %v21097_v38  ;;  %v5228_v54 = vpop.f32.mrf.mxu0 }
 0xa4b   : > { %v14290_v54 = vld [vmem:[%s20760_s3 + $0x218] sm:$0xff]  }
 0xa4c   : > { %12623 = vmatpush3.bf16.msra.mxu1 %v17937_v18  ;;  %v12659_v42 = vpop.f32.mrf.mxu0 }
 0xa4d   : > { %12624 = vmatprep.subr.bf16.mxu1 %v21097_v38  ;;  %12807 = vmatpush3.bf16.msra.mxu0 %v17947_v47 }
 0xa4e   : > { %12808 = vmatprep.subr.bf16.mxu0 %v21097_v38 }
 0xa50   : > { %12625 = vmatpush3.bf16.msra.mxu1 %v17953_v41 }
 0xa51   : > { %12626 = vmatprep.subr.bf16.mxu1 %v21097_v38  ;;  %12809 = vmatpush3.bf16.msra.mxu0 %v17961_v40 }
 0xa52   : > { %12810 = vmatprep.subr.bf16.mxu0 %v21097_v38 }
 0xa54   : > { %12627 = vmatpush3.bf16.msra.mxu1 %v17967_v35 }
 0xa55   : > { %12628 = vmatprep.subr.bf16.mxu1 %v21097_v38  ;;  %12811 = vmatpush3.bf16.msra.mxu0 %v17975_v33 }
 0xa56   : > { %12812 = vmatprep.subr.bf16.mxu0 %v21097_v38 }
 0xa58   : > { %12629 = vmatpush3.bf16.msra.mxu1 %v17981_v44 }
 0xa59   : > { %12630 = vmatprep.subr.bf16.mxu1 %v21097_v38  ;;  %12813 = vmatpush3.bf16.msra.mxu0 %v17989_v43 }
 0xa5a   : > { %12814 = vmatprep.subr.bf16.mxu0 %v21097_v38 }
 0xa5c   : > { %12631 = vmatpush3.bf16.msra.mxu1 %v17995_v29 }
 0xa5d   : > { %12632 = vmatprep.subr.bf16.mxu1 %v21097_v38  ;;  %12815 = vmatpush3.bf16.msra.mxu0 %v18003_v0 }
 0xa5e   : > { %12840 = vmatprep.subr.bf16.mxu0 %v21097_v38 }
 0xa60   : > { %12633 = vmatpush3.bf16.msra.mxu1 %v18009_v20  ;;  %12817 = vmatmul.mubr.bf16.vlgmr.msra.gmra.mxu0 %v18406_v36 }
 0xa61   : > { %12634 = vmatprep.subr.bf16.mxu1 %v21097_v38  ;;  %12841 = vmatpush3.bf16.msra.mxu0 %v18021_v7 }
 0xa62   : > { %12842 = vmatprep.subr.bf16.mxu0 %v21097_v38  ;;  %12856 = vmatprep.mubr.msk.bf16.mxu0 %vm14808_vm0, %v21097_v38 }
 0xa64   : > { %12635 = vmatpush3.bf16.msra.mxu1 %v18029_v8 }
 0xa65   : > { %12660 = vmatprep.subr.bf16.mxu1 %v21097_v38  ;;  %12843 = vmatpush3.bf16.msra.mxu0 %v21177_v28 }
 0xa66   : > { %12844 = vmatprep.subr.bf16.mxu0 %v21097_v38 }
 0xa67   : > { %12637 = vmatmul.mubr.bf16.vlgmr.msra.gmra.mxu1 %v18406_v36  ;;  %v14288_v36 = vld [vmem:[%s20760_s3 + $0x228] sm:$0xff]  }
 0xa68   : > { %12661 = vmatpush3.bf16.msra.mxu1 %v21176_v31  ;;  %12676 = vmatprep.mubr.msk.bf16.mxu1 %vm14808_vm0, %v21097_v38 }
 0xa69   : > { %12662 = vmatprep.subr.bf16.mxu1 %v21097_v38  ;;  %12845 = vmatpush3.bf16.msra.mxu0 %v21179_v53 }
 0xa6a   : > { %12846 = vmatprep.subr.bf16.mxu0 %v21097_v38 }
 0xa6c   : > { %12663 = vmatpush3.bf16.msra.mxu1 %v21178_v3 }
 0xa6d   : > { %12664 = vmatprep.subr.bf16.mxu1 %v21097_v38  ;;  %12847 = vmatpush3.bf16.msra.mxu0 %v21181_v49 }
 0xa6e   : > { %12848 = vmatprep.subr.bf16.mxu0 %v21097_v38 }
 0xa70   : > { %12665 = vmatpush3.bf16.msra.mxu1 %v21180_v50 }
 0xa71   : > { %12666 = vmatprep.subr.bf16.mxu1 %v21097_v38  ;;  %12849 = vmatpush3.bf16.msra.mxu0 %v21183_v62 }
 0xa72   : > { %12850 = vmatprep.subr.bf16.mxu0 %v21097_v38 }
 0xa74   : > { %12667 = vmatpush3.bf16.msra.mxu1 %v21182_v25 }
 0xa75   : > { %12668 = vmatprep.subr.bf16.mxu1 %v21097_v38  ;;  %12851 = vmatpush3.bf16.msra.mxu0 %v21185_v27 }
 0xa76   : > { %12852 = vmatprep.subr.bf16.mxu0 %v21097_v38 }
 0xa78   : > { %12669 = vmatpush3.bf16.msra.mxu1 %v21184_v46 }
 0xa79   : > { %12670 = vmatprep.subr.bf16.mxu1 %v21097_v38  ;;  %12853 = vmatpush3.bf16.msra.mxu0 %v21187_v39  ;;  %v18510_v39 = vld [vmem:[%s15034_s14 + $0x6c] sm:$0xf] }
 0xa7a   : > { %12854 = vmatprep.subr.bf16.mxu0 %v21097_v38 }
 0xa7c   : > { %12671 = vmatpush3.bf16.msra.mxu1 %v21186_v1 }
 0xa7d   : > { %12672 = vmatprep.subr.bf16.mxu1 %v21097_v38  ;;  %12855 = vmatpush3.bf16.msra.mxu0 %v21189_v63 }
 0xa7e   : > { %12880 = vmatprep.subr.bf16.mxu0 %v21097_v38 }
 0xa80   : > { %12673 = vmatpush3.bf16.msra.mxu1 %v21188_v4  ;;  %12857 = vmatmul.mubr.bf16.vlgmr.msra.gmra.mxu0 %v8895_v23 }
 0xa81   : > { %12674 = vmatprep.subr.bf16.mxu1 %v21097_v38  ;;  %12881 = vmatpush3.bf16.msra.mxu0 %v18188_v19 }
 0xa82   : > { %12882 = vmatprep.subr.bf16.mxu0 %v21097_v38  ;;  %12896 = vmatprep.mubr.msk.bf16.mxu0 %vm14808_vm0, %v21097_v38 }
 0xa84   : > { %12675 = vmatpush3.bf16.msra.mxu1 %v21190_v57 }
 0xa85   : > { %12700 = vmatprep.subr.bf16.mxu1 %v21097_v38  ;;  %12883 = vmatpush3.bf16.msra.mxu0 %v18197_v48 }
 0xa86   : > { %12884 = vmatprep.subr.bf16.mxu0 %v21097_v38 }
 0xa87   : > { %12677 = vmatmul.mubr.bf16.vlgmr.msra.gmra.mxu1 %v8895_v23  ;;  %v14287_v23 = vld [vmem:[%s20760_s3 + $0x230] sm:$0xff]  }
 0xa88   : > { %12716 = vmatprep.mubr.msk.bf16.mxu1 %vm14808_vm0, %v21097_v38  ;;  %12701 = vmatpush3.bf16.msra.mxu1 %v14286_v34 }
 0xa89   : > { %12885 = vmatpush3.bf16.msra.mxu0 %v18205_v16  ;;  %12702 = vmatprep.subr.bf16.mxu1 %v21097_v38 }
 0xa8a   : > { %12886 = vmatprep.subr.bf16.mxu0 %v21097_v38 }
 0xa8c   : > { %12703 = vmatpush3.bf16.msra.mxu1 %v14287_v23 }
 0xa8d   : > { %12887 = vmatpush3.bf16.msra.mxu0 %v18213_v17  ;;  %12704 = vmatprep.subr.bf16.mxu1 %v21097_v38 }
 0xa8e   : > { %12888 = vmatprep.subr.bf16.mxu0 %v21097_v38 }
 0xa90   : > { %12705 = vmatpush3.bf16.msra.mxu1 %v14288_v36  ;;  %v14291_v36 = vld [vmem:[%s20760_s3 + $0x210] sm:$0xff]  }
 0xa91   : > { %12889 = vmatpush3.bf16.msra.mxu0 %v18221_v61  ;;  %12706 = vmatprep.subr.bf16.mxu1 %v21097_v38 }
 0xa92   : > { %12890 = vmatprep.subr.bf16.mxu0 %v21097_v38 }
 0xa94   : > { %12707 = vmatpush3.bf16.msra.mxu1 %v14289_v11 }
 0xa95   : > { %12891 = vmatpush3.bf16.msra.mxu0 %v18228_v22  ;;  %12708 = vmatprep.subr.bf16.mxu1 %v21097_v38 }
 0xa96   : > { %12892 = vmatprep.subr.bf16.mxu0 %v21097_v38 }
 0xa98   : > { %12709 = vmatpush3.bf16.msra.mxu1 %v14290_v54  ;;  %v14292_v54 = vld [vmem:[%s20760_s3 + $0x208] sm:$0xff]  }
 0xa99   : > { %12893 = vmatpush3.bf16.msra.mxu0 %v18236_v45  ;;  %12710 = vmatprep.subr.bf16.mxu1 %v21097_v38 }
 0xa9a   : > { %12894 = vmatprep.subr.bf16.mxu0 %v21097_v38 }
 0xa9c   : > { %12711 = vmatpush3.bf16.msra.mxu1 %v14291_v36  ;;  %v14293_v36 = vld [vmem:[%s20760_s3 + $0x200] sm:$0xff]  }
 0xa9d   : > { %12895 = vmatpush3.bf16.msra.mxu0 %v18244_v21  ;;  %v21191_v21 = vld [vmem:[#allocation18_spill] sm:$0xff]  ;;  %12712 = vmatprep.subr.bf16.mxu1 %v21097_v38 }
 0xa9e   : > { %12920 = vmatprep.subr.bf16.mxu0 %v21097_v38 }
 0xaa0   : > { %12713 = vmatpush3.bf16.msra.mxu1 %v14292_v54  ;;  %12897 = vmatmul.mubr.bf16.vlgmr.msra.gmra.mxu0 %v18510_v39 }
 0xaa1   : > { %12714 = vmatprep.subr.bf16.mxu1 %v21097_v38  ;;  %12921 = vmatpush3.bf16.msra.mxu0 %v18255_v59 }
 0xaa2   : > { %12936 = vmatprep.mubr.msk.bf16.mxu0 %vm14808_vm0, %v21097_v38  ;;  %12922 = vmatprep.subr.bf16.mxu0 %v21097_v38 }
 0xaa4   : > { %12715 = vmatpush3.bf16.msra.mxu1 %v14293_v36 }
 0xaa5   : > { %12740 = vmatprep.subr.bf16.mxu1 %v21097_v38  ;;  %12923 = vmatpush3.bf16.msra.mxu0 %v18270_v37 }
 0xaa6   : > { %12924 = vmatprep.subr.bf16.mxu0 %v21097_v38 }
 0xaa9   : > { %12925 = vmatpush3.bf16.msra.mxu0 %v18279_v32 }
 0xaaa   : > { %12926 = vmatprep.subr.bf16.mxu0 %v21097_v38 }
 0xaad   : > { %12927 = vmatpush3.bf16.msra.mxu0 %v18288_v12 }
 0xaae   : > { %12928 = vmatprep.subr.bf16.mxu0 %v21097_v38 }
 0xab0   : > { %v5307_v42 = vpop.f32.mrf.mxu0 }
 0xab1   : > { %12929 = vmatpush3.bf16.msra.mxu0 %v18297_v13 }
 0xab2   : > { %v12698_v34 = vpop.f32.mrf.mxu0  ;;  %12930 = vmatprep.subr.bf16.mxu0 %v21097_v38 }
 0xab4   : > { %v5310_v11 = vpop.f32.mrf.mxu0 }
 0xab5   : > { %12931 = vmatpush3.bf16.msra.mxu0 %v18306_v30 }
 0xab6   : > { %v12699_v61 = vpop.f32.mrf.mxu0  ;;  %12932 = vmatprep.subr.bf16.mxu0 %v21097_v38 }
 0xab9   : > { %12933 = vmatpush3.bf16.msra.mxu0 %v18315_v24 }
 0xaba   : > { %12934 = vmatprep.subr.bf16.mxu0 %v21097_v38 }
 0xac7   : > { %v4940_v23 = vpop.f32.mrf.mxu1 }
 0xac8   : > { %v18494_v45 = vadd.f32 %v4940_v23, %v21191_v21 }
 0xac9   : > { %v12518_v22 = vpop.f32.mrf.mxu1 }
 0xaca   : > { %21192 = vst [vmem:[#allocation33_spill] sm:$0xff] %v18494_v45 }
 0xacb   : > { %v4943_v17 = vpop.f32.mrf.mxu1 }
 0xacd   : > { %v12519_v16 = vpop.f32.mrf.mxu1 }
 0xae7   : > { %v5021_v21 = vpop.f32.mrf.mxu1 }
 0xae8   : > { %v5022_v19 = vadd.f32 %v5021_v21, %v18261_v26  ;;  %v18517_v26 = vpop.f32.mrf.mxu0  ;;  %v18570_v21 = vld [vmem:[%s20758_s1 + $0x10] sm:$0xff]  }
 0xae9   : > { %v12558_v34 = vpop.f32.mrf.mxu1 }
 0xaea   : > { %v5067_v58 = vadd.f32 %v18380_v14, %v5022_v19  ;;  %v12738_v14 = vpop.f32.mrf.mxu0 }
 0xaeb   : > { %v5024_v22 = vpop.f32.mrf.mxu1  ;;  %v21194_v14 = vld [vmem:[#allocation5_spill] sm:$0xff] }
 0xaed   : > { %v12559_v23 = vpop.f32.mrf.mxu1 }
 0xb07   : > { %v5102_v11 = vpop.f32.mrf.mxu1 }
 0xb08   : > { %v5108_v36 = vadd.f32 %v5102_v11, %v5067_v58  ;;  %v18578_v11 = vld [vmem:[%s20758_s1 + $0x40] sm:$0xff]  }
 0xb09   : > { %v12598_v45 = vpop.f32.mrf.mxu1  ;;  %12935 = vmatpush3.bf16.msra.mxu0 %v18578_v11 }
 0xb0a   : > { %v5149_v4 = vadd.f32 %v18423_v2, %v5108_v36  ;;  %v5462_v2 = vpop.f32.mrf.mxu0  ;;  %12960 = vmatprep.subr.bf16.mxu0 %v21097_v38  ;;  %v18601_v36 = vld [vmem:[%s20758_s1] sm:$0xff]  }
 0xb0b   : > { %v5105_v48 = vpop.f32.mrf.mxu1 }
 0xb0c   : > { %12937 = vmatmul.mubr.bf16.vlgmr.msra.gmra.mxu0 %v18363_v15  ;;  %v21193_v15 = vld [vmem:[#allocation15_spill] sm:$0xff] }
 0xb0d   : > { %v12599_v61 = vpop.f32.mrf.mxu1  ;;  %12976 = vmatprep.mubr.msk.bf16.mxu0 %vm14808_vm0, %v21097_v38 }
 0xb27   : > { %v5184_v17 = vpop.f32.mrf.mxu1 }
 0xb28   : > { %v5190_v63 = vadd.f32 %v5184_v17, %v5149_v4  ;;  %v12739_v4 = vpop.f32.mrf.mxu0  ;;  %v18584_v17 = vld [vmem:[%s20758_s1 + $0x8] sm:$0xff]  }
 0xb29   : > { %v12638_v54 = vpop.f32.mrf.mxu1  ;;  %v14295_v4 = vld [vmem:[%s20760_s3 + $0x270] sm:$0xff]  }
 0xb2a   : > { %v5231_v34 = vadd.f32 %v5225_v60, %v5190_v63  ;;  %v18543_v63 = vld [vmem:[%s20758_s1 + $0x28] sm:$0xff]   ;;  %v18552_v60 = vld [vmem:[%s20758_s1 + $0x20] sm:$0xff]  }
 0xb2b   : > { %v5187_v57 = vpop.f32.mrf.mxu1 }
 0xb2d   : > { %v12639_v16 = vpop.f32.mrf.mxu1 }
 0xb2e   : > { %v18593_v16 = vld [vmem:[%s20758_s1 + $0xb8] sm:$0xff]  }
 0xb2f   : > { %12961 = vmatpush3.bf16.msra.mxu0 %v18593_v16 }
 0xb30   : > { %12962 = vmatprep.subr.bf16.mxu0 %v21097_v38 }
 0xb47   : > { %v5266_v22 = vpop.f32.mrf.mxu1 }
 0xb48   : > { %v5272_v23 = vadd.f32 %v5266_v22, %v5231_v34  ;;  %v18610_v34 = vld [vmem:[%s20758_s1 + $0xb0] sm:$0xff]   ;;  %v18616_v22 = vld [vmem:[%s20758_s1 + $0xf8] sm:$0xff]  }
 0xb49   : > { %v12678_v1 = vpop.f32.mrf.mxu1  ;;  %12963 = vmatpush3.bf16.msra.mxu0 %v18610_v34 }
 0xb4a   : > { %v5313_v45 = vadd.f32 %v5307_v42, %v5272_v23  ;;  %v18534_v1 = vld [vmem:[%s20758_s1 + $0x30] sm:$0xff]   ;;  %v18561_v42 = vld [vmem:[%s20758_s1 + $0x18] sm:$0xff]   ;;  %12964 = vmatprep.subr.bf16.mxu0 %v21097_v38  ;;  %v18626_v23 = vld [vmem:[%s20758_s1 + $0xa8] sm:$0xff]  }
 0xb4b   : > { %v5269_v48 = vpop.f32.mrf.mxu1 }
 0xb4c   : > { %v5314_v61 = vadd.f32 %v17800_v52, %v5313_v45  ;;  %v18523_v52 = vld [vmem:[%s20758_s1 + $0x38] sm:$0xff]   ;;  %v18632_v45 = vld [vmem:[%s20758_s1 + $0xf0] sm:$0xff]   ;;  %v18640_v48 = vld [vmem:[%s20758_s1 + $0xa0] sm:$0xff]  }
 0xb4d   : > { %v12679_v54 = vpop.f32.mrf.mxu1  ;;  %12965 = vmatpush3.bf16.msra.mxu0 %v18626_v23 }
 0xb4e   : > { %vm5315_vm9 = vcmp.ge.f32.partialorder %v5314_v61, 0.0  ;;  %v5316_v57 = vmul.f32 0.2, %v5314_v61  ;;  %12966 = vmatprep.subr.bf16.mxu0 %v21097_v38  ;;  %v18654_v54 = vld [vmem:[%s20758_s1 + $0x98] sm:$0xff]  }
 0xb50   : > { %v5317_v19 = vsel %vm5315_vm9, %v5314_v61, %v5316_v57  ;;  %v18646_v61 = vld [vmem:[%s20758_s1 + $0xe8] sm:$0xff]   ;;  %v18660_v57 = vld [vmem:[%s20758_s1 + $0xe0] sm:$0xff]  }
 0xb51   : > { %v5318_v58 = vpack.c.bf16 %v5317_v19, %v5317_v19  ;;  %12967 = vmatpush3.bf16.msra.mxu0 %v18640_v48  ;;  %v18669_v19 = vld [vmem:[%s20758_s1 + $0xd8] sm:$0xff]  }
 0xb52   : > { %12968 = vmatprep.subr.bf16.mxu0 %v21097_v38 }
 0xb53   : > { %12717 = vmatmul.mubr.bf16.vlgmr.msra.gmra.mxu1 %v5318_v58  ;;  %v18678_v58 = vld [vmem:[%s20758_s1 + $0xd0] sm:$0xff]  }
 0xb54   : > { %12741 = vmatpush3.bf16.msra.mxu1 %v18523_v52  ;;  %12756 = vmatprep.mubr.msk.bf16.mxu1 %vm14808_vm0, %v21097_v38 }
 0xb55   : > { %12742 = vmatprep.subr.bf16.mxu1 %v21097_v38  ;;  %12969 = vmatpush3.bf16.msra.mxu0 %v18654_v54 }
 0xb56   : > { %12970 = vmatprep.subr.bf16.mxu0 %v21097_v38 }
 0xb58   : > { %12743 = vmatpush3.bf16.msra.mxu1 %v18534_v1 }
 0xb59   : > { %12744 = vmatprep.subr.bf16.mxu1 %v21097_v38  ;;  %12971 = vmatpush3.bf16.msra.mxu0 %v17872_v56  ;;  %v18687_v56 = vld [vmem:[%s20758_s1 + $0xc8] sm:$0xff]  }
 0xb5a   : > { %12972 = vmatprep.subr.bf16.mxu0 %v21097_v38 }
 0xb5c   : > { %12745 = vmatpush3.bf16.msra.mxu1 %v18543_v63 }
 0xb5d   : > { %12746 = vmatprep.subr.bf16.mxu1 %v21097_v38  ;;  %12973 = vmatpush3.bf16.msra.mxu0 %v17881_v9  ;;  %v18693_v9 = vld [vmem:[%s15034_s14 + $0x40] sm:$0xf] }
 0xb5e   : > { %12974 = vmatprep.subr.bf16.mxu0 %v21097_v38 }
 0xb60   : > { %12747 = vmatpush3.bf16.msra.mxu1 %v18552_v60 }
 0xb61   : > { %12748 = vmatprep.subr.bf16.mxu1 %v21097_v38  ;;  %12975 = vmatpush3.bf16.msra.mxu0 %v17890_v55  ;;  %v18702_v55 = vld [vmem:[%s20758_s1 + $0xc0] sm:$0xff]  }
 0xb62   : > { %13000 = vmatprep.subr.bf16.mxu0 %v21097_v38 }
 0xb64   : > { %12749 = vmatpush3.bf16.msra.mxu1 %v18561_v42  ;;  %12977 = vmatmul.mubr.bf16.vlgmr.msra.gmra.mxu0 %v18693_v9 }
 0xb65   : > { %12750 = vmatprep.subr.bf16.mxu1 %v21097_v38  ;;  %13001 = vmatpush3.bf16.msra.mxu0 %v17903_v51  ;;  %v18718_v51 = vpop.f32.mrf.mxu0 }
 0xb66   : > { %13016 = vmatprep.mubr.msk.bf16.mxu0 %vm14808_vm0, %v21097_v38  ;;  %13002 = vmatprep.subr.bf16.mxu0 %v21097_v38 }
 0xb68   : > { %12751 = vmatpush3.bf16.msra.mxu1 %v18570_v21 }
 0xb69   : > { %12752 = vmatprep.subr.bf16.mxu1 %v21097_v38  ;;  %13003 = vmatpush3.bf16.msra.mxu0 %v17915_v5  ;;  %v12778_v5 = vpop.f32.mrf.mxu0 }
 0xb6a   : > { %13004 = vmatprep.subr.bf16.mxu0 %v21097_v38  ;;  %v14298_v5 = vld [vmem:[%s20760_s3 + $0x258] sm:$0xff]  }
 0xb6c   : > { %12753 = vmatpush3.bf16.msra.mxu1 %v18584_v17 }
 0xb6d   : > { %12754 = vmatprep.subr.bf16.mxu1 %v21097_v38  ;;  %13005 = vmatpush3.bf16.msra.mxu0 %v17931_v10  ;;  %v18741_v10 = vld [vmem:[%s15034_s14 + $0x54] sm:$0xf] }
 0xb6e   : > { %13006 = vmatprep.subr.bf16.mxu0 %v21097_v38 }
 0xb70   : > { %12755 = vmatpush3.bf16.msra.mxu1 %v18601_v36 }
 0xb71   : > { %12780 = vmatprep.subr.bf16.mxu1 %v21097_v38  ;;  %13007 = vmatpush3.bf16.msra.mxu0 %v17947_v47 }
 0xb72   : > { %13008 = vmatprep.subr.bf16.mxu0 %v21097_v38 }
 0xb73   : > { %12757 = vmatmul.mubr.bf16.vlgmr.msra.gmra.mxu1 %v21193_v15  ;;  %v14296_v15 = vld [vmem:[%s20760_s3 + $0x268] sm:$0xff]  }
 0xb74   : > { %12781 = vmatpush3.bf16.msra.mxu1 %v18616_v22  ;;  %12796 = vmatprep.mubr.msk.bf16.mxu1 %vm14808_vm0, %v21097_v38 }
 0xb75   : > { %12782 = vmatprep.subr.bf16.mxu1 %v21097_v38  ;;  %13009 = vmatpush3.bf16.msra.mxu0 %v17961_v40 }
 0xb76   : > { %13010 = vmatprep.subr.bf16.mxu0 %v21097_v38 }
 0xb78   : > { %12783 = vmatpush3.bf16.msra.mxu1 %v18632_v45 }
 0xb79   : > { %12784 = vmatprep.subr.bf16.mxu1 %v21097_v38  ;;  %13011 = vmatpush3.bf16.msra.mxu0 %v17975_v33  ;;  %v21196_v33 = vld [vmem:[#allocation24_spill] sm:$0xff] }
 0xb7a   : > { %13012 = vmatprep.subr.bf16.mxu0 %v21097_v38 }
 0xb7c   : > { %12785 = vmatpush3.bf16.msra.mxu1 %v18646_v61 }
 0xb7d   : > { %12786 = vmatprep.subr.bf16.mxu1 %v21097_v38  ;;  %13013 = vmatpush3.bf16.msra.mxu0 %v17989_v43  ;;  %v21198_v43 = vld [vmem:[#allocation35_spill] sm:$0xff] }
 0xb7e   : > { %13014 = vmatprep.subr.bf16.mxu0 %v21097_v38 }
 0xb80   : > { %12787 = vmatpush3.bf16.msra.mxu1 %v18660_v57 }
 0xb81   : > { %12788 = vmatprep.subr.bf16.mxu1 %v21097_v38  ;;  %13015 = vmatpush3.bf16.msra.mxu0 %v18003_v0  ;;  %v21200_v0 = vld [vmem:[#allocation23_spill] sm:$0xff] }
 0xb82   : > { %13040 = vmatprep.subr.bf16.mxu0 %v21097_v38 }
 0xb84   : > { %12789 = vmatpush3.bf16.msra.mxu1 %v18669_v19  ;;  %13017 = vmatmul.mubr.bf16.vlgmr.msra.gmra.mxu0 %v18741_v10 }
 0xb85   : > { %12790 = vmatprep.subr.bf16.mxu1 %v21097_v38  ;;  %13041 = vmatpush3.bf16.msra.mxu0 %v18021_v7  ;;  %v21202_v7 = vld [vmem:[#allocation26_spill] sm:$0xff] }
 0xb86   : > { %13056 = vmatprep.mubr.msk.bf16.mxu0 %vm14808_vm0, %v21097_v38  ;;  %13042 = vmatprep.subr.bf16.mxu0 %v21097_v38 }
 0xb88   : > { %12791 = vmatpush3.bf16.msra.mxu1 %v18678_v58 }
 0xb89   : > { %12792 = vmatprep.subr.bf16.mxu1 %v21097_v38  ;;  %13043 = vmatpush3.bf16.msra.mxu0 %v21177_v28 }
 0xb8a   : > { %13044 = vmatprep.subr.bf16.mxu0 %v21097_v38 }
 0xb8c   : > { %12793 = vmatpush3.bf16.msra.mxu1 %v18687_v56 }
 0xb8d   : > { %12794 = vmatprep.subr.bf16.mxu1 %v21097_v38  ;;  %13045 = vmatpush3.bf16.msra.mxu0 %v21179_v53 }
 0xb8e   : > { %13046 = vmatprep.subr.bf16.mxu0 %v21097_v38 }
 0xb90   : > { %12795 = vmatpush3.bf16.msra.mxu1 %v18702_v55 }
 0xb91   : > { %12820 = vmatprep.subr.bf16.mxu1 %v21097_v38  ;;  %13047 = vmatpush3.bf16.msra.mxu0 %v21181_v49  ;;  %v21205_v49 = vld [vmem:[#allocation28_spill] sm:$0xff] }
 0xb92   : > { %13048 = vmatprep.subr.bf16.mxu0 %v21097_v38 }
 0xb93   : > { %12797 = vmatmul.mubr.bf16.vlgmr.msra.gmra.mxu1 %v21194_v14  ;;  %v14297_v14 = vld [vmem:[%s20760_s3 + $0x260] sm:$0xff]  }
 0xb94   : > { %12821 = vmatpush3.bf16.msra.mxu1 %v17921_v6  ;;  %12836 = vmatprep.mubr.msk.bf16.mxu1 %vm14808_vm0, %v21097_v38  ;;  %v5542_v6 = vpop.f32.mrf.mxu0 }
 0xb95   : > { %12822 = vmatprep.subr.bf16.mxu1 %v21097_v38  ;;  %13049 = vmatpush3.bf16.msra.mxu0 %v21183_v62  ;;  %v21207_v62 = vld [vmem:[#allocation29_spill] sm:$0xff] }
 0xb96   : > { %v12779_v2 = vpop.f32.mrf.mxu0  ;;  %13050 = vmatprep.subr.bf16.mxu0 %v21097_v38 }
 0xb98   : > { %12823 = vmatpush3.bf16.msra.mxu1 %v17937_v18  ;;  %v18761_v18 = vpop.f32.mrf.mxu0 }
 0xb99   : > { %12824 = vmatprep.subr.bf16.mxu1 %v21097_v38  ;;  %13051 = vmatpush3.bf16.msra.mxu0 %v21185_v27  ;;  %v14294_v27 = vld [vmem:[%s20760_s3 + $0x278] sm:$0xff]  }
 0xb9a   : > { %v12818_v47 = vpop.f32.mrf.mxu0  ;;  %13052 = vmatprep.subr.bf16.mxu0 %v21097_v38 }
 0xb9b   : > { %v14299_v47 = vld [vmem:[%s20760_s3 + $0x250] sm:$0xff]  }
 0xb9c   : > { %12825 = vmatpush3.bf16.msra.mxu1 %v17953_v41  ;;  %v5624_v41 = vpop.f32.mrf.mxu0 }
 0xb9d   : > { %12826 = vmatprep.subr.bf16.mxu1 %v21097_v38 }
 0xb9e   : > { %v12819_v40 = vpop.f32.mrf.mxu0 }
 0xba0   : > { %12827 = vmatpush3.bf16.msra.mxu1 %v17967_v35  ;;  %v21195_v35 = vld [vmem:[#allocation21_spill] sm:$0xff] }
 0xba1   : > { %12828 = vmatprep.subr.bf16.mxu1 %v21097_v38  ;;  %13053 = vmatpush3.bf16.msra.mxu0 %v21195_v35  ;;  %v21209_v35 = vld [vmem:[#allocation33_spill] sm:$0xff] }
 0xba2   : > { %13054 = vmatprep.subr.bf16.mxu0 %v21097_v38 }
 0xba4   : > { %12829 = vmatpush3.bf16.msra.mxu1 %v17981_v44  ;;  %v21197_v44 = vld [vmem:[#allocation11_spill] sm:$0xff] }
 0xba5   : > { %12830 = vmatprep.subr.bf16.mxu1 %v21097_v38  ;;  %13055 = vmatpush3.bf16.msra.mxu0 %v21197_v44 }
 0xba6   : > { %13080 = vmatprep.subr.bf16.mxu0 %v21097_v38 }
 0xba8   : > { %12831 = vmatpush3.bf16.msra.mxu1 %v17995_v29  ;;  %v21199_v29 = vld [vmem:[#allocation31_spill] sm:$0xff] }
 0xba9   : > { %12832 = vmatprep.subr.bf16.mxu1 %v21097_v38  ;;  %13057 = vmatmul.mubr.bf16.vlgmr.msra.gmra.mxu0 %v21199_v29 }
 0xbaa   : > { %13081 = vmatpush3.bf16.msra.mxu0 %v21200_v0  ;;  %13096 = vmatprep.mubr.msk.bf16.mxu0 %vm14808_vm0, %v21097_v38 }
 0xbab   : > { %13082 = vmatprep.subr.bf16.mxu0 %v21097_v38 }
 0xbac   : > { %12833 = vmatpush3.bf16.msra.mxu1 %v18009_v20  ;;  %v21201_v20 = vld [vmem:[#allocation13_spill] sm:$0xff] }
 0xbad   : > { %12834 = vmatprep.subr.bf16.mxu1 %v21097_v38 }
 0xbae   : > { %13083 = vmatpush3.bf16.msra.mxu0 %v21202_v7  ;;  %v14301_v7 = vld [vmem:[%s20760_s3 + $0x240] sm:$0xff]  }
 0xbaf   : > { %13084 = vmatprep.subr.bf16.mxu0 %v21097_v38 }
 0xbb0   : > { %12835 = vmatpush3.bf16.msra.mxu1 %v18029_v8  ;;  %v21203_v8 = vld [vmem:[#allocation25_spill] sm:$0xff] }
 0xbb1   : > { %12860 = vmatprep.subr.bf16.mxu1 %v21097_v38 }
 0xbb2   : > { %13085 = vmatpush3.bf16.msra.mxu0 %v21203_v8 }
 0xbb3   : > { %12837 = vmatmul.mubr.bf16.vlgmr.msra.gmra.mxu1 %v18741_v10  ;;  %13086 = vmatprep.subr.bf16.mxu0 %v21097_v38 }
 0xbb4   : > { %12861 = vmatpush3.bf16.msra.mxu1 %v21176_v31  ;;  %12876 = vmatprep.mubr.msk.bf16.mxu1 %vm14808_vm0, %v21097_v38  ;;  %v18797_v31 = vpop.f32.mrf.mxu0 }
 0xbb5   : > { %12862 = vmatprep.subr.bf16.mxu1 %v21097_v38 }
 0xbb6   : > { %v12858_v28 = vpop.f32.mrf.mxu0 }
 0xbb8   : > { %12863 = vmatpush3.bf16.msra.mxu1 %v21178_v3  ;;  %v21204_v3 = vld [vmem:[#allocation36_spill] sm:$0xff]  ;;  %v5706_v53 = vpop.f32.mrf.mxu0 }
 0xbb9   : > { %12864 = vmatprep.subr.bf16.mxu1 %v21097_v38  ;;  %13087 = vmatpush3.bf16.msra.mxu0 %v21204_v3 }
 0xbba   : > { %13088 = vmatprep.subr.bf16.mxu0 %v21097_v38 }
 0xbbc   : > { %12865 = vmatpush3.bf16.msra.mxu1 %v21180_v50  ;;  %v12859_v50 = vpop.f32.mrf.mxu0 }
 0xbbd   : > { %12866 = vmatprep.subr.bf16.mxu1 %v21097_v38  ;;  %13089 = vmatpush3.bf16.msra.mxu0 %v21205_v49 }
 0xbbe   : > { %13090 = vmatprep.subr.bf16.mxu0 %v21097_v38  ;;  %v5785_v6 = vpop.f32.mrf.mxu0 }
 0xbc0   : > { %12867 = vmatpush3.bf16.msra.mxu1 %v21182_v25  ;;  %v21206_v25 = vld [vmem:[#allocation27_spill] sm:$0xff]  ;;  %v12898_v2 = vpop.f32.mrf.mxu0 }
 0xbc1   : > { %12868 = vmatprep.subr.bf16.mxu1 %v21097_v38  ;;  %13091 = vmatpush3.bf16.msra.mxu0 %v21206_v25 }
 0xbc2   : > { %13092 = vmatprep.subr.bf16.mxu0 %v21097_v38  ;;  %v5788_v41 = vpop.f32.mrf.mxu0 }
 0xbc4   : > { %12869 = vmatpush3.bf16.msra.mxu1 %v21184_v46  ;;  %v21208_v46 = vld [vmem:[#allocation30_spill] sm:$0xff]  ;;  %v12899_v44 = vpop.f32.mrf.mxu0 }
 0xbc5   : > { %12870 = vmatprep.subr.bf16.mxu1 %v21097_v38  ;;  %13093 = vmatpush3.bf16.msra.mxu0 %v21207_v62 }
 0xbc6   : > { %13094 = vmatprep.subr.bf16.mxu0 %v21097_v38 }
 0xbc8   : > { %12871 = vmatpush3.bf16.msra.mxu1 %v21196_v33 }
 0xbc9   : > { %12872 = vmatprep.subr.bf16.mxu1 %v21097_v38  ;;  %13095 = vmatpush3.bf16.msra.mxu0 %v21208_v46 }
 0xbca   : > { %13120 = vmatprep.subr.bf16.mxu0 %v21097_v38 }
 0xbcc   : > { %12873 = vmatpush3.bf16.msra.mxu1 %v21198_v43 }
 0xbcd   : > { %12874 = vmatprep.subr.bf16.mxu1 %v21097_v38 }
 0xbd0   : > { %12875 = vmatpush3.bf16.msra.mxu1 %v21201_v20 }
 0xbd1   : > { %12900 = vmatprep.subr.bf16.mxu1 %v21097_v38 }
 0xbd3   : > { %12877 = vmatmul.mubr.bf16.vlgmr.msra.gmra.mxu1 %v21199_v29  ;;  %v14300_v29 = vld [vmem:[%s20760_s3 + $0x248] sm:$0xff]  }
 0xbd4   : > { %12916 = vmatprep.mubr.msk.bf16.mxu1 %vm14808_vm0, %v21097_v38  ;;  %12901 = vmatpush3.bf16.msra.mxu1 %v14294_v27 }
 0xbd5   : > { %12902 = vmatprep.subr.bf16.mxu1 %v21097_v38 }
 0xbd8   : > { %12903 = vmatpush3.bf16.msra.mxu1 %v14295_v4 }
 0xbd9   : > { %12904 = vmatprep.subr.bf16.mxu1 %v21097_v38 }
 0xbdc   : > { %12905 = vmatpush3.bf16.msra.mxu1 %v14296_v15 }
 0xbdd   : > { %12906 = vmatprep.subr.bf16.mxu1 %v21097_v38 }
 0xbe0   : > { %12907 = vmatpush3.bf16.msra.mxu1 %v14297_v14 }
 0xbe1   : > { %12908 = vmatprep.subr.bf16.mxu1 %v21097_v38 }
 0xbe4   : > { %12909 = vmatpush3.bf16.msra.mxu1 %v14298_v5 }
 0xbe5   : > { %12910 = vmatprep.subr.bf16.mxu1 %v21097_v38 }
 0xbe8   : > { %12911 = vmatpush3.bf16.msra.mxu1 %v14299_v47 }
 0xbe9   : > { %12912 = vmatprep.subr.bf16.mxu1 %v21097_v38 }
 0xbec   : > { %12913 = vmatpush3.bf16.msra.mxu1 %v14300_v29 }
 0xbed   : > { %12914 = vmatprep.subr.bf16.mxu1 %v21097_v38 }
 0xbf0   : > { %12915 = vmatpush3.bf16.msra.mxu1 %v14301_v7 }
 0xbf1   : > { %12940 = vmatprep.subr.bf16.mxu1 %v21097_v38 }
 0xc13   : > { %v5418_v40 = vpop.f32.mrf.mxu1 }
 0xc14   : > { %v18833_v33 = vadd.f32 %v5418_v40, %v21209_v35 }
 0xc15   : > { %v12718_v43 = vpop.f32.mrf.mxu1 }
 0xc17   : > { %v5421_v0 = vpop.f32.mrf.mxu1 }
 0xc19   : > { %v12719_v20 = vpop.f32.mrf.mxu1 }
 0xc1a   : > { %v18851_v20 = vld [vmem:[%s20759_s2] ss:$0 sm:$0xff] }
 0xc33   : > { %v5499_v8 = vpop.f32.mrf.mxu1 }
 0xc34   : > { %v5500_v14 = vadd.f32 %v5499_v8, %v18517_v26  ;;  %v18862_v8 = vpop.f32.mrf.mxu0 }
 0xc35   : > { %v12758_v28 = vpop.f32.mrf.mxu1 }
 0xc36   : > { %v5545_v5 = vadd.f32 %v18718_v51, %v5500_v14  ;;  %v18855_v51 = vld [vmem:[%s15034_s14 + $0x70] sm:$0xf] }
 0xc37   : > { %v5502_v3 = vpop.f32.mrf.mxu1  ;;  %21210 = vst [vmem:[#allocation34_spill] sm:$0xff] %v18855_v51  ;;  %13097 = vmatmul.mubr.bf16.vlgmr.msra.gmra.mxu0 %v18855_v51  ;;  %v19176_v51 = vld [vmem:[%s20758_s1 + $0x1c8] sm:$0xff]  }
 0xc38   : > { %13121 = vmatpush3.bf16.msra.mxu0 %v18255_v59  ;;  %13136 = vmatprep.mubr.msk.bf16.mxu0 %vm14808_vm0, %v21097_v38  ;;  %v12938_v59 = vpop.f32.mrf.mxu0  ;;  %v21211_v3 = vld [vmem:[#allocation32_spill] sm:$0xff]  ;;  %21229 = vst [vmem:[#allocation24_spill] sm:$0xff] %v19176_v51 }
 0xc39   : > { %v12759_v53 = vpop.f32.mrf.mxu1  ;;  %13122 = vmatprep.subr.bf16.mxu0 %v21097_v38 }
 0xc3a   : > { %v5940_v28 = vpop.f32.mrf.mxu0  ;;  %v18963_v53 = vld [vmem:[%s20758_s1 + $0x130] sm:$0xff]  }
 0xc3c   : > { %13123 = vmatpush3.bf16.msra.mxu0 %v18270_v37  ;;  %v12939_v37 = vpop.f32.mrf.mxu0 }
 0xc3d   : > { %13124 = vmatprep.subr.bf16.mxu0 %v21097_v38  ;;  %v19114_v37 = vld [vmem:[%s20758_s1 + $0x1a0] sm:$0xff]  }
 0xc3e   : > { %21220 = vst [vmem:[#allocation7_spill] sm:$0xff] %v19114_v37 }
 0xc40   : > { %13125 = vmatpush3.bf16.msra.mxu0 %v18279_v32  ;;  %v14624_v32 = vld [vmem:[%s15034_s14 + $0x38] sm:$0xf] }
 0xc41   : > { %13126 = vmatprep.subr.bf16.mxu0 %v21097_v38 }
 0xc44   : > { %13127 = vmatpush3.bf16.msra.mxu0 %v18288_v12  ;;  %v18923_v12 = vld [vmem:[%s20758_s1 + $0x90] sm:$0xff]  }
 0xc45   : > { %13128 = vmatprep.subr.bf16.mxu0 %v21097_v38 }
 0xc48   : > { %13129 = vmatpush3.bf16.msra.mxu0 %v18297_v13  ;;  %v18932_v13 = vld [vmem:[%s20758_s1 + $0x88] sm:$0xff]  }
 0xc49   : > { %13130 = vmatprep.subr.bf16.mxu0 %v21097_v38 }
 0xc4c   : > { %13131 = vmatpush3.bf16.msra.mxu0 %v18306_v30  ;;  %v18941_v30 = vld [vmem:[%s20758_s1 + $0x80] sm:$0xff]  }
 0xc4d   : > { %13132 = vmatprep.subr.bf16.mxu0 %v21097_v38 }
 0xc50   : > { %13133 = vmatpush3.bf16.msra.mxu0 %v18315_v24  ;;  %v14628_v24 = vld [vmem:[%s15034_s14 + $0x44] sm:$0xf] }
 0xc51   : > { %13134 = vmatprep.subr.bf16.mxu0 %v21097_v38 }
 0xc53   : > { %v5580_v50 = vpop.f32.mrf.mxu1 }
 0xc54   : > { %v5586_v2 = vadd.f32 %v5580_v50, %v5545_v5  ;;  %13135 = vmatpush3.bf16.msra.mxu0 %v18578_v11  ;;  %v18969_v50 = vld [vmem:[%s20758_s1 + $0x178] sm:$0xff]  }
 0xc55   : > { %v12798_v49 = vpop.f32.mrf.mxu1  ;;  %13160 = vmatprep.subr.bf16.mxu0 %v21097_v38  ;;  %v19009_v5 = vld [vmem:[%s20758_s1 + $0x118] sm:$0xff]  }
 0xc56   : > { %v5627_v47 = vadd.f32 %v18761_v18, %v5586_v2  ;;  %v18979_v49 = vld [vmem:[%s20758_s1 + $0x128] sm:$0xff]   ;;  %v19015_v2 = vld [vmem:[%s20758_s1 + $0x160] sm:$0xff]  }
 0xc57   : > { %v5583_v25 = vpop.f32.mrf.mxu1  ;;  %13137 = vmatmul.mubr.bf16.vlgmr.msra.gmra.mxu0 %v18693_v9  ;;  %v18951_v9 = vld [vmem:[%s20758_s1 + $0x138] sm:$0xff]  }
 0xc58   : > { %13161 = vmatpush3.bf16.msra.mxu0 %v18593_v16  ;;  %13176 = vmatprep.mubr.msk.bf16.mxu0 %vm14808_vm0, %v21097_v38  ;;  %v18985_v25 = vld [vmem:[%s20758_s1 + $0x170] sm:$0xff]  }
 0xc59   : > { %v12799_v62 = vpop.f32.mrf.mxu1  ;;  %13162 = vmatprep.subr.bf16.mxu0 %v21097_v38 }
 0xc5a   : > { %v18990_v62 = vpop.f32.mrf.mxu0 }
 0xc5c   : > { %13163 = vmatpush3.bf16.msra.mxu0 %v18610_v34 }
 0xc5d   : > { %13164 = vmatprep.subr.bf16.mxu0 %v21097_v38 }
 0xc60   : > { %13165 = vmatpush3.bf16.msra.mxu0 %v18626_v23 }
 0xc61   : > { %13166 = vmatprep.subr.bf16.mxu0 %v21097_v38 }
 0xc64   : > { %13167 = vmatpush3.bf16.msra.mxu0 %v18640_v48 }
 0xc65   : > { %13168 = vmatprep.subr.bf16.mxu0 %v21097_v38 }
 0xc68   : > { %13169 = vmatpush3.bf16.msra.mxu0 %v18654_v54 }
 0xc69   : > { %13170 = vmatprep.subr.bf16.mxu0 %v21097_v38 }
 0xc6c   : > { %13171 = vmatpush3.bf16.msra.mxu0 %v18923_v12 }
 0xc6d   : > { %13172 = vmatprep.subr.bf16.mxu0 %v21097_v38 }
 0xc70   : > { %13173 = vmatpush3.bf16.msra.mxu0 %v18932_v13 }
 0xc71   : > { %13174 = vmatprep.subr.bf16.mxu0 %v21097_v38 }
 0xc73   : > { %v5662_v46 = vpop.f32.mrf.mxu1 }
 0xc74   : > { %v5668_v41 = vadd.f32 %v5662_v46, %v5627_v47  ;;  %13175 = vmatpush3.bf16.msra.mxu0 %v18941_v30  ;;  %v12978_v46 = vpop.f32.mrf.mxu0  ;;  %v19023_v47 = vld [vmem:[%s20758_s1 + $0x110] sm:$0xff]  }
 0xc75   : > { %v12838_v27 = vpop.f32.mrf.mxu1  ;;  %13200 = vmatprep.subr.bf16.mxu0 %v21097_v38  ;;  %v19128_v46 = vld [vmem:[%s20758_s1 + $0x198] sm:$0xff]  }
 0xc76   : > { %v5709_v40 = vadd.f32 %v18797_v31, %v5668_v41  ;;  %v18995_v27 = vld [vmem:[%s20758_s1 + $0x120] sm:$0xff]   ;;  %v19029_v41 = vld [vmem:[%s20758_s1 + $0x158] sm:$0xff]   ;;  %21222 = vst [vmem:[#allocation9_spill] sm:$0xff] %v19128_v46 }
 0xc77   : > { %v5665_v4 = vpop.f32.mrf.mxu1  ;;  %13177 = vmatmul.mubr.bf16.vlgmr.msra.gmra.mxu0 %v14628_v24 }
 0xc78   : > { %13201 = vmatpush3.bf16.msra.mxu0 %v18951_v9  ;;  %13216 = vmatprep.mubr.msk.bf16.mxu0 %vm14808_vm0, %v21097_v38  ;;  %v19001_v4 = vld [vmem:[%s20758_s1 + $0x168] sm:$0xff]  }
 0xc79   : > { %v12839_v15 = vpop.f32.mrf.mxu1  ;;  %13202 = vmatprep.subr.bf16.mxu0 %v21097_v38 }
 0xc7a   : > { %v6020_v15 = vpop.f32.mrf.mxu0 }
 0xc7b   : > { %v19134_v15 = vld [vmem:[%s20758_s1 + $0x1e0] sm:$0xff]  }
 0xc7c   : > { %13203 = vmatpush3.bf16.msra.mxu0 %v18963_v53  ;;  %v12979_v14 = vpop.f32.mrf.mxu0  ;;  %21223 = vst [vmem:[#allocation22_spill] sm:$0xff] %v19134_v15 }
 0xc7d   : > { %13204 = vmatprep.subr.bf16.mxu0 %v21097_v38  ;;  %v19142_v14 = vld [vmem:[%s20758_s1 + $0x190] sm:$0xff]  }
 0xc7e   : > { %v19109_v59 = vpop.f32.mrf.mxu0  ;;  %21224 = vst [vmem:[#allocation19_spill] sm:$0xff] %v19142_v14 }
 0xc80   : > { %13205 = vmatpush3.bf16.msra.mxu0 %v18979_v49  ;;  %v13018_v28 = vpop.f32.mrf.mxu0 }
 0xc81   : > { %13206 = vmatprep.subr.bf16.mxu0 %v21097_v38  ;;  %v19156_v28 = vld [vmem:[%s20758_s1 + $0x188] sm:$0xff]  }
 0xc82   : > { %v6102_v24 = vpop.f32.mrf.mxu0  ;;  %21226 = vst [vmem:[#allocation15_spill] sm:$0xff] %v19156_v28 }
 0xc83   : > { %v19162_v24 = vld [vmem:[%s20758_s1 + $0x1d0] sm:$0xff]  }
 0xc84   : > { %13207 = vmatpush3.bf16.msra.mxu0 %v18995_v27  ;;  %21227 = vst [vmem:[#allocation5_spill] sm:$0xff] %v19162_v24 }
 0xc85   : > { %13208 = vmatprep.subr.bf16.mxu0 %v21097_v38 }
 0xc88   : > { %13209 = vmatpush3.bf16.msra.mxu0 %v19009_v5 }
 0xc89   : > { %13210 = vmatprep.subr.bf16.mxu0 %v21097_v38 }
 0xc8c   : > { %13211 = vmatpush3.bf16.msra.mxu0 %v19023_v47 }
 0xc8d   : > { %13212 = vmatprep.subr.bf16.mxu0 %v21097_v38 }
 0xc93   : > { %v5744_v35 = vpop.f32.mrf.mxu1 }
 0xc94   : > { %v5750_v44 = vadd.f32 %v5744_v35, %v5709_v40  ;;  %v19037_v40 = vld [vmem:[%s20758_s1 + $0x108] sm:$0xff]   ;;  %v19043_v35 = vld [vmem:[%s20758_s1 + $0x150] sm:$0xff]  }
 0xc95   : > { %v12878_v43 = vpop.f32.mrf.mxu1  ;;  %13213 = vmatpush3.bf16.msra.mxu0 %v19037_v40 }
 0xc96   : > { %v5791_v29 = vadd.f32 %v5785_v6, %v5750_v44  ;;  %13214 = vmatprep.subr.bf16.mxu0 %v21097_v38  ;;  %v19051_v44 = vld [vmem:[%s20758_s1 + $0x100] sm:$0xff]   ;;  %v19057_v43 = vld [vmem:[%s20758_s1 + $0x148] sm:$0xff]  }
 0xc97   : > { %v5747_v0 = vpop.f32.mrf.mxu1  ;;  %21212 = vst [vmem:[#allocation14_spill] sm:$0xff] %v19051_v44  ;;  %21213 = vst [vmem:[#allocation16_spill] sm:$0xff] %v19057_v43 }
 0xc98   : > { %v5792_v26 = vadd.f32 %v18851_v20, %v5791_v29  ;;  %v14644_v29 = vld [vmem:[%s15034_s14 + $0x58] sm:$0xf] }
 0xc99   : > { %v12879_v7 = vpop.f32.mrf.mxu1  ;;  %13215 = vmatpush3.bf16.msra.mxu0 %v19051_v44  ;;  %v19066_v0 = vld [vmem:[%s20758_s1 + $0x1b8] sm:$0xff]  }
 0xc9a   : > { %vm5793_vm10 = vcmp.ge.f32.partialorder %v5792_v26, 0.0  ;;  %v5794_v18 = vmul.f32 0.2, %v5792_v26  ;;  %13240 = vmatprep.subr.bf16.mxu0 %v21097_v38  ;;  %21214 = vst [vmem:[#allocation12_spill] sm:$0xff] %v19066_v0  ;;  %v19082_v7 = vld [vmem:[%s20758_s1 + $0x1b0] sm:$0xff]  }
 0xc9b   : > { %21216 = vst [vmem:[#allocation17_spill] sm:$0xff] %v19082_v7 }
 0xc9c   : > { %v5795_v31 = vsel %vm5793_vm10, %v5792_v26, %v5794_v18  ;;  %13217 = vmatmul.mubr.bf16.vlgmr.msra.gmra.mxu0 %v14644_v29  ;;  %v19074_v26 = vld [vmem:[%s20758_s1 + $0x140] sm:$0xff]   ;;  %v19088_v18 = vld [vmem:[%s20758_s1 + $0x1f8] sm:$0xff]  }
 0xc9d   : > { %v5796_v6 = vpack.c.bf16 %v5795_v31, %v5795_v31  ;;  %13241 = vmatpush3.bf16.msra.mxu0 %v19066_v0  ;;  %13256 = vmatprep.mubr.msk.bf16.mxu0 %vm14808_vm0, %v21097_v38  ;;  %21215 = vst [vmem:[#allocation4_spill] sm:$0xff] %v19074_v26  ;;  %21217 = vst [vmem:[#allocation8_spill] sm:$0xff] %v19088_v18  ;;  %v19098_v31 = vld [vmem:[%s20758_s1 + $0x1a8] sm:$0xff]  }
 0xc9e   : > { %13242 = vmatprep.subr.bf16.mxu0 %v21097_v38  ;;  %21218 = vst [vmem:[#allocation6_spill] sm:$0xff] %v19098_v31 }
 0xc9f   : > { %12917 = vmatmul.mubr.bf16.vlgmr.msra.gmra.mxu1 %v5796_v6  ;;  %v19104_v6 = vld [vmem:[%s20758_s1 + $0x1f0] sm:$0xff]  }
 0xca0   : > { %12941 = vmatpush3.bf16.msra.mxu1 %v18523_v52  ;;  %12956 = vmatprep.mubr.msk.bf16.mxu1 %vm14808_vm0, %v21097_v38  ;;  %21219 = vst [vmem:[#allocation10_spill] sm:$0xff] %v19104_v6 }
 0xca1   : > { %12942 = vmatprep.subr.bf16.mxu1 %v21097_v38  ;;  %13243 = vmatpush3.bf16.msra.mxu0 %v19082_v7 }
 0xca2   : > { %13244 = vmatprep.subr.bf16.mxu0 %v21097_v38 }
 0xca4   : > { %12943 = vmatpush3.bf16.msra.mxu1 %v18534_v1 }
 0xca5   : > { %12944 = vmatprep.subr.bf16.mxu1 %v21097_v38  ;;  %13245 = vmatpush3.bf16.msra.mxu0 %v19098_v31 }
 0xca6   : > { %13246 = vmatprep.subr.bf16.mxu0 %v21097_v38 }
 0xca8   : > { %12945 = vmatpush3.bf16.msra.mxu1 %v18543_v63 }
 0xca9   : > { %12946 = vmatprep.subr.bf16.mxu1 %v21097_v38  ;;  %13247 = vmatpush3.bf16.msra.mxu0 %v19114_v37 }
 0xcaa   : > { %13248 = vmatprep.subr.bf16.mxu0 %v21097_v38 }
 0xcac   : > { %12947 = vmatpush3.bf16.msra.mxu1 %v18552_v60 }
 0xcad   : > { %12948 = vmatprep.subr.bf16.mxu1 %v21097_v38  ;;  %13249 = vmatpush3.bf16.msra.mxu0 %v19128_v46 }
 0xcae   : > { %13250 = vmatprep.subr.bf16.mxu0 %v21097_v38 }
 0xcb0   : > { %12949 = vmatpush3.bf16.msra.mxu1 %v18561_v42 }
 0xcb1   : > { %12950 = vmatprep.subr.bf16.mxu1 %v21097_v38  ;;  %13251 = vmatpush3.bf16.msra.mxu0 %v19142_v14 }
 0xcb2   : > { %13252 = vmatprep.subr.bf16.mxu0 %v21097_v38 }
 0xcb4   : > { %12951 = vmatpush3.bf16.msra.mxu1 %v18570_v21 }
 0xcb5   : > { %12952 = vmatprep.subr.bf16.mxu1 %v21097_v38  ;;  %13253 = vmatpush3.bf16.msra.mxu0 %v19156_v28 }
 0xcb6   : > { %13254 = vmatprep.subr.bf16.mxu0 %v21097_v38 }
 0xcb8   : > { %12953 = vmatpush3.bf16.msra.mxu1 %v18584_v17 }
 0xcb9   : > { %12954 = vmatprep.subr.bf16.mxu1 %v21097_v38 }
 0xcbc   : > { %12955 = vmatpush3.bf16.msra.mxu1 %v18601_v36 }
 0xcbd   : > { %12980 = vmatprep.subr.bf16.mxu1 %v21097_v38 }
 0xcbf   : > { %12957 = vmatmul.mubr.bf16.vlgmr.msra.gmra.mxu1 %v14624_v32  ;;  %v19120_v32 = vld [vmem:[%s20758_s1 + $0x1e8] sm:$0xff]  }
 0xcc0   : > { %12981 = vmatpush3.bf16.msra.mxu1 %v18616_v22  ;;  %12996 = vmatprep.mubr.msk.bf16.mxu1 %vm14808_vm0, %v21097_v38  ;;  %21221 = vst [vmem:[#allocation20_spill] sm:$0xff] %v19120_v32 }
 0xcc1   : > { %12982 = vmatprep.subr.bf16.mxu1 %v21097_v38 }
 0xcc4   : > { %12983 = vmatpush3.bf16.msra.mxu1 %v18632_v45 }
 0xcc5   : > { %12984 = vmatprep.subr.bf16.mxu1 %v21097_v38 }
 0xcc8   : > { %12985 = vmatpush3.bf16.msra.mxu1 %v18646_v61 }
 0xcc9   : > { %12986 = vmatprep.subr.bf16.mxu1 %v21097_v38 }
 0xccc   : > { %12987 = vmatpush3.bf16.msra.mxu1 %v18660_v57 }
 0xccd   : > { %12988 = vmatprep.subr.bf16.mxu1 %v21097_v38 }
 0xcd0   : > { %12989 = vmatpush3.bf16.msra.mxu1 %v18669_v19 }
 0xcd1   : > { %12990 = vmatprep.subr.bf16.mxu1 %v21097_v38 }
 0xcd4   : > { %12991 = vmatpush3.bf16.msra.mxu1 %v18678_v58 }
 0xcd5   : > { %12992 = vmatprep.subr.bf16.mxu1 %v21097_v38 }
 0xcd8   : > { %12993 = vmatpush3.bf16.msra.mxu1 %v18687_v56 }
 0xcd9   : > { %12994 = vmatprep.subr.bf16.mxu1 %v21097_v38 }
 0xcdc   : > { %12995 = vmatpush3.bf16.msra.mxu1 %v18702_v55 }
 0xcdd   : > { %13020 = vmatprep.subr.bf16.mxu1 %v21097_v38 }
 0xcdf   : > { %12997 = vmatmul.mubr.bf16.vlgmr.msra.gmra.mxu1 %v21211_v3  ;;  %v13019_v3 = vpop.f32.mrf.mxu0 }
 0xce0   : > { %13021 = vmatpush3.bf16.msra.mxu1 %v18969_v50  ;;  %13036 = vmatprep.mubr.msk.bf16.mxu1 %vm14808_vm0, %v21097_v38  ;;  %v19170_v3 = vld [vmem:[%s20758_s1 + $0x180] sm:$0xff]  }
 0xce1   : > { %13022 = vmatprep.subr.bf16.mxu1 %v21097_v38  ;;  %21228 = vst [vmem:[#allocation21_spill] sm:$0xff] %v19170_v3  ;;  %13255 = vmatpush3.bf16.msra.mxu0 %v19170_v3 }
 0xce2   : > { %13280 = vmatprep.subr.bf16.mxu0 %v21097_v38 }
 0xce4   : > { %13023 = vmatpush3.bf16.msra.mxu1 %v18985_v25  ;;  %13257 = vmatmul.mubr.bf16.vlgmr.msra.gmra.mxu0 %v18510_v39 }
 0xce5   : > { %13024 = vmatprep.subr.bf16.mxu1 %v21097_v38  ;;  %13296 = vmatprep.mubr.msk.bf16.mxu0 %vm14808_vm0, %v21097_v38 }
 0xce8   : > { %13025 = vmatpush3.bf16.msra.mxu1 %v19001_v4 }
 0xce9   : > { %13026 = vmatprep.subr.bf16.mxu1 %v21097_v38 }
 0xcec   : > { %13027 = vmatpush3.bf16.msra.mxu1 %v19015_v2 }
 0xced   : > { %13028 = vmatprep.subr.bf16.mxu1 %v21097_v38 }
 0xcf0   : > { %13029 = vmatpush3.bf16.msra.mxu1 %v19029_v41 }
 0xcf1   : > { %13030 = vmatprep.subr.bf16.mxu1 %v21097_v38 }
 0xcf4   : > { %13031 = vmatpush3.bf16.msra.mxu1 %v19043_v35 }
 0xcf5   : > { %13032 = vmatprep.subr.bf16.mxu1 %v21097_v38 }
 0xcf8   : > { %13033 = vmatpush3.bf16.msra.mxu1 %v19057_v43 }
 0xcf9   : > { %13034 = vmatprep.subr.bf16.mxu1 %v21097_v38 }
 0xcfc   : > { %13035 = vmatpush3.bf16.msra.mxu1 %v19074_v26 }
 0xcfd   : > { %13060 = vmatprep.subr.bf16.mxu1 %v21097_v38 }
 0xcff   : > { %13037 = vmatmul.mubr.bf16.vlgmr.msra.gmra.mxu1 %v14644_v29  ;;  %v19148_v29 = vld [vmem:[%s20758_s1 + $0x1d8] sm:$0xff]  }
 0xd00   : > { %13061 = vmatpush3.bf16.msra.mxu1 %v19088_v18  ;;  %13076 = vmatprep.mubr.msk.bf16.mxu1 %vm14808_vm0, %v21097_v38  ;;  %21225 = vst [vmem:[#allocation18_spill] sm:$0xff] %v19148_v29 }
 0xd01   : > { %13062 = vmatprep.subr.bf16.mxu1 %v21097_v38 }
 0xd04   : > { %13063 = vmatpush3.bf16.msra.mxu1 %v19104_v6 }
 0xd05   : > { %13064 = vmatprep.subr.bf16.mxu1 %v21097_v38 }
 0xd08   : > { %13065 = vmatpush3.bf16.msra.mxu1 %v19120_v32 }
 0xd09   : > { %13066 = vmatprep.subr.bf16.mxu1 %v21097_v38 }
 0xd0c   : > { %13067 = vmatpush3.bf16.msra.mxu1 %v19134_v15 }
 0xd0d   : > { %13068 = vmatprep.subr.bf16.mxu1 %v21097_v38 }
 0xd10   : > { %13069 = vmatpush3.bf16.msra.mxu1 %v19148_v29 }
 0xd11   : > { %13070 = vmatprep.subr.bf16.mxu1 %v21097_v38 }
 0xd14   : > { %13071 = vmatpush3.bf16.msra.mxu1 %v19162_v24  ;;  %v19185_v24 = vld [vmem:[%s20758_s1 + $0x238] sm:$0xff]  }
 0xd15   : > { %13072 = vmatprep.subr.bf16.mxu1 %v21097_v38  ;;  %21230 = vst [vmem:[#allocation11_spill] sm:$0xff] %v19185_v24  ;;  %13281 = vmatpush3.bf16.msra.mxu0 %v19185_v24  ;;  %v19202_v24 = vld [vmem:[%s20758_s1 + $0x230] sm:$0xff]  }
 0xd16   : > { %13282 = vmatprep.subr.bf16.mxu0 %v21097_v38  ;;  %21232 = vst [vmem:[#allocation31_spill] sm:$0xff] %v19202_v24 }
 0xd18   : > { %13073 = vmatpush3.bf16.msra.mxu1 %v19176_v51  ;;  %v19193_v51 = vld [vmem:[%s20758_s1 + $0x1c0] sm:$0xff]  }
 0xd19   : > { %13074 = vmatprep.subr.bf16.mxu1 %v21097_v38  ;;  %21231 = vst [vmem:[#allocation35_spill] sm:$0xff] %v19193_v51  ;;  %13283 = vmatpush3.bf16.msra.mxu0 %v19202_v24  ;;  %v19220_v24 = vld [vmem:[%s20758_s1 + $0x220] sm:$0xff]  }
 0xd1a   : > { %13284 = vmatprep.subr.bf16.mxu0 %v21097_v38  ;;  %21234 = vst [vmem:[#allocation13_spill] sm:$0xff] %v19220_v24 }
 0xd1c   : > { %13075 = vmatpush3.bf16.msra.mxu1 %v19193_v51  ;;  %v19211_v51 = vld [vmem:[%s20758_s1 + $0x228] sm:$0xff]  }
 0xd1d   : > { %13100 = vmatprep.subr.bf16.mxu1 %v21097_v38  ;;  %21233 = vst [vmem:[#allocation23_spill] sm:$0xff] %v19211_v51  ;;  %13285 = vmatpush3.bf16.msra.mxu0 %v19211_v51  ;;  %v19227_v51 = vld [vmem:[%s20758_s1 + $0x218] sm:$0xff]  }
 0xd1e   : > { %13286 = vmatprep.subr.bf16.mxu0 %v21097_v38  ;;  %21235 = vst [vmem:[#allocation26_spill] sm:$0xff] %v19227_v51 }
 0xd1f   : > { %13077 = vmatmul.mubr.bf16.vlgmr.msra.gmra.mxu1 %v18510_v39  ;;  %v19215_v39 = vpop.f32.mrf.mxu0 }
 0xd20   : > { %13116 = vmatprep.mubr.msk.bf16.mxu1 %vm14808_vm0, %v21097_v38 }
 0xd21   : > { %v13058_v3 = vpop.f32.mrf.mxu0  ;;  %13287 = vmatpush3.bf16.msra.mxu0 %v19220_v24 }
 0xd22   : > { %13288 = vmatprep.subr.bf16.mxu0 %v21097_v38  ;;  %v19234_v3 = vld [vmem:[%s20758_s1 + $0x210] sm:$0xff]  }
 0xd23   : > { %v6184_v28 = vpop.f32.mrf.mxu0  ;;  %21236 = vst [vmem:[#allocation25_spill] sm:$0xff] %v19234_v3 }
 0xd24   : > { %v19248_v28 = vld [vmem:[%s20758_s1 + $0x200] sm:$0xff]  }
 0xd25   : > { %v13059_v29 = vpop.f32.mrf.mxu0  ;;  %13289 = vmatpush3.bf16.msra.mxu0 %v19227_v51  ;;  %21238 = vst [vmem:[#allocation28_spill] sm:$0xff] %v19248_v28  ;;  %v14304_v51 = vld [vmem:[%s20760_s3 + $0x2a8] sm:$0xff]  }
 0xd26   : > { %13290 = vmatprep.subr.bf16.mxu0 %v21097_v38  ;;  %v19241_v29 = vld [vmem:[%s20758_s1 + $0x208] sm:$0xff]  }
 0xd27   : > { %21237 = vst [vmem:[#allocation36_spill] sm:$0xff] %v19241_v29 }
 0xd29   : > { %13291 = vmatpush3.bf16.msra.mxu0 %v19234_v3  ;;  %v14302_v3 = vld [vmem:[%s20760_s3 + $0x2b8] sm:$0xff]  }
 0xd2a   : > { %13292 = vmatprep.subr.bf16.mxu0 %v21097_v38  ;;  %13101 = vmatpush3.bf16.msra.mxu1 %v14302_v3  ;;  %v14306_v3 = vld [vmem:[%s20760_s3 + $0x298] sm:$0xff]  }
 0xd2b   : > { %13102 = vmatprep.subr.bf16.mxu1 %v21097_v38 }
 0xd2d   : > { %13293 = vmatpush3.bf16.msra.mxu0 %v19241_v29  ;;  %v14303_v29 = vld [vmem:[%s20760_s3 + $0x2b0] sm:$0xff]  }
 0xd2e   : > { %13294 = vmatprep.subr.bf16.mxu0 %v21097_v38  ;;  %13103 = vmatpush3.bf16.msra.mxu1 %v14303_v29  ;;  %v6263_v29 = vpop.f32.mrf.mxu0 }
 0xd2f   : > { %13104 = vmatprep.subr.bf16.mxu1 %v21097_v38 }
 0xd30   : > { %v13098_v24 = vpop.f32.mrf.mxu0 }
 0xd31   : > { %13295 = vmatpush3.bf16.msra.mxu0 %v19248_v28  ;;  %v14305_v28 = vld [vmem:[%s20760_s3 + $0x2a0] sm:$0xff]  }
 0xd32   : > { %13320 = vmatprep.subr.bf16.mxu0 %v21097_v38  ;;  %13105 = vmatpush3.bf16.msra.mxu1 %v14304_v51  ;;  %v14307_v51 = vld [vmem:[%s20760_s3 + $0x290] sm:$0xff]   ;;  %v6266_v14 = vpop.f32.mrf.mxu0 }
 0xd33   : > { %13106 = vmatprep.subr.bf16.mxu1 %v21097_v38  ;;  %v14309_v14 = vld [vmem:[%s20760_s3 + $0x280] sm:$0xff]  }
 0xd34   : > { %v13099_v46 = vpop.f32.mrf.mxu0 }
 0xd36   : > { %13107 = vmatpush3.bf16.msra.mxu1 %v14305_v28 }
 0xd37   : > { %13108 = vmatprep.subr.bf16.mxu1 %v21097_v38 }
 0xd3a   : > { %13109 = vmatpush3.bf16.msra.mxu1 %v14306_v3  ;;  %v14308_v3 = vld [vmem:[%s20760_s3 + $0x288] sm:$0xff]  }
 0xd3b   : > { %13110 = vmatprep.subr.bf16.mxu1 %v21097_v38 }
 0xd3e   : > { %13111 = vmatpush3.bf16.msra.mxu1 %v14307_v51 }
 0xd3f   : > { %13112 = vmatprep.subr.bf16.mxu1 %v21097_v38 }
 0xd42   : > { %13113 = vmatpush3.bf16.msra.mxu1 %v14308_v3 }
 0xd43   : > { %13114 = vmatprep.subr.bf16.mxu1 %v21097_v38 }
 0xd46   : > { %13115 = vmatpush3.bf16.msra.mxu1 %v14309_v14 }
 0xd47   : > { %13140 = vmatprep.subr.bf16.mxu1 %v21097_v38 }
 0xd5f   : > { %v5896_v15 = vpop.f32.mrf.mxu1 }
 0xd60   : > { %v19276_v28 = vadd.f32 %v5896_v15, %v18833_v33 }
 0xd61   : > { %v12918_v32 = vpop.f32.mrf.mxu1 }
 0xd62   : > { %21239 = vst [vmem:[#allocation27_spill] sm:$0xff] %v19276_v28 }
 0xd63   : > { %v5899_v37 = vpop.f32.mrf.mxu1 }
 0xd65   : > { %v12919_v24 = vpop.f32.mrf.mxu1 }
 0xd7f   : > { %v5977_v33 = vpop.f32.mrf.mxu1 }
 0xd80   : > { %v5978_v7 = vadd.f32 %v5977_v33, %v18862_v8  ;;  %v19296_v8 = vld [vmem:[%s20758_s1 + $0x78] sm:$0xff]   ;;  %v21251_v33 = vld [vmem:[#allocation20_spill] sm:$0xff] }
 0xd81   : > { %v12958_v46 = vpop.f32.mrf.mxu1 }
 0xd82   : > { %v6023_v26 = vadd.f32 %v18990_v62, %v5978_v7 }
 0xd83   : > { %v5980_v15 = vpop.f32.mrf.mxu1 }
 0xd85   : > { %v12959_v32 = vpop.f32.mrf.mxu1 }
 0xd9f   : > { %v6058_v51 = vpop.f32.mrf.mxu1 }
 0xda0   : > { %v6064_v14 = vadd.f32 %v6058_v51, %v6023_v26 }
 0xda1   : > { %v12998_v28 = vpop.f32.mrf.mxu1 }
 0xda2   : > { %v6105_v0 = vadd.f32 %v19109_v59, %v6064_v14  ;;  %v19318_v59 = vld [vmem:[%s20758_s1 + $0x68] sm:$0xff]  }
 0xda3   : > { %v6061_v6 = vpop.f32.mrf.mxu1  ;;  %v21252_v14 = vld [vmem:[#allocation9_spill] sm:$0xff] }
 0xda5   : > { %v12999_v31 = vpop.f32.mrf.mxu1 }
 0xdbf   : > { %v6140_v37 = vpop.f32.mrf.mxu1 }
 0xdc0   : > { %v6146_v43 = vadd.f32 %v6140_v37, %v6105_v0  ;;  %v19307_v0 = vld [vmem:[%s20758_s1 + $0x70] sm:$0xff]  }
 0xdc1   : > { %v13038_v3 = vpop.f32.mrf.mxu1 }
 0xdc2   : > { %v6187_v46 = vadd.f32 %v19215_v39, %v6146_v43  ;;  %v19327_v39 = vld [vmem:[%s20758_s1 + $0x60] sm:$0xff]  }
 0xdc3   : > { %v6143_v18 = vpop.f32.mrf.mxu1 }
 0xdc4   : > { %v8899_v18 = vld [vmem:[%s15034_s14 + $0x74] sm:$0xf] }
 0xdc5   : > { %v13039_v24 = vpop.f32.mrf.mxu1  ;;  %13297 = vmatmul.mubr.bf16.vlgmr.msra.gmra.mxu0 %v8899_v18  ;;  %v21260_v18 = vld [vmem:[#allocation35_spill] sm:$0xff] }
 0xdc6   : > { %13321 = vmatpush3.bf16.msra.mxu0 %v19296_v8  ;;  %13336 = vmatprep.mubr.msk.bf16.mxu0 %vm14808_vm0, %v21097_v38 }
 0xdc7   : > { %13322 = vmatprep.subr.bf16.mxu0 %v21097_v38 }
 0xdca   : > { %13323 = vmatpush3.bf16.msra.mxu0 %v19307_v0 }
 0xdcb   : > { %13324 = vmatprep.subr.bf16.mxu0 %v21097_v38 }
 0xdce   : > { %13325 = vmatpush3.bf16.msra.mxu0 %v19318_v59 }
 0xdcf   : > { %13326 = vmatprep.subr.bf16.mxu0 %v21097_v38 }
 0xdd2   : > { %13327 = vmatpush3.bf16.msra.mxu0 %v19327_v39 }
 0xdd3   : > { %13328 = vmatprep.subr.bf16.mxu0 %v21097_v38 }
 0xddf   : > { %v6222_v15 = vpop.f32.mrf.mxu1 }
 0xde0   : > { %v6228_v32 = vadd.f32 %v6222_v15, %v6187_v46  ;;  %v21253_v46 = vld [vmem:[#allocation22_spill] sm:$0xff]  ;;  %v21254_v15 = vld [vmem:[#allocation19_spill] sm:$0xff] }
 0xde1   : > { %v13078_v28 = vpop.f32.mrf.mxu1 }
 0xde2   : > { %v6269_v6 = vadd.f32 %v6263_v29, %v6228_v32  ;;  %v21250_v29 = vld [vmem:[#allocation7_spill] sm:$0xff]  ;;  %v21255_v32 = vld [vmem:[#allocation18_spill] sm:$0xff] }
 0xde3   : > { %v6225_v31 = vpop.f32.mrf.mxu1  ;;  %v21256_v28 = vld [vmem:[#allocation15_spill] sm:$0xff] }
 0xde4   : > { %v6270_v3 = vadd.f32 %v18851_v20, %v6269_v6  ;;  %v21257_v6 = vld [vmem:[#allocation5_spill] sm:$0xff] }
 0xde5   : > { %v13079_v44 = vpop.f32.mrf.mxu1  ;;  %v21258_v31 = vld [vmem:[#allocation21_spill] sm:$0xff] }
 0xde6   : > { %vm6271_vm11 = vcmp.ge.f32.partialorder %v6270_v3, 0.0  ;;  %v6272_v24 = vmul.f32 0.2, %v6270_v3  ;;  %v19302_v44 = vpop.f32.mrf.mxu0 }
 0xde8   : > { %v6273_v62 = vsel %vm6271_vm11, %v6270_v3, %v6272_v24  ;;  %v13138_v26 = vpop.f32.mrf.mxu0  ;;  %v21259_v3 = vld [vmem:[#allocation24_spill] sm:$0xff]  ;;  %v21261_v24 = vld [vmem:[#allocation34_spill] sm:$0xff] }
 0xde9   : > { %v6274_v43 = vpack.c.bf16 %v6273_v62, %v6273_v62 }
 0xdea   : > { %v6418_v7 = vpop.f32.mrf.mxu0 }
 0xdeb   : > { %13117 = vmatmul.mubr.bf16.vlgmr.msra.gmra.mxu1 %v6274_v43 }
 0xdec   : > { %13141 = vmatpush3.bf16.msra.mxu1 %v18523_v52  ;;  %13156 = vmatprep.mubr.msk.bf16.mxu1 %vm14808_vm0, %v21097_v38  ;;  %v13139_v52 = vpop.f32.mrf.mxu0 }
 0xded   : > { %13142 = vmatprep.subr.bf16.mxu1 %v21097_v38  ;;  %v14310_v52 = vld [vmem:[%s20760_s3 + $0x2f8] sm:$0xff]  }
 0xdf0   : > { %13143 = vmatpush3.bf16.msra.mxu1 %v18534_v1  ;;  %v19336_v1 = vld [vmem:[%s20758_s1 + $0x58] sm:$0xff]  }
 0xdf1   : > { %13144 = vmatprep.subr.bf16.mxu1 %v21097_v38  ;;  %13329 = vmatpush3.bf16.msra.mxu0 %v19336_v1 }
 0xdf2   : > { %13330 = vmatprep.subr.bf16.mxu0 %v21097_v38 }
 0xdf4   : > { %13145 = vmatpush3.bf16.msra.mxu1 %v18543_v63  ;;  %v19345_v63 = vld [vmem:[%s20758_s1 + $0x50] sm:$0xff]  }
 0xdf5   : > { %13146 = vmatprep.subr.bf16.mxu1 %v21097_v38  ;;  %13331 = vmatpush3.bf16.msra.mxu0 %v19345_v63 }
 0xdf6   : > { %13332 = vmatprep.subr.bf16.mxu0 %v21097_v38 }
 0xdf8   : > { %13147 = vmatpush3.bf16.msra.mxu1 %v18552_v60  ;;  %v19354_v60 = vld [vmem:[%s20758_s1 + $0x48] sm:$0xff]  }
 0xdf9   : > { %13148 = vmatprep.subr.bf16.mxu1 %v21097_v38  ;;  %13333 = vmatpush3.bf16.msra.mxu0 %v19354_v60 }
 0xdfa   : > { %13334 = vmatprep.subr.bf16.mxu0 %v21097_v38 }
 0xdfc   : > { %13149 = vmatpush3.bf16.msra.mxu1 %v18561_v42  ;;  %v19365_v42 = vld [vmem:[%s15034_s14 + $0x4c] sm:$0xf] }
 0xdfd   : > { %13150 = vmatprep.subr.bf16.mxu1 %v21097_v38  ;;  %13335 = vmatpush3.bf16.msra.mxu0 %v18578_v11  ;;  %21240 = vst [vmem:[#allocation29_spill] sm:$0xff] %v19365_v42  ;;  %v19406_v11 = vld [vmem:[%s15034_s14 + $0x50] sm:$0xf] }
 0xdfe   : > { %13360 = vmatprep.subr.bf16.mxu0 %v21097_v38 }
 0xe00   : > { %13151 = vmatpush3.bf16.msra.mxu1 %v18570_v21  ;;  %13337 = vmatmul.mubr.bf16.vlgmr.msra.gmra.mxu0 %v19365_v42  ;;  %v14678_v21 = vld [vmem:[%s15034_s14 + $0x3c] sm:$0xf] }
 0xe01   : > { %13152 = vmatprep.subr.bf16.mxu1 %v21097_v38  ;;  %13361 = vmatpush3.bf16.msra.mxu0 %v18593_v16 }
 0xe02   : > { %13376 = vmatprep.mubr.msk.bf16.mxu0 %vm14808_vm0, %v21097_v38  ;;  %13362 = vmatprep.subr.bf16.mxu0 %v21097_v38 }
 0xe04   : > { %13153 = vmatpush3.bf16.msra.mxu1 %v18584_v17  ;;  %v19426_v17 = vpop.f32.mrf.mxu0 }
 0xe05   : > { %13154 = vmatprep.subr.bf16.mxu1 %v21097_v38  ;;  %13363 = vmatpush3.bf16.msra.mxu0 %v18610_v34 }
 0xe06   : > { %13364 = vmatprep.subr.bf16.mxu0 %v21097_v38  ;;  %v13178_v16 = vpop.f32.mrf.mxu0 }
 0xe07   : > { %v14312_v16 = vld [vmem:[%s20760_s3 + $0x2e8] sm:$0xff]  }
 0xe08   : > { %13155 = vmatpush3.bf16.msra.mxu1 %v18601_v36  ;;  %v6498_v36 = vpop.f32.mrf.mxu0 }
 0xe09   : > { %13180 = vmatprep.subr.bf16.mxu1 %v21097_v38  ;;  %13365 = vmatpush3.bf16.msra.mxu0 %v18626_v23  ;;  %v21242_v23 = vld [vmem:[#allocation16_spill] sm:$0xff] }
 0xe0a   : > { %13366 = vmatprep.subr.bf16.mxu0 %v21097_v38  ;;  %v13179_v34 = vpop.f32.mrf.mxu0  ;;  %v14313_v36 = vld [vmem:[%s20760_s3 + $0x2e0] sm:$0xff]  }
 0xe0b   : > { %13157 = vmatmul.mubr.bf16.vlgmr.msra.gmra.mxu1 %v14678_v21  ;;  %v14311_v21 = vld [vmem:[%s20760_s3 + $0x2f0] sm:$0xff]   ;;  %v14314_v34 = vld [vmem:[%s20760_s3 + $0x2d8] sm:$0xff]  }
 0xe0c   : > { %13181 = vmatpush3.bf16.msra.mxu1 %v18616_v22  ;;  %13196 = vmatprep.mubr.msk.bf16.mxu1 %vm14808_vm0, %v21097_v38  ;;  %v21241_v22 = vld [vmem:[#allocation14_spill] sm:$0xff] }
 0xe0d   : > { %13182 = vmatprep.subr.bf16.mxu1 %v21097_v38  ;;  %13367 = vmatpush3.bf16.msra.mxu0 %v18640_v48  ;;  %v21244_v48 = vld [vmem:[#allocation12_spill] sm:$0xff] }
 0xe0e   : > { %13368 = vmatprep.subr.bf16.mxu0 %v21097_v38 }
 0xe10   : > { %13183 = vmatpush3.bf16.msra.mxu1 %v18632_v45  ;;  %v19449_v45 = vld [vmem:[%s15034_s14 + $0x64] sm:$0xf] }
 0xe11   : > { %13184 = vmatprep.subr.bf16.mxu1 %v21097_v38  ;;  %13369 = vmatpush3.bf16.msra.mxu0 %v18654_v54  ;;  %21243 = vst [vmem:[#allocation30_spill] sm:$0xff] %v19449_v45  ;;  %v14681_v54 = vld [vmem:[%s15034_s14 + $0x5c] sm:$0xf] }
 0xe12   : > { %13370 = vmatprep.subr.bf16.mxu0 %v21097_v38 }
 0xe14   : > { %13185 = vmatpush3.bf16.msra.mxu1 %v18646_v61  ;;  %v21245_v61 = vld [vmem:[#allocation4_spill] sm:$0xff] }
 0xe15   : > { %13186 = vmatprep.subr.bf16.mxu1 %v21097_v38  ;;  %13371 = vmatpush3.bf16.msra.mxu0 %v18923_v12 }
 0xe16   : > { %13372 = vmatprep.subr.bf16.mxu0 %v21097_v38 }
 0xe18   : > { %13187 = vmatpush3.bf16.msra.mxu1 %v18660_v57  ;;  %v21246_v57 = vld [vmem:[#allocation17_spill] sm:$0xff] }
 0xe19   : > { %13188 = vmatprep.subr.bf16.mxu1 %v21097_v38  ;;  %13373 = vmatpush3.bf16.msra.mxu0 %v18932_v13 }
 0xe1a   : > { %13374 = vmatprep.subr.bf16.mxu0 %v21097_v38 }
 0xe1c   : > { %13189 = vmatpush3.bf16.msra.mxu1 %v18669_v19  ;;  %v21247_v19 = vld [vmem:[#allocation8_spill] sm:$0xff] }
 0xe1d   : > { %13190 = vmatprep.subr.bf16.mxu1 %v21097_v38  ;;  %13375 = vmatpush3.bf16.msra.mxu0 %v18941_v30 }
 0xe1e   : > { %13400 = vmatprep.subr.bf16.mxu0 %v21097_v38 }
 0xe20   : > { %13191 = vmatpush3.bf16.msra.mxu1 %v18678_v58  ;;  %13377 = vmatmul.mubr.bf16.vlgmr.msra.gmra.mxu0 %v19406_v11  ;;  %v21248_v58 = vld [vmem:[#allocation6_spill] sm:$0xff] }
 0xe21   : > { %13192 = vmatprep.subr.bf16.mxu1 %v21097_v38  ;;  %13401 = vmatpush3.bf16.msra.mxu0 %v18951_v9 }
 0xe22   : > { %13416 = vmatprep.mubr.msk.bf16.mxu0 %vm14808_vm0, %v21097_v38  ;;  %13402 = vmatprep.subr.bf16.mxu0 %v21097_v38 }
 0xe24   : > { %13193 = vmatpush3.bf16.msra.mxu1 %v18687_v56  ;;  %v21249_v56 = vld [vmem:[#allocation10_spill] sm:$0xff] }
 0xe25   : > { %13194 = vmatprep.subr.bf16.mxu1 %v21097_v38  ;;  %13403 = vmatpush3.bf16.msra.mxu0 %v18963_v53 }
 0xe26   : > { %13404 = vmatprep.subr.bf16.mxu0 %v21097_v38 }
 0xe28   : > { %13195 = vmatpush3.bf16.msra.mxu1 %v18702_v55  ;;  %v19469_v55 = vpop.f32.mrf.mxu0 }
 0xe29   : > { %13220 = vmatprep.subr.bf16.mxu1 %v21097_v38  ;;  %13405 = vmatpush3.bf16.msra.mxu0 %v18979_v49 }
 0xe2a   : > { %13406 = vmatprep.subr.bf16.mxu0 %v21097_v38 }
 0xe2b   : > { %13197 = vmatmul.mubr.bf16.vlgmr.msra.gmra.mxu1 %v18741_v10  ;;  %v13218_v10 = vpop.f32.mrf.mxu0 }
 0xe2c   : > { %13221 = vmatpush3.bf16.msra.mxu1 %v18969_v50  ;;  %13236 = vmatprep.mubr.msk.bf16.mxu1 %vm14808_vm0, %v21097_v38 }
 0xe2d   : > { %13222 = vmatprep.subr.bf16.mxu1 %v21097_v38  ;;  %13407 = vmatpush3.bf16.msra.mxu0 %v18995_v27  ;;  %v6580_v51 = vpop.f32.mrf.mxu0 }
 0xe2e   : > { %13408 = vmatprep.subr.bf16.mxu0 %v21097_v38  ;;  %v14315_v51 = vld [vmem:[%s20760_s3 + $0x2d0] sm:$0xff]  }
 0xe2f   : > { %v13219_v37 = vpop.f32.mrf.mxu0 }
 0xe30   : > { %13223 = vmatpush3.bf16.msra.mxu1 %v18985_v25 }
 0xe31   : > { %13224 = vmatprep.subr.bf16.mxu1 %v21097_v38  ;;  %13409 = vmatpush3.bf16.msra.mxu0 %v19009_v5  ;;  %v19496_v62 = vpop.f32.mrf.mxu0 }
 0xe32   : > { %13410 = vmatprep.subr.bf16.mxu0 %v21097_v38 }
 0xe33   : > { %v13258_v43 = vpop.f32.mrf.mxu0 }
 0xe34   : > { %13225 = vmatpush3.bf16.msra.mxu1 %v19001_v4  ;;  %v21262_v43 = vld [vmem:[#allocation27_spill] sm:$0xff] }
 0xe35   : > { %13226 = vmatprep.subr.bf16.mxu1 %v21097_v38  ;;  %13411 = vmatpush3.bf16.msra.mxu0 %v19023_v47  ;;  %v6662_v26 = vpop.f32.mrf.mxu0 }
 0xe36   : > { %13412 = vmatprep.subr.bf16.mxu0 %v21097_v38 }
 0xe37   : > { %v13259_v7 = vpop.f32.mrf.mxu0 }
 0xe38   : > { %13227 = vmatpush3.bf16.msra.mxu1 %v19015_v2 }
 0xe39   : > { %13228 = vmatprep.subr.bf16.mxu1 %v21097_v38  ;;  %13413 = vmatpush3.bf16.msra.mxu0 %v19037_v40 }
 0xe3a   : > { %13414 = vmatprep.subr.bf16.mxu0 %v21097_v38 }
 0xe3c   : > { %13229 = vmatpush3.bf16.msra.mxu1 %v19029_v41 }
 0xe3d   : > { %13230 = vmatprep.subr.bf16.mxu1 %v21097_v38  ;;  %13415 = vmatpush3.bf16.msra.mxu0 %v21241_v22 }
 0xe3e   : > { %13440 = vmatprep.subr.bf16.mxu0 %v21097_v38 }
 0xe40   : > { %13231 = vmatpush3.bf16.msra.mxu1 %v19043_v35  ;;  %13417 = vmatmul.mubr.bf16.vlgmr.msra.gmra.mxu0 %v19449_v45 }
 0xe41   : > { %13232 = vmatprep.subr.bf16.mxu1 %v21097_v38  ;;  %13441 = vmatpush3.bf16.msra.mxu0 %v21244_v48 }
 0xe42   : > { %13456 = vmatprep.mubr.msk.bf16.mxu0 %vm14808_vm0, %v21097_v38  ;;  %13442 = vmatprep.subr.bf16.mxu0 %v21097_v38 }
 0xe44   : > { %13233 = vmatpush3.bf16.msra.mxu1 %v21242_v23 }
 0xe45   : > { %13234 = vmatprep.subr.bf16.mxu1 %v21097_v38  ;;  %13443 = vmatpush3.bf16.msra.mxu0 %v21246_v57 }
 0xe46   : > { %13444 = vmatprep.subr.bf16.mxu0 %v21097_v38 }
 0xe48   : > { %13235 = vmatpush3.bf16.msra.mxu1 %v21245_v61 }
 0xe49   : > { %13260 = vmatprep.subr.bf16.mxu1 %v21097_v38  ;;  %13445 = vmatpush3.bf16.msra.mxu0 %v21248_v58 }
 0xe4a   : > { %13446 = vmatprep.subr.bf16.mxu0 %v21097_v38 }
 0xe4b   : > { %13237 = vmatmul.mubr.bf16.vlgmr.msra.gmra.mxu1 %v14681_v54 }
 0xe4c   : > { %13261 = vmatpush3.bf16.msra.mxu1 %v21247_v19  ;;  %13276 = vmatprep.mubr.msk.bf16.mxu1 %vm14808_vm0, %v21097_v38 }
 0xe4d   : > { %13262 = vmatprep.subr.bf16.mxu1 %v21097_v38  ;;  %13447 = vmatpush3.bf16.msra.mxu0 %v21250_v29 }
 0xe4e   : > { %13448 = vmatprep.subr.bf16.mxu0 %v21097_v38 }
 0xe50   : > { %13263 = vmatpush3.bf16.msra.mxu1 %v21249_v56 }
 0xe51   : > { %13264 = vmatprep.subr.bf16.mxu1 %v21097_v38  ;;  %13449 = vmatpush3.bf16.msra.mxu0 %v21252_v14 }
 0xe52   : > { %13450 = vmatprep.subr.bf16.mxu0 %v21097_v38 }
 0xe54   : > { %13265 = vmatpush3.bf16.msra.mxu1 %v21251_v33 }
 0xe55   : > { %13266 = vmatprep.subr.bf16.mxu1 %v21097_v38  ;;  %13451 = vmatpush3.bf16.msra.mxu0 %v21254_v15 }
 0xe56   : > { %13452 = vmatprep.subr.bf16.mxu0 %v21097_v38 }
 0xe58   : > { %13267 = vmatpush3.bf16.msra.mxu1 %v21253_v46 }
 0xe59   : > { %13268 = vmatprep.subr.bf16.mxu1 %v21097_v38  ;;  %13453 = vmatpush3.bf16.msra.mxu0 %v21256_v28 }
 0xe5a   : > { %13454 = vmatprep.subr.bf16.mxu0 %v21097_v38 }
 0xe5c   : > { %13269 = vmatpush3.bf16.msra.mxu1 %v21255_v32 }
 0xe5d   : > { %13270 = vmatprep.subr.bf16.mxu1 %v21097_v38  ;;  %13455 = vmatpush3.bf16.msra.mxu0 %v21258_v31 }
 0xe5e   : > { %13480 = vmatprep.subr.bf16.mxu0 %v21097_v38 }
 0xe60   : > { %13271 = vmatpush3.bf16.msra.mxu1 %v21257_v6 }
 0xe61   : > { %13272 = vmatprep.subr.bf16.mxu1 %v21097_v38 }
 0xe64   : > { %13273 = vmatpush3.bf16.msra.mxu1 %v21259_v3 }
 0xe65   : > { %13274 = vmatprep.subr.bf16.mxu1 %v21097_v38 }
 0xe68   : > { %13275 = vmatpush3.bf16.msra.mxu1 %v21260_v18  ;;  %v21264_v18 = vld [vmem:[#allocation11_spill] sm:$0xff] }
 0xe69   : > { %13300 = vmatprep.subr.bf16.mxu1 %v21097_v38 }
 0xe6b   : > { %13277 = vmatmul.mubr.bf16.vlgmr.msra.gmra.mxu1 %v21261_v24 }
 0xe6c   : > { %13316 = vmatprep.mubr.msk.bf16.mxu1 %vm14808_vm0, %v21097_v38  ;;  %13301 = vmatpush3.bf16.msra.mxu1 %v14310_v52 }
 0xe6d   : > { %13302 = vmatprep.subr.bf16.mxu1 %v21097_v38 }
 0xe70   : > { %13303 = vmatpush3.bf16.msra.mxu1 %v14311_v21  ;;  %v14316_v21 = vld [vmem:[%s20760_s3 + $0x2c8] sm:$0xff]  }
 0xe71   : > { %13304 = vmatprep.subr.bf16.mxu1 %v21097_v38 }
 0xe74   : > { %13305 = vmatpush3.bf16.msra.mxu1 %v14312_v16 }
 0xe75   : > { %13306 = vmatprep.subr.bf16.mxu1 %v21097_v38 }
 0xe78   : > { %13307 = vmatpush3.bf16.msra.mxu1 %v14313_v36 }
 0xe79   : > { %13308 = vmatprep.subr.bf16.mxu1 %v21097_v38 }
 0xe7c   : > { %13309 = vmatpush3.bf16.msra.mxu1 %v14314_v34  ;;  %v14317_v34 = vld [vmem:[%s20760_s3 + $0x2c0] sm:$0xff]  }
 0xe7d   : > { %13310 = vmatprep.subr.bf16.mxu1 %v21097_v38 }
 0xe80   : > { %13311 = vmatpush3.bf16.msra.mxu1 %v14315_v51 }
 0xe81   : > { %13312 = vmatprep.subr.bf16.mxu1 %v21097_v38 }
 0xe84   : > { %13313 = vmatpush3.bf16.msra.mxu1 %v14316_v21 }
 0xe85   : > { %v6741_v54 = vpop.f32.mrf.mxu0  ;;  %13314 = vmatprep.subr.bf16.mxu1 %v21097_v38 }
 0xe87   : > { %v13298_v10 = vpop.f32.mrf.mxu0 }
 0xe88   : > { %13315 = vmatpush3.bf16.msra.mxu1 %v14317_v34  ;;  %v21265_v34 = vld [vmem:[#allocation31_spill] sm:$0xff] }
 0xe89   : > { %v6744_v37 = vpop.f32.mrf.mxu0  ;;  %13340 = vmatprep.subr.bf16.mxu1 %v21097_v38 }
 0xe8b   : > { %v13299_v7 = vpop.f32.mrf.mxu0 }
 0xeab   : > { %v6374_v24 = vpop.f32.mrf.mxu1 }
 0xeac   : > { %v19522_v26 = vadd.f32 %v6374_v24, %v21262_v43 }
 0xead   : > { %v13118_v52 = vpop.f32.mrf.mxu1 }
 0xeae   : > { %21263 = vst [vmem:[#allocation33_spill] sm:$0xff] %v19522_v26  ;;  %v8900_v26 = vld [vmem:[%s15034_s14 + $0x78] sm:$0xf] }
 0xeaf   : > { %v6377_v16 = vpop.f32.mrf.mxu1  ;;  %13457 = vmatmul.mubr.bf16.vlgmr.msra.gmra.mxu0 %v8900_v26  ;;  %v21267_v26 = vld [vmem:[#allocation13_spill] sm:$0xff] }
 0xeb0   : > { %13481 = vmatpush3.bf16.msra.mxu0 %v21264_v18  ;;  %13496 = vmatprep.mubr.msk.bf16.mxu0 %vm14808_vm0, %v21097_v38 }
 0xeb1   : > { %v13119_v36 = vpop.f32.mrf.mxu1  ;;  %13482 = vmatprep.subr.bf16.mxu0 %v21097_v38 }
 0xeb4   : > { %13483 = vmatpush3.bf16.msra.mxu0 %v21265_v34 }
 0xeb5   : > { %13484 = vmatprep.subr.bf16.mxu0 %v21097_v38 }
 0xecb   : > { %v6455_v10 = vpop.f32.mrf.mxu1 }
 0xecd   : > { %v13158_v51 = vpop.f32.mrf.mxu1 }
 0xece   : > { %v6456_v51 = vadd.f32 %v6455_v10, %v19302_v44  ;;  %v21269_v44 = vld [vmem:[#allocation25_spill] sm:$0xff] }
 0xecf   : > { %v6458_v37 = vpop.f32.mrf.mxu1 }
 0xed0   : > { %v21266_v37 = vld [vmem:[#allocation23_spill] sm:$0xff] }
 0xed1   : > { %v13159_v24 = vpop.f32.mrf.mxu1  ;;  %13485 = vmatpush3.bf16.msra.mxu0 %v21266_v37 }
 0xed2   : > { %13486 = vmatprep.subr.bf16.mxu0 %v21097_v38 }
 0xed5   : > { %13487 = vmatpush3.bf16.msra.mxu0 %v21267_v26 }
 0xed6   : > { %13488 = vmatprep.subr.bf16.mxu0 %v21097_v38 }
 0xeeb   : > { %v6536_v43 = vpop.f32.mrf.mxu1 }
 0xeed   : > { %v13198_v7 = vpop.f32.mrf.mxu1 }
 0xeee   : > { %v21268_v7 = vld [vmem:[#allocation26_spill] sm:$0xff] }
 0xeef   : > { %v6539_v52 = vpop.f32.mrf.mxu1  ;;  %13489 = vmatpush3.bf16.msra.mxu0 %v21268_v7 }
 0xef0   : > { %13490 = vmatprep.subr.bf16.mxu0 %v21097_v38 }
 0xef1   : > { %v13199_v16 = vpop.f32.mrf.mxu1 }
 0xef3   : > { %13491 = vmatpush3.bf16.msra.mxu0 %v21269_v44 }
 0xef4   : > { %13492 = vmatprep.subr.bf16.mxu0 %v21097_v38 }
 0xf0b   : > { %v6618_v21 = vpop.f32.mrf.mxu1 }
 0xf0d   : > { %v13238_v45 = vpop.f32.mrf.mxu1 }
 0xf0f   : > { %v6621_v42 = vpop.f32.mrf.mxu1 }
 0xf10   : > { %v6501_v42 = vadd.f32 %v19426_v17, %v6456_v51 }
 0xf11   : > { %v13239_v36 = vpop.f32.mrf.mxu1 }
 0xf12   : > { %v6542_v45 = vadd.f32 %v6536_v43, %v6501_v42  ;;  %v21270_v36 = vld [vmem:[#allocation36_spill] sm:$0xff] }
 0xf13   : > { %13493 = vmatpush3.bf16.msra.mxu0 %v21270_v36 }
 0xf14   : > { %v6583_v24 = vadd.f32 %v19469_v55, %v6542_v45  ;;  %13494 = vmatprep.subr.bf16.mxu0 %v21097_v38  ;;  %v21271_v45 = vld [vmem:[#allocation28_spill] sm:$0xff] }
 0xf16   : > { %v6624_v52 = vadd.f32 %v6618_v21, %v6583_v24  ;;  %v19557_v24 = vld [vmem:[%s15034_s14 + $0x80] sm:$0xf] }
 0xf17   : > { %13495 = vmatpush3.bf16.msra.mxu0 %v21271_v45  ;;  %21272 = vst [vmem:[#allocation32_spill] sm:$0xff] %v19557_v24 }
 0xf18   : > { %v6665_v10 = vadd.f32 %v19496_v62, %v6624_v52  ;;  %13520 = vmatprep.subr.bf16.mxu0 %v21097_v38 }
 0xf1a   : > { %13497 = vmatmul.mubr.bf16.vlgmr.msra.gmra.mxu0 %v19557_v24  ;;  %v19667_v24 = vld [vmem:[%s20758_s1 + $0xb0] sm:$0xff]  }
 0xf1b   : > { %13521 = vmatpush3.bf16.msra.mxu0 %v19296_v8  ;;  %13536 = vmatprep.mubr.msk.bf16.mxu0 %vm14808_vm0, %v21097_v38  ;;  %21274 = vst [vmem:[#allocation16_spill] sm:$0xff] %v19667_v24 }
 0xf1c   : > { %13522 = vmatprep.subr.bf16.mxu0 %v21097_v38 }
 0xf1f   : > { %13523 = vmatpush3.bf16.msra.mxu0 %v19307_v0 }
 0xf20   : > { %13524 = vmatprep.subr.bf16.mxu0 %v21097_v38 }
 0xf23   : > { %13525 = vmatpush3.bf16.msra.mxu0 %v19318_v59 }
 0xf24   : > { %13526 = vmatprep.subr.bf16.mxu0 %v21097_v38 }
 0xf27   : > { %13527 = vmatpush3.bf16.msra.mxu0 %v19327_v39 }
 0xf28   : > { %13528 = vmatprep.subr.bf16.mxu0 %v21097_v38 }
 0xf2b   : > { %v6700_v17 = vpop.f32.mrf.mxu1  ;;  %13529 = vmatpush3.bf16.msra.mxu0 %v19336_v1 }
 0xf2c   : > { %v6706_v43 = vadd.f32 %v6700_v17, %v6665_v10  ;;  %13530 = vmatprep.subr.bf16.mxu0 %v21097_v38 }
 0xf2d   : > { %v13278_v16 = vpop.f32.mrf.mxu1 }
 0xf2e   : > { %v6747_v51 = vadd.f32 %v6741_v54, %v6706_v43  ;;  %v19570_v54 = vld [vmem:[%s20758_s1 + $0x38] sm:$0xff]   ;;  %v19581_v16 = vld [vmem:[%s20758_s1 + $0x30] sm:$0xff]  }
 0xf2f   : > { %v6703_v55 = vpop.f32.mrf.mxu1  ;;  %13531 = vmatpush3.bf16.msra.mxu0 %v19345_v63 }
 0xf30   : > { %v6748_v42 = vadd.f32 %v18851_v20, %v6747_v51  ;;  %v19565_v20 = vpop.f32.mrf.mxu0  ;;  %v19590_v55 = vld [vmem:[%s20758_s1 + $0x28] sm:$0xff]   ;;  %13532 = vmatprep.subr.bf16.mxu0 %v21097_v38 }
 0xf31   : > { %v13279_v21 = vpop.f32.mrf.mxu1 }
 0xf32   : > { %vm6749_vm12 = vcmp.ge.f32.partialorder %v6748_v42, 0.0  ;;  %v6750_v62 = vmul.f32 0.2, %v6748_v42  ;;  %v13338_v17 = vpop.f32.mrf.mxu0  ;;  %v19608_v21 = vld [vmem:[%s20758_s1 + $0x18] sm:$0xff]  }
 0xf33   : > { %13533 = vmatpush3.bf16.msra.mxu0 %v19354_v60  ;;  %v19640_v17 = vld [vmem:[%s20758_s1] sm:$0xff]  }
 0xf34   : > { %v6751_v52 = vsel %vm6749_vm12, %v6748_v42, %v6750_v62  ;;  %v6896_v43 = vpop.f32.mrf.mxu0  ;;  %v19599_v42 = vld [vmem:[%s20758_s1 + $0x20] sm:$0xff]   ;;  %v19617_v62 = vld [vmem:[%s20758_s1 + $0x10] sm:$0xff]   ;;  %13534 = vmatprep.subr.bf16.mxu0 %v21097_v38 }
 0xf35   : > { %v6752_v10 = vpack.c.bf16 %v6751_v52, %v6751_v52  ;;  %v19626_v52 = vld [vmem:[%s20758_s1 + $0x8] sm:$0xff]   ;;  %v19648_v43 = vld [vmem:[%s20758_s1 + $0xb8] sm:$0xff]  }
 0xf36   : > { %v13339_v51 = vpop.f32.mrf.mxu0 }
 0xf37   : > { %13317 = vmatmul.mubr.bf16.vlgmr.msra.gmra.mxu1 %v6752_v10  ;;  %v19633_v10 = vld [vmem:[%s20758_s1 + $0x40] sm:$0xff]   ;;  %v14692_v51 = vld [vmem:[%s15034_s14 + $0x48] sm:$0xf] }
 0xf38   : > { %13341 = vmatpush3.bf16.msra.mxu1 %v19570_v54  ;;  %13356 = vmatprep.mubr.msk.bf16.mxu1 %vm14808_vm0, %v21097_v38 }
 0xf39   : > { %13342 = vmatprep.subr.bf16.mxu1 %v21097_v38  ;;  %13535 = vmatpush3.bf16.msra.mxu0 %v19633_v10 }
 0xf3a   : > { %13560 = vmatprep.subr.bf16.mxu0 %v21097_v38 }
 0xf3c   : > { %13343 = vmatpush3.bf16.msra.mxu1 %v19581_v16  ;;  %13537 = vmatmul.mubr.bf16.vlgmr.msra.gmra.mxu0 %v19406_v11  ;;  %v19658_v11 = vld [vmem:[%s20758_s1 + $0xf8] sm:$0xff]  }
 0xf3d   : > { %13344 = vmatprep.subr.bf16.mxu1 %v21097_v38  ;;  %13561 = vmatpush3.bf16.msra.mxu0 %v19648_v43  ;;  %21273 = vst [vmem:[#allocation14_spill] sm:$0xff] %v19658_v11 }
 0xf3e   : > { %13562 = vmatprep.subr.bf16.mxu0 %v21097_v38  ;;  %13576 = vmatprep.mubr.msk.bf16.mxu0 %vm14808_vm0, %v21097_v38 }
 0xf40   : > { %13345 = vmatpush3.bf16.msra.mxu1 %v19590_v55 }
 0xf41   : > { %13346 = vmatprep.subr.bf16.mxu1 %v21097_v38  ;;  %13563 = vmatpush3.bf16.msra.mxu0 %v19667_v24  ;;  %v19688_v24 = vld [vmem:[%s20758_s1 + $0xe8] sm:$0xff]  }
 0xf42   : > { %13564 = vmatprep.subr.bf16.mxu0 %v21097_v38  ;;  %21277 = vst [vmem:[#allocation17_spill] sm:$0xff] %v19688_v24 }
 0xf44   : > { %13347 = vmatpush3.bf16.msra.mxu1 %v19599_v42 }
 0xf45   : > { %13348 = vmatprep.subr.bf16.mxu1 %v21097_v38 }
 0xf48   : > { %13349 = vmatpush3.bf16.msra.mxu1 %v19608_v21 }
 0xf49   : > { %13350 = vmatprep.subr.bf16.mxu1 %v21097_v38 }
 0xf4c   : > { %13351 = vmatpush3.bf16.msra.mxu1 %v19617_v62 }
 0xf4d   : > { %13352 = vmatprep.subr.bf16.mxu1 %v21097_v38 }
 0xf50   : > { %13353 = vmatpush3.bf16.msra.mxu1 %v19626_v52 }
 0xf51   : > { %13354 = vmatprep.subr.bf16.mxu1 %v21097_v38 }
 0xf54   : > { %13355 = vmatpush3.bf16.msra.mxu1 %v19640_v17 }
 0xf55   : > { %13380 = vmatprep.subr.bf16.mxu1 %v21097_v38 }
 0xf57   : > { %13357 = vmatmul.mubr.bf16.vlgmr.msra.gmra.mxu1 %v14692_v51  ;;  %v19674_v51 = vld [vmem:[%s20758_s1 + $0xf0] sm:$0xff]  }
 0xf58   : > { %13381 = vmatpush3.bf16.msra.mxu1 %v19658_v11  ;;  %13396 = vmatprep.mubr.msk.bf16.mxu1 %vm14808_vm0, %v21097_v38  ;;  %21275 = vst [vmem:[#allocation12_spill] sm:$0xff] %v19674_v51  ;;  %v19681_v11 = vld [vmem:[%s20758_s1 + $0xa8] sm:$0xff]  }
 0xf59   : > { %13382 = vmatprep.subr.bf16.mxu1 %v21097_v38  ;;  %21276 = vst [vmem:[#allocation4_spill] sm:$0xff] %v19681_v11  ;;  %13565 = vmatpush3.bf16.msra.mxu0 %v19681_v11  ;;  %v19702_v11 = vld [vmem:[%s20758_s1 + $0xe0] sm:$0xff]  }
 0xf5a   : > { %13566 = vmatprep.subr.bf16.mxu0 %v21097_v38  ;;  %21279 = vst [vmem:[#allocation6_spill] sm:$0xff] %v19702_v11 }
 0xf5c   : > { %13383 = vmatpush3.bf16.msra.mxu1 %v19674_v51  ;;  %v19695_v51 = vld [vmem:[%s20758_s1 + $0xa0] sm:$0xff]  }
 0xf5d   : > { %13384 = vmatprep.subr.bf16.mxu1 %v21097_v38  ;;  %21278 = vst [vmem:[#allocation8_spill] sm:$0xff] %v19695_v51  ;;  %13567 = vmatpush3.bf16.msra.mxu0 %v19695_v51  ;;  %v19716_v51 = vld [vmem:[%s20758_s1 + $0xd8] sm:$0xff]  }
 0xf5e   : > { %13568 = vmatprep.subr.bf16.mxu0 %v21097_v38 }
 0xf60   : > { %13385 = vmatpush3.bf16.msra.mxu1 %v19688_v24  ;;  %v19709_v24 = vld [vmem:[%s20758_s1 + $0x98] sm:$0xff]  }
 0xf61   : > { %13386 = vmatprep.subr.bf16.mxu1 %v21097_v38  ;;  %13569 = vmatpush3.bf16.msra.mxu0 %v19709_v24 }
 0xf62   : > { %13570 = vmatprep.subr.bf16.mxu0 %v21097_v38 }
 0xf64   : > { %13387 = vmatpush3.bf16.msra.mxu1 %v19702_v11  ;;  %v19725_v11 = vld [vmem:[%s20758_s1 + $0xd0] sm:$0xff]  }
 0xf65   : > { %13388 = vmatprep.subr.bf16.mxu1 %v21097_v38  ;;  %13571 = vmatpush3.bf16.msra.mxu0 %v18923_v12  ;;  %21280 = vst [vmem:[#allocation10_spill] sm:$0xff] %v19725_v11  ;;  %v19734_v12 = vld [vmem:[%s20758_s1 + $0xc8] sm:$0xff]  }
 0xf66   : > { %13572 = vmatprep.subr.bf16.mxu0 %v21097_v38 }
 0xf68   : > { %13389 = vmatpush3.bf16.msra.mxu1 %v19716_v51 }
 0xf69   : > { %13390 = vmatprep.subr.bf16.mxu1 %v21097_v38  ;;  %13573 = vmatpush3.bf16.msra.mxu0 %v18932_v13  ;;  %v19747_v13 = vld [vmem:[%s15034_s14 + $0x54] sm:$0xf] }
 0xf6a   : > { %13574 = vmatprep.subr.bf16.mxu0 %v21097_v38 }
 0xf6c   : > { %13391 = vmatpush3.bf16.msra.mxu1 %v19725_v11  ;;  %v19743_v11 = vld [vmem:[%s20758_s1 + $0xc0] sm:$0xff]  }
 0xf6d   : > { %13392 = vmatprep.subr.bf16.mxu1 %v21097_v38  ;;  %13575 = vmatpush3.bf16.msra.mxu0 %v18941_v30  ;;  %v14706_v30 = vld [vmem:[%s15034_s14 + $0x60] sm:$0xf] }
 0xf6e   : > { %13600 = vmatprep.subr.bf16.mxu0 %v21097_v38 }
 0xf70   : > { %13393 = vmatpush3.bf16.msra.mxu1 %v19734_v12  ;;  %13577 = vmatmul.mubr.bf16.vlgmr.msra.gmra.mxu0 %v19747_v13 }
 0xf71   : > { %13394 = vmatprep.subr.bf16.mxu1 %v21097_v38  ;;  %13601 = vmatpush3.bf16.msra.mxu0 %v18951_v9  ;;  %v19764_v9 = vpop.f32.mrf.mxu0 }
 0xf72   : > { %13602 = vmatprep.subr.bf16.mxu0 %v21097_v38  ;;  %13616 = vmatprep.mubr.msk.bf16.mxu0 %vm14808_vm0, %v21097_v38 }
 0xf74   : > { %13395 = vmatpush3.bf16.msra.mxu1 %v19743_v11 }
 0xf75   : > { %13420 = vmatprep.subr.bf16.mxu1 %v21097_v38  ;;  %13603 = vmatpush3.bf16.msra.mxu0 %v18963_v53 }
 0xf76   : > { %13604 = vmatprep.subr.bf16.mxu0 %v21097_v38 }
 0xf77   : > { %13397 = vmatmul.mubr.bf16.vlgmr.msra.gmra.mxu1 %v14706_v30 }
 0xf78   : > { %13421 = vmatpush3.bf16.msra.mxu1 %v18969_v50  ;;  %13436 = vmatprep.mubr.msk.bf16.mxu1 %vm14808_vm0, %v21097_v38  ;;  %v13378_v50 = vpop.f32.mrf.mxu0 }
 0xf79   : > { %13422 = vmatprep.subr.bf16.mxu1 %v21097_v38  ;;  %13605 = vmatpush3.bf16.msra.mxu0 %v18979_v49  ;;  %v19790_v49 = vld [vmem:[%s15034_s14 + $0x68] sm:$0xf] }
 0xf7a   : > { %13606 = vmatprep.subr.bf16.mxu0 %v21097_v38  ;;  %v6976_v30 = vpop.f32.mrf.mxu0 }
 0xf7c   : > { %13423 = vmatpush3.bf16.msra.mxu1 %v18985_v25  ;;  %v13379_v53 = vpop.f32.mrf.mxu0 }
 0xf7d   : > { %13424 = vmatprep.subr.bf16.mxu1 %v21097_v38  ;;  %13607 = vmatpush3.bf16.msra.mxu0 %v18995_v27 }
 0xf7e   : > { %13608 = vmatprep.subr.bf16.mxu0 %v21097_v38  ;;  %v19807_v25 = vpop.f32.mrf.mxu0 }
 0xf80   : > { %13425 = vmatpush3.bf16.msra.mxu1 %v19001_v4  ;;  %v13418_v27 = vpop.f32.mrf.mxu0 }
 0xf81   : > { %13426 = vmatprep.subr.bf16.mxu1 %v21097_v38  ;;  %13609 = vmatpush3.bf16.msra.mxu0 %v19009_v5 }
 0xf82   : > { %13610 = vmatprep.subr.bf16.mxu0 %v21097_v38  ;;  %v7058_v4 = vpop.f32.mrf.mxu0 }
 0xf84   : > { %13427 = vmatpush3.bf16.msra.mxu1 %v19015_v2  ;;  %v13419_v5 = vpop.f32.mrf.mxu0  ;;  %v8901_v2 = vld [vmem:[%s15034_s14 + $0x7c] sm:$0xf] }
 0xf85   : > { %13428 = vmatprep.subr.bf16.mxu1 %v21097_v38  ;;  %13611 = vmatpush3.bf16.msra.mxu0 %v19023_v47  ;;  %v21281_v47 = vld [vmem:[#allocation35_spill] sm:$0xff] }
 0xf86   : > { %13612 = vmatprep.subr.bf16.mxu0 %v21097_v38 }
 0xf88   : > { %13429 = vmatpush3.bf16.msra.mxu1 %v19029_v41  ;;  %v7137_v41 = vpop.f32.mrf.mxu0 }
 0xf89   : > { %13430 = vmatprep.subr.bf16.mxu1 %v21097_v38  ;;  %13613 = vmatpush3.bf16.msra.mxu0 %v19037_v40 }
 0xf8a   : > { %13614 = vmatprep.subr.bf16.mxu0 %v21097_v38  ;;  %v13458_v40 = vpop.f32.mrf.mxu0 }
 0xf8c   : > { %13431 = vmatpush3.bf16.msra.mxu1 %v19043_v35  ;;  %v7140_v35 = vpop.f32.mrf.mxu0 }
 0xf8d   : > { %13432 = vmatprep.subr.bf16.mxu1 %v21097_v38  ;;  %13615 = vmatpush3.bf16.msra.mxu0 %v21241_v22 }
 0xf8e   : > { %13640 = vmatprep.subr.bf16.mxu0 %v21097_v38  ;;  %v13459_v22 = vpop.f32.mrf.mxu0 }
 0xf90   : > { %13433 = vmatpush3.bf16.msra.mxu1 %v21242_v23  ;;  %13617 = vmatmul.mubr.bf16.vlgmr.msra.gmra.mxu0 %v19790_v49  ;;  %v14318_v23 = vld [vmem:[%s20760_s3 + $0x338] sm:$0xff]  }
 0xf91   : > { %13434 = vmatprep.subr.bf16.mxu1 %v21097_v38  ;;  %13641 = vmatpush3.bf16.msra.mxu0 %v21244_v48  ;;  %v14319_v48 = vld [vmem:[%s20760_s3 + $0x330] sm:$0xff]  }
 0xf92   : > { %13642 = vmatprep.subr.bf16.mxu0 %v21097_v38  ;;  %13656 = vmatprep.mubr.msk.bf16.mxu0 %vm14808_vm0, %v21097_v38 }
 0xf94   : > { %13435 = vmatpush3.bf16.msra.mxu1 %v21245_v61  ;;  %v14320_v61 = vld [vmem:[%s20760_s3 + $0x328] sm:$0xff]  }
 0xf95   : > { %13460 = vmatprep.subr.bf16.mxu1 %v21097_v38  ;;  %13643 = vmatpush3.bf16.msra.mxu0 %v21246_v57  ;;  %v14321_v57 = vld [vmem:[%s20760_s3 + $0x320] sm:$0xff]  }
 0xf96   : > { %13644 = vmatprep.subr.bf16.mxu0 %v21097_v38 }
 0xf97   : > { %13437 = vmatmul.mubr.bf16.vlgmr.msra.gmra.mxu1 %v19790_v49 }
 0xf98   : > { %13461 = vmatpush3.bf16.msra.mxu1 %v21247_v19  ;;  %13476 = vmatprep.mubr.msk.bf16.mxu1 %vm14808_vm0, %v21097_v38  ;;  %v14322_v19 = vld [vmem:[%s20760_s3 + $0x318] sm:$0xff]  }
 0xf99   : > { %13462 = vmatprep.subr.bf16.mxu1 %v21097_v38  ;;  %13645 = vmatpush3.bf16.msra.mxu0 %v21248_v58 }
 0xf9a   : > { %13646 = vmatprep.subr.bf16.mxu0 %v21097_v38 }
 0xf9c   : > { %13463 = vmatpush3.bf16.msra.mxu1 %v21249_v56  ;;  %v14323_v56 = vld [vmem:[%s20760_s3 + $0x310] sm:$0xff]  }
 0xf9d   : > { %13464 = vmatprep.subr.bf16.mxu1 %v21097_v38  ;;  %13647 = vmatpush3.bf16.msra.mxu0 %v21250_v29 }
 0xf9e   : > { %13648 = vmatprep.subr.bf16.mxu0 %v21097_v38 }
 0xfa0   : > { %13465 = vmatpush3.bf16.msra.mxu1 %v21251_v33 }
 0xfa1   : > { %13466 = vmatprep.subr.bf16.mxu1 %v21097_v38  ;;  %13649 = vmatpush3.bf16.msra.mxu0 %v21252_v14  ;;  %v21282_v14 = vld [vmem:[#allocation33_spill] sm:$0xff] }
 0xfa2   : > { %13650 = vmatprep.subr.bf16.mxu0 %v21097_v38 }
 0xfa4   : > { %13467 = vmatpush3.bf16.msra.mxu1 %v21253_v46 }
 0xfa5   : > { %13468 = vmatprep.subr.bf16.mxu1 %v21097_v38  ;;  %13651 = vmatpush3.bf16.msra.mxu0 %v21254_v15 }
 0xfa6   : > { %13652 = vmatprep.subr.bf16.mxu0 %v21097_v38 }
 0xfa8   : > { %13469 = vmatpush3.bf16.msra.mxu1 %v21255_v32 }
 0xfa9   : > { %13470 = vmatprep.subr.bf16.mxu1 %v21097_v38  ;;  %13653 = vmatpush3.bf16.msra.mxu0 %v21256_v28  ;;  %v14324_v28 = vld [vmem:[%s20760_s3 + $0x308] sm:$0xff]  }
 0xfaa   : > { %13654 = vmatprep.subr.bf16.mxu0 %v21097_v38 }
 0xfac   : > { %13471 = vmatpush3.bf16.msra.mxu1 %v21257_v6 }
 0xfad   : > { %13472 = vmatprep.subr.bf16.mxu1 %v21097_v38  ;;  %13655 = vmatpush3.bf16.msra.mxu0 %v21258_v31 }
 0xfae   : > { %13680 = vmatprep.subr.bf16.mxu0 %v21097_v38 }
 0xfb0   : > { %13473 = vmatpush3.bf16.msra.mxu1 %v21259_v3  ;;  %13657 = vmatmul.mubr.bf16.vlgmr.msra.gmra.mxu0 %v8901_v2 }
 0xfb1   : > { %13474 = vmatprep.subr.bf16.mxu1 %v21097_v38  ;;  %13681 = vmatpush3.bf16.msra.mxu0 %v21264_v18  ;;  %v14325_v18 = vld [vmem:[%s20760_s3 + $0x300] sm:$0xff]  }
 0xfb2   : > { %13682 = vmatprep.subr.bf16.mxu0 %v21097_v38  ;;  %13696 = vmatprep.mubr.msk.bf16.mxu0 %vm14808_vm0, %v21097_v38 }
 0xfb4   : > { %13475 = vmatpush3.bf16.msra.mxu1 %v21281_v47 }
 0xfb5   : > { %13500 = vmatprep.subr.bf16.mxu1 %v21097_v38  ;;  %13683 = vmatpush3.bf16.msra.mxu0 %v21265_v34 }
 0xfb6   : > { %13684 = vmatprep.subr.bf16.mxu0 %v21097_v38 }
 0xfb7   : > { %13477 = vmatmul.mubr.bf16.vlgmr.msra.gmra.mxu1 %v8901_v2 }
 0xfb8   : > { %13516 = vmatprep.mubr.msk.bf16.mxu1 %vm14808_vm0, %v21097_v38  ;;  %13501 = vmatpush3.bf16.msra.mxu1 %v14318_v23 }
 0xfb9   : > { %13685 = vmatpush3.bf16.msra.mxu0 %v21266_v37  ;;  %13502 = vmatprep.subr.bf16.mxu1 %v21097_v38 }
 0xfba   : > { %13686 = vmatprep.subr.bf16.mxu0 %v21097_v38 }
 0xfbc   : > { %13503 = vmatpush3.bf16.msra.mxu1 %v14319_v48 }
 0xfbd   : > { %13687 = vmatpush3.bf16.msra.mxu0 %v21267_v26  ;;  %13504 = vmatprep.subr.bf16.mxu1 %v21097_v38 }
 0xfbe   : > { %13688 = vmatprep.subr.bf16.mxu0 %v21097_v38 }
 0xfc0   : > { %13505 = vmatpush3.bf16.msra.mxu1 %v14320_v61 }
 0xfc1   : > { %13689 = vmatpush3.bf16.msra.mxu0 %v21268_v7  ;;  %13506 = vmatprep.subr.bf16.mxu1 %v21097_v38 }
 0xfc2   : > { %13690 = vmatprep.subr.bf16.mxu0 %v21097_v38 }
 0xfc4   : > { %13507 = vmatpush3.bf16.msra.mxu1 %v14321_v57 }
 0xfc5   : > { %13691 = vmatpush3.bf16.msra.mxu0 %v21269_v44  ;;  %13508 = vmatprep.subr.bf16.mxu1 %v21097_v38 }
 0xfc6   : > { %13692 = vmatprep.subr.bf16.mxu0 %v21097_v38 }
 0xfc8   : > { %13509 = vmatpush3.bf16.msra.mxu1 %v14322_v19 }
 0xfc9   : > { %13693 = vmatpush3.bf16.msra.mxu0 %v21270_v36  ;;  %13510 = vmatprep.subr.bf16.mxu1 %v21097_v38 }
 0xfca   : > { %13694 = vmatprep.subr.bf16.mxu0 %v21097_v38 }
 0xfcc   : > { %13511 = vmatpush3.bf16.msra.mxu1 %v14323_v56  ;;  %v19895_v56 = vld [vmem:[%s20759_s2] ss:$0 sm:$0xff] }
 0xfcd   : > { %13695 = vmatpush3.bf16.msra.mxu0 %v21271_v45  ;;  %13512 = vmatprep.subr.bf16.mxu1 %v21097_v38 }
 0xfce   : > { %13720 = vmatprep.subr.bf16.mxu0 %v21097_v38 }
 0xfd0   : > { %13513 = vmatpush3.bf16.msra.mxu1 %v14324_v28  ;;  %v19967_v28 = vld [vmem:[%s20758_s1 + $0x90] sm:$0xff]  }
 0xfd1   : > { %13514 = vmatprep.subr.bf16.mxu1 %v21097_v38 }
 0xfd4   : > { %13515 = vmatpush3.bf16.msra.mxu1 %v14325_v18  ;;  %v19992_v18 = vld [vmem:[%s15034_s14 + $0x58] sm:$0xf] }
 0xfd5   : > { %13540 = vmatprep.subr.bf16.mxu1 %v21097_v38 }
 0xfda   : > { %v7219_v58 = vpop.f32.mrf.mxu0 }
 0xfdc   : > { %v13498_v29 = vpop.f32.mrf.mxu0 }
 0xfde   : > { %v7222_v15 = vpop.f32.mrf.mxu0 }
 0xfdf   : > { %v21290_v15 = vld [vmem:[#allocation17_spill] sm:$0xff] }
 0xfe0   : > { %v13499_v6 = vpop.f32.mrf.mxu0 }
 0xfe1   : > { %v19976_v6 = vld [vmem:[%s20758_s1 + $0x88] sm:$0xff]  }
 0xff7   : > { %v6852_v33 = vpop.f32.mrf.mxu1 }
 0xff8   : > { %v19878_v46 = vadd.f32 %v6852_v33, %v21282_v14  ;;  %v19899_v33 = vld [vmem:[%s15034_s14 + $0x84] sm:$0xf] }
 0xff9   : > { %v13318_v32 = vpop.f32.mrf.mxu1  ;;  %21283 = vst [vmem:[#allocation7_spill] sm:$0xff] %v19899_v33  ;;  %13697 = vmatmul.mubr.bf16.vlgmr.msra.gmra.mxu0 %v19899_v33  ;;  %v20227_v33 = vld [vmem:[%s20758_s1 + $0x1c8] sm:$0xff]  }
 0xffa   : > { %13721 = vmatpush3.bf16.msra.mxu0 %v19296_v8  ;;  %13736 = vmatprep.mubr.msk.bf16.mxu0 %vm14808_vm0, %v21097_v38  ;;  %v21291_v32 = vld [vmem:[#allocation6_spill] sm:$0xff]  ;;  %21313 = vst [vmem:[#allocation35_spill] sm:$0xff] %v20227_v33 }
 0xffb   : > { %v6855_v31 = vpop.f32.mrf.mxu1  ;;  %13722 = vmatprep.subr.bf16.mxu0 %v21097_v38 }
 0xffc   : > { %v21292_v31 = vld [vmem:[#allocation10_spill] sm:$0xff] }
 0xffd   : > { %v13319_v3 = vpop.f32.mrf.mxu1 }
 0xffe   : > { %13723 = vmatpush3.bf16.msra.mxu0 %v19307_v0  ;;  %v19985_v3 = vld [vmem:[%s20758_s1 + $0x80] sm:$0xff]  }
 0xfff   : > { %13724 = vmatprep.subr.bf16.mxu0 %v21097_v38 }
0x1002   : > { %13725 = vmatpush3.bf16.msra.mxu0 %v19318_v59  ;;  %v21284_v59 = vld [vmem:[#allocation29_spill] sm:$0xff] }
0x1003   : > { %13726 = vmatprep.subr.bf16.mxu0 %v21097_v38 }
0x1006   : > { %13727 = vmatpush3.bf16.msra.mxu0 %v19327_v39  ;;  %v21285_v39 = vld [vmem:[#allocation16_spill] sm:$0xff] }
0x1007   : > { %13728 = vmatprep.subr.bf16.mxu0 %v21097_v38 }
0x100a   : > { %13729 = vmatpush3.bf16.msra.mxu0 %v19336_v1  ;;  %v21286_v1 = vld [vmem:[#allocation14_spill] sm:$0xff] }
0x100b   : > { %13730 = vmatprep.subr.bf16.mxu0 %v21097_v38 }
0x100e   : > { %13731 = vmatpush3.bf16.msra.mxu0 %v19345_v63  ;;  %v21287_v63 = vld [vmem:[#allocation4_spill] sm:$0xff] }
0x100f   : > { %13732 = vmatprep.subr.bf16.mxu0 %v21097_v38 }
0x1012   : > { %13733 = vmatpush3.bf16.msra.mxu0 %v19354_v60  ;;  %v21288_v60 = vld [vmem:[#allocation12_spill] sm:$0xff] }
0x1013   : > { %13734 = vmatprep.subr.bf16.mxu0 %v21097_v38 }
0x1016   : > { %13735 = vmatpush3.bf16.msra.mxu0 %v19633_v10 }
0x1017   : > { %v6933_v34 = vpop.f32.mrf.mxu1  ;;  %13760 = vmatprep.subr.bf16.mxu0 %v21097_v38 }
0x1018   : > { %v6934_v5 = vadd.f32 %v6933_v34, %v19565_v20  ;;  %v19998_v34 = vld [vmem:[%s20758_s1 + $0x138] sm:$0xff]  }
0x1019   : > { %v13358_v37 = vpop.f32.mrf.mxu1  ;;  %13737 = vmatmul.mubr.bf16.vlgmr.msra.gmra.mxu0 %v19747_v13  ;;  %v21289_v13 = vld [vmem:[#allocation8_spill] sm:$0xff] }
0x101a   : > { %v6979_v2 = vadd.f32 %v19764_v9, %v6934_v5  ;;  %13761 = vmatpush3.bf16.msra.mxu0 %v19648_v43  ;;  %13776 = vmatprep.mubr.msk.bf16.mxu0 %vm14808_vm0, %v21097_v38  ;;  %v21293_v37 = vld [vmem:[#allocation30_spill] sm:$0xff] }
0x101b   : > { %v6936_v26 = vpop.f32.mrf.mxu1  ;;  %13762 = vmatprep.subr.bf16.mxu0 %v21097_v38  ;;  %v20056_v5 = vld [vmem:[%s20758_s1 + $0x118] sm:$0xff]  }
0x101c   : > { %v20010_v26 = vld [vmem:[%s20758_s1 + $0x130] sm:$0xff]  }
0x101d   : > { %v13359_v7 = vpop.f32.mrf.mxu1 }
0x101e   : > { %13763 = vmatpush3.bf16.msra.mxu0 %v21285_v39  ;;  %v20016_v7 = vld [vmem:[%s20758_s1 + $0x178] sm:$0xff]  }
0x101f   : > { %13764 = vmatprep.subr.bf16.mxu0 %v21097_v38 }
0x1022   : > { %13765 = vmatpush3.bf16.msra.mxu0 %v21287_v63 }
0x1023   : > { %13766 = vmatprep.subr.bf16.mxu0 %v21097_v38 }
0x1026   : > { %13767 = vmatpush3.bf16.msra.mxu0 %v21289_v13 }
0x1027   : > { %13768 = vmatprep.subr.bf16.mxu0 %v21097_v38 }
0x102a   : > { %13769 = vmatpush3.bf16.msra.mxu0 %v19709_v24 }
0x102b   : > { %13770 = vmatprep.subr.bf16.mxu0 %v21097_v38 }
0x102e   : > { %13771 = vmatpush3.bf16.msra.mxu0 %v19967_v28 }
0x102f   : > { %13772 = vmatprep.subr.bf16.mxu0 %v21097_v38 }
0x1032   : > { %13773 = vmatpush3.bf16.msra.mxu0 %v19976_v6 }
0x1033   : > { %13774 = vmatprep.subr.bf16.mxu0 %v21097_v38 }
0x1036   : > { %13775 = vmatpush3.bf16.msra.mxu0 %v19985_v3 }
0x1037   : > { %v7014_v44 = vpop.f32.mrf.mxu1  ;;  %13800 = vmatprep.subr.bf16.mxu0 %v21097_v38 }
0x1038   : > { %v7020_v47 = vadd.f32 %v7014_v44, %v6979_v2  ;;  %v20026_v44 = vld [vmem:[%s20758_s1 + $0x128] sm:$0xff]   ;;  %v20062_v2 = vld [vmem:[%s20758_s1 + $0x160] sm:$0xff]  }
0x1039   : > { %v13398_v36 = vpop.f32.mrf.mxu1  ;;  %13777 = vmatmul.mubr.bf16.vlgmr.msra.gmra.mxu0 %v19992_v18 }
0x103a   : > { %v7061_v40 = vadd.f32 %v19807_v25, %v7020_v47  ;;  %13801 = vmatpush3.bf16.msra.mxu0 %v19998_v34  ;;  %13816 = vmatprep.mubr.msk.bf16.mxu0 %vm14808_vm0, %v21097_v38  ;;  %v20032_v36 = vld [vmem:[%s20758_s1 + $0x170] sm:$0xff]  }
0x103b   : > { %v7017_v45 = vpop.f32.mrf.mxu1  ;;  %13802 = vmatprep.subr.bf16.mxu0 %v21097_v38  ;;  %v20070_v47 = vld [vmem:[%s20758_s1 + $0x110] sm:$0xff]  }
0x103d   : > { %v13399_v50 = vpop.f32.mrf.mxu1 }
0x103e   : > { %13803 = vmatpush3.bf16.msra.mxu0 %v20010_v26 }
0x103f   : > { %13804 = vmatprep.subr.bf16.mxu0 %v21097_v38 }
0x1042   : > { %13805 = vmatpush3.bf16.msra.mxu0 %v20026_v44 }
0x1043   : > { %13806 = vmatprep.subr.bf16.mxu0 %v21097_v38 }
0x1057   : > { %v7096_v30 = vpop.f32.mrf.mxu1 }
0x1058   : > { %v7102_v35 = vadd.f32 %v7096_v30, %v7061_v40  ;;  %v20042_v30 = vld [vmem:[%s20758_s1 + $0x120] sm:$0xff]   ;;  %v20076_v40 = vld [vmem:[%s20758_s1 + $0x158] sm:$0xff]  }
0x1059   : > { %v13438_v53 = vpop.f32.mrf.mxu1  ;;  %13807 = vmatpush3.bf16.msra.mxu0 %v20042_v30 }
0x105a   : > { %v7143_v22 = vadd.f32 %v7137_v41, %v7102_v35  ;;  %v20048_v53 = vld [vmem:[%s20758_s1 + $0x168] sm:$0xff]   ;;  %13808 = vmatprep.subr.bf16.mxu0 %v21097_v38 }
0x105b   : > { %v7099_v27 = vpop.f32.mrf.mxu1  ;;  %v20084_v35 = vld [vmem:[%s20758_s1 + $0x108] sm:$0xff]  }
0x105d   : > { %v13439_v4 = vpop.f32.mrf.mxu1  ;;  %13809 = vmatpush3.bf16.msra.mxu0 %v20056_v5 }
0x105e   : > { %13810 = vmatprep.subr.bf16.mxu0 %v21097_v38 }
0x1061   : > { %13811 = vmatpush3.bf16.msra.mxu0 %v20070_v47 }
0x1062   : > { %13812 = vmatprep.subr.bf16.mxu0 %v21097_v38 }
0x1065   : > { %13813 = vmatpush3.bf16.msra.mxu0 %v20084_v35 }
0x1066   : > { %13814 = vmatprep.subr.bf16.mxu0 %v21097_v38 }
0x1077   : > { %v7178_v23 = vpop.f32.mrf.mxu1 }
0x1078   : > { %v7184_v48 = vadd.f32 %v7178_v23, %v7143_v22  ;;  %v20090_v22 = vld [vmem:[%s20758_s1 + $0x150] sm:$0xff]   ;;  %v20098_v23 = vld [vmem:[%s20758_s1 + $0x100] sm:$0xff]  }
0x1079   : > { %v13478_v61 = vpop.f32.mrf.mxu1  ;;  %21294 = vst [vmem:[#allocation20_spill] sm:$0xff] %v20090_v22  ;;  %21295 = vst [vmem:[#allocation9_spill] sm:$0xff] %v20098_v23  ;;  %13815 = vmatpush3.bf16.msra.mxu0 %v20098_v23 }
0x107a   : > { %v7225_v57 = vadd.f32 %v7219_v58, %v7184_v48  ;;  %v19906_v58 = vpop.f32.mrf.mxu0  ;;  %v20104_v48 = vld [vmem:[%s20758_s1 + $0x148] sm:$0xff]   ;;  %13840 = vmatprep.subr.bf16.mxu0 %v21097_v38 }
0x107b   : > { %v7181_v19 = vpop.f32.mrf.mxu1  ;;  %21296 = vst [vmem:[#allocation22_spill] sm:$0xff] %v20104_v48  ;;  %v20110_v61 = vld [vmem:[%s15034_s14 + $0x6c] sm:$0xf] }
0x107c   : > { %v7226_v29 = vadd.f32 %v19895_v56, %v7225_v57  ;;  %v13538_v8 = vpop.f32.mrf.mxu0  ;;  %21297 = vst [vmem:[#allocation19_spill] sm:$0xff] %v20110_v61  ;;  %13817 = vmatmul.mubr.bf16.vlgmr.msra.gmra.mxu0 %v20110_v61  ;;  %v20116_v57 = vld [vmem:[%s20758_s1 + $0x1b8] sm:$0xff]   ;;  %v20124_v19 = vld [vmem:[%s20758_s1 + $0x140] sm:$0xff]  }
0x107d   : > { %v13479_v20 = vpop.f32.mrf.mxu1  ;;  %21298 = vst [vmem:[#allocation18_spill] sm:$0xff] %v20116_v57  ;;  %13841 = vmatpush3.bf16.msra.mxu0 %v20116_v57  ;;  %13856 = vmatprep.mubr.msk.bf16.mxu0 %vm14808_vm0, %v21097_v38  ;;  %21299 = vst [vmem:[#allocation15_spill] sm:$0xff] %v20124_v19 }
0x107e   : > { %vm7227_vm13 = vcmp.ge.f32.partialorder %v7226_v29, 0.0  ;;  %v7228_v9 = vmul.f32 0.2, %v7226_v29  ;;  %v7374_v14 = vpop.f32.mrf.mxu0  ;;  %13842 = vmatprep.subr.bf16.mxu0 %v21097_v38  ;;  %v20139_v20 = vld [vmem:[%s20758_s1 + $0x1f8] sm:$0xff]  }
0x107f   : > { %21301 = vst [vmem:[#allocation21_spill] sm:$0xff] %v20139_v20  ;;  %v20165_v14 = vld [vmem:[%s20758_s1 + $0x1a0] sm:$0xff]  }
0x1080   : > { %v7229_v25 = vsel %vm7227_vm13, %v7226_v29, %v7228_v9  ;;  %v13539_v0 = vpop.f32.mrf.mxu0  ;;  %v20133_v29 = vld [vmem:[%s20758_s1 + $0x1b0] sm:$0xff]   ;;  %v20149_v9 = vld [vmem:[%s20758_s1 + $0x1a8] sm:$0xff]   ;;  %21304 = vst [vmem:[#allocation27_spill] sm:$0xff] %v20165_v14 }
0x1081   : > { %v7230_v41 = vpack.c.bf16 %v7229_v25, %v7229_v25  ;;  %21300 = vst [vmem:[#allocation5_spill] sm:$0xff] %v20133_v29  ;;  %13843 = vmatpush3.bf16.msra.mxu0 %v20133_v29  ;;  %21302 = vst [vmem:[#allocation24_spill] sm:$0xff] %v20149_v9  ;;  %v20155_v25 = vld [vmem:[%s20758_s1 + $0x1f0] sm:$0xff]   ;;  %v20171_v0 = vld [vmem:[%s20758_s1 + $0x1e8] sm:$0xff]  }
0x1082   : > { %v20037_v45 = vpop.f32.mrf.mxu0  ;;  %13844 = vmatprep.subr.bf16.mxu0 %v21097_v38  ;;  %21303 = vst [vmem:[#allocation34_spill] sm:$0xff] %v20155_v25  ;;  %21305 = vst [vmem:[#allocation11_spill] sm:$0xff] %v20171_v0 }
0x1083   : > { %13517 = vmatmul.mubr.bf16.vlgmr.msra.gmra.mxu1 %v7230_v41 }
0x1084   : > { %13541 = vmatpush3.bf16.msra.mxu1 %v19570_v54  ;;  %13556 = vmatprep.mubr.msk.bf16.mxu1 %vm14808_vm0, %v21097_v38  ;;  %v13578_v50 = vpop.f32.mrf.mxu0 }
0x1085   : > { %13542 = vmatprep.subr.bf16.mxu1 %v21097_v38  ;;  %13845 = vmatpush3.bf16.msra.mxu0 %v20149_v9  ;;  %v20179_v50 = vld [vmem:[%s20758_s1 + $0x198] sm:$0xff]  }
0x1086   : > { %v7454_v27 = vpop.f32.mrf.mxu0  ;;  %13846 = vmatprep.subr.bf16.mxu0 %v21097_v38  ;;  %21306 = vst [vmem:[#allocation31_spill] sm:$0xff] %v20179_v50 }
0x1087   : > { %v20185_v27 = vld [vmem:[%s20758_s1 + $0x1e0] sm:$0xff]  }
0x1088   : > { %13543 = vmatpush3.bf16.msra.mxu1 %v19581_v16  ;;  %v13579_v4 = vpop.f32.mrf.mxu0  ;;  %21307 = vst [vmem:[#allocation23_spill] sm:$0xff] %v20185_v27 }
0x1089   : > { %13544 = vmatprep.subr.bf16.mxu1 %v21097_v38  ;;  %13847 = vmatpush3.bf16.msra.mxu0 %v20165_v14  ;;  %v20193_v4 = vld [vmem:[%s20758_s1 + $0x190] sm:$0xff]  }
0x108a   : > { %v20160_v41 = vpop.f32.mrf.mxu0  ;;  %13848 = vmatprep.subr.bf16.mxu0 %v21097_v38  ;;  %21308 = vst [vmem:[#allocation13_spill] sm:$0xff] %v20193_v4 }
0x108c   : > { %13545 = vmatpush3.bf16.msra.mxu1 %v19590_v55  ;;  %v13618_v8 = vpop.f32.mrf.mxu0 }
0x108d   : > { %13546 = vmatprep.subr.bf16.mxu1 %v21097_v38  ;;  %13849 = vmatpush3.bf16.msra.mxu0 %v20179_v50  ;;  %v20199_v8 = vld [vmem:[%s20758_s1 + $0x1d8] sm:$0xff]  }
0x108e   : > { %13850 = vmatprep.subr.bf16.mxu0 %v21097_v38  ;;  %21309 = vst [vmem:[#allocation26_spill] sm:$0xff] %v20199_v8 }
0x1090   : > { %13547 = vmatpush3.bf16.msra.mxu1 %v19599_v42 }
0x1091   : > { %13548 = vmatprep.subr.bf16.mxu1 %v21097_v38  ;;  %13851 = vmatpush3.bf16.msra.mxu0 %v20193_v4 }
0x1092   : > { %13852 = vmatprep.subr.bf16.mxu0 %v21097_v38 }
0x1094   : > { %13549 = vmatpush3.bf16.msra.mxu1 %v19608_v21 }
0x1095   : > { %13550 = vmatprep.subr.bf16.mxu1 %v21097_v38 }
0x1098   : > { %13551 = vmatpush3.bf16.msra.mxu1 %v19617_v62 }
0x1099   : > { %13552 = vmatprep.subr.bf16.mxu1 %v21097_v38 }
0x109c   : > { %13553 = vmatpush3.bf16.msra.mxu1 %v19626_v52 }
0x109d   : > { %13554 = vmatprep.subr.bf16.mxu1 %v21097_v38 }
0x10a0   : > { %13555 = vmatpush3.bf16.msra.mxu1 %v19640_v17 }
0x10a1   : > { %13580 = vmatprep.subr.bf16.mxu1 %v21097_v38 }
0x10a3   : > { %13557 = vmatmul.mubr.bf16.vlgmr.msra.gmra.mxu1 %v21284_v59  ;;  %v7536_v59 = vpop.f32.mrf.mxu0 }
0x10a4   : > { %13581 = vmatpush3.bf16.msra.mxu1 %v21286_v1  ;;  %13596 = vmatprep.mubr.msk.bf16.mxu1 %vm14808_vm0, %v21097_v38  ;;  %v20207_v59 = vld [vmem:[%s20758_s1 + $0x188] sm:$0xff]  }
0x10a5   : > { %13582 = vmatprep.subr.bf16.mxu1 %v21097_v38  ;;  %21310 = vst [vmem:[#allocation25_spill] sm:$0xff] %v20207_v59  ;;  %13853 = vmatpush3.bf16.msra.mxu0 %v20207_v59  ;;  %v20236_v59 = vld [vmem:[%s20758_s1 + $0x238] sm:$0xff]  }
0x10a6   : > { %13854 = vmatprep.subr.bf16.mxu0 %v21097_v38  ;;  %21315 = vst [vmem:[#allocation33_spill] sm:$0xff] %v20236_v59 }
0x10a8   : > { %13583 = vmatpush3.bf16.msra.mxu1 %v21288_v60 }
0x10a9   : > { %13584 = vmatprep.subr.bf16.mxu1 %v21097_v38 }
0x10ac   : > { %13585 = vmatpush3.bf16.msra.mxu1 %v21290_v15 }
0x10ad   : > { %13586 = vmatprep.subr.bf16.mxu1 %v21097_v38 }
0x10b0   : > { %13587 = vmatpush3.bf16.msra.mxu1 %v21291_v32 }
0x10b1   : > { %13588 = vmatprep.subr.bf16.mxu1 %v21097_v38 }
0x10b4   : > { %13589 = vmatpush3.bf16.msra.mxu1 %v19716_v51 }
0x10b5   : > { %13590 = vmatprep.subr.bf16.mxu1 %v21097_v38 }
0x10b8   : > { %13591 = vmatpush3.bf16.msra.mxu1 %v21292_v31 }
0x10b9   : > { %13592 = vmatprep.subr.bf16.mxu1 %v21097_v38 }
0x10bc   : > { %13593 = vmatpush3.bf16.msra.mxu1 %v19734_v12 }
0x10bd   : > { %13594 = vmatprep.subr.bf16.mxu1 %v21097_v38 }
0x10c0   : > { %13595 = vmatpush3.bf16.msra.mxu1 %v19743_v11 }
0x10c1   : > { %13620 = vmatprep.subr.bf16.mxu1 %v21097_v38 }
0x10c3   : > { %13597 = vmatmul.mubr.bf16.vlgmr.msra.gmra.mxu1 %v21293_v37  ;;  %v13619_v37 = vpop.f32.mrf.mxu0 }
0x10c4   : > { %13621 = vmatpush3.bf16.msra.mxu1 %v20016_v7  ;;  %13636 = vmatprep.mubr.msk.bf16.mxu1 %vm14808_vm0, %v21097_v38  ;;  %v20213_v37 = vld [vmem:[%s20758_s1 + $0x1d0] sm:$0xff]  }
0x10c5   : > { %13622 = vmatprep.subr.bf16.mxu1 %v21097_v38  ;;  %21311 = vst [vmem:[#allocation36_spill] sm:$0xff] %v20213_v37 }
0x10c8   : > { %13623 = vmatpush3.bf16.msra.mxu1 %v20032_v36 }
0x10c9   : > { %13624 = vmatprep.subr.bf16.mxu1 %v21097_v38 }
0x10cc   : > { %13625 = vmatpush3.bf16.msra.mxu1 %v20048_v53 }
0x10cd   : > { %13626 = vmatprep.subr.bf16.mxu1 %v21097_v38 }
0x10d0   : > { %13627 = vmatpush3.bf16.msra.mxu1 %v20062_v2 }
0x10d1   : > { %13628 = vmatprep.subr.bf16.mxu1 %v21097_v38 }
0x10d4   : > { %13629 = vmatpush3.bf16.msra.mxu1 %v20076_v40 }
0x10d5   : > { %13630 = vmatprep.subr.bf16.mxu1 %v21097_v38 }
0x10d8   : > { %13631 = vmatpush3.bf16.msra.mxu1 %v20090_v22 }
0x10d9   : > { %13632 = vmatprep.subr.bf16.mxu1 %v21097_v38 }
0x10dc   : > { %13633 = vmatpush3.bf16.msra.mxu1 %v20104_v48 }
0x10dd   : > { %13634 = vmatprep.subr.bf16.mxu1 %v21097_v38 }
0x10e0   : > { %13635 = vmatpush3.bf16.msra.mxu1 %v20124_v19 }
0x10e1   : > { %13660 = vmatprep.subr.bf16.mxu1 %v21097_v38 }
0x10e3   : > { %13637 = vmatmul.mubr.bf16.vlgmr.msra.gmra.mxu1 %v20110_v61  ;;  %v20221_v61 = vld [vmem:[%s20758_s1 + $0x180] sm:$0xff]  }
0x10e4   : > { %13661 = vmatpush3.bf16.msra.mxu1 %v20139_v20  ;;  %13676 = vmatprep.mubr.msk.bf16.mxu1 %vm14808_vm0, %v21097_v38  ;;  %21312 = vst [vmem:[#allocation28_spill] sm:$0xff] %v20221_v61 }
0x10e5   : > { %13662 = vmatprep.subr.bf16.mxu1 %v21097_v38  ;;  %13855 = vmatpush3.bf16.msra.mxu0 %v20221_v61 }
0x10e6   : > { %13880 = vmatprep.subr.bf16.mxu0 %v21097_v38 }
0x10e8   : > { %13663 = vmatpush3.bf16.msra.mxu1 %v20155_v25 }
0x10e9   : > { %13664 = vmatprep.subr.bf16.mxu1 %v21097_v38 }
0x10ec   : > { %13665 = vmatpush3.bf16.msra.mxu1 %v20171_v0 }
0x10ed   : > { %13666 = vmatprep.subr.bf16.mxu1 %v21097_v38 }
0x10f0   : > { %13667 = vmatpush3.bf16.msra.mxu1 %v20185_v27 }
0x10f1   : > { %13668 = vmatprep.subr.bf16.mxu1 %v21097_v38 }
0x10f4   : > { %13669 = vmatpush3.bf16.msra.mxu1 %v20199_v8 }
0x10f5   : > { %13670 = vmatprep.subr.bf16.mxu1 %v21097_v38 }
0x10f8   : > { %13671 = vmatpush3.bf16.msra.mxu1 %v20213_v37  ;;  %v21314_v37 = vld [vmem:[#allocation32_spill] sm:$0xff] }
0x10f9   : > { %13672 = vmatprep.subr.bf16.mxu1 %v21097_v38  ;;  %13857 = vmatmul.mubr.bf16.vlgmr.msra.gmra.mxu0 %v21314_v37 }
0x10fa   : > { %13881 = vmatpush3.bf16.msra.mxu0 %v20236_v59  ;;  %13896 = vmatprep.mubr.msk.bf16.mxu0 %vm14808_vm0, %v21097_v38  ;;  %v20253_v59 = vld [vmem:[%s20758_s1 + $0x230] sm:$0xff]  }
0x10fb   : > { %13882 = vmatprep.subr.bf16.mxu0 %v21097_v38  ;;  %21317 = vst [vmem:[#allocation16_spill] sm:$0xff] %v20253_v59 }
0x10fc   : > { %13673 = vmatpush3.bf16.msra.mxu1 %v20227_v33  ;;  %v20244_v33 = vld [vmem:[%s20758_s1 + $0x1c0] sm:$0xff]  }
0x10fd   : > { %13674 = vmatprep.subr.bf16.mxu1 %v21097_v38  ;;  %21316 = vst [vmem:[#allocation29_spill] sm:$0xff] %v20244_v33 }
0x10fe   : > { %13883 = vmatpush3.bf16.msra.mxu0 %v20253_v59  ;;  %v20271_v59 = vld [vmem:[%s20758_s1 + $0x220] sm:$0xff]  }
0x10ff   : > { %13884 = vmatprep.subr.bf16.mxu0 %v21097_v38  ;;  %21319 = vst [vmem:[#allocation4_spill] sm:$0xff] %v20271_v59 }
0x1100   : > { %13675 = vmatpush3.bf16.msra.mxu1 %v20244_v33  ;;  %v20262_v33 = vld [vmem:[%s20758_s1 + $0x228] sm:$0xff]  }
0x1101   : > { %13700 = vmatprep.subr.bf16.mxu1 %v21097_v38  ;;  %21318 = vst [vmem:[#allocation14_spill] sm:$0xff] %v20262_v33 }
0x1102   : > { %13885 = vmatpush3.bf16.msra.mxu0 %v20262_v33  ;;  %v20278_v33 = vld [vmem:[%s20758_s1 + $0x218] sm:$0xff]  }
0x1103   : > { %13677 = vmatmul.mubr.bf16.vlgmr.msra.gmra.mxu1 %v21314_v37  ;;  %13886 = vmatprep.subr.bf16.mxu0 %v21097_v38  ;;  %v20266_v37 = vpop.f32.mrf.mxu0  ;;  %21320 = vst [vmem:[#allocation12_spill] sm:$0xff] %v20278_v33 }
0x1104   : > { %13716 = vmatprep.mubr.msk.bf16.mxu1 %vm14808_vm0, %v21097_v38 }
0x1105   : > { %v13658_v61 = vpop.f32.mrf.mxu0 }
0x1106   : > { %13887 = vmatpush3.bf16.msra.mxu0 %v20271_v59  ;;  %v20285_v61 = vld [vmem:[%s20758_s1 + $0x210] sm:$0xff]  }
0x1107   : > { %13888 = vmatprep.subr.bf16.mxu0 %v21097_v38  ;;  %v7618_v8 = vpop.f32.mrf.mxu0  ;;  %21321 = vst [vmem:[#allocation8_spill] sm:$0xff] %v20285_v61 }
0x1108   : > { %v20299_v8 = vld [vmem:[%s20758_s1 + $0x200] sm:$0xff]  }
0x1109   : > { %v13659_v4 = vpop.f32.mrf.mxu0  ;;  %21323 = vst [vmem:[#allocation6_spill] sm:$0xff] %v20299_v8 }
0x110a   : > { %13889 = vmatpush3.bf16.msra.mxu0 %v20278_v33  ;;  %v20292_v4 = vld [vmem:[%s20758_s1 + $0x208] sm:$0xff]  }
0x110b   : > { %13890 = vmatprep.subr.bf16.mxu0 %v21097_v38  ;;  %21322 = vst [vmem:[#allocation17_spill] sm:$0xff] %v20292_v4  ;;  %v14328_v33 = vld [vmem:[%s20760_s3 + $0x368] sm:$0xff]  }
0x110e   : > { %13891 = vmatpush3.bf16.msra.mxu0 %v20285_v61  ;;  %v14326_v61 = vld [vmem:[%s20760_s3 + $0x378] sm:$0xff]  }
0x110f   : > { %13892 = vmatprep.subr.bf16.mxu0 %v21097_v38  ;;  %13701 = vmatpush3.bf16.msra.mxu1 %v14326_v61  ;;  %v14330_v61 = vld [vmem:[%s20760_s3 + $0x358] sm:$0xff]  }
0x1110   : > { %13702 = vmatprep.subr.bf16.mxu1 %v21097_v38 }
0x1112   : > { %13893 = vmatpush3.bf16.msra.mxu0 %v20292_v4  ;;  %v14327_v4 = vld [vmem:[%s20760_s3 + $0x370] sm:$0xff]  }
0x1113   : > { %13894 = vmatprep.subr.bf16.mxu0 %v21097_v38  ;;  %13703 = vmatpush3.bf16.msra.mxu1 %v14327_v4  ;;  %v7697_v4 = vpop.f32.mrf.mxu0 }
0x1114   : > { %13704 = vmatprep.subr.bf16.mxu1 %v21097_v38 }
0x1115   : > { %v13698_v59 = vpop.f32.mrf.mxu0 }
0x1116   : > { %13895 = vmatpush3.bf16.msra.mxu0 %v20299_v8  ;;  %v14329_v8 = vld [vmem:[%s20760_s3 + $0x360] sm:$0xff]  }
0x1117   : > { %13920 = vmatprep.subr.bf16.mxu0 %v21097_v38  ;;  %13705 = vmatpush3.bf16.msra.mxu1 %v14328_v33  ;;  %v14331_v33 = vld [vmem:[%s20760_s3 + $0x350] sm:$0xff]   ;;  %v7700_v27 = vpop.f32.mrf.mxu0 }
0x1118   : > { %13706 = vmatprep.subr.bf16.mxu1 %v21097_v38  ;;  %v14333_v27 = vld [vmem:[%s20760_s3 + $0x340] sm:$0xff]  }
0x1119   : > { %v13699_v0 = vpop.f32.mrf.mxu0 }
0x111b   : > { %13707 = vmatpush3.bf16.msra.mxu1 %v14329_v8 }
0x111c   : > { %13708 = vmatprep.subr.bf16.mxu1 %v21097_v38 }
0x111f   : > { %13709 = vmatpush3.bf16.msra.mxu1 %v14330_v61  ;;  %v14332_v61 = vld [vmem:[%s20760_s3 + $0x348] sm:$0xff]  }
0x1120   : > { %13710 = vmatprep.subr.bf16.mxu1 %v21097_v38 }
0x1123   : > { %13711 = vmatpush3.bf16.msra.mxu1 %v14331_v33 }
0x1124   : > { %13712 = vmatprep.subr.bf16.mxu1 %v21097_v38 }
0x1127   : > { %13713 = vmatpush3.bf16.msra.mxu1 %v14332_v61 }
0x1128   : > { %13714 = vmatprep.subr.bf16.mxu1 %v21097_v38 }
0x112b   : > { %13715 = vmatpush3.bf16.msra.mxu1 %v14333_v27 }
0x112c   : > { %13740 = vmatprep.subr.bf16.mxu1 %v21097_v38 }
0x1143   : > { %v7330_v50 = vpop.f32.mrf.mxu1 }
0x1144   : > { %v20327_v8 = vadd.f32 %v7330_v50, %v19878_v46 }
0x1145   : > { %v13518_v14 = vpop.f32.mrf.mxu1 }
0x1146   : > { %21324 = vst [vmem:[#allocation10_spill] sm:$0xff] %v20327_v8 }
0x1147   : > { %v7333_v25 = vpop.f32.mrf.mxu1 }
0x1149   : > { %v13519_v59 = vpop.f32.mrf.mxu1 }
0x1163   : > { %v7411_v46 = vpop.f32.mrf.mxu1 }
0x1164   : > { %v7412_v19 = vadd.f32 %v7411_v46, %v19906_v58  ;;  %v14759_v46 = vld [vmem:[%s20758_s1 + $0x50] sm:$0xff]  }
0x1165   : > { %v13558_v0 = vpop.f32.mrf.mxu1 }
0x1166   : > { %v7457_v57 = vadd.f32 %v20037_v45, %v7412_v19  ;;  %v14754_v45 = vld [vmem:[%s20758_s1 + $0x78] sm:$0xff]  }
0x1167   : > { %v7414_v50 = vpop.f32.mrf.mxu1 }
0x1169   : > { %v13559_v14 = vpop.f32.mrf.mxu1 }
0x1183   : > { %v7492_v33 = vpop.f32.mrf.mxu1 }
0x1184   : > { %v7498_v27 = vadd.f32 %v7492_v33, %v7457_v57  ;;  %v14755_v57 = vld [vmem:[%s20758_s1 + $0x70] sm:$0xff]  }
0x1185   : > { %v13598_v8 = vpop.f32.mrf.mxu1  ;;  %v21345_v33 = vld [vmem:[#allocation33_spill] sm:$0xff] }
0x1186   : > { %v7539_v48 = vadd.f32 %v20160_v41, %v7498_v27  ;;  %v21348_v27 = vld [vmem:[#allocation14_spill] sm:$0xff] }
0x1187   : > { %v7495_v9 = vpop.f32.mrf.mxu1 }
0x1189   : > { %v13599_v20 = vpop.f32.mrf.mxu1 }
0x11a3   : > { %v7574_v25 = vpop.f32.mrf.mxu1 }
0x11a4   : > { %v7580_v23 = vadd.f32 %v7574_v25, %v7539_v48  ;;  %v21346_v25 = vld [vmem:[#allocation29_spill] sm:$0xff] }
0x11a5   : > { %v13638_v61 = vpop.f32.mrf.mxu1 }
0x11a6   : > { %v7621_v0 = vadd.f32 %v20266_v37, %v7580_v23  ;;  %v14756_v37 = vld [vmem:[%s20758_s1 + $0x68] sm:$0xff]  }
0x11a7   : > { %v7577_v29 = vpop.f32.mrf.mxu1 }
0x11a8   : > { %v20344_v29 = vld [vmem:[%s15034_s14 + $0x88] sm:$0xf] }
0x11a9   : > { %v13639_v59 = vpop.f32.mrf.mxu1  ;;  %13897 = vmatmul.mubr.bf16.vlgmr.msra.gmra.mxu0 %v20344_v29 }
0x11aa   : > { %13921 = vmatpush3.bf16.msra.mxu0 %v14754_v45  ;;  %13936 = vmatprep.mubr.msk.bf16.mxu0 %vm14808_vm0, %v21097_v38  ;;  %v21347_v59 = vld [vmem:[#allocation16_spill] sm:$0xff]  ;;  %v21353_v45 = vld [vmem:[#allocation6_spill] sm:$0xff] }
0x11ab   : > { %13922 = vmatprep.subr.bf16.mxu0 %v21097_v38 }
0x11ae   : > { %13923 = vmatpush3.bf16.msra.mxu0 %v14755_v57  ;;  %v14336_v57 = vld [vmem:[%s20760_s3 + $0x3a8] sm:$0xff]  }
0x11af   : > { %13924 = vmatprep.subr.bf16.mxu0 %v21097_v38 }
0x11b2   : > { %13925 = vmatpush3.bf16.msra.mxu0 %v14756_v37 }
0x11b3   : > { %13926 = vmatprep.subr.bf16.mxu0 %v21097_v38 }
0x11c3   : > { %v7656_v50 = vpop.f32.mrf.mxu1 }
0x11c4   : > { %v7662_v14 = vadd.f32 %v7656_v50, %v7621_v0 }
0x11c5   : > { %v13678_v8 = vpop.f32.mrf.mxu1 }
0x11c6   : > { %v7703_v9 = vadd.f32 %v7697_v4, %v7662_v14  ;;  %v14757_v4 = vld [vmem:[%s20758_s1 + $0x60] sm:$0xff]  }
0x11c7   : > { %v7659_v20 = vpop.f32.mrf.mxu1  ;;  %13927 = vmatpush3.bf16.msra.mxu0 %v14757_v4  ;;  %v21349_v14 = vld [vmem:[#allocation4_spill] sm:$0xff]  ;;  %v14339_v4 = vld [vmem:[%s20760_s3 + $0x390] sm:$0xff]  }
0x11c8   : > { %v7704_v61 = vadd.f32 %v19895_v56, %v7703_v9  ;;  %13928 = vmatprep.subr.bf16.mxu0 %v21097_v38  ;;  %v21350_v20 = vld [vmem:[#allocation12_spill] sm:$0xff] }
0x11c9   : > { %v13679_v22 = vpop.f32.mrf.mxu1 }
0x11ca   : > { %vm7705_vm14 = vcmp.ge.f32.partialorder %v7704_v61, 0.0  ;;  %v7706_v58 = vmul.f32 0.2, %v7704_v61  ;;  %v20353_v22 = vpop.f32.mrf.mxu0 }
0x11cc   : > { %v7707_v23 = vsel %vm7705_vm14, %v7704_v61, %v7706_v58  ;;  %v13738_v19 = vpop.f32.mrf.mxu0  ;;  %v21351_v61 = vld [vmem:[#allocation8_spill] sm:$0xff]  ;;  %v21352_v58 = vld [vmem:[#allocation17_spill] sm:$0xff] }
0x11cd   : > { %v7708_v48 = vpack.c.bf16 %v7707_v23, %v7707_v23  ;;  %v14334_v23 = vld [vmem:[%s20760_s3 + $0x3b8] sm:$0xff]   ;;  %v14337_v19 = vld [vmem:[%s20760_s3 + $0x3a0] sm:$0xff]  }
0x11ce   : > { %v7852_v41 = vpop.f32.mrf.mxu0 }
0x11cf   : > { %13717 = vmatmul.mubr.bf16.vlgmr.msra.gmra.mxu1 %v7708_v48  ;;  %v14335_v48 = vld [vmem:[%s20760_s3 + $0x3b0] sm:$0xff]   ;;  %v14338_v41 = vld [vmem:[%s20760_s3 + $0x398] sm:$0xff]  }
0x11d0   : > { %13741 = vmatpush3.bf16.msra.mxu1 %v19570_v54  ;;  %13756 = vmatprep.mubr.msk.bf16.mxu1 %vm14808_vm0, %v21097_v38  ;;  %v13739_v54 = vpop.f32.mrf.mxu0 }
0x11d1   : > { %13742 = vmatprep.subr.bf16.mxu1 %v21097_v38 }
0x11d4   : > { %13743 = vmatpush3.bf16.msra.mxu1 %v19581_v16  ;;  %v14758_v16 = vld [vmem:[%s20758_s1 + $0x58] sm:$0xff]  }
0x11d5   : > { %13744 = vmatprep.subr.bf16.mxu1 %v21097_v38  ;;  %13929 = vmatpush3.bf16.msra.mxu0 %v14758_v16 }
0x11d6   : > { %13930 = vmatprep.subr.bf16.mxu0 %v21097_v38 }
0x11d8   : > { %13745 = vmatpush3.bf16.msra.mxu1 %v19590_v55  ;;  %v14760_v55 = vld [vmem:[%s20758_s1 + $0x48] sm:$0xff]  }
0x11d9   : > { %13746 = vmatprep.subr.bf16.mxu1 %v21097_v38  ;;  %13931 = vmatpush3.bf16.msra.mxu0 %v14759_v46 }
0x11da   : > { %13932 = vmatprep.subr.bf16.mxu0 %v21097_v38 }
0x11dc   : > { %13747 = vmatpush3.bf16.msra.mxu1 %v19599_v42  ;;  %v14761_v42 = vld [vmem:[%s15034_s14 + $0x50] sm:$0xf] }
0x11dd   : > { %13748 = vmatprep.subr.bf16.mxu1 %v21097_v38  ;;  %13933 = vmatpush3.bf16.msra.mxu0 %v14760_v55  ;;  %v21354_v55 = vld [vmem:[#allocation10_spill] sm:$0xff] }
0x11de   : > { %13934 = vmatprep.subr.bf16.mxu0 %v21097_v38 }
0x11e0   : > { %13749 = vmatpush3.bf16.msra.mxu1 %v19608_v21  ;;  %v20453_v21 = vpop.f32.mrf.mxu0 }
0x11e1   : > { %13750 = vmatprep.subr.bf16.mxu1 %v21097_v38  ;;  %13935 = vmatpush3.bf16.msra.mxu0 %v19633_v10 }
0x11e2   : > { %13960 = vmatprep.subr.bf16.mxu0 %v21097_v38 }
0x11e4   : > { %13751 = vmatpush3.bf16.msra.mxu1 %v19617_v62  ;;  %13937 = vmatmul.mubr.bf16.vlgmr.msra.gmra.mxu0 %v19992_v18  ;;  %v13778_v62 = vpop.f32.mrf.mxu0  ;;  %v21337_v18 = vld [vmem:[#allocation23_spill] sm:$0xff] }
0x11e5   : > { %13752 = vmatprep.subr.bf16.mxu1 %v21097_v38  ;;  %13961 = vmatpush3.bf16.msra.mxu0 %v19648_v43  ;;  %v21326_v43 = vld [vmem:[#allocation9_spill] sm:$0xff] }
0x11e6   : > { %13976 = vmatprep.mubr.msk.bf16.mxu0 %vm14808_vm0, %v21097_v38  ;;  %13962 = vmatprep.subr.bf16.mxu0 %v21097_v38 }
0x11e8   : > { %13753 = vmatpush3.bf16.msra.mxu1 %v19626_v52  ;;  %v7932_v52 = vpop.f32.mrf.mxu0 }
0x11e9   : > { %13754 = vmatprep.subr.bf16.mxu1 %v21097_v38  ;;  %13963 = vmatpush3.bf16.msra.mxu0 %v21285_v39  ;;  %v21330_v39 = vld [vmem:[#allocation5_spill] sm:$0xff] }
0x11ea   : > { %13964 = vmatprep.subr.bf16.mxu0 %v21097_v38  ;;  %v13779_v10 = vpop.f32.mrf.mxu0  ;;  %v14340_v52 = vld [vmem:[%s20760_s3 + $0x388] sm:$0xff]  }
0x11ec   : > { %13755 = vmatpush3.bf16.msra.mxu1 %v19640_v17  ;;  %v21325_v17 = vld [vmem:[#allocation20_spill] sm:$0xff] }
0x11ed   : > { %13780 = vmatprep.subr.bf16.mxu1 %v21097_v38  ;;  %13965 = vmatpush3.bf16.msra.mxu0 %v21287_v63  ;;  %v21332_v63 = vld [vmem:[#allocation24_spill] sm:$0xff] }
0x11ee   : > { %13966 = vmatprep.subr.bf16.mxu0 %v21097_v38 }
0x11ef   : > { %13757 = vmatmul.mubr.bf16.vlgmr.msra.gmra.mxu1 %v14761_v42 }
0x11f0   : > { %13781 = vmatpush3.bf16.msra.mxu1 %v21286_v1  ;;  %13796 = vmatprep.mubr.msk.bf16.mxu1 %vm14808_vm0, %v21097_v38  ;;  %v21331_v1 = vld [vmem:[#allocation21_spill] sm:$0xff] }
0x11f1   : > { %13782 = vmatprep.subr.bf16.mxu1 %v21097_v38  ;;  %13967 = vmatpush3.bf16.msra.mxu0 %v21289_v13  ;;  %v20492_v13 = vpop.f32.mrf.mxu0 }
0x11f2   : > { %13968 = vmatprep.subr.bf16.mxu0 %v21097_v38 }
0x11f4   : > { %13783 = vmatpush3.bf16.msra.mxu1 %v21288_v60  ;;  %v21333_v60 = vld [vmem:[#allocation34_spill] sm:$0xff] }
0x11f5   : > { %13784 = vmatprep.subr.bf16.mxu1 %v21097_v38  ;;  %13969 = vmatpush3.bf16.msra.mxu0 %v19709_v24  ;;  %v14762_v24 = vld [vmem:[%s15034_s14 + $0x5c] sm:$0xf] }
0x11f6   : > { %13970 = vmatprep.subr.bf16.mxu0 %v21097_v38 }
0x11f8   : > { %13785 = vmatpush3.bf16.msra.mxu1 %v21290_v15  ;;  %v13818_v15 = vpop.f32.mrf.mxu0 }
0x11f9   : > { %13786 = vmatprep.subr.bf16.mxu1 %v21097_v38  ;;  %13971 = vmatpush3.bf16.msra.mxu0 %v19967_v28  ;;  %v21335_v28 = vld [vmem:[#allocation11_spill] sm:$0xff] }
0x11fa   : > { %13972 = vmatprep.subr.bf16.mxu0 %v21097_v38 }
0x11fc   : > { %13787 = vmatpush3.bf16.msra.mxu1 %v21291_v32  ;;  %v21334_v32 = vld [vmem:[#allocation27_spill] sm:$0xff] }
0x11fd   : > { %13788 = vmatprep.subr.bf16.mxu1 %v21097_v38  ;;  %13973 = vmatpush3.bf16.msra.mxu0 %v19976_v6  ;;  %v8014_v6 = vpop.f32.mrf.mxu0 }
0x11fe   : > { %13974 = vmatprep.subr.bf16.mxu0 %v21097_v38 }
0x1200   : > { %13789 = vmatpush3.bf16.msra.mxu1 %v19716_v51  ;;  %v14763_v51 = vld [vmem:[%s15034_s14 + $0x70] sm:$0xf] }
0x1201   : > { %13790 = vmatprep.subr.bf16.mxu1 %v21097_v38  ;;  %13975 = vmatpush3.bf16.msra.mxu0 %v19985_v3  ;;  %v21336_v3 = vld [vmem:[#allocation31_spill] sm:$0xff] }
0x1202   : > { %14000 = vmatprep.subr.bf16.mxu0 %v21097_v38 }
0x1204   : > { %13791 = vmatpush3.bf16.msra.mxu1 %v21292_v31  ;;  %13977 = vmatmul.mubr.bf16.vlgmr.msra.gmra.mxu0 %v14762_v24  ;;  %v13819_v31 = vpop.f32.mrf.mxu0 }
0x1205   : > { %13792 = vmatprep.subr.bf16.mxu1 %v21097_v38  ;;  %14001 = vmatpush3.bf16.msra.mxu0 %v19998_v34  ;;  %v21338_v34 = vld [vmem:[#allocation13_spill] sm:$0xff] }
0x1206   : > { %14016 = vmatprep.mubr.msk.bf16.mxu0 %vm14808_vm0, %v21097_v38  ;;  %14002 = vmatprep.subr.bf16.mxu0 %v21097_v38  ;;  %v20528_v0 = vpop.f32.mrf.mxu0 }
0x1208   : > { %13793 = vmatpush3.bf16.msra.mxu1 %v19734_v12  ;;  %v21328_v12 = vld [vmem:[#allocation18_spill] sm:$0xff]  ;;  %v13858_v50 = vpop.f32.mrf.mxu0 }
0x1209   : > { %13794 = vmatprep.subr.bf16.mxu1 %v21097_v38  ;;  %14003 = vmatpush3.bf16.msra.mxu0 %v20010_v26  ;;  %v21339_v26 = vld [vmem:[#allocation26_spill] sm:$0xff] }
0x120a   : > { %14004 = vmatprep.subr.bf16.mxu0 %v21097_v38  ;;  %v8096_v8 = vpop.f32.mrf.mxu0 }
0x120c   : > { %13795 = vmatpush3.bf16.msra.mxu1 %v19743_v11  ;;  %v21327_v11 = vld [vmem:[#allocation22_spill] sm:$0xff]  ;;  %v13859_v9 = vpop.f32.mrf.mxu0 }
0x120d   : > { %13820 = vmatprep.subr.bf16.mxu1 %v21097_v38  ;;  %14005 = vmatpush3.bf16.msra.mxu0 %v20026_v44  ;;  %v21340_v44 = vld [vmem:[#allocation25_spill] sm:$0xff] }
0x120e   : > { %14006 = vmatprep.subr.bf16.mxu0 %v21097_v38 }
0x120f   : > { %13797 = vmatmul.mubr.bf16.vlgmr.msra.gmra.mxu1 %v19790_v49  ;;  %v21329_v49 = vld [vmem:[#allocation15_spill] sm:$0xff] }
0x1210   : > { %13821 = vmatpush3.bf16.msra.mxu1 %v20016_v7  ;;  %13836 = vmatprep.mubr.msk.bf16.mxu1 %vm14808_vm0, %v21097_v38 }
0x1211   : > { %13822 = vmatprep.subr.bf16.mxu1 %v21097_v38  ;;  %14007 = vmatpush3.bf16.msra.mxu0 %v20042_v30  ;;  %v21341_v30 = vld [vmem:[#allocation36_spill] sm:$0xff] }
0x1212   : > { %14008 = vmatprep.subr.bf16.mxu0 %v21097_v38 }
0x1214   : > { %13823 = vmatpush3.bf16.msra.mxu1 %v20032_v36 }
0x1215   : > { %13824 = vmatprep.subr.bf16.mxu1 %v21097_v38  ;;  %14009 = vmatpush3.bf16.msra.mxu0 %v20056_v5  ;;  %v21342_v5 = vld [vmem:[#allocation28_spill] sm:$0xff] }
0x1216   : > { %14010 = vmatprep.subr.bf16.mxu0 %v21097_v38 }
0x1218   : > { %13825 = vmatpush3.bf16.msra.mxu1 %v20048_v53 }
0x1219   : > { %13826 = vmatprep.subr.bf16.mxu1 %v21097_v38  ;;  %14011 = vmatpush3.bf16.msra.mxu0 %v20070_v47  ;;  %v21343_v47 = vld [vmem:[#allocation35_spill] sm:$0xff] }
0x121a   : > { %14012 = vmatprep.subr.bf16.mxu0 %v21097_v38 }
0x121c   : > { %13827 = vmatpush3.bf16.msra.mxu1 %v20062_v2 }
0x121d   : > { %13828 = vmatprep.subr.bf16.mxu1 %v21097_v38  ;;  %14013 = vmatpush3.bf16.msra.mxu0 %v20084_v35  ;;  %v21344_v35 = vld [vmem:[#allocation7_spill] sm:$0xff] }
0x121e   : > { %14014 = vmatprep.subr.bf16.mxu0 %v21097_v38 }
0x1220   : > { %13829 = vmatpush3.bf16.msra.mxu1 %v20076_v40 }
0x1221   : > { %13830 = vmatprep.subr.bf16.mxu1 %v21097_v38  ;;  %14015 = vmatpush3.bf16.msra.mxu0 %v21326_v43 }
0x1222   : > { %14040 = vmatprep.subr.bf16.mxu0 %v21097_v38 }
0x1224   : > { %13831 = vmatpush3.bf16.msra.mxu1 %v21325_v17  ;;  %14017 = vmatmul.mubr.bf16.vlgmr.msra.gmra.mxu0 %v14763_v51 }
0x1225   : > { %13832 = vmatprep.subr.bf16.mxu1 %v21097_v38  ;;  %14041 = vmatpush3.bf16.msra.mxu0 %v21328_v12 }
0x1226   : > { %14056 = vmatprep.mubr.msk.bf16.mxu0 %vm14808_vm0, %v21097_v38  ;;  %14042 = vmatprep.subr.bf16.mxu0 %v21097_v38 }
0x1228   : > { %13833 = vmatpush3.bf16.msra.mxu1 %v21327_v11 }
0x1229   : > { %13834 = vmatprep.subr.bf16.mxu1 %v21097_v38  ;;  %14043 = vmatpush3.bf16.msra.mxu0 %v21330_v39 }
0x122a   : > { %14044 = vmatprep.subr.bf16.mxu0 %v21097_v38 }
0x122c   : > { %13835 = vmatpush3.bf16.msra.mxu1 %v21329_v49 }
0x122d   : > { %13860 = vmatprep.subr.bf16.mxu1 %v21097_v38  ;;  %14045 = vmatpush3.bf16.msra.mxu0 %v21332_v63 }
0x122e   : > { %14046 = vmatprep.subr.bf16.mxu0 %v21097_v38 }
0x122f   : > { %13837 = vmatmul.mubr.bf16.vlgmr.msra.gmra.mxu1 %v14763_v51  ;;  %v14341_v51 = vld [vmem:[%s20760_s3 + $0x380] sm:$0xff]  }
0x1230   : > { %13861 = vmatpush3.bf16.msra.mxu1 %v21331_v1  ;;  %13876 = vmatprep.mubr.msk.bf16.mxu1 %vm14808_vm0, %v21097_v38 }
0x1231   : > { %13862 = vmatprep.subr.bf16.mxu1 %v21097_v38  ;;  %14047 = vmatpush3.bf16.msra.mxu0 %v21334_v32 }
0x1232   : > { %14048 = vmatprep.subr.bf16.mxu0 %v21097_v38 }
0x1234   : > { %13863 = vmatpush3.bf16.msra.mxu1 %v21333_v60 }
0x1235   : > { %13864 = vmatprep.subr.bf16.mxu1 %v21097_v38  ;;  %14049 = vmatpush3.bf16.msra.mxu0 %v21336_v3 }
0x1236   : > { %14050 = vmatprep.subr.bf16.mxu0 %v21097_v38 }
0x1238   : > { %13865 = vmatpush3.bf16.msra.mxu1 %v21335_v28 }
0x1239   : > { %13866 = vmatprep.subr.bf16.mxu1 %v21097_v38  ;;  %14051 = vmatpush3.bf16.msra.mxu0 %v21338_v34 }
0x123a   : > { %14052 = vmatprep.subr.bf16.mxu0 %v21097_v38 }
0x123c   : > { %13867 = vmatpush3.bf16.msra.mxu1 %v21337_v18 }
0x123d   : > { %13868 = vmatprep.subr.bf16.mxu1 %v21097_v38  ;;  %14053 = vmatpush3.bf16.msra.mxu0 %v21340_v44 }
0x123e   : > { %14054 = vmatprep.subr.bf16.mxu0 %v21097_v38 }
0x1240   : > { %13869 = vmatpush3.bf16.msra.mxu1 %v21339_v26 }
0x1241   : > { %13870 = vmatprep.subr.bf16.mxu1 %v21097_v38  ;;  %14055 = vmatpush3.bf16.msra.mxu0 %v21342_v5 }
0x1242   : > { %14080 = vmatprep.subr.bf16.mxu0 %v21097_v38 }
0x1244   : > { %13871 = vmatpush3.bf16.msra.mxu1 %v21341_v30  ;;  %14057 = vmatmul.mubr.bf16.vlgmr.msra.gmra.mxu0 %v21344_v35 }
0x1245   : > { %13872 = vmatprep.subr.bf16.mxu1 %v21097_v38  ;;  %14081 = vmatpush3.bf16.msra.mxu0 %v21345_v33 }
0x1246   : > { %14096 = vmatprep.mubr.msk.bf16.mxu0 %vm14808_vm0, %v21097_v38  ;;  %14082 = vmatprep.subr.bf16.mxu0 %v21097_v38 }
0x1248   : > { %13873 = vmatpush3.bf16.msra.mxu1 %v21343_v47 }
0x1249   : > { %13874 = vmatprep.subr.bf16.mxu1 %v21097_v38  ;;  %14083 = vmatpush3.bf16.msra.mxu0 %v21347_v59 }
0x124a   : > { %14084 = vmatprep.subr.bf16.mxu0 %v21097_v38 }
0x124c   : > { %13875 = vmatpush3.bf16.msra.mxu1 %v21346_v25 }
0x124d   : > { %13900 = vmatprep.subr.bf16.mxu1 %v21097_v38  ;;  %14085 = vmatpush3.bf16.msra.mxu0 %v21348_v27 }
0x124e   : > { %14086 = vmatprep.subr.bf16.mxu0 %v21097_v38 }
0x124f   : > { %13877 = vmatmul.mubr.bf16.vlgmr.msra.gmra.mxu1 %v21344_v35 }
0x1250   : > { %13916 = vmatprep.mubr.msk.bf16.mxu1 %vm14808_vm0, %v21097_v38  ;;  %13901 = vmatpush3.bf16.msra.mxu1 %v14334_v23 }
0x1251   : > { %14087 = vmatpush3.bf16.msra.mxu0 %v21349_v14  ;;  %13902 = vmatprep.subr.bf16.mxu1 %v21097_v38 }
0x1252   : > { %14088 = vmatprep.subr.bf16.mxu0 %v21097_v38 }
0x1254   : > { %13903 = vmatpush3.bf16.msra.mxu1 %v14335_v48 }
0x1255   : > { %14089 = vmatpush3.bf16.msra.mxu0 %v21350_v20  ;;  %13904 = vmatprep.subr.bf16.mxu1 %v21097_v38 }
0x1256   : > { %14090 = vmatprep.subr.bf16.mxu0 %v21097_v38 }
0x1258   : > { %13905 = vmatpush3.bf16.msra.mxu1 %v14336_v57  ;;  %v8905_v57 = vld [vmem:[%s15034_s14 + $0x8c] sm:$0xf] }
0x1259   : > { %14091 = vmatpush3.bf16.msra.mxu0 %v21351_v61  ;;  %13906 = vmatprep.subr.bf16.mxu1 %v21097_v38 }
0x125a   : > { %14092 = vmatprep.subr.bf16.mxu0 %v21097_v38 }
0x125c   : > { %13907 = vmatpush3.bf16.msra.mxu1 %v14337_v19 }
0x125d   : > { %14093 = vmatpush3.bf16.msra.mxu0 %v21352_v58  ;;  %13908 = vmatprep.subr.bf16.mxu1 %v21097_v38 }
0x125e   : > { %14094 = vmatprep.subr.bf16.mxu0 %v21097_v38 }
0x1260   : > { %13909 = vmatpush3.bf16.msra.mxu1 %v14338_v41 }
0x1261   : > { %14095 = vmatpush3.bf16.msra.mxu0 %v21353_v45  ;;  %13910 = vmatprep.subr.bf16.mxu1 %v21097_v38 }
0x1264   : > { %13911 = vmatpush3.bf16.msra.mxu1 %v14339_v4  ;;  %14097 = vmatmul.mubr.bf16.vlgmr.msra.gmra.mxu0 %v8905_v57  ;;  %v14766_v4 = vld [vmem:[%s20758_s1 + $0x28] sm:$0xff]  }
0x1265   : > { %13912 = vmatprep.subr.bf16.mxu1 %v21097_v38 }
0x1268   : > { %13913 = vmatpush3.bf16.msra.mxu1 %v14340_v52  ;;  %v14772_v52 = vld [vmem:[%s15034_s14 + $0x54] sm:$0xf] }
0x1269   : > { %v8175_v37 = vpop.f32.mrf.mxu0  ;;  %13914 = vmatprep.subr.bf16.mxu1 %v21097_v38 }
0x126b   : > { %v13898_v54 = vpop.f32.mrf.mxu0 }
0x126c   : > { %13915 = vmatpush3.bf16.msra.mxu1 %v14341_v51  ;;  %v14775_v51 = vld [vmem:[%s20758_s1 + $0xe8] sm:$0xff]  }
0x126d   : > { %v8178_v16 = vpop.f32.mrf.mxu0  ;;  %13940 = vmatprep.subr.bf16.mxu1 %v21097_v38 }
0x126e   : > { %v14767_v16 = vld [vmem:[%s20758_s1 + $0x20] sm:$0xff]  }
0x126f   : > { %v13899_v24 = vpop.f32.mrf.mxu0 }
0x1270   : > { %v14770_v24 = vld [vmem:[%s20758_s1 + $0x8] sm:$0xff]  }
0x128f   : > { %v7808_v46 = vpop.f32.mrf.mxu1 }
0x1290   : > { %v20563_v42 = vadd.f32 %v7808_v46, %v21354_v55  ;;  %v14768_v46 = vld [vmem:[%s20758_s1 + $0x18] sm:$0xff]   ;;  %v14769_v55 = vld [vmem:[%s20758_s1 + $0x10] sm:$0xff]  }
0x1291   : > { %v13718_v62 = vpop.f32.mrf.mxu1 }
0x1292   : > { %v14771_v62 = vld [vmem:[%s20758_s1] sm:$0xff]  }
0x1293   : > { %v7811_v10 = vpop.f32.mrf.mxu1 }
0x1294   : > { %v14773_v10 = vld [vmem:[%s20758_s1 + $0xf8] sm:$0xff]  }
0x1295   : > { %v13719_v43 = vpop.f32.mrf.mxu1 }
0x1296   : > { %v14774_v43 = vld [vmem:[%s20758_s1 + $0xf0] sm:$0xff]  }
0x12a4   : > { %v20580_v41 = vpop.f32.mrf.mxu0 }
0x12af   : > { %v7889_v12 = vpop.f32.mrf.mxu1 }
0x12b0   : > { %v7890_v33 = vadd.f32 %v7889_v12, %v20353_v22  ;;  %v14776_v12 = vld [vmem:[%s20758_s1 + $0xe0] sm:$0xff]  }
0x12b1   : > { %v13758_v39 = vpop.f32.mrf.mxu1 }
0x12b2   : > { %v7935_v59 = vadd.f32 %v20453_v21, %v7890_v33  ;;  %v14777_v39 = vld [vmem:[%s20758_s1 + $0xd8] sm:$0xff]  }
0x12b3   : > { %v7892_v63 = vpop.f32.mrf.mxu1 }
0x12b4   : > { %v14778_v63 = vld [vmem:[%s20758_s1 + $0xd0] sm:$0xff]  }
0x12b5   : > { %v13759_v15 = vpop.f32.mrf.mxu1 }
0x12b6   : > { %v14779_v15 = vld [vmem:[%s20758_s1 + $0xc8] sm:$0xff]  }
0x12cf   : > { %v7970_v32 = vpop.f32.mrf.mxu1 }
0x12d0   : > { %v7976_v27 = vadd.f32 %v7970_v32, %v7935_v59  ;;  %v14780_v32 = vld [vmem:[%s20758_s1 + $0xc0] sm:$0xff]  }
0x12d1   : > { %v13798_v6 = vpop.f32.mrf.mxu1 }
0x12d2   : > { %v8017_v50 = vadd.f32 %v20492_v13, %v7976_v27  ;;  %v14764_v13 = vld [vmem:[%s20758_s1 + $0x38] sm:$0xff]  }
0x12d3   : > { %v7973_v31 = vpop.f32.mrf.mxu1  ;;  %v21355_v6 = vld [vmem:[#allocation19_spill] sm:$0xff] }
0x12d5   : > { %v13799_v3 = vpop.f32.mrf.mxu1 }
0x12ef   : > { %v8052_v34 = vpop.f32.mrf.mxu1 }
0x12f0   : > { %v8058_v14 = vadd.f32 %v8052_v34, %v8017_v50  ;;  %v14348_v50 = vld [vmem:[%s20760_s3 + $0x3c8] sm:$0xff]  }
0x12f1   : > { %v13838_v44 = vpop.f32.mrf.mxu1 }
0x12f2   : > { %v8099_v8 = vadd.f32 %v20528_v0, %v8058_v14 }
0x12f3   : > { %v8055_v5 = vpop.f32.mrf.mxu1 }
0x12f4   : > { %v14347_v5 = vld [vmem:[%s20760_s3 + $0x3d0] sm:$0xff]  }
0x12f5   : > { %v13839_v35 = vpop.f32.mrf.mxu1 }
0x130f   : > { %v8134_v9 = vpop.f32.mrf.mxu1 }
0x1310   : > { %v8140_v20 = vadd.f32 %v8134_v9, %v8099_v8  ;;  %v14349_v9 = vld [vmem:[%s20760_s3 + $0x3c0] sm:$0xff]  }
0x1311   : > { %v13878_v61 = vpop.f32.mrf.mxu1 }
0x1312   : > { %v8181_v58 = vadd.f32 %v8175_v37, %v8140_v20  ;;  %v14765_v37 = vld [vmem:[%s20758_s1 + $0x30] sm:$0xff]  }
0x1313   : > { %v8137_v45 = vpop.f32.mrf.mxu1 }
0x1314   : > { %v8182_v23 = vadd.f32 %v19895_v56, %v8181_v58  ;;  %v13938_v56 = vpop.f32.mrf.mxu0 }
0x1315   : > { %v13879_v48 = vpop.f32.mrf.mxu1 }
0x1316   : > { %vm8183_vm15 = vcmp.ge.f32.partialorder %v8182_v23, 0.0  ;;  %v8184_v19 = vmul.f32 0.2, %v8182_v23  ;;  %v8330_v0 = vpop.f32.mrf.mxu0 }
0x1318   : > { %v8185_v22 = vsel %vm8183_vm15, %v8182_v23, %v8184_v19  ;;  %v13939_v54 = vpop.f32.mrf.mxu0 }
0x1319   : > { %v8186_v21 = vpack.c.bf16 %v8185_v22, %v8185_v22 }
0x131a   : > { %v20658_v31 = vpop.f32.mrf.mxu0 }
0x131b   : > { %13917 = vmatmul.mubr.bf16.vlgmr.msra.gmra.mxu1 %v8186_v21 }
0x131c   : > { %13941 = vmatpush3.bf16.msra.mxu1 %v14764_v13  ;;  %13956 = vmatprep.mubr.msk.bf16.mxu1 %vm14808_vm0, %v21097_v38  ;;  %v13978_v3 = vpop.f32.mrf.mxu0 }
0x131d   : > { %13942 = vmatprep.subr.bf16.mxu1 %v21097_v38 }
0x131e   : > { %v8410_v34 = vpop.f32.mrf.mxu0 }
0x131f   : > { %v9476_v34 = vld [vmem:[%s20762_s5] ss:$0 sm:$0xff] }
0x1320   : > { %13943 = vmatpush3.bf16.msra.mxu1 %v14765_v37  ;;  %v13979_v44 = vpop.f32.mrf.mxu0 }
0x1321   : > { %13944 = vmatprep.subr.bf16.mxu1 %v21097_v38 }
0x1324   : > { %13945 = vmatpush3.bf16.msra.mxu1 %v14766_v4 }
0x1325   : > { %13946 = vmatprep.subr.bf16.mxu1 %v21097_v38 }
0x1328   : > { %13947 = vmatpush3.bf16.msra.mxu1 %v14767_v16 }
0x1329   : > { %13948 = vmatprep.subr.bf16.mxu1 %v21097_v38 }
0x132c   : > { %13949 = vmatpush3.bf16.msra.mxu1 %v14768_v46 }
0x132d   : > { %13950 = vmatprep.subr.bf16.mxu1 %v21097_v38 }
0x1330   : > { %13951 = vmatpush3.bf16.msra.mxu1 %v14769_v55 }
0x1331   : > { %13952 = vmatprep.subr.bf16.mxu1 %v21097_v38 }
0x1334   : > { %13953 = vmatpush3.bf16.msra.mxu1 %v14770_v24 }
0x1335   : > { %13954 = vmatprep.subr.bf16.mxu1 %v21097_v38 }
0x1338   : > { %13955 = vmatpush3.bf16.msra.mxu1 %v14771_v62 }
0x1339   : > { %13980 = vmatprep.subr.bf16.mxu1 %v21097_v38 }
0x133b   : > { %13957 = vmatmul.mubr.bf16.vlgmr.msra.gmra.mxu1 %v14772_v52  ;;  %v14782_v52 = vld [vmem:[%s20759_s2] ss:$0 sm:$0xff] }
0x133c   : > { %13981 = vmatpush3.bf16.msra.mxu1 %v14773_v10  ;;  %13996 = vmatprep.mubr.msk.bf16.mxu1 %vm14808_vm0, %v21097_v38 }
0x133d   : > { %13982 = vmatprep.subr.bf16.mxu1 %v21097_v38 }
0x1340   : > { %13983 = vmatpush3.bf16.msra.mxu1 %v14774_v43 }
0x1341   : > { %13984 = vmatprep.subr.bf16.mxu1 %v21097_v38 }
0x1344   : > { %13985 = vmatpush3.bf16.msra.mxu1 %v14775_v51 }
0x1345   : > { %13986 = vmatprep.subr.bf16.mxu1 %v21097_v38 }
0x1348   : > { %13987 = vmatpush3.bf16.msra.mxu1 %v14776_v12 }
0x1349   : > { %13988 = vmatprep.subr.bf16.mxu1 %v21097_v38 }
0x134c   : > { %13989 = vmatpush3.bf16.msra.mxu1 %v14777_v39  ;;  %v9475_v39 = vld [vmem:[%s20761_s4] ss:$0 sm:$0xff] }
0x134d   : > { %13990 = vmatprep.subr.bf16.mxu1 %v21097_v38 }
0x1350   : > { %13991 = vmatpush3.bf16.msra.mxu1 %v14778_v63 }
0x1351   : > { %13992 = vmatprep.subr.bf16.mxu1 %v21097_v38 }
0x1354   : > { %13993 = vmatpush3.bf16.msra.mxu1 %v14779_v15 }
0x1355   : > { %13994 = vmatprep.subr.bf16.mxu1 %v21097_v38 }
0x1358   : > { %13995 = vmatpush3.bf16.msra.mxu1 %v14780_v32 }
0x1359   : > { %14020 = vmatprep.subr.bf16.mxu1 %v21097_v38 }
0x135b   : > { %13997 = vmatmul.mubr.bf16.vlgmr.msra.gmra.mxu1 %v21355_v6 }
0x135c   : > { %14021 = vmatpush3.bf16.msra.mxu1 %v20016_v7  ;;  %14036 = vmatprep.mubr.msk.bf16.mxu1 %vm14808_vm0, %v21097_v38  ;;  %v14781_v7 = vld [vmem:[%s15034_s14 + $0x74] sm:$0xf] }
0x135d   : > { %14022 = vmatprep.subr.bf16.mxu1 %v21097_v38 }
0x1360   : > { %14023 = vmatpush3.bf16.msra.mxu1 %v20032_v36  ;;  %v20679_v36 = vpop.f32.mrf.mxu0 }
0x1361   : > { %14024 = vmatprep.subr.bf16.mxu1 %v21097_v38 }
0x1364   : > { %14025 = vmatpush3.bf16.msra.mxu1 %v20048_v53  ;;  %v14018_v53 = vpop.f32.mrf.mxu0 }
0x1365   : > { %14026 = vmatprep.subr.bf16.mxu1 %v21097_v38  ;;  %v14809_v53 = vmov 0  }
0x1366   : > { %14149 = vset.pattern.permute.xlu0 %v14809_v53 }
0x1368   : > { %14027 = vmatpush3.bf16.msra.mxu1 %v20062_v2  ;;  %v8492_v2 = vpop.f32.mrf.mxu0 }
0x1369   : > { %14028 = vmatprep.subr.bf16.mxu1 %v21097_v38  ;;  %v9477_v2 = vld [vmem:[#allocation2] ss:$0 sm:$0xff] }
0x136c   : > { %14029 = vmatpush3.bf16.msra.mxu1 %v20076_v40  ;;  %v14019_v40 = vpop.f32.mrf.mxu0 }
0x136d   : > { %14030 = vmatprep.subr.bf16.mxu1 %v21097_v38 }
0x1370   : > { %14031 = vmatpush3.bf16.msra.mxu1 %v21325_v17  ;;  %v8571_v17 = vpop.f32.mrf.mxu0 }
0x1371   : > { %14032 = vmatprep.subr.bf16.mxu1 %v21097_v38 }
0x1374   : > { %14033 = vmatpush3.bf16.msra.mxu1 %v21327_v11  ;;  %v14058_v11 = vpop.f32.mrf.mxu0 }
0x1375   : > { %14034 = vmatprep.subr.bf16.mxu1 %v21097_v38 }
0x1378   : > { %14035 = vmatpush3.bf16.msra.mxu1 %v21329_v49  ;;  %v8574_v49 = vpop.f32.mrf.mxu0 }
0x1379   : > { %14060 = vmatprep.subr.bf16.mxu1 %v21097_v38 }
0x137b   : > { %14037 = vmatmul.mubr.bf16.vlgmr.msra.gmra.mxu1 %v14781_v7 }
0x137c   : > { %14061 = vmatpush3.bf16.msra.mxu1 %v21331_v1  ;;  %14076 = vmatprep.mubr.msk.bf16.mxu1 %vm14808_vm0, %v21097_v38  ;;  %v14059_v1 = vpop.f32.mrf.mxu0 }
0x137d   : > { %14062 = vmatprep.subr.bf16.mxu1 %v21097_v38 }
0x1380   : > { %14063 = vmatpush3.bf16.msra.mxu1 %v21333_v60  ;;  %v14342_v60 = vld [vmem:[%s20760_s3 + $0x3f8] sm:$0xff]  }
0x1381   : > { %14064 = vmatprep.subr.bf16.mxu1 %v21097_v38 }
0x1384   : > { %14065 = vmatpush3.bf16.msra.mxu1 %v21335_v28  ;;  %v14343_v28 = vld [vmem:[%s20760_s3 + $0x3f0] sm:$0xff]  }
0x1385   : > { %14066 = vmatprep.subr.bf16.mxu1 %v21097_v38 }
0x1388   : > { %14067 = vmatpush3.bf16.msra.mxu1 %v21337_v18  ;;  %v14345_v18 = vld [vmem:[%s20760_s3 + $0x3e0] sm:$0xff]  }
0x1389   : > { %14068 = vmatprep.subr.bf16.mxu1 %v21097_v38 }
0x138c   : > { %14069 = vmatpush3.bf16.msra.mxu1 %v21339_v26  ;;  %v14346_v26 = vld [vmem:[%s20760_s3 + $0x3d8] sm:$0xff]  }
0x138d   : > { %14070 = vmatprep.subr.bf16.mxu1 %v21097_v38 }
0x1390   : > { %14071 = vmatpush3.bf16.msra.mxu1 %v21341_v30  ;;  %v8653_v30 = vpop.f32.mrf.mxu0 }
0x1391   : > { %14072 = vmatprep.subr.bf16.mxu1 %v21097_v38 }
0x1394   : > { %14073 = vmatpush3.bf16.msra.mxu1 %v21343_v47  ;;  %v14098_v47 = vpop.f32.mrf.mxu0 }
0x1395   : > { %14074 = vmatprep.subr.bf16.mxu1 %v21097_v38 }
0x1398   : > { %14075 = vmatpush3.bf16.msra.mxu1 %v21346_v25  ;;  %v8656_v25 = vpop.f32.mrf.mxu0 }
0x1399   : > { %14100 = vmatprep.subr.bf16.mxu1 %v21097_v38 }
0x139a   : > { %v14099_v59 = vpop.f32.mrf.mxu0 }
0x139b   : > { %14077 = vmatmul.mubr.bf16.vlgmr.msra.gmra.mxu1 %v20344_v29  ;;  %v14344_v29 = vld [vmem:[%s20760_s3 + $0x3e8] sm:$0xff]  }
0x139c   : > { %14116 = vmatprep.mubr.msk.bf16.mxu1 %vm14808_vm0, %v21097_v38  ;;  %14101 = vmatpush3.bf16.msra.mxu1 %v14342_v60 }
0x139d   : > { %14102 = vmatprep.subr.bf16.mxu1 %v21097_v38 }
0x13a0   : > { %14103 = vmatpush3.bf16.msra.mxu1 %v14343_v28 }
0x13a1   : > { %14104 = vmatprep.subr.bf16.mxu1 %v21097_v38 }
0x13a4   : > { %14105 = vmatpush3.bf16.msra.mxu1 %v14344_v29 }
0x13a5   : > { %14106 = vmatprep.subr.bf16.mxu1 %v21097_v38 }
0x13a8   : > { %14107 = vmatpush3.bf16.msra.mxu1 %v14345_v18 }
0x13a9   : > { %14108 = vmatprep.subr.bf16.mxu1 %v21097_v38 }
0x13ac   : > { %14109 = vmatpush3.bf16.msra.mxu1 %v14346_v26 }
0x13ad   : > { %14110 = vmatprep.subr.bf16.mxu1 %v21097_v38 }
0x13b0   : > { %14111 = vmatpush3.bf16.msra.mxu1 %v14347_v5 }
0x13b1   : > { %14112 = vmatprep.subr.bf16.mxu1 %v21097_v38 }
0x13b4   : > { %14113 = vmatpush3.bf16.msra.mxu1 %v14348_v50 }
0x13b5   : > { %14114 = vmatprep.subr.bf16.mxu1 %v21097_v38 }
0x13b8   : > { %14115 = vmatpush3.bf16.msra.mxu1 %v14349_v9 }
0x13db   : > { %v8286_v35 = vpop.f32.mrf.mxu1 }
0x13dc   : > { %v8292_v33 = vadd.f32 %v8286_v35, %v20563_v42 }
0x13dd   : > { %v13918_v27 = vpop.f32.mrf.mxu1 }
0x13df   : > { %v8289_v14 = vpop.f32.mrf.mxu1 }
0x13e1   : > { %v13919_v8 = vpop.f32.mrf.mxu1 }
0x13fb   : > { %v8367_v42 = vpop.f32.mrf.mxu1 }
0x13fc   : > { %v8368_v56 = vadd.f32 %v8367_v42, %v20580_v41 }
0x13fd   : > { %v13958_v20 = vpop.f32.mrf.mxu1 }
0x13fe   : > { %v8413_v38 = vadd.f32 %v20658_v31, %v8368_v56 }
0x13ff   : > { %v8370_v61 = vpop.f32.mrf.mxu1 }
0x1401   : > { %v13959_v58 = vpop.f32.mrf.mxu1 }
0x141b   : > { %v8448_v45 = vpop.f32.mrf.mxu1 }
0x141c   : > { %v8454_v0 = vadd.f32 %v8448_v45, %v8413_v38 }
0x141d   : > { %v13998_v23 = vpop.f32.mrf.mxu1 }
0x141e   : > { %v8495_v37 = vadd.f32 %v20679_v36, %v8454_v0 }
0x141f   : > { %v8451_v48 = vpop.f32.mrf.mxu1 }
0x1421   : > { %v13999_v57 = vpop.f32.mrf.mxu1 }
0x143b   : > { %v8530_v19 = vpop.f32.mrf.mxu1 }
0x143c   : > { %v8536_v54 = vadd.f32 %v8530_v19, %v8495_v37 }
0x143d   : > { %v14038_v22 = vpop.f32.mrf.mxu1 }
0x143e   : > { %v8577_v4 = vadd.f32 %v8571_v17, %v8536_v54 }
0x143f   : > { %v8533_v21 = vpop.f32.mrf.mxu1 }
0x1441   : > { %v14039_v13 = vpop.f32.mrf.mxu1 }
0x145b   : > { %v8612_v16 = vpop.f32.mrf.mxu1 }
0x145c   : > { %v8618_v46 = vadd.f32 %v8612_v16, %v8577_v4 }
0x145d   : > { %v14078_v55 = vpop.f32.mrf.mxu1 }
0x145e   : > { %v8659_v24 = vadd.f32 %v8653_v30, %v8618_v46 }
0x145f   : > { %v8615_v62 = vpop.f32.mrf.mxu1 }
0x1460   : > { %v8660_v10 = vadd.f32 %v14782_v52, %v8659_v24 }
0x1461   : > { %v14079_v43 = vpop.f32.mrf.mxu1 }
0x1462   : > { %vm8661_vm0 = vcmp.ge.f32.partialorder %v8660_v10, 0.0  ;;  %v8662_v41 = vmul.f32 0.2, %v8660_v10 }
0x1464   : > { %v8663_v51 = vsel %vm8661_vm0, %v8660_v10, %v8662_v41 }
0x1465   : > { %v8664_v12 = vpack.c.bf16 %v8663_v51, %v8663_v51 }
0x1467   : > { %14117 = vmatmul.mubr.bf16.vlgmr.msra.gmra.mxu1 %v8664_v12 }
0x1527   : > { %v8764_v63 = vpop.f32.mrf.mxu1 }
0x1528   : > { %v8770_v15 = vadd.f32 %v8764_v63, %v8292_v33 }
0x1529   : > { %v14118_v32 = vpop.f32.mrf.mxu1 }
0x152a   : > { %v8777_v6 = vadd.f32 %v9475_v39, %v8770_v15 }
0x152b   : > { %v8767_v31 = vpop.f32.mrf.mxu1 }
0x152c   : > { %vm8778_vm1 = vcmp.ge.f32.partialorder %v8777_v6, 0.0  ;;  %v8779_v3 = vmul.f32 0.2, %v8777_v6 }
0x152d   : > { %v14119_v44 = vpop.f32.mrf.mxu1 }
0x152e   : > { %v8780_v7 = vsel %vm8778_vm1, %v8777_v6, %v8779_v3 }
0x152f   : > { %v8788_v36 = vmul.f32 %v9476_v34, %v8780_v7 }
0x1531   : > { %8789 = vadd.xlane.f32.xlu0 %v8788_v36 }
0x15ba   : > { %v8790_v40 = vpop.xlane.xlu0 %8789 }
0x15bb   : > { %v8798_v17 = vadd.f32 %v9477_v2, %v8790_v40 }
0x15bd   : > { %8801 = vperm.xlu0 %14149, %v8798_v17  }
0x1638   : > { %v8802_v11 = vpop.permute.xlu0 %8801 }
0x1639   : > { %8804 = vst [vmem:[%s461_s13] sm:$0xff] %v8802_v11 }
0x163a PF: > { %p16_p9 = scmp.ge.s32.totalorder %s14870_s29, 4   ;;  %s21356_s26 = smov %s14801_s27 }
0x163b   : > { %s21357_s27 = smov %s14879_s9  ;;  %s21358_s28 = smov %s14870_s29 }
0x163c   :  { %18 = sbr.rel (!%p16_p9) target bundleno = 5 (0x5), region = 182 }

</bundles_post_ra>
